<compile_context>
chip_gen: v7x
topology: tpu7x:2x2x1
jax: 0.10.0
libtpu: 0.0.40
codegen_flags: <defaults>
</compile_context>

<pallas_src>
import functools

import jax
import jax.numpy as jnp
from jax import lax
from jax.experimental import pallas as pl
from jax.experimental.pallas import tpu as pltpu

LANE = 128          # TPU lane width; channel dims are zero-padded to a multiple of this.
W_CONTENT = 1.0     # content-loss weight
W_STYLE = 10.0      # style-loss weight


def _round_up(n, m):
    return ((n + m - 1) // m) * m


def _l_buf(h, w):
    # Flattened zero-padded spatial buffer length: (h+2)*(w+2) plus 2 rows of slack so the
    # largest tap offset (2*(w+2)+2) never reads past the end, rounded up to 8 sublanes.
    return _round_up((h + 2) * (w + 2) + 2, 8)


def _make_mask(h, w):
    # Validity mask over the flattened conv-output rows a = y*(w+2) + x:
    # columns x in [0, w) are real output pixels, x in {w, w+1} are layout garbage.
    wp = w + 2
    col = jnp.arange(h * wp, dtype=jnp.int32) % wp
    return (col < w).astype(jnp.float32)[:, None]          # (h*wp, 1)


# -----------------------------------------------------------------------------
# Pure-JAX math: used by set_targets and as the independent correctness reference.
# -----------------------------------------------------------------------------
def _extract_features(x, w1, b1, w2, b2, mask, *, h, w, c_hid):
    """x: (l_buf, cin_pad) bf16 zero-padded flattened image; returns (f2, gram1, gram2)."""
    wp = w + 2
    hwp = h * wp
    l_buf = x.shape[0]

    def conv3x3(p, w_taps, bias):
        cout = w_taps.shape[-1]
        acc = jnp.zeros((hwp, cout), jnp.float32)
        for t in range(9):                      # 9 shifted bf16 MXU matmuls (no im2col)
            off = (t // 3) * wp + (t % 3)
            acc = acc + jnp.dot(p[off:off + hwp, :], w_taps[t],
                                preferred_element_type=jnp.float32)
        f = jnp.maximum(acc + bias, 0.0)        # bias + ReLU in f32
        return f * mask                         # zero the flat-layout garbage columns

    f1 = conv3x3(x, w1, b1)                     # (hwp, chid_pad) f32
    f1_b = f1.astype(jnp.bfloat16)

    # Re-embed F1 into the zero-padded flattened layout for the second conv.
    chp = f1_b.shape[-1]
    pad_top = jnp.zeros((wp + 1, chp), jnp.bfloat16)
    pad_bot = jnp.zeros((l_buf - hwp - wp - 1, chp), jnp.bfloat16)
    p2 = jnp.concatenate([pad_top, f1_b, pad_bot], axis=0)

    f2 = conv3x3(p2, w2, b2)
    f2_b = f2.astype(jnp.bfloat16)

    # Gram matrices: F^T F on the MXU (contract over rows), f32 accumulation, 1/(C*H*W).
    dn = (((0,), (0,)), ((), ()))
    gscale = 1.0 / float(c_hid * h * w)
    g1 = lax.dot_general(f1_b, f1_b, dn, preferred_element_type=jnp.float32) * gscale
    g2 = lax.dot_general(f2_b, f2_b, dn, preferred_element_type=jnp.float32) * gscale
    return f2, g1, g2


def _loss_math(x, w1, b1, w2, b2, mask, tc, tg1, tg2, *,
               h, w, c_hid, w_content, w_style):
    f2, g1, g2 = _extract_features(x, w1, b1, w2, b2, mask, h=h, w=w, c_hid=c_hid)
    dc = f2 - tc.astype(jnp.float32)
    content = jnp.sum(dc * dc) * (1.0 / float(h * w * c_hid))
    d1 = g1 - tg1
    d2 = g2 - tg2
    style = (jnp.sum(d1 * d1) + jnp.sum(d2 * d2)) * (1.0 / float(c_hid * c_hid))
    return w_content * content + w_style * style


# -----------------------------------------------------------------------------
# Pallas kernel: one batch element per grid step; conv1+conv2+Gram+MSE fully fused.
# -----------------------------------------------------------------------------
def _style_loss_kernel(x_ref, w1_ref, b1_ref, w2_ref, b2_ref, mask_ref,
                       tc_ref, tg1_ref, tg2_ref, out_ref, p2_ref, *,
                       h, w, c_hid, w_content, w_style):
    wp = w + 2
    hwp = h * wp
    chp = p2_ref.shape[1]
    mask = mask_ref[...]                                    # (hwp, 1) f32

    # Fresh zero padding for the conv2 input buffer each step (persistent VMEM scratch,
    # but no cross-iteration state -> safe under "parallel" core sharding).
    p2_ref[...] = jnp.zeros_like(p2_ref)

    def conv3x3(load_tap, w_ref, b_ref):
        acc = jnp.zeros((hwp, chp), jnp.float32)
        for t in range(9):                                  # static unroll; 9 bf16 MXU matmuls
            off = (t // 3) * wp + (t % 3)
            acc = acc + jnp.dot(load_tap(off), w_ref[t],
                                preferred_element_type=jnp.float32)
        f = jnp.maximum(acc + b_ref[...], 0.0)              # bias + ReLU in f32
        return f * mask                                     # zero flat-layout garbage columns

    # conv1: per-tap loads straight from the (resident) input block.
    f1 = conv3x3(lambda off: x_ref[0, off:off + hwp, :], w1_ref, b1_ref)
    # Re-embed F1 into the zero-padded flat layout held in the VMEM scratch.
    p2_ref[wp + 1:wp + 1 + hwp, :] = f1.astype(jnp.bfloat16)

    # conv2: per-tap loads from the scratch (keeps vreg pressure low, no concat copy).
    f2 = conv3x3(lambda off: p2_ref[off:off + hwp, :], w2_ref, b2_ref)

    # Gram matrices on the MXU: contract over the pixel (row) axis, f32 accumulation.
    dn = (((0,), (0,)), ((), ()))
    gscale = 1.0 / float(c_hid * h * w)
    f1_b = p2_ref[wp + 1:wp + 1 + hwp, :]                   # reload bf16 F1 (already masked)
    g1 = lax.dot_general(f1_b, f1_b, dn, preferred_element_type=jnp.float32) * gscale
    f2_b = f2.astype(jnp.bfloat16)
    g2 = lax.dot_general(f2_b, f2_b, dn, preferred_element_type=jnp.float32) * gscale

    d1 = g1 - tg1_ref[...]
    d2 = g2 - tg2_ref[...]
    style = (jnp.sum(d1 * d1) + jnp.sum(d2 * d2)) * (1.0 / float(c_hid * c_hid))

    dc = f2 - tc_ref[0].astype(jnp.float32)
    content = jnp.sum(dc * dc) * (1.0 / float(h * w * c_hid))

    loss = w_content * content + w_style * style
    # Lane-dense scalar output: broadcast the per-batch loss across 128 lanes.
    out_ref[...] = jnp.full((1, 1, LANE), loss, dtype=jnp.float32)


# -----------------------------------------------------------------------------
# Host-side wrappers (parameter packing, set_targets, forward).
# -----------------------------------------------------------------------------
def prepare_params(w1, b1, w2, b2):
    """Pad conv params to lane-dense (multiple-of-128) channel dims; weights in bf16."""
    c_in, c_hid = w1.shape[2], w1.shape[3]
    cip = _round_up(c_in, LANE)
    chp = _round_up(c_hid, LANE)
    w1p = jnp.zeros((9, cip, chp), jnp.float32)
    w1p = w1p.at[:, :c_in, :c_hid].set(w1.reshape(9, c_in, c_hid)).astype(jnp.bfloat16)
    w2p = jnp.zeros((9, chp, chp), jnp.float32)
    w2p = w2p.at[:, :c_hid, :c_hid].set(w2.reshape(9, c_hid, c_hid)).astype(jnp.bfloat16)
    b1p = jnp.zeros((1, chp), jnp.float32).at[:, :c_hid].set(b1[None, :])
    b2p = jnp.zeros((1, chp), jnp.float32).at[:, :c_hid].set(b2[None, :])
    return dict(w1=w1p, b1=b1p, w2=w2p, b2=b2p, c_in=c_in, c_hid=c_hid)


def _to_padded_flat(img_nchw, c_pad, l_buf):
    # NCHW -> NHWC, zero-pad spatially (pad=1) + channel-pad to 128 lanes, flatten spatial.
    # TODO(synk): for production-size images fold this transpose/pad into the kernel's
    # index_map / in-kernel masked stores instead of a wrapper-side HBM pass.
    b, c, h, w = img_nchw.shape
    x = jnp.transpose(img_nchw, (0, 2, 3, 1)).astype(jnp.float32)
    xp = jnp.zeros((b, h + 2, w + 2, c_pad), jnp.float32)
    xp = xp.at[:, 1:h + 1, 1:w + 1, :c].set(x)
    xf = xp.reshape(b, (h + 2) * (w + 2), c_pad)
    xf = jnp.pad(xf, ((0, 0), (0, l_buf - (h + 2) * (w + 2)), (0, 0)))
    return xf.astype(jnp.bfloat16)


def set_targets(prep, content_nchw, style_nchw):
    """Equivalent of StyleTransferLossWrapper.set_targets: fix the content-feature target
    and the style Gram targets by running the (pure-JAX reference) net once."""
    _, _, h, w = content_nchw.shape
    cip = prep["w1"].shape[1]
    mask = _make_mask(h, w)
    lb = _l_buf(h, w)
    feat = functools.partial(_extract_features, h=h, w=w, c_hid=prep["c_hid"])

    xc = _to_padded_flat(content_nchw, cip, lb)
    f2_c, _, _ = jax.vmap(
        lambda xb: feat(xb, prep["w1"], prep["b1"], prep["w2"], prep["b2"], mask))(xc)
    tc = f2_c.astype(jnp.bfloat16)                           # (B, h*(w+2), chid_pad)

    xs = _to_padded_flat(style_nchw, cip, lb)
    _, tg1, tg2 = feat(xs[0], prep["w1"], prep["b1"], prep["w2"], prep["b2"], mask)
    return tc, tg1, tg2


def style_transfer_loss_pallas(image_nchw, prep, targets,
                               w_content=W_CONTENT, w_style=W_STYLE):
    """forward(image) = loss(image, net(image)) -- one fused pallas_call over the batch."""
    tc, tg1, tg2 = targets
    b, _, h, w = image_nchw.shape
    c_hid = prep["c_hid"]
    cip, chp = prep["w1"].shape[1], prep["w1"].shape[2]
    hwp = h * (w + 2)
    lb = _l_buf(h, w)
    mask = _make_mask(h, w)
    x_flat = _to_padded_flat(image_nchw, cip, lb)            # (B, lb, cip) bf16

    kernel = functools.partial(
        _style_loss_kernel, h=h, w=w, c_hid=c_hid,
        w_content=float(w_content), w_style=float(w_style))

    out = pl.pallas_call(
        kernel,
        out_shape=jax.ShapeDtypeStruct((b, 1, LANE), jnp.float32),
        grid=(b,),
        in_specs=[
            pl.BlockSpec((1, lb, cip), lambda i: (i, 0, 0)),     # padded image (per batch)
            pl.BlockSpec((9, cip, chp), lambda i: (0, 0, 0)),    # conv1 weights (resident)
            pl.BlockSpec((1, chp), lambda i: (0, 0)),            # conv1 bias    (resident)
            pl.BlockSpec((9, chp, chp), lambda i: (0, 0, 0)),    # conv2 weights (resident)
            pl.BlockSpec((1, chp), lambda i: (0, 0)),            # conv2 bias    (resident)
            pl.BlockSpec((hwp, 1), lambda i: (0, 0)),            # garbage-column mask
            pl.BlockSpec((1, hwp, chp), lambda i: (i, 0, 0)),    # content target (per batch)
            pl.BlockSpec((chp, chp), lambda i: (0, 0)),          # style Gram target, layer 1
            pl.BlockSpec((chp, chp), lambda i: (0, 0)),          # style Gram target, layer 2
        ],
        out_specs=pl.BlockSpec((1, 1, LANE), lambda i: (i, 0, 0)),
        scratch_shapes=[pltpu.VMEM((lb, chp), jnp.bfloat16)],    # conv2 input (re-embedded F1)
        compiler_params=pltpu.CompilerParams(
            dimension_semantics=("parallel",),      # batch programs across TCs where available
        ),
    )(x_flat, prep["w1"], prep["b1"], prep["w2"], prep["b2"], mask, tc, tg1, tg2)

    # Per-batch losses (lane-broadcast) -> scalar mean over the batch.
    return jnp.mean(out[:, 0, 0])


if __name__ == "__main__":
    key = jax.random.PRNGKey(0)
    ks = jax.random.split(key, 7)
    B, C_IN, H, W_IMG, C_HID = 2, 4, 16, 16, 32

    image = jax.random.normal(ks[0], (B, C_IN, H, W_IMG), jnp.float32)
    content = jax.random.normal(ks[1], (B, C_IN, H, W_IMG), jnp.float32)
    style = jax.random.normal(ks[2], (1, C_IN, H, W_IMG), jnp.float32)
    w1 = jax.random.normal(ks[3], (3, 3, C_IN, C_HID), jnp.float32) * 0.2
    b1 = jax.random.normal(ks[4], (C_HID,), jnp.float32) * 0.1
    w2 = jax.random.normal(ks[5], (3, 3, C_HID, C_HID), jnp.float32) * 0.1
    b2 = jax.random.normal(ks[6], (C_HID,), jnp.float32) * 0.1

    prep = prepare_params(w1, b1, w2, b2)
    targets = set_targets(prep, content, style)               # loss.set_target(net, ...)

    loss = style_transfer_loss_pallas(image, prep, targets)   # forward(image)
    loss = jax.block_until_ready(loss)

    # Pure-JAX reference of the identical math (independent correctness check).
    tc, tg1, tg2 = targets
    mask = _make_mask(H, W_IMG)
    x_flat = _to_padded_flat(image, prep["w1"].shape[1], _l_buf(H, W_IMG))
    per_batch = jax.vmap(
        lambda xb, tcb: _loss_math(
            xb, prep["w1"], prep["b1"], prep["w2"], prep["b2"], mask, tcb, tg1, tg2,
            h=H, w=W_IMG, c_hid=C_HID, w_content=W_CONTENT, w_style=W_STYLE)
    )(x_flat, tc)
    ref = float(jnp.mean(per_batch))
    got = float(loss)
    assert abs(got - ref) <= 5e-2 * max(1.0, abs(ref)), (got, ref)
    print("KERNEL_OK")
</pallas_src>

<mosaic_0001>
module attributes {stable_mosaic.version = 11 : i64} {
  func.func @_style_loss_kernel(%arg0: i32, %arg1: memref<1x328x128xbf16, #tpu.memory_space<vmem>>, %arg2: memref<9x128x128xbf16, #tpu.memory_space<vmem>>, %arg3: memref<1x128xf32, #tpu.memory_space<vmem>>, %arg4: memref<9x128x128xbf16, #tpu.memory_space<vmem>>, %arg5: memref<1x128xf32, #tpu.memory_space<vmem>>, %arg6: memref<288x1xf32, #tpu.memory_space<vmem>>, %arg7: memref<1x288x128xbf16, #tpu.memory_space<vmem>>, %arg8: memref<128x128xf32, #tpu.memory_space<vmem>>, %arg9: memref<128x128xf32, #tpu.memory_space<vmem>>, %arg10: memref<1x1x128xf32, #tpu.memory_space<vmem>>, %arg11: memref<328x128xbf16, #tpu.memory_space<vmem>>) attributes {dimension_semantics = [#tpu.dimension_semantics<parallel>], iteration_bounds = array<i64: 2>, scalar_prefetch = 0 : i64, scratch_operands = 1 : i64, tpu.core_type = #tpu.core_type<tc>, window_params = [{transform_indices = @transform_0, window_bounds = array<i64: 1, 328, 128>}, {pipeline_mode = #tpu.pipeline_mode<synchronous>, transform_indices = @transform_1, window_bounds = array<i64: 9, 128, 128>}, {pipeline_mode = #tpu.pipeline_mode<synchronous>, transform_indices = @transform_2, window_bounds = array<i64: 1, 128>}, {pipeline_mode = #tpu.pipeline_mode<synchronous>, transform_indices = @transform_3, window_bounds = array<i64: 9, 128, 128>}, {pipeline_mode = #tpu.pipeline_mode<synchronous>, transform_indices = @transform_4, window_bounds = array<i64: 1, 128>}, {pipeline_mode = #tpu.pipeline_mode<synchronous>, transform_indices = @transform_5, window_bounds = array<i64: 288, 1>}, {transform_indices = @transform_6, window_bounds = array<i64: 1, 288, 128>}, {pipeline_mode = #tpu.pipeline_mode<synchronous>, transform_indices = @transform_7, window_bounds = array<i64: 128, 128>}, {pipeline_mode = #tpu.pipeline_mode<synchronous>, transform_indices = @transform_8, window_bounds = array<i64: 128, 128>}, {transform_indices = @transform_9, window_bounds = array<i64: 1, 1, 128>}]} {
    %c0 = arith.constant 0 : index
    %c0_0 = arith.constant 0 : index
    %0 = vector.load %arg6[%c0, %c0_0] : memref<288x1xf32, #tpu.memory_space<vmem>>, vector<288x1xf32>
    %cst = arith.constant 0.000000e+00 : bf16
    %1 = vector.broadcast %cst : bf16 to vector<328x128xbf16>
    %c0_1 = arith.constant 0 : index
    %c0_2 = arith.constant 0 : index
    %2 = vector.load %arg11[%c0_1, %c0_2] : memref<328x128xbf16, #tpu.memory_space<vmem>>, vector<328x128xbf16>
    tpu.vector_store %arg11[%c0_1, %c0_2], %1 {strides = array<i32>} : memref<328x128xbf16, #tpu.memory_space<vmem>>, vector<328x128xbf16>,
    %cst_3 = arith.constant 0.000000e+00 : f32
    %3 = vector.broadcast %cst_3 : f32 to vector<288x128xf32>
    %c0_4 = arith.constant 0 : index
    %c0_5 = arith.constant 0 : index
    %c0_6 = arith.constant 0 : index
    %4 = vector.load %arg1[%c0_4, %c0_5, %c0_6] : memref<1x328x128xbf16, #tpu.memory_space<vmem>>, vector<1x288x128xbf16>
    %5 = vector.shape_cast %4 : vector<1x288x128xbf16> to vector<288x128xbf16>
    %c0_7 = arith.constant 0 : index
    %c0_8 = arith.constant 0 : index
    %c0_9 = arith.constant 0 : index
    %6 = vector.load %arg2[%c0_7, %c0_8, %c0_9] : memref<9x128x128xbf16, #tpu.memory_space<vmem>>, vector<1x128x128xbf16>
    %7 = vector.shape_cast %6 : vector<1x128x128xbf16> to vector<128x128xbf16>
    %cst_10 = arith.constant dense<0.000000e+00> : vector<288x128xf32>
    %8 = tpu.matmul %5, %7, %cst_10 {dimension_numbers = #tpu.dot_dimension_numbers<[1], [0], [0], [1], [0, 0, 1, 1], [], []>} : vector<288x128xbf16>, vector<128x128xbf16>, vector<288x128xf32> -> vector<288x128xf32>
    %9 = arith.addf %3, %8 : vector<288x128xf32>
    %c0_11 = arith.constant 0 : index
    %c1 = arith.constant 1 : index
    %c0_12 = arith.constant 0 : index
    %10 = vector.load %arg1[%c0_11, %c1, %c0_12] : memref<1x328x128xbf16, #tpu.memory_space<vmem>>, vector<1x288x128xbf16>
    %11 = vector.shape_cast %10 : vector<1x288x128xbf16> to vector<288x128xbf16>
    %c1_13 = arith.constant 1 : index
    %c0_14 = arith.constant 0 : index
    %c0_15 = arith.constant 0 : index
    %12 = vector.load %arg2[%c1_13, %c0_14, %c0_15] : memref<9x128x128xbf16, #tpu.memory_space<vmem>>, vector<1x128x128xbf16>
    %13 = vector.shape_cast %12 : vector<1x128x128xbf16> to vector<128x128xbf16>
    %cst_16 = arith.constant dense<0.000000e+00> : vector<288x128xf32>
    %14 = tpu.matmul %11, %13, %cst_16 {dimension_numbers = #tpu.dot_dimension_numbers<[1], [0], [0], [1], [0, 0, 1, 1], [], []>} : vector<288x128xbf16>, vector<128x128xbf16>, vector<288x128xf32> -> vector<288x128xf32>
    %15 = arith.addf %9, %14 : vector<288x128xf32>
    %c0_17 = arith.constant 0 : index
    %c2 = arith.constant 2 : index
    %c0_18 = arith.constant 0 : index
    %16 = vector.load %arg1[%c0_17, %c2, %c0_18] : memref<1x328x128xbf16, #tpu.memory_space<vmem>>, vector<1x288x128xbf16>
    %17 = vector.shape_cast %16 : vector<1x288x128xbf16> to vector<288x128xbf16>
    %c2_19 = arith.constant 2 : index
    %c0_20 = arith.constant 0 : index
    %c0_21 = arith.constant 0 : index
    %18 = vector.load %arg2[%c2_19, %c0_20, %c0_21] : memref<9x128x128xbf16, #tpu.memory_space<vmem>>, vector<1x128x128xbf16>
    %19 = vector.shape_cast %18 : vector<1x128x128xbf16> to vector<128x128xbf16>
    %cst_22 = arith.constant dense<0.000000e+00> : vector<288x128xf32>
    %20 = tpu.matmul %17, %19, %cst_22 {dimension_numbers = #tpu.dot_dimension_numbers<[1], [0], [0], [1], [0, 0, 1, 1], [], []>} : vector<288x128xbf16>, vector<128x128xbf16>, vector<288x128xf32> -> vector<288x128xf32>
    %21 = arith.addf %15, %20 : vector<288x128xf32>
    %c0_23 = arith.constant 0 : index
    %c18 = arith.constant 18 : index
    %c0_24 = arith.constant 0 : index
    %22 = vector.load %arg1[%c0_23, %c18, %c0_24] : memref<1x328x128xbf16, #tpu.memory_space<vmem>>, vector<1x288x128xbf16>
    %23 = vector.shape_cast %22 : vector<1x288x128xbf16> to vector<288x128xbf16>
    %c3 = arith.constant 3 : index
    %c0_25 = arith.constant 0 : index
    %c0_26 = arith.constant 0 : index
    %24 = vector.load %arg2[%c3, %c0_25, %c0_26] : memref<9x128x128xbf16, #tpu.memory_space<vmem>>, vector<1x128x128xbf16>
    %25 = vector.shape_cast %24 : vector<1x128x128xbf16> to vector<128x128xbf16>
    %cst_27 = arith.constant dense<0.000000e+00> : vector<288x128xf32>
    %26 = tpu.matmul %23, %25, %cst_27 {dimension_numbers = #tpu.dot_dimension_numbers<[1], [0], [0], [1], [0, 0, 1, 1], [], []>} : vector<288x128xbf16>, vector<128x128xbf16>, vector<288x128xf32> -> vector<288x128xf32>
    %27 = arith.addf %21, %26 : vector<288x128xf32>
    %c0_28 = arith.constant 0 : index
    %c19 = arith.constant 19 : index
    %c0_29 = arith.constant 0 : index
    %28 = vector.load %arg1[%c0_28, %c19, %c0_29] : memref<1x328x128xbf16, #tpu.memory_space<vmem>>, vector<1x288x128xbf16>
    %29 = vector.shape_cast %28 : vector<1x288x128xbf16> to vector<288x128xbf16>
    %c4 = arith.constant 4 : index
    %c0_30 = arith.constant 0 : index
    %c0_31 = arith.constant 0 : index
    %30 = vector.load %arg2[%c4, %c0_30, %c0_31] : memref<9x128x128xbf16, #tpu.memory_space<vmem>>, vector<1x128x128xbf16>
    %31 = vector.shape_cast %30 : vector<1x128x128xbf16> to vector<128x128xbf16>
    %cst_32 = arith.constant dense<0.000000e+00> : vector<288x128xf32>
    %32 = tpu.matmul %29, %31, %cst_32 {dimension_numbers = #tpu.dot_dimension_numbers<[1], [0], [0], [1], [0, 0, 1, 1], [], []>} : vector<288x128xbf16>, vector<128x128xbf16>, vector<288x128xf32> -> vector<288x128xf32>
    %33 = arith.addf %27, %32 : vector<288x128xf32>
    %c0_33 = arith.constant 0 : index
    %c20 = arith.constant 20 : index
    %c0_34 = arith.constant 0 : index
    %34 = vector.load %arg1[%c0_33, %c20, %c0_34] : memref<1x328x128xbf16, #tpu.memory_space<vmem>>, vector<1x288x128xbf16>
    %35 = vector.shape_cast %34 : vector<1x288x128xbf16> to vector<288x128xbf16>
    %c5 = arith.constant 5 : index
    %c0_35 = arith.constant 0 : index
    %c0_36 = arith.constant 0 : index
    %36 = vector.load %arg2[%c5, %c0_35, %c0_36] : memref<9x128x128xbf16, #tpu.memory_space<vmem>>, vector<1x128x128xbf16>
    %37 = vector.shape_cast %36 : vector<1x128x128xbf16> to vector<128x128xbf16>
    %cst_37 = arith.constant dense<0.000000e+00> : vector<288x128xf32>
    %38 = tpu.matmul %35, %37, %cst_37 {dimension_numbers = #tpu.dot_dimension_numbers<[1], [0], [0], [1], [0, 0, 1, 1], [], []>} : vector<288x128xbf16>, vector<128x128xbf16>, vector<288x128xf32> -> vector<288x128xf32>
    %39 = arith.addf %33, %38 : vector<288x128xf32>
    %c0_38 = arith.constant 0 : index
    %c36 = arith.constant 36 : index
    %c0_39 = arith.constant 0 : index
    %40 = vector.load %arg1[%c0_38, %c36, %c0_39] : memref<1x328x128xbf16, #tpu.memory_space<vmem>>, vector<1x288x128xbf16>
    %41 = vector.shape_cast %40 : vector<1x288x128xbf16> to vector<288x128xbf16>
    %c6 = arith.constant 6 : index
    %c0_40 = arith.constant 0 : index
    %c0_41 = arith.constant 0 : index
    %42 = vector.load %arg2[%c6, %c0_40, %c0_41] : memref<9x128x128xbf16, #tpu.memory_space<vmem>>, vector<1x128x128xbf16>
    %43 = vector.shape_cast %42 : vector<1x128x128xbf16> to vector<128x128xbf16>
    %cst_42 = arith.constant dense<0.000000e+00> : vector<288x128xf32>
    %44 = tpu.matmul %41, %43, %cst_42 {dimension_numbers = #tpu.dot_dimension_numbers<[1], [0], [0], [1], [0, 0, 1, 1], [], []>} : vector<288x128xbf16>, vector<128x128xbf16>, vector<288x128xf32> -> vector<288x128xf32>
    %45 = arith.addf %39, %44 : vector<288x128xf32>
    %c0_43 = arith.constant 0 : index
    %c37 = arith.constant 37 : index
    %c0_44 = arith.constant 0 : index
    %46 = vector.load %arg1[%c0_43, %c37, %c0_44] : memref<1x328x128xbf16, #tpu.memory_space<vmem>>, vector<1x288x128xbf16>
    %47 = vector.shape_cast %46 : vector<1x288x128xbf16> to vector<288x128xbf16>
    %c7 = arith.constant 7 : index
    %c0_45 = arith.constant 0 : index
    %c0_46 = arith.constant 0 : index
    %48 = vector.load %arg2[%c7, %c0_45, %c0_46] : memref<9x128x128xbf16, #tpu.memory_space<vmem>>, vector<1x128x128xbf16>
    %49 = vector.shape_cast %48 : vector<1x128x128xbf16> to vector<128x128xbf16>
    %cst_47 = arith.constant dense<0.000000e+00> : vector<288x128xf32>
    %50 = tpu.matmul %47, %49, %cst_47 {dimension_numbers = #tpu.dot_dimension_numbers<[1], [0], [0], [1], [0, 0, 1, 1], [], []>} : vector<288x128xbf16>, vector<128x128xbf16>, vector<288x128xf32> -> vector<288x128xf32>
    %51 = arith.addf %45, %50 : vector<288x128xf32>
    %c0_48 = arith.constant 0 : index
    %c38 = arith.constant 38 : index
    %c0_49 = arith.constant 0 : index
    %52 = vector.load %arg1[%c0_48, %c38, %c0_49] : memref<1x328x128xbf16, #tpu.memory_space<vmem>>, vector<1x288x128xbf16>
    %53 = vector.shape_cast %52 : vector<1x288x128xbf16> to vector<288x128xbf16>
    %c8 = arith.constant 8 : index
    %c0_50 = arith.constant 0 : index
    %c0_51 = arith.constant 0 : index
    %54 = vector.load %arg2[%c8, %c0_50, %c0_51] : memref<9x128x128xbf16, #tpu.memory_space<vmem>>, vector<1x128x128xbf16>
    %55 = vector.shape_cast %54 : vector<1x128x128xbf16> to vector<128x128xbf16>
    %cst_52 = arith.constant dense<0.000000e+00> : vector<288x128xf32>
    %56 = tpu.matmul %53, %55, %cst_52 {dimension_numbers = #tpu.dot_dimension_numbers<[1], [0], [0], [1], [0, 0, 1, 1], [], []>} : vector<288x128xbf16>, vector<128x128xbf16>, vector<288x128xf32> -> vector<288x128xf32>
    %57 = arith.addf %51, %56 : vector<288x128xf32>
    %c0_53 = arith.constant 0 : index
    %c0_54 = arith.constant 0 : index
    %58 = vector.load %arg3[%c0_53, %c0_54] : memref<1x128xf32, #tpu.memory_space<vmem>>, vector<1x128xf32>
    %59 = vector.broadcast %58 : vector<1x128xf32> to vector<288x128xf32>
    %60 = arith.addf %57, %59 : vector<288x128xf32>
    %cst_55 = arith.constant 0.000000e+00 : f32
    %61 = vector.broadcast %cst_55 : f32 to vector<288x128xf32>
    %62 = arith.maximumf %60, %61 : vector<288x128xf32>
    %63 = vector.broadcast %0 : vector<288x1xf32> to vector<288x128xf32>
    %64 = arith.mulf %62, %63 : vector<288x128xf32>
    %65 = arith.truncf %64 : vector<288x128xf32> to vector<288x128xbf16>
    %c19_56 = arith.constant 19 : index
    %c0_57 = arith.constant 0 : index
    %66 = vector.load %arg11[%c19_56, %c0_57] : memref<328x128xbf16, #tpu.memory_space<vmem>>, vector<288x128xbf16>
    tpu.vector_store %arg11[%c19_56, %c0_57], %65 {strides = array<i32>} : memref<328x128xbf16, #tpu.memory_space<vmem>>, vector<288x128xbf16>,
    %cst_58 = arith.constant 0.000000e+00 : f32
    %67 = vector.broadcast %cst_58 : f32 to vector<288x128xf32>
    %c0_59 = arith.constant 0 : index
    %c0_60 = arith.constant 0 : index
    %68 = vector.load %arg11[%c0_59, %c0_60] : memref<328x128xbf16, #tpu.memory_space<vmem>>, vector<288x128xbf16>
    %c0_61 = arith.constant 0 : index
    %c0_62 = arith.constant 0 : index
    %c0_63 = arith.constant 0 : index
    %69 = vector.load %arg4[%c0_61, %c0_62, %c0_63] : memref<9x128x128xbf16, #tpu.memory_space<vmem>>, vector<1x128x128xbf16>
    %70 = vector.shape_cast %69 : vector<1x128x128xbf16> to vector<128x128xbf16>
    %cst_64 = arith.constant dense<0.000000e+00> : vector<288x128xf32>
    %71 = tpu.matmul %68, %70, %cst_64 {dimension_numbers = #tpu.dot_dimension_numbers<[1], [0], [0], [1], [0, 0, 1, 1], [], []>} : vector<288x128xbf16>, vector<128x128xbf16>, vector<288x128xf32> -> vector<288x128xf32>
    %72 = arith.addf %67, %71 : vector<288x128xf32>
    %c1_65 = arith.constant 1 : index
    %c0_66 = arith.constant 0 : index
    %73 = vector.load %arg11[%c1_65, %c0_66] : memref<328x128xbf16, #tpu.memory_space<vmem>>, vector<288x128xbf16>
    %c1_67 = arith.constant 1 : index
    %c0_68 = arith.constant 0 : index
    %c0_69 = arith.constant 0 : index
    %74 = vector.load %arg4[%c1_67, %c0_68, %c0_69] : memref<9x128x128xbf16, #tpu.memory_space<vmem>>, vector<1x128x128xbf16>
    %75 = vector.shape_cast %74 : vector<1x128x128xbf16> to vector<128x128xbf16>
    %cst_70 = arith.constant dense<0.000000e+00> : vector<288x128xf32>
    %76 = tpu.matmul %73, %75, %cst_70 {dimension_numbers = #tpu.dot_dimension_numbers<[1], [0], [0], [1], [0, 0, 1, 1], [], []>} : vector<288x128xbf16>, vector<128x128xbf16>, vector<288x128xf32> -> vector<288x128xf32>
    %77 = arith.addf %72, %76 : vector<288x128xf32>
    %c2_71 = arith.constant 2 : index
    %c0_72 = arith.constant 0 : index
    %78 = vector.load %arg11[%c2_71, %c0_72] : memref<328x128xbf16, #tpu.memory_space<vmem>>, vector<288x128xbf16>
    %c2_73 = arith.constant 2 : index
    %c0_74 = arith.constant 0 : index
    %c0_75 = arith.constant 0 : index
    %79 = vector.load %arg4[%c2_73, %c0_74, %c0_75] : memref<9x128x128xbf16, #tpu.memory_space<vmem>>, vector<1x128x128xbf16>
    %80 = vector.shape_cast %79 : vector<1x128x128xbf16> to vector<128x128xbf16>
    %cst_76 = arith.constant dense<0.000000e+00> : vector<288x128xf32>
    %81 = tpu.matmul %78, %80, %cst_76 {dimension_numbers = #tpu.dot_dimension_numbers<[1], [0], [0], [1], [0, 0, 1, 1], [], []>} : vector<288x128xbf16>, vector<128x128xbf16>, vector<288x128xf32> -> vector<288x128xf32>
    %82 = arith.addf %77, %81 : vector<288x128xf32>
    %c18_77 = arith.constant 18 : index
    %c0_78 = arith.constant 0 : index
    %83 = vector.load %arg11[%c18_77, %c0_78] : memref<328x128xbf16, #tpu.memory_space<vmem>>, vector<288x128xbf16>
    %c3_79 = arith.constant 3 : index
    %c0_80 = arith.constant 0 : index
    %c0_81 = arith.constant 0 : index
    %84 = vector.load %arg4[%c3_79, %c0_80, %c0_81] : memref<9x128x128xbf16, #tpu.memory_space<vmem>>, vector<1x128x128xbf16>
    %85 = vector.shape_cast %84 : vector<1x128x128xbf16> to vector<128x128xbf16>
    %cst_82 = arith.constant dense<0.000000e+00> : vector<288x128xf32>
    %86 = tpu.matmul %83, %85, %cst_82 {dimension_numbers = #tpu.dot_dimension_numbers<[1], [0], [0], [1], [0, 0, 1, 1], [], []>} : vector<288x128xbf16>, vector<128x128xbf16>, vector<288x128xf32> -> vector<288x128xf32>
    %87 = arith.addf %82, %86 : vector<288x128xf32>
    %c19_83 = arith.constant 19 : index
    %c0_84 = arith.constant 0 : index
    %88 = vector.load %arg11[%c19_83, %c0_84] : memref<328x128xbf16, #tpu.memory_space<vmem>>, vector<288x128xbf16>
    %c4_85 = arith.constant 4 : index
    %c0_86 = arith.constant 0 : index
    %c0_87 = arith.constant 0 : index
    %89 = vector.load %arg4[%c4_85, %c0_86, %c0_87] : memref<9x128x128xbf16, #tpu.memory_space<vmem>>, vector<1x128x128xbf16>
    %90 = vector.shape_cast %89 : vector<1x128x128xbf16> to vector<128x128xbf16>
    %cst_88 = arith.constant dense<0.000000e+00> : vector<288x128xf32>
    %91 = tpu.matmul %88, %90, %cst_88 {dimension_numbers = #tpu.dot_dimension_numbers<[1], [0], [0], [1], [0, 0, 1, 1], [], []>} : vector<288x128xbf16>, vector<128x128xbf16>, vector<288x128xf32> -> vector<288x128xf32>
    %92 = arith.addf %87, %91 : vector<288x128xf32>
    %c20_89 = arith.constant 20 : index
    %c0_90 = arith.constant 0 : index
    %93 = vector.load %arg11[%c20_89, %c0_90] : memref<328x128xbf16, #tpu.memory_space<vmem>>, vector<288x128xbf16>
    %c5_91 = arith.constant 5 : index
    %c0_92 = arith.constant 0 : index
    %c0_93 = arith.constant 0 : index
    %94 = vector.load %arg4[%c5_91, %c0_92, %c0_93] : memref<9x128x128xbf16, #tpu.memory_space<vmem>>, vector<1x128x128xbf16>
    %95 = vector.shape_cast %94 : vector<1x128x128xbf16> to vector<128x128xbf16>
    %cst_94 = arith.constant dense<0.000000e+00> : vector<288x128xf32>
    %96 = tpu.matmul %93, %95, %cst_94 {dimension_numbers = #tpu.dot_dimension_numbers<[1], [0], [0], [1], [0, 0, 1, 1], [], []>} : vector<288x128xbf16>, vector<128x128xbf16>, vector<288x128xf32> -> vector<288x128xf32>
    %97 = arith.addf %92, %96 : vector<288x128xf32>
    %c36_95 = arith.constant 36 : index
    %c0_96 = arith.constant 0 : index
    %98 = vector.load %arg11[%c36_95, %c0_96] : memref<328x128xbf16, #tpu.memory_space<vmem>>, vector<288x128xbf16>
    %c6_97 = arith.constant 6 : index
    %c0_98 = arith.constant 0 : index
    %c0_99 = arith.constant 0 : index
    %99 = vector.load %arg4[%c6_97, %c0_98, %c0_99] : memref<9x128x128xbf16, #tpu.memory_space<vmem>>, vector<1x128x128xbf16>
    %100 = vector.shape_cast %99 : vector<1x128x128xbf16> to vector<128x128xbf16>
    %cst_100 = arith.constant dense<0.000000e+00> : vector<288x128xf32>
    %101 = tpu.matmul %98, %100, %cst_100 {dimension_numbers = #tpu.dot_dimension_numbers<[1], [0], [0], [1], [0, 0, 1, 1], [], []>} : vector<288x128xbf16>, vector<128x128xbf16>, vector<288x128xf32> -> vector<288x128xf32>
    %102 = arith.addf %97, %101 : vector<288x128xf32>
    %c37_101 = arith.constant 37 : index
    %c0_102 = arith.constant 0 : index
    %103 = vector.load %arg11[%c37_101, %c0_102] : memref<328x128xbf16, #tpu.memory_space<vmem>>, vector<288x128xbf16>
    %c7_103 = arith.constant 7 : index
    %c0_104 = arith.constant 0 : index
    %c0_105 = arith.constant 0 : index
    %104 = vector.load %arg4[%c7_103, %c0_104, %c0_105] : memref<9x128x128xbf16, #tpu.memory_space<vmem>>, vector<1x128x128xbf16>
    %105 = vector.shape_cast %104 : vector<1x128x128xbf16> to vector<128x128xbf16>
    %cst_106 = arith.constant dense<0.000000e+00> : vector<288x128xf32>
    %106 = tpu.matmul %103, %105, %cst_106 {dimension_numbers = #tpu.dot_dimension_numbers<[1], [0], [0], [1], [0, 0, 1, 1], [], []>} : vector<288x128xbf16>, vector<128x128xbf16>, vector<288x128xf32> -> vector<288x128xf32>
    %107 = arith.addf %102, %106 : vector<288x128xf32>
    %c38_107 = arith.constant 38 : index
    %c0_108 = arith.constant 0 : index
    %108 = vector.load %arg11[%c38_107, %c0_108] : memref<328x128xbf16, #tpu.memory_space<vmem>>, vector<288x128xbf16>
    %c8_109 = arith.constant 8 : index
    %c0_110 = arith.constant 0 : index
    %c0_111 = arith.constant 0 : index
    %109 = vector.load %arg4[%c8_109, %c0_110, %c0_111] : memref<9x128x128xbf16, #tpu.memory_space<vmem>>, vector<1x128x128xbf16>
    %110 = vector.shape_cast %109 : vector<1x128x128xbf16> to vector<128x128xbf16>
    %cst_112 = arith.constant dense<0.000000e+00> : vector<288x128xf32>
    %111 = tpu.matmul %108, %110, %cst_112 {dimension_numbers = #tpu.dot_dimension_numbers<[1], [0], [0], [1], [0, 0, 1, 1], [], []>} : vector<288x128xbf16>, vector<128x128xbf16>, vector<288x128xf32> -> vector<288x128xf32>
    %112 = arith.addf %107, %111 : vector<288x128xf32>
    %c0_113 = arith.constant 0 : index
    %c0_114 = arith.constant 0 : index
    %113 = vector.load %arg5[%c0_113, %c0_114] : memref<1x128xf32, #tpu.memory_space<vmem>>, vector<1x128xf32>
    %114 = vector.broadcast %113 : vector<1x128xf32> to vector<288x128xf32>
    %115 = arith.addf %112, %114 : vector<288x128xf32>
    %cst_115 = arith.constant 0.000000e+00 : f32
    %116 = vector.broadcast %cst_115 : f32 to vector<288x128xf32>
    %117 = arith.maximumf %115, %116 : vector<288x128xf32>
    %118 = vector.broadcast %0 : vector<288x1xf32> to vector<288x128xf32>
    %119 = arith.mulf %117, %118 : vector<288x128xf32>
    %c19_116 = arith.constant 19 : index
    %c0_117 = arith.constant 0 : index
    %120 = vector.load %arg11[%c19_116, %c0_117] : memref<328x128xbf16, #tpu.memory_space<vmem>>, vector<288x128xbf16>
    %cst_118 = arith.constant dense<0.000000e+00> : vector<128x128xf32>
    %121 = tpu.matmul %120, %120, %cst_118 {dimension_numbers = #tpu.dot_dimension_numbers<[0], [0], [1], [1], [0, 1, 1, 1], [], []>} : vector<288x128xbf16>, vector<288x128xbf16>, vector<128x128xf32> -> vector<128x128xf32>
    %cst_119 = arith.constant 1.22070313E-4 : f32
    %122 = vector.broadcast %cst_119 : f32 to vector<128x128xf32>
    %123 = arith.mulf %121, %122 : vector<128x128xf32>
    %124 = arith.truncf %119 : vector<288x128xf32> to vector<288x128xbf16>
    %cst_120 = arith.constant dense<0.000000e+00> : vector<128x128xf32>
    %125 = tpu.matmul %124, %124, %cst_120 {dimension_numbers = #tpu.dot_dimension_numbers<[0], [0], [1], [1], [0, 1, 1, 1], [], []>} : vector<288x128xbf16>, vector<288x128xbf16>, vector<128x128xf32> -> vector<128x128xf32>
    %cst_121 = arith.constant 1.22070313E-4 : f32
    %126 = vector.broadcast %cst_121 : f32 to vector<128x128xf32>
    %127 = arith.mulf %125, %126 : vector<128x128xf32>
    %c0_122 = arith.constant 0 : index
    %c0_123 = arith.constant 0 : index
    %128 = vector.load %arg8[%c0_122, %c0_123] : memref<128x128xf32, #tpu.memory_space<vmem>>, vector<128x128xf32>
    %129 = arith.subf %123, %128 : vector<128x128xf32>
    %c0_124 = arith.constant 0 : index
    %c0_125 = arith.constant 0 : index
    %130 = vector.load %arg9[%c0_124, %c0_125] : memref<128x128xf32, #tpu.memory_space<vmem>>, vector<128x128xf32>
    %131 = arith.subf %127, %130 : vector<128x128xf32>
    %132 = arith.mulf %129, %129 : vector<128x128xf32>
    %133 = vector.shape_cast %132 : vector<128x128xf32> to vector<1x128x128xf32>
    %cst_126 = arith.constant dense<0.000000e+00> : vector<1xf32>
    %134 = vector.multi_reduction <add>, %133, %cst_126 [1, 2] : vector<1x128x128xf32> to vector<1xf32>
    %135 = vector.shape_cast %134 : vector<1xf32> to vector<1x1x1xf32>
    %136 = vector.extract %135[0, 0, 0] : f32 from vector<1x1x1xf32>
    %137 = arith.mulf %131, %131 : vector<128x128xf32>
    %138 = vector.shape_cast %137 : vector<128x128xf32> to vector<1x128x128xf32>
    %cst_127 = arith.constant dense<0.000000e+00> : vector<1xf32>
    %139 = vector.multi_reduction <add>, %138, %cst_127 [1, 2] : vector<1x128x128xf32> to vector<1xf32>
    %140 = vector.shape_cast %139 : vector<1xf32> to vector<1x1x1xf32>
    %141 = vector.extract %140[0, 0, 0] : f32 from vector<1x1x1xf32>
    %142 = arith.addf %136, %141 : f32
    %cst_128 = arith.constant 9.765625E-4 : f32
    %143 = arith.mulf %142, %cst_128 : f32
    %c0_129 = arith.constant 0 : index
    %c0_130 = arith.constant 0 : index
    %c0_131 = arith.constant 0 : index
    %144 = vector.load %arg7[%c0_129, %c0_130, %c0_131] : memref<1x288x128xbf16, #tpu.memory_space<vmem>>, vector<1x288x128xbf16>
    %145 = vector.shape_cast %144 : vector<1x288x128xbf16> to vector<288x128xbf16>
    %146 = arith.extf %145 : vector<288x128xbf16> to vector<288x128xf32>
    %147 = arith.subf %119, %146 : vector<288x128xf32>
    %148 = arith.mulf %147, %147 : vector<288x128xf32>
    %149 = vector.shape_cast %148 : vector<288x128xf32> to vector<1x288x128xf32>
    %cst_132 = arith.constant dense<0.000000e+00> : vector<1xf32>
    %150 = vector.multi_reduction <add>, %149, %cst_132 [1, 2] : vector<1x288x128xf32> to vector<1xf32>
    %151 = vector.shape_cast %150 : vector<1xf32> to vector<1x1x1xf32>
    %152 = vector.extract %151[0, 0, 0] : f32 from vector<1x1x1xf32>
    %cst_133 = arith.constant 1.22070313E-4 : f32
    %153 = arith.mulf %152, %cst_133 : f32
    %cst_134 = arith.constant 1.000000e+00 : f32
    %154 = arith.mulf %cst_134, %153 : f32
    %cst_135 = arith.constant 1.000000e+01 : f32
    %155 = arith.mulf %cst_135, %143 : f32
    %156 = arith.addf %154, %155 : f32
    %157 = vector.broadcast %156 : f32 to vector<1x1x128xf32>
    %c0_136 = arith.constant 0 : index
    %c0_137 = arith.constant 0 : index
    %c0_138 = arith.constant 0 : index
    %158 = vector.load %arg10[%c0_136, %c0_137, %c0_138] : memref<1x1x128xf32, #tpu.memory_space<vmem>>, vector<1x1x128xf32>
    tpu.vector_store %arg10[%c0_136, %c0_137, %c0_138], %157 {strides = array<i32>} : memref<1x1x128xf32, #tpu.memory_space<vmem>>, vector<1x1x128xf32>,
    return
  }
  func.func @transform_0(%arg0: i32) -> (i32, i32, i32) {
    %c0_i32 = arith.constant 0 : i32
    %c0_i32_0 = arith.constant 0 : i32
    %c0_i32_1 = arith.constant 0 : i32
    return %arg0, %c0_i32, %c0_i32_0 : i32, i32, i32
  }
  func.func @transform_1(%arg0: i32) -> (i32, i32, i32) {
    %c0_i32 = arith.constant 0 : i32
    %c0_i32_0 = arith.constant 0 : i32
    %c0_i32_1 = arith.constant 0 : i32
    %c0_i32_2 = arith.constant 0 : i32
    return %c0_i32, %c0_i32_0, %c0_i32_1 : i32, i32, i32
  }
  func.func @transform_2(%arg0: i32) -> (i32, i32) {
    %c0_i32 = arith.constant 0 : i32
    %c0_i32_0 = arith.constant 0 : i32
    %c0_i32_1 = arith.constant 0 : i32
    return %c0_i32, %c0_i32_0 : i32, i32
  }
  func.func @transform_3(%arg0: i32) -> (i32, i32, i32) {
    %c0_i32 = arith.constant 0 : i32
    %c0_i32_0 = arith.constant 0 : i32
    %c0_i32_1 = arith.constant 0 : i32
    %c0_i32_2 = arith.constant 0 : i32
    return %c0_i32, %c0_i32_0, %c0_i32_1 : i32, i32, i32
  }
  func.func @transform_4(%arg0: i32) -> (i32, i32) {
    %c0_i32 = arith.constant 0 : i32
    %c0_i32_0 = arith.constant 0 : i32
    %c0_i32_1 = arith.constant 0 : i32
    return %c0_i32, %c0_i32_0 : i32, i32
  }
  func.func @transform_5(%arg0: i32) -> (i32, i32) {
    %c0_i32 = arith.constant 0 : i32
    %c0_i32_0 = arith.constant 0 : i32
    %c0_i32_1 = arith.constant 0 : i32
    return %c0_i32, %c0_i32_0 : i32, i32
  }
  func.func @transform_6(%arg0: i32) -> (i32, i32, i32) {
    %c0_i32 = arith.constant 0 : i32
    %c0_i32_0 = arith.constant 0 : i32
    %c0_i32_1 = arith.constant 0 : i32
    return %arg0, %c0_i32, %c0_i32_0 : i32, i32, i32
  }
  func.func @transform_7(%arg0: i32) -> (i32, i32) {
    %c0_i32 = arith.constant 0 : i32
    %c0_i32_0 = arith.constant 0 : i32
    %c0_i32_1 = arith.constant 0 : i32
    return %c0_i32, %c0_i32_0 : i32, i32
  }
  func.func @transform_8(%arg0: i32) -> (i32, i32) {
    %c0_i32 = arith.constant 0 : i32
    %c0_i32_0 = arith.constant 0 : i32
    %c0_i32_1 = arith.constant 0 : i32
    return %c0_i32, %c0_i32_0 : i32, i32
  }
  func.func @transform_9(%arg0: i32) -> (i32, i32, i32) {
    %c0_i32 = arith.constant 0 : i32
    %c0_i32_0 = arith.constant 0 : i32
    %c0_i32_1 = arith.constant 0 : i32
    return %arg0, %c0_i32, %c0_i32_0 : i32, i32, i32
  }
}

</mosaic_0001>

<bundles_post_ra>
// kernel: tpu_custom_call.1
= control target key start
LH: loop header
LB: loop body
LE: loop exit
PB: predicated region body
PF: predicated region fallthrough
CT: control target
= control target key end

     0   :  { %s15465_s0 = inlined_call_operand.hbm [shape: bf16[2,328,128], index: 0, kind: input, shape index: {}]   ;;  %s15466_s1 = inlined_call_operand.hbm [shape: bf16[9,128,128], index: 1, kind: input, shape index: {}]   ;;  %s15467_s2 = inlined_call_operand.vmem [shape: f32[1,128], index: 2, kind: input, shape index: {}]   ;;  %s15468_s3 = inlined_call_operand.hbm [shape: bf16[9,128,128], index: 3, kind: input, shape index: {}]   ;;  %s15469_s4 = inlined_call_operand.vmem [shape: f32[1,128], index: 4, kind: input, shape index: {}]   ;;  %s15470_s5 = inlined_call_operand.vmem [shape: f32[288,1], index: 5, kind: input, shape index: {}]   ;;  %s15471_s6 = inlined_call_operand.vmem [shape: bf16[2,288,128], index: 6, kind: input, shape index: {}]   ;;  %s15472_s7 = inlined_call_operand.hbm [shape: f32[128,128], index: 7, kind: input, shape index: {}]   ;;  %s15473_s8 = inlined_call_operand.hbm [shape: f32[128,128], index: 8, kind: input, shape index: {}]   ;;  %s15474_s9 = inlined_call_operand.hbm [shape: f32[2,1,128], index: 9, kind: output, shape index: {}]  }
   0x1   :  { %15546 = sst [smem:[#allocation113_spill]] %s15466_s1 }
   0x2   :  { %15547 = sst [smem:[#allocation114_spill]] %s15468_s3 }
   0x3   :  { %15548 = sst [smem:[#allocation115_spill]] %s15472_s7 }
   0x4   :  { %14 = vsyncpa [#allocation4], 0 }
   0x5   :  { %16 = vsyncpa [#allocation4 + $0x1], 0 }
   0x6   :  { %17 = vsyncpa [#allocation7], 0 }
   0x7   :  { %18 = vsyncpa [#allocation10], 0 }
   0x8   :  { %19 = vsyncpa [#allocation5], 0 }
   0x9   :  { %21 = vsyncpa [#allocation5 + $0x1], 0  ;;  %s13188_s30 = smov 0   ;;  %s13190_s10 = smov 0  }
   0xa   :  { %s13192_s11 = smov 0   ;;  %s13194_s12 = smov 0  }
   0xb LB: > { %15549 = sst [smem:[#allocation17_spill]] %s13113_s30  ;;  %s13209_s13 = sadd.s32 4294967295, %s13125_s12   ;;  %s13125_s12 = sphi %s13194_s12, %s15777_s12   ;;  %s13121_s11 = sphi %s13192_s11, %s15776_s11   ;;  %s13117_s10 = sphi %s13190_s10, %s15775_s10   ;;  %s13113_s30 = sphi %s13188_s30, %s15774_s30  }
   0xc   : > { %s9874_s14 = sadd.s32 4294967294, %s13125_s12   ;;  %p47_p0 = scmp.ne.s32.totalorder %s13117_s10, %s13113_s30 }
   0xd   : > { %p15475_p1 = scmp.eq.s32.totalorder %s13209_s13, 0  ;;  %p250_p3 = scmp.eq.s32.totalorder %s9874_s14, 1 }
   0xe   : > { %p9875_p5 = scmp.ge.s32.totalorder %s13125_s12, 1  ;;  %p257_p7 = scmp.lt.s32.totalorder %s13125_s12, 3 }
   0xf   : > { %p13218_p4 = por %p15475_p1, %p47_p0  ;;  %p13223_p6 = por %p250_p3, %p47_p0 }
  0x10   : > { %p13228_p8 = pnand %p9875_p5, %p257_p7  ;;  %s13127_s18 = smov [#allocation6]  }
  0x11   : > { %s15550_s15 = scalar_select %p13218_p4, 1, 0 }
  0x12   : > { %s15551_s16 = scalar_select %p13223_p6, 1, 0 }
  0x13   : > { %s15553_s17 = scalar_select %p13228_p8, 1, 0 }
  0x14   : > { %15552 = sst [smem:[#allocation18_spill]] %s15551_s16  ;;  %s269_s19 = sshll.u32 %s13127_s18, 4  ;;  %s13232_s19 = int_to_ptr.vmem [resolvable:$true] %s269_s19 }
  0x15   : > { %p12536_p9 = pneg %p13228_p8  ;;  %s13128_s21 = smov [#allocation9]  }
  0x16   : > { %s304_s22 = sshll.u32 %s13128_s21, 4  ;;  %s15555_s1 = sld [smem:[#allocation113_spill]]  ;;  %s13243_s22 = int_to_ptr.vmem [resolvable:$true] %s304_s22 }
  0x17   : > { %p13239_p11 = pnand %p12536_p9, %p15475_p1 }
  0x19   : > { %p13253_p13 = pneg %p13239_p11 }
  0x1c   : > { %s12909_s25 = scalar_lea.hbm %s15555_s1, 9216 }
  0x1d   : > { %p12910_p12 = scmp.ne.s32.totalorder %s15555_s1, %s12909_s25  ;;  %p12916_p5 = scmp.lt.u32.totalorder %s12909_s25, %s15555_s1 }
  0x1f   : > { %p12912_p0 = pnand %p13253_p13, %p12910_p12 }
  0x21   : > { %p12913_p3 = pneg %p12912_p0 }
  0x23   : > { %p12918_p7 = pnand %p12916_p5, %p12913_p3 }
  0x25   : > { %12921 = shalt.err (!%p12918_p7)
}
  0x26   : > { %s12922_s18 = scalar_lea.vmem %s13232_s19, 9216  ;;  %p12930_p2 = scmp.lt.s32.totalorder %s13232_s19, %s13232_s19 }
  0x27   : > { %p12923_p9 = scmp.ne.s32.totalorder %s13232_s19, %s12922_s18  ;;  %p12931_p6 = scmp.lt.s32.totalorder %s12922_s18, %s12922_s18 }
  0x29   : > { %p12925_p10 = pnand %p12923_p9, %p13253_p13  ;;  %p12932_p12 = por %p12931_p6, %p12930_p2 }
  0x2b   : > { %p12926_p1 = pneg %p12925_p10 }
  0x2d   : > { %p12933_p0 = pnand %p12932_p12, %p12926_p1 }
  0x2f   : > { %12936 = shalt.err (!%p12933_p0)
}
  0x30   : > { %s15478_s21 = smov 64   ;;  %s15480_s23 = smov 4  }
  0x31   : > { %12539 = dma.hbm_to_vmem [thread:$0]  (!%p13239_p11), %s15555_s1, 9216, %s13232_s19, [#allocation7], %s15478_s21, %s15478_s21, %s15480_s23  }
  0x32   : > { %s15557_s7 = sld [smem:[#allocation115_spill]] }
  0x38   : > { %s12937_s29 = scalar_lea.hbm %s15557_s7, 2048 }
  0x39   : > { %p12938_p1 = scmp.ne.s32.totalorder %s15557_s7, %s12937_s29  ;;  %p12944_p10 = scmp.lt.u32.totalorder %s12937_s29, %s15557_s7 }
  0x3b   : > { %p12940_p2 = pnand %p12938_p1, %p13253_p13 }
  0x3d   : > { %p12941_p6 = pneg %p12940_p2 }
  0x3f   : > { %p12946_p3 = pnand %p12944_p10, %p12941_p6 }
  0x41   : > { %12949 = shalt.err (!%p12946_p3)
}
  0x42   : > { %s12950_s19 = scalar_lea.vmem %s13243_s22, 2048  ;;  %p12958_p12 = scmp.lt.s32.totalorder %s13243_s22, %s13243_s22 }
  0x43   : > { %p12951_p5 = scmp.ne.s32.totalorder %s13243_s22, %s12950_s19  ;;  %p12959_p0 = scmp.lt.s32.totalorder %s12950_s19, %s12950_s19 }
  0x45   : > { %p12953_p7 = pnand %p12951_p5, %p13253_p13  ;;  %p12960_p1 = por %p12959_p0, %p12958_p12 }
  0x47   : > { %p12954_p9 = pneg %p12953_p7 }
  0x49   : > { %p12961_p2 = pnand %p12960_p1, %p12954_p9 }
  0x4b   : > { %12964 = shalt.err (!%p12961_p2)
}
  0x4c   : > { %s15484_s24 = smov 128   ;;  %s13132_s30 = smov 8  }
  0x4d   : > { %12545 = dma.hbm_to_vmem [thread:$0]  (!%p13239_p11), %s15557_s7, 2048, %s13243_s22, [#allocation10], %s15484_s24, %s15484_s24, %s13132_s30  }
  0x4e   : > { %s13133_s26 = smov [#allocation8]   ;;  %s13134_s29 = smov [#allocation11]  }
  0x4f   : > { %s285_s27 = sshll.u32 %s13133_s26, 4  ;;  %s317_s14 = sshll.u32 %s13134_s29, 4  ;;  %s286_s27 = int_to_ptr.vmem [resolvable:$true] %s285_s27  ;;  %s13303_s14 = int_to_ptr.vmem [resolvable:$true] %s317_s14 }
  0x50   : > { %s15558_s3 = sld [smem:[#allocation114_spill]] }
  0x56   : > { %s12965_s21 = scalar_lea.hbm %s15558_s3, 9216 }
  0x57   : > { %p12966_p6 = scmp.ne.s32.totalorder %s15558_s3, %s12965_s21  ;;  %p12972_p5 = scmp.lt.u32.totalorder %s12965_s21, %s15558_s3 }
  0x59   : > { %p12968_p10 = pnand %p12966_p6, %p13253_p13 }
  0x5b   : > { %p12969_p3 = pneg %p12968_p10 }
  0x5d   : > { %p12974_p7 = pnand %p12972_p5, %p12969_p3 }
  0x5f   : > { %12977 = shalt.err (!%p12974_p7)
}
  0x60   : > { %s12978_s25 = scalar_lea.vmem %s286_s27, 9216  ;;  %p12986_p1 = scmp.lt.s32.totalorder %s286_s27, %s286_s27 }
  0x61   : > { %p12979_p9 = scmp.ne.s32.totalorder %s286_s27, %s12978_s25  ;;  %p12987_p2 = scmp.lt.s32.totalorder %s12978_s25, %s12978_s25 }
  0x63   : > { %p12981_p12 = pnand %p12979_p9, %p13253_p13  ;;  %p12988_p4 = por %p12987_p2, %p12986_p1 }
  0x65   : > { %p12982_p0 = pneg %p12981_p12 }
  0x67   : > { %p12989_p8 = pnand %p12988_p4, %p12982_p0 }
  0x69   : > { %12992 = shalt.err (!%p12989_p8)
}
  0x6a   : > { %s15559_s1 = smov 4   ;;  %s15560_s23 = smov 64  }
  0x6b   : > { %12542 = dma.hbm_to_vmem [thread:$0]  (!%p13239_p11), %s15558_s3, 9216, %s286_s27, [#allocation7], %s15560_s23, %s15560_s23, %s15559_s1  }
  0x6c   : > { %s12993_s19 = scalar_lea.hbm %s15473_s8, 2048 }
  0x6d   : > { %p12994_p6 = scmp.ne.s32.totalorder %s15473_s8, %s12993_s19  ;;  %p13000_p10 = scmp.lt.u32.totalorder %s12993_s19, %s15473_s8 }
  0x6f   : > { %p12996_p4 = pnand %p12994_p6, %p13253_p13 }
  0x71   : > { %p12997_p8 = pneg %p12996_p4 }
  0x73   : > { %p13002_p3 = pnand %p13000_p10, %p12997_p8 }
  0x75   : > { %13005 = shalt.err (!%p13002_p3)
}
  0x76   : > { %s13006_s27 = scalar_lea.vmem %s13303_s14, 2048  ;;  %p13014_p12 = scmp.lt.s32.totalorder %s13303_s14, %s13303_s14 }
  0x77   : > { %p13007_p5 = scmp.ne.s32.totalorder %s13303_s14, %s13006_s27  ;;  %p13015_p0 = scmp.lt.s32.totalorder %s13006_s27, %s13006_s27 }
  0x79   : > { %p13009_p7 = pnand %p13007_p5, %p13253_p13  ;;  %p13016_p1 = por %p13015_p0, %p13014_p12 }
  0x7b   : > { %p13010_p9 = pneg %p13009_p7 }
  0x7d   : > { %p13017_p2 = pnand %p13016_p1, %p13010_p9 }
  0x7f   : > { %13020 = shalt.err (!%p13017_p2)
}
  0x80   : > { %s15561_s24 = smov 128   ;;  %s13353_s20 = sadd.s32 1, %s13125_s12  }
  0x81   : > { %12548 = dma.hbm_to_vmem [thread:$0]  (!%p13239_p11), %s15473_s8, 2048, %s13303_s14, [#allocation10], %s15561_s24, %s15561_s24, %s13132_s30  }
  0x82   : > { %s31_s28 = ssub.s32 %s13125_s12, %s13353_s20  ;;  %s34_s29 = sadd.s32 1, %s13121_s11 }
  0x83   : > { %p32_p13 = scmp.eq.s32.totalorder %s31_s28, 0  ;;  %p41_p6 = scmp.ne.s32.totalorder %s13121_s11, %s13117_s10 }
  0x84   : > { %p42_p4 = scmp.eq.s32.totalorder %s13125_s12, 0  ;;  %p15562_p10 = scmp.eq.s32.totalorder %s13209_s13, 1 }
  0x85   : > { %s13362_s18 = scalar_select %p32_p13, %s13121_s11, %s34_s29  }
  0x86   : > { %p43_p8 = por %p42_p4, %p41_p6  ;;  %p13366_p3 = por %p15562_p10, %p41_p6 }
  0x87   : > { %p12561_p5 = scmp.lt.s32.totalorder %s13125_s12, 2  ;;  %s331_s16 = sand.u32 1, %s13121_s11  }
  0x88   : > { %s12506_s22 = smul.u32 164, %s331_s16  ;;  %s13384_s28 = scalar_lea.sflag [#allocation4], %s331_s16 }
  0x89   : > { %s12507_s30 = smul.u32 2624, %s13125_s12  ;;  %p13373_p11 = pnand %p12561_p5, %p43_p8 }
  0x8a   : > { %s335_s26 = scalar_lea.vmem [#allocation3], %s12506_s22  ;;  %s13026_s27 = scalar_lea.hbm %s15465_s0, 5248 }
  0x8b   : > { %s13380_s24 = scalar_lea.hbm %s15465_s0, %s12507_s30  ;;  %s342_s21 = sshll.u32 %s335_s26, 4  ;;  %s13382_s21 = int_to_ptr.vmem [resolvable:$true] %s342_s21 }
  0x8c   : > { %s13021_s29 = scalar_lea.hbm %s13380_s24, 2624  ;;  %p13023_p9 = pneg %p13373_p11 }
  0x8d   : > { %p13022_p7 = scmp.ne.s32.totalorder %s13380_s24, %s13021_s29  ;;  %p13027_p1 = scmp.lt.u32.totalorder %s13380_s24, %s15465_s0 }
  0x8e   : > { %p13028_p2 = scmp.lt.u32.totalorder %s13026_s27, %s13021_s29  ;;  %p13030_p6 = scmp.lt.u32.totalorder %s13021_s29, %s13380_s24 }
  0x8f   : > { %p13024_p12 = pnand %p13023_p9, %p13022_p7 }
  0x90   : > { %p13029_p13 = por %p13028_p2, %p13027_p1 }
  0x91   : > { %p13025_p0 = pneg %p13024_p12 }
  0x92   : > { %p13031_p4 = por %p13030_p6, %p13029_p13 }
  0x94   : > { %p13032_p8 = pnand %p13031_p4, %p13025_p0 }
  0x96   : > { %13035 = shalt.err (!%p13032_p8)
}
  0x97   : > { %s13036_s16 = scalar_lea.vmem %s13382_s21, 2624  ;;  %s13135_s22 = smov [#allocation3]  }
  0x98   : > { %p13037_p10 = scmp.ne.s32.totalorder %s13382_s21, %s13036_s16  ;;  %s13041_s26 = sshll.u32 %s13135_s22, 4  ;;  %s13042_s26 = int_to_ptr.vmem [resolvable:$false] %s13041_s26 }
  0x99   : > { %s13043_s3 = scalar_lea.vmem %s13042_s26, 5248  ;;  %p13044_p12 = scmp.lt.s32.totalorder %s13382_s21, %s13042_s26 }
  0x9a   : > { %p13039_p5 = pnand %p13037_p10, %p13023_p9  ;;  %p13045_p1 = scmp.lt.s32.totalorder %s13043_s3, %s13036_s16 }
  0x9c   : > { %p13040_p7 = pneg %p13039_p5  ;;  %p13046_p2 = por %p13045_p1, %p13044_p12 }
  0x9e   : > { %p13047_p13 = pnand %p13046_p2, %p13040_p7 }
  0xa0   : > { %13050 = shalt.err (!%p13047_p13)
}
  0xa1   : > { %12552 = dma.hbm_to_vmem [thread:$0]  (!%p13373_p11), %s13380_s24, 2624, %s13382_s21, %s13384_s28, %s15560_s23, %s15560_s23, %s15559_s1  }
  0xa2   : > { %p15565_p9 = scmp.ne.s32.totalorder %s15553_s17, 0 }
  0xa4   : > { %362 = sbr.rel (%p15565_p9) target bundleno = 2553 (0x9f9), region = 56 }
  0xab   : > { %s13418_s7 = sand.u32 1, %s13117_s10   ;;  %p15566_p0 = scmp.ne.s32.totalorder %s15550_s15, 0 }
  0xac   : > { %s12508_s29 = smul.u32 164, %s13418_s7  ;;  %s365_s30 = scalar_lea.sflag [#allocation4], %s13418_s7 }
  0xae   : > { %s13422_s25 = scalar_lea.vmem [#allocation3], %s12508_s29 }
  0xaf   : > { %13096 = dma.done.wait (%p15566_p0), %s365_s30, 2624  }
  0xb0   : > { %13098 = vsyncadd (%p15566_p0), %s365_s30, 4294964672  ;;  %p15567_p11 = scmp.eq.s32.totalorder %s13209_s13, 0 }
  0xb2   : > { %13100 = dma.done.wait (%p15567_p11), [#allocation7], 18432   ;;  %p15568_p6 = pmov %p15567_p11 }
  0xb4   : > { %13102 = vsyncadd (%p15568_p6), [#allocation7], 4294948864  ;;  %p15569_p4 = pmov %p15568_p6 }
  0xb6   : > { %13104 = dma.done.wait (%p15569_p4), [#allocation10], 4096   ;;  %p15570_p8 = pmov %p15569_p4 }
  0xb7   : > { %v12610_v0 = vld [vmem:[#allocation6 + $0x40] sm:$0xff]   ;;  %v12611_v1 = vld [vmem:[#allocation6 + $0x48] sm:$0xff]   ;;  %v12612_v2 = vld [vmem:[#allocation6 + $0x50] sm:$0xff]   ;;  %vm669_vm0 = vsmask.f32 7424  ;;  %vm1325_vm1 = vcmask 1046528  }
  0xb8   : > { %13106 = vsyncadd (%p15570_p8), [#allocation10], 4294963200  ;;  %10954 = vmatprep.subr.bf16.mxu0 %v12610_v0  ;;  %v12613_v3 = vld [vmem:[#allocation6 + $0x58] sm:$0xff]   ;;  %v13441_v7 = vld [vmem:[%s13422_s25 + $0x8] sm:$0xff]   ;;  %vm2126_vm2 = vsmask.f32 6400 }
  0xb9   : > { %10955 = vmatpush3.bf16.msra.mxu0 %v12610_v0  ;;  %v506_v4 = vld [vmem:[%s13422_s25] sm:$0xf]  ;;  %v507_v5 = vld [vmem:[%s13422_s25 + $0x4] sm:$0xf]  ;;  %v678_v10 = vshll.u32 %v13441_v7, 16  ;;  %v12615_v15 = vld [vmem:[#allocation6 + $0x68] sm:$0xff]  }
  0xba   : > { %10956 = vmatprep.subr.bf16.mxu0 %v12611_v1  ;;  %v13438_v6 = vcombine.low %v506_v4, %v507_v5  ;;  %v12614_v11 = vld [vmem:[#allocation6 + $0x60] sm:$0xff]   ;;  %v13448_v17 = vld [vmem:[%s13422_s25 + $0x10] sm:$0xff]   ;;  %v13451_v19 = vld [vmem:[%s13422_s25 + $0x18] sm:$0xff]   ;;  %v682_v22 = vshrl.u32 %v13441_v7, 16  ;;  %vm2597_vm3 = vcmask 1045504   ;;  %vm3869_vm5 = vcmask 1044480  }
  0xbb   : > { %v680_v13 = vrot.slane %v678_v10, 1  ;;  %v12616_v18 = vld [vmem:[#allocation6 + $0x70] sm:$0xff]   ;;  %v686_v20 = vshll.u32 %v13448_v17, 16  ;;  %v12617_v21 = vld [vmem:[#allocation6 + $0x78] sm:$0xff]   ;;  %v690_v23 = vshrl.u32 %v13448_v17, 16  ;;  %v694_v24 = vshll.u32 %v13451_v19, 16 }
  0xbc   : > { %v671_v8 = vshrl.u32 %v13438_v6, 16  ;;  %v673_v9 = vshll.u32 %v13438_v6, 16  ;;  %v13458_v26 = vld [vmem:[%s13422_s25 + $0x20] sm:$0xff]   ;;  %v13461_v31 = vld [vmem:[%s13422_s25 + $0x28] sm:$0xff]   ;;  %v698_v32 = vshrl.u32 %v13451_v19, 16  ;;  %v13466_v34 = vld [vmem:[%s13422_s25 + $0x30] sm:$0xff]  }
  0xbd   : > { %10957 = vmatpush3.bf16.msra.mxu0 %v12611_v1  ;;  %v688_v25 = vrot.slane %v686_v20, 1  ;;  %v684_v27 = vor.u32 %v682_v22, %v680_v13  ;;  %v12621_v28 = vld [vmem:[#allocation6] sm:$0xff]   ;;  %v696_v30 = vrot.slane %v694_v24, 1  ;;  %v702_v33 = vshll.u32 %v13458_v26, 16  ;;  %v13470_v36 = vld [vmem:[%s13422_s25 + $0x38] sm:$0xff]   ;;  %v12624_v38 = vld [vmem:[#allocation6 + $0x8] sm:$0xff]  }
  0xbe   : > { %10958 = vmatprep.subr.bf16.mxu0 %v12612_v2  ;;  %v675_v12 = vrot.slane %v673_v9, 1  ;;  %v706_v39 = vshrl.u32 %v13458_v26, 16  ;;  %v710_v40 = vshll.u32 %v13461_v31, 16  ;;  %v13476_v41 = vld [vmem:[%s13422_s25 + $0x40] sm:$0xff]   ;;  %v718_v44 = vshll.u32 %v13466_v34, 16  ;;  %v13481_v46 = vld [vmem:[%s13422_s25 + $0x48] sm:$0xff]  }
  0xbf   : > { %v692_v29 = vor.u32 %v690_v23, %v688_v25  ;;  %v689_v35 = vsel %vm669_vm0, %v684_v27, %v688_v25  ;;  %v700_v42 = vor.u32 %v698_v32, %v696_v30  ;;  %v704_v43 = vrot.slane %v702_v33, 1  ;;  %v12627_v49 = vld [vmem:[#allocation6 + $0x10] sm:$0xff]   ;;  %v12630_v58 = vld [vmem:[#allocation6 + $0x18] sm:$0xff]   ;;  %p423_p10 = scmp.lt.s32.totalorder %s13209_s13, 1  ;;  %s10210_s3 = sshll.u32 %s13209_s13, 4 }
  0xc0   : > { %v676_v14 = vor.u32 %v675_v12, %v671_v8  ;;  %v726_v45 = vshll.u32 %v13470_v36, 16  ;;  %v712_v48 = vrot.slane %v710_v40, 1  ;;  %v714_v50 = vshrl.u32 %v13461_v31, 16  ;;  %v13486_v52 = vld [vmem:[%s13422_s25 + $0x50] sm:$0xff]   ;;  %v13494_v61 = vld [vmem:[%s13422_s25 + $0x58] sm:$0xff]   ;;  %v12633_v8 = vld [vmem:[#allocation6 + $0x20] sm:$0xff]  }
  0xc1   : > { %10959 = vmatpush3.bf16.msra.mxu0 %v12612_v2  ;;  %v697_v37 = vsel %vm669_vm0, %v692_v29, %v696_v30  ;;  %v708_v47 = vor.u32 %v706_v39, %v704_v43  ;;  %v734_v51 = vshll.u32 %v13476_v41, 16  ;;  %v705_v53 = vsel %vm669_vm0, %v700_v42, %v704_v43  ;;  %v13506_v12 = vld [vmem:[%s13422_s25 + $0x68] sm:$0xff]   ;;  %v12639_v25 = vld [vmem:[#allocation6 + $0x30] sm:$0xff]   ;;  %v12643_v29 = vld [vmem:[#allocation6 + $0x38] sm:$0xff]   ;;  %s424_s15 = scalar_select %p423_p10, %s13209_s13, 1 }
  0xc2   : > { %10960 = vmatprep.subr.bf16.mxu0 %v12613_v3  ;;  %v681_v16 = vsel %vm669_vm0, %v676_v14, %v680_v13  ;;  %v722_v54 = vshrl.u32 %v13466_v34, 16  ;;  %v730_v55 = vshrl.u32 %v13470_v36, 16  ;;  %v720_v56 = vrot.slane %v718_v44, 1  ;;  %v12645_v39 = vld [vmem:[#allocation6 + $0x80] sm:$0xff]   ;;  %v13521_v42 = vld [vmem:[%s13422_s25 + $0x78] sm:$0xff]   ;;  %s422_s30 = scalar_lea.vmem [#allocation12], %s13418_s7 }
  0xc3   : > { %10970 = vmatprep.mubr.bf16.mxu0 %v681_v16  ;;  %v728_v57 = vrot.slane %v726_v45, 1  ;;  %v738_v59 = vshrl.u32 %v13476_v41, 16  ;;  %v742_v60 = vshll.u32 %v13481_v46, 16  ;;  %v713_v62 = vsel %vm669_vm0, %v708_v47, %v712_v48  ;;  %s12509_s17 = smul.u32 144, %s424_s15  ;;  %s9758_s15 = sshll.u32 %s422_s30, 4  ;;  %s15423_s15 = int_to_ptr.vmem [resolvable:$true] %s9758_s15 }
  0xc4   : > { %v736_v63 = vrot.slane %v734_v51, 1  ;;  %v750_v0 = vshll.u32 %v13486_v52, 16  ;;  %v716_v1 = vor.u32 %v714_v50, %v712_v48  ;;  %v758_v2 = vshll.u32 %v13494_v61, 16  ;;  %s9746_s24 = scalar_lea.sflag [#allocation5], %s13418_s7  ;;  %s13051_s21 = scalar_lea.vmem %s15423_s15, 16 }
  0xc5   : > { %10961 = vmatpush3.bf16.msra.mxu0 %v12613_v3  ;;  %v13500_v3 = vld [vmem:[%s13422_s25 + $0x60] sm:$0xff]   ;;  %v724_v4 = vor.u32 %v722_v54, %v720_v56  ;;  %v746_v5 = vshrl.u32 %v13481_v46, 16  ;;  %v744_v9 = vrot.slane %v742_v60, 1  ;;  %v754_v10 = vshrl.u32 %v13486_v52, 16  ;;  %v13532_v54 = vld [vmem:[%s13422_s25 + $0x88] sm:$0xff]   ;;  %s15241_s14 = scalar_lea.vmem %s15471_s6, %s12509_s17  ;;  %p13052_p5 = scmp.ne.s32.totalorder %s15423_s15, %s13051_s21 }
  0xc6   : > { %10962 = vmatprep.subr.bf16.mxu0 %v12614_v11  ;;  %v721_v13 = vsel %vm669_vm0, %v716_v1, %v720_v56  ;;  %v752_v14 = vrot.slane %v750_v0, 1  ;;  %v766_v16 = vshll.u32 %v13500_v3, 16  ;;  %v774_v22 = vshll.u32 %v13506_v12, 16  ;;  %v13540_v0 = vld [vmem:[%s13422_s25 + $0x90] ss:$0 sps:$4 sm:$0x11]  }
  0xc7   : > { %v729_v20 = vsel %vm669_vm0, %v724_v4, %v728_v57  ;;  %v732_v23 = vor.u32 %v730_v55, %v728_v57  ;;  %v740_v27 = vor.u32 %v738_v59, %v736_v63  ;;  %v790_v47 = vshll.u32 %v13521_v42, 16  ;;  %p13053_p7 = pnand %p13052_p5, %p13366_p3  ;;  %s13137_s13 = smov [#allocation12]  }
  0xc8   : > { %v768_v24 = vrot.slane %v766_v16, 1  ;;  %v776_v33 = vrot.slane %v774_v22, 1  ;;  %v756_v40 = vor.u32 %v754_v10, %v752_v14  ;;  %v794_v50 = vshrl.u32 %v13521_v42, 16  ;;  %v12648_v22 = vld [vmem:[#allocation6 + $0x98] sm:$0xff]  }
  0xc9   : > { %10963 = vmatpush3.bf16.msra.mxu0 %v12614_v11  ;;  %v762_v11 = vshrl.u32 %v13494_v61, 16  ;;  %v737_v30 = vsel %vm669_vm0, %v732_v23, %v736_v63  ;;  %v745_v32 = vsel %vm669_vm0, %v740_v27, %v744_v9  ;;  %v792_v57 = vrot.slane %v790_v47, 1  ;;  %v12649_v23 = vld [vmem:[#allocation6 + $0xa0] sm:$0xff]   ;;  %p13054_p12 = pneg %p13053_p7 }
  0xca   : > { %10964 = vmatprep.subr.bf16.mxu0 %v12615_v15  ;;  %v814_v10 = vshll.u32 %v13540_v0, 16  ;;  %vm3398_vm4 = vsmask.f32 5376  ;;  %vm4988_vm6 = vcmask 1043457   ;;  %vm4989_vm7 = vsmask.f32 7942 }
  0xcb   : > { %vm4589_vm8 = vsmask.f32 1280  ;;  %vm4590_vm9 = vsmask.f32 5392  ;;  %vm14149_vm10 = vmand %vm4988_vm6, %vm4989_vm7  ;;  %vm5029_vm12 = vcmask 1041408   ;;  %vm8871_vm14 = vcmask 261120  }
  0xcc   : > { %v816_v16 = vrot.slane %v814_v10, 1  ;;  %v12665_v10 = vld [vmem:[#allocation6 + $0x100] sm:$0xff]   ;;  %vm14157_vm11 = vmor %vm4589_vm8, %vm4590_vm9 }
  0xcd   : > { %10965 = vmatpush3.bf16.msra.mxu0 %v12615_v15  ;;  %v760_v15 = vrot.slane %v758_v2, 1  ;;  %vm5030_vm13 = vmand %vm5029_vm12, %vm4589_vm8 }
  0xce   : > { %10966 = vmatprep.subr.bf16.mxu0 %v12616_v18 }
  0xcf   : > { %v761_v44 = vsel %vm669_vm0, %v756_v40, %v760_v15  ;;  %v764_v48 = vor.u32 %v762_v11, %v760_v15 }
  0xd1   : > { %10967 = vmatpush3.bf16.msra.mxu0 %v12616_v18  ;;  %v12636_v18 = vld [vmem:[#allocation6 + $0x28] sm:$0xff]   ;;  %v769_v55 = vsel %vm669_vm0, %v764_v48, %v768_v24  ;;  %v12885_v48 = vld [vmem:[%s13422_s25 + $0x38] sm:$0xff]  }
  0xd2   : > { %10968 = vmatprep.subr.bf16.mxu0 %v12617_v21 }
  0xd5   : > { %10969 = vmatpush3.bf16.msra.mxu0 %v12617_v21  ;;  %v770_v21 = vshrl.u32 %v13500_v3, 16 }
  0xd6   : > { %11006 = vmatprep.subr.bf16.mxu0 %v12621_v28 }
  0xd7   : > { %v772_v51 = vor.u32 %v770_v21, %v768_v24  ;;  %v12647_v21 = vld [vmem:[#allocation6 + $0x90] sm:$0xff]   ;;  %v12650_v24 = vld [vmem:[#allocation6 + $0xa8] sm:$0xff]  }
  0xd8   : > { %10971 = vmatmul.mubr.bf16.vlgmr.msra.gmra.mrb[0].mxu0 %v689_v35  ;;  %v778_v35 = vshrl.u32 %v13506_v12, 16 }
  0xd9   : > { %11007 = vmatpush3.bf16.msra.mxu0 %v12621_v28  ;;  %10974 = vmatprep.mubr.bf16.mxu0 %v697_v37  ;;  %v13514_v28 = vld [vmem:[%s13422_s25 + $0x70] sm:$0xff]   ;;  %v748_v37 = vor.u32 %v746_v5, %v744_v9  ;;  %v777_v56 = vsel %vm669_vm0, %v772_v51, %v776_v33  ;;  %v810_v5 = vshrl.u32 %v13532_v54, 16 }
  0xda   : > { %11008 = vmatprep.subr.bf16.mxu0 %v12624_v38  ;;  %v786_v45 = vshrl.u32 %v13514_v28, 16  ;;  %v780_v59 = vor.u32 %v778_v35, %v776_v33  ;;  %v12882_v33 = vld [vmem:[%s13422_s25 + $0x20] sm:$0xff]  }
  0xdb   : > { %v753_v43 = vsel %vm669_vm0, %v748_v37, %v752_v14  ;;  %v1333_v35 = vrot.slane %v12882_v33, 1  ;;  %v12883_v37 = vld [vmem:[%s13422_s25 + $0x28] sm:$0xff]  }
  0xdd   : > { %11009 = vmatpush3.bf16.msra.mxu0 %v12624_v38  ;;  %v782_v38 = vshll.u32 %v13514_v28, 16 }
  0xde   : > { %11010 = vmatprep.subr.bf16.mxu0 %v12627_v49 }
  0xe0   : > { %10975 = vmatmul.mubr.bf16.gmra.mrb[4].mxu0 %v705_v53  ;;  %v13529_v53 = vld [vmem:[%s13422_s25 + $0x80] sm:$0xff]  }
  0xe1   : > { %10978 = vmatprep.mubr.bf16.mxu0 %v713_v62  ;;  %11011 = vmatpush3.bf16.msra.mxu0 %v12627_v49  ;;  %v784_v49 = vrot.slane %v782_v38, 1  ;;  %v802_v60 = vshrl.u32 %v13529_v53, 16  ;;  %v806_v62 = vshll.u32 %v13532_v54, 16  ;;  %v1335_v38 = vrot.slane %v12883_v37, 1 }
  0xe2   : > { %11012 = vmatprep.subr.bf16.mxu0 %v12630_v58 }
  0xe3   : > { %v788_v63 = vor.u32 %v786_v45, %v784_v49  ;;  %v785_v1 = vsel %vm669_vm0, %v780_v59, %v784_v49  ;;  %v808_v9 = vrot.slane %v806_v62, 1  ;;  %v12884_v45 = vld [vmem:[%s13422_s25 + $0x30] sm:$0xff]   ;;  %v1339_v49 = vrot.slane %v12885_v48, 1  ;;  %v12887_v59 = vld [vmem:[%s13422_s25 + $0x48] sm:$0xff]  }
  0xe4   : > { %v1337_v47 = vrot.slane %v12884_v45, 1  ;;  %v12660_v62 = vld [vmem:[#allocation6 + $0xf0] sm:$0xff]  }
  0xe5   : > { %11013 = vmatpush3.bf16.msra.mxu0 %v12630_v58  ;;  %v798_v58 = vshll.u32 %v13529_v53, 16  ;;  %v793_v2 = vsel %vm669_vm0, %v788_v63, %v792_v57  ;;  %v812_v15 = vor.u32 %v810_v5, %v808_v9 }
  0xe6   : > { %11014 = vmatprep.subr.bf16.mxu0 %v12633_v8  ;;  %v1338_v51 = vsel %vm1325_vm1, %v1335_v38, %v1337_v47 }
  0xe7   : > { %v800_v4 = vrot.slane %v798_v58, 1 }
  0xe8   : > { %10979 = vmatmul.mubr.bf16.gmra.mrb[8].mxu0 %v721_v13 }
  0xe9   : > { %10982 = vmatprep.mubr.bf16.mxu0 %v729_v20  ;;  %11015 = vmatpush3.bf16.msra.mxu0 %v12633_v8  ;;  %v796_v8 = vor.u32 %v794_v50, %v792_v57  ;;  %v804_v11 = vor.u32 %v802_v60, %v800_v4  ;;  %v12646_v20 = vld [vmem:[#allocation6 + $0x88] sm:$0xff]   ;;  %v12658_v50 = vld [vmem:[#allocation6 + $0xe0] sm:$0xff]   ;;  %v1343_v60 = vrot.slane %v12887_v59, 1 }
  0xea   : > { %11016 = vmatprep.subr.bf16.mxu0 %v12636_v18  ;;  %v12886_v57 = vld [vmem:[%s13422_s25 + $0x40] sm:$0xff]  }
  0xeb   : > { %v801_v13 = vsel %vm669_vm0, %v796_v8, %v800_v4  ;;  %v809_v14 = vsel %vm669_vm0, %v804_v11, %v808_v9  ;;  %v1341_v58 = vrot.slane %v12886_v57, 1  ;;  %v12888_v4 = vld [vmem:[%s13422_s25 + $0x50] sm:$0xff]   ;;  %v12889_v8 = vld [vmem:[%s13422_s25 + $0x58] sm:$0xff]  }
  0xec   : > { %v1345_v5 = vrot.slane %v12888_v4, 1  ;;  %v1347_v9 = vrot.slane %v12889_v8, 1 }
  0xed   : > { %11017 = vmatpush3.bf16.msra.mxu0 %v12636_v18  ;;  %v817_v18 = vsel %vm669_vm0, %v812_v15, %v816_v16  ;;  %v1342_v63 = vsel %vm1325_vm1, %v1339_v49, %v1341_v58  ;;  %v1351_v15 = vrot.slane %v13506_v12, 1 }
  0xee   : > { %11018 = vmatprep.subr.bf16.mxu0 %v12639_v25  ;;  %v1346_v11 = vsel %vm1325_vm1, %v1343_v60, %v1345_v5 }
  0xf0   : > { %10983 = vmatmul.mubr.bf16.gmra.mrb[12].mxu0 %v737_v30 }
  0xf1   : > { %10986 = vmatprep.mubr.bf16.mxu0 %v745_v32  ;;  %11019 = vmatpush3.bf16.msra.mxu0 %v12639_v25  ;;  %v12881_v25 = vld [vmem:[%s13422_s25 + $0x18] sm:$0xff]   ;;  %v12655_v32 = vld [vmem:[#allocation6 + $0xc8] sm:$0xff]  }
  0xf2   : > { %11020 = vmatprep.subr.bf16.mxu0 %v12643_v29  ;;  %v1331_v27 = vrot.slane %v12881_v25, 1  ;;  %v12668_v25 = vld [vmem:[#allocation6 + $0x108] sm:$0xff]  }
  0xf4   : > { %v1334_v40 = vsel %vm1325_vm1, %v1331_v27, %v1333_v35 }
  0xf5   : > { %11021 = vmatpush3.bf16.msra.mxu0 %v12643_v29 }
  0xf6   : > { %11058 = vmatprep.subr.bf16.mxu0 %v12645_v39 }
  0xf8   : > { %10987 = vmatmul.mubr.bf16.gmra.mrb[16].mxu0 %v753_v43  ;;  %v1336_v43 = vsel %vm1325_vm1, %v1333_v35, %v1335_v38  ;;  %v13638_v35 = vld [vmem:[%s13422_s25 + $0x38] sm:$0xff]   ;;  %v13642_v38 = vld [vmem:[%s13422_s25 + $0x40] sm:$0xff]  }
  0xf9   : > { %10990 = vmatprep.mubr.bf16.mxu0 %v761_v44  ;;  %v12657_v44 = vld [vmem:[#allocation6 + $0xd8] sm:$0xff]  }
 0x100   : > { %10991 = vmatmul.mubr.bf16.gmra.mrb[20].mxu0 %v769_v55  ;;  %v1340_v55 = vsel %vm1325_vm1, %v1337_v47, %v1339_v49  ;;  %v13648_v47 = vld [vmem:[%s13422_s25 + $0x48] sm:$0xff]   ;;  %v13652_v49 = vld [vmem:[%s13422_s25 + $0x50] sm:$0xff]  }
 0x101   : > { %10994 = vmatprep.mubr.bf16.mxu0 %v777_v56  ;;  %v12659_v56 = vld [vmem:[#allocation6 + $0xe8] sm:$0xff]  }
 0x108   : > { %10995 = vmatmul.mubr.bf16.gmra.mrb[24].mxu0 %v785_v1  ;;  %v1344_v1 = vsel %vm1325_vm1, %v1341_v58, %v1343_v60  ;;  %v13658_v58 = vld [vmem:[%s13422_s25 + $0x58] sm:$0xff]   ;;  %v13662_v60 = vld [vmem:[%s13422_s25 + $0x60] sm:$0xff]  }
 0x109   : > { %10998 = vmatprep.mubr.bf16.mxu0 %v793_v2  ;;  %v12661_v2 = vld [vmem:[#allocation6 + $0xf8] sm:$0xff]  }
 0x110   : > { %10999 = vmatmul.mubr.bf16.gmra.mrb[28].mxu0 %v801_v13  ;;  %v1348_v13 = vsel %vm1325_vm1, %v1345_v5, %v1347_v9  ;;  %v13670_v5 = vld [vmem:[%s13422_s25 + $0x68] sm:$0xff]  }
 0x111   : > { %11002 = vmatprep.mubr.bf16.mxu0 %v809_v14  ;;  %v1349_v14 = vrot.slane %v13500_v3, 1 }
 0x113   : > { %v1350_v16 = vsel %vm1325_vm1, %v1347_v9, %v1349_v14  ;;  %v13674_v9 = vld [vmem:[%s13422_s25 + $0x70] sm:$0xff]  }
 0x118   : > { %11003 = vmatmul.mubr.bf16.gmra.mrb[32].mxu0 %v817_v18  ;;  %v1352_v18 = vsel %vm1325_vm1, %v1349_v14, %v1351_v15  ;;  %v13681_v14 = vld [vmem:[%s13422_s25 + $0x78] sm:$0xff]  }
 0x119   : > { %11022 = vmatprep.mubr.bf16.mxu0 %v13438_v6  ;;  %v12651_v6 = vld [vmem:[#allocation6 + $0xb0] sm:$0xff]  }
 0x120   : > { %11023 = vmatmul.mubr.bf16.vlgmr.msra.gmra.mrb[0].mxu0 %v13441_v7  ;;  %v12652_v7 = vld [vmem:[#allocation6 + $0xb8] sm:$0xff]  }
 0x121   : > { %11059 = vmatpush3.bf16.msra.mxu0 %v12645_v39  ;;  %11026 = vmatprep.mubr.bf16.mxu0 %v13448_v17  ;;  %v12654_v17 = vld [vmem:[#allocation6 + $0xc0] sm:$0xff]   ;;  %v12656_v39 = vld [vmem:[#allocation6 + $0xd0] sm:$0xff]  }
 0x122   : > { %11060 = vmatprep.subr.bf16.mxu0 %v12646_v20 }
 0x125   : > { %11061 = vmatpush3.bf16.msra.mxu0 %v12646_v20  ;;  %v1353_v20 = vrot.slane %v13514_v28, 1 }
 0x126   : > { %11062 = vmatprep.subr.bf16.mxu0 %v12647_v21 }
 0x128   : > { %11027 = vmatmul.mubr.bf16.gmra.mrb[4].mxu0 %v13451_v19  ;;  %v1304_v19 = vld [vmem:[%s13422_s25] sm:$0xe] }
 0x129   : > { %11030 = vmatprep.mubr.bf16.mxu0 %v13458_v26  ;;  %11063 = vmatpush3.bf16.msra.mxu0 %v12647_v21  ;;  %v12878_v26 = vld [vmem:[%s13422_s25 + $0x4] sm:$0xf]  ;;  %v1355_v21 = vrot.slane %v13521_v42, 1 }
 0x12a   : > { %11064 = vmatprep.subr.bf16.mxu0 %v12648_v22 }
 0x12d   : > { %11065 = vmatpush3.bf16.msra.mxu0 %v12648_v22  ;;  %v1354_v22 = vsel %vm1325_vm1, %v1351_v15, %v1353_v20 }
 0x12e   : > { %11066 = vmatprep.subr.bf16.mxu0 %v12649_v23 }
 0x130   : > { %11031 = vmatmul.mubr.bf16.gmra.mrb[8].mxu0 %v13461_v31  ;;  %v9923_v31 = vcombine.low %v1304_v19, %v12878_v26 }
 0x131   : > { %11034 = vmatprep.mubr.bf16.mxu0 %v13466_v34  ;;  %11067 = vmatpush3.bf16.msra.mxu0 %v12649_v23  ;;  %v1356_v23 = vsel %vm1325_vm1, %v1353_v20, %v1355_v21 }
 0x132   : > { %11068 = vmatprep.subr.bf16.mxu0 %v12650_v24  ;;  %v1326_v34 = vrot.slane %v9923_v31, 1  ;;  %v13618_v31 = vld [vmem:[%s13422_s25 + $0x18] sm:$0xff]  }
 0x135   : > { %11069 = vmatpush3.bf16.msra.mxu0 %v12650_v24  ;;  %v1642_v24 = vld [vmem:[%s13422_s25 + $0x8] sm:$0xe] }
 0x136   : > { %11070 = vmatprep.subr.bf16.mxu0 %v12651_v6 }
 0x138   : > { %11035 = vmatmul.mubr.bf16.gmra.mrb[12].mxu0 %v13470_v36  ;;  %v12879_v36 = vld [vmem:[%s13422_s25 + $0x8] sm:$0xff]  }
 0x139   : > { %11038 = vmatprep.mubr.bf16.mxu0 %v13476_v41  ;;  %11071 = vmatpush3.bf16.msra.mxu0 %v12651_v6  ;;  %v1327_v41 = vrot.slane %v12879_v36, 1  ;;  %v13603_v6 = vld [vmem:[%s13422_s25 + $0xc] sm:$0xf]  ;;  %v13622_v36 = vld [vmem:[%s13422_s25 + $0x20] sm:$0xff]  }
 0x13a   : > { %11072 = vmatprep.subr.bf16.mxu0 %v12652_v7 }
 0x13d   : > { %11073 = vmatpush3.bf16.msra.mxu0 %v12652_v7 }
 0x13e   : > { %11110 = vmatprep.subr.bf16.mxu0 %v12654_v17 }
 0x140   : > { %11039 = vmatmul.mubr.bf16.gmra.mrb[16].mxu0 %v13481_v46  ;;  %v1328_v46 = vsel %vm1325_vm1, %v1326_v34, %v1327_v41 }
 0x141   : > { %11042 = vmatprep.mubr.bf16.mxu0 %v13486_v52  ;;  %v12880_v52 = vld [vmem:[%s13422_s25 + $0x10] sm:$0xff]  }
 0x148   : > { %11043 = vmatmul.mubr.bf16.gmra.mrb[20].mxu0 %v13494_v61  ;;  %v1329_v61 = vrot.slane %v12880_v52, 1  ;;  %v13628_v52 = vld [vmem:[%s13422_s25 + $0x28] sm:$0xff]  }
 0x149   : > { %11046 = vmatprep.mubr.bf16.mxu0 %v13500_v3  ;;  %v1357_v3 = vrot.slane %v13529_v53, 1 }
 0x14a   : > { %v1330_v29 = vsel %vm1325_vm1, %v1327_v41, %v1329_v61  ;;  %v1332_v30 = vsel %vm1325_vm1, %v1329_v61, %v1331_v27  ;;  %v1792_v41 = vrot.slane %v13618_v31, 1  ;;  %v13632_v27 = vld [vmem:[%s13422_s25 + $0x30] sm:$0xff]  }
 0x14b   : > { %v1358_v7 = vsel %vm1325_vm1, %v1355_v21, %v1357_v3 }
 0x150   : > { %11047 = vmatmul.mubr.bf16.gmra.mrb[24].mxu0 %v13506_v12  ;;  %v1359_v12 = vrot.slane %v13532_v54, 1 }
 0x151   : > { %11050 = vmatprep.mubr.bf16.mxu0 %v13514_v28 }
 0x152   : > { %v1360_v28 = vsel %vm1325_vm1, %v1357_v3, %v1359_v12 }
 0x158   : > { %11051 = vmatmul.mubr.bf16.gmra.mrb[28].mxu0 %v13521_v42  ;;  %v13608_v42 = vcombine.low %v1642_v24, %v13603_v6 }
 0x159   : > { %11054 = vmatprep.mubr.bf16.mxu0 %v13529_v53  ;;  %v1361_v53 = vrot.slane %v13540_v0, 1 }
 0x15b   : > { %v1362_v26 = vsel %vm1325_vm1, %v1359_v12, %v1361_v53 }
 0x160   : > { %11055 = vmatmul.mubr.bf16.gmra.mrb[32].mxu0 %v13532_v54  ;;  %v1789_v54 = vrot.slane %v13608_v42, 1 }
 0x161   : > { %11074 = vmatprep.mubr.bf16.mxu0 %v1328_v46  ;;  %v1794_v46 = vrot.slane %v13622_v36, 1 }
 0x163   : > { %v1795_v61 = vsel %vm1325_vm1, %v1792_v41, %v1794_v46 }
 0x168   : > { %11075 = vmatmul.mubr.bf16.vlgmr.msra.gmra.mrb[0].mxu0 %v1330_v29  ;;  %v1796_v29 = vrot.slane %v13628_v52, 1 }
 0x169   : > { %11111 = vmatpush3.bf16.msra.mxu0 %v12654_v17  ;;  %11078 = vmatprep.mubr.bf16.mxu0 %v1332_v30  ;;  %v13611_v17 = vld [vmem:[%s13422_s25 + $0x10] sm:$0xff]   ;;  %v1798_v30 = vrot.slane %v13632_v27, 1 }
 0x16a   : > { %11112 = vmatprep.subr.bf16.mxu0 %v12655_v32  ;;  %v1790_v19 = vrot.slane %v13611_v17, 1  ;;  %v1797_v33 = vsel %vm1325_vm1, %v1794_v46, %v1796_v29  ;;  %v2136_v53 = vshrl.u32 %v13611_v17, 16 }
 0x16b   : > { %v1799_v37 = vsel %vm1325_vm1, %v1796_v29, %v1798_v30  ;;  %v2145_v29 = vshrl.u32 %v13618_v31, 16 }
 0x16c   : > { %v1791_v34 = vsel %vm1325_vm1, %v1789_v54, %v1790_v19  ;;  %v1793_v0 = vsel %vm1325_vm1, %v1790_v19, %v1792_v41  ;;  %v2139_v54 = vshll.u32 %v13611_v17, 16 }
 0x16d   : > { %11113 = vmatpush3.bf16.msra.mxu0 %v12655_v32  ;;  %v12671_v32 = vld [vmem:[#allocation6 + $0x110] sm:$0xff]  }
 0x16e   : > { %11114 = vmatprep.subr.bf16.mxu0 %v12656_v39 }
 0x170   : > { %11079 = vmatmul.mubr.bf16.gmra.mrb[4].mxu0 %v1334_v40  ;;  %v1800_v40 = vrot.slane %v13638_v35, 1 }
 0x171   : > { %11082 = vmatprep.mubr.bf16.mxu0 %v1336_v43  ;;  %11115 = vmatpush3.bf16.msra.mxu0 %v12656_v39  ;;  %v12674_v39 = vld [vmem:[#allocation6 + $0x118] sm:$0xff]   ;;  %v1802_v43 = vrot.slane %v13642_v38, 1 }
 0x172   : > { %11116 = vmatprep.subr.bf16.mxu0 %v12657_v44  ;;  %v1801_v45 = vsel %vm1325_vm1, %v1798_v30, %v1800_v40 }
 0x173   : > { %v1803_v48 = vsel %vm1325_vm1, %v1800_v40, %v1802_v43  ;;  %v2147_v40 = vrot.slane %v2145_v29, 1 }
 0x175   : > { %11117 = vmatpush3.bf16.msra.mxu0 %v12657_v44  ;;  %v12677_v44 = vld [vmem:[#allocation6 + $0x120] sm:$0xff]  }
 0x176   : > { %11118 = vmatprep.subr.bf16.mxu0 %v12658_v50 }
 0x178   : > { %11083 = vmatmul.mubr.bf16.gmra.mrb[8].mxu0 %v1338_v51  ;;  %v1804_v51 = vrot.slane %v13648_v47, 1 }
 0x179   : > { %11086 = vmatprep.mubr.bf16.mxu0 %v1340_v55  ;;  %11119 = vmatpush3.bf16.msra.mxu0 %v12658_v50  ;;  %v12680_v50 = vld [vmem:[#allocation6 + $0x128] sm:$0xff]   ;;  %v1806_v55 = vrot.slane %v13652_v49, 1 }
 0x17a   : > { %11120 = vmatprep.subr.bf16.mxu0 %v12659_v56  ;;  %v1805_v57 = vsel %vm1325_vm1, %v1802_v43, %v1804_v51 }
 0x17b   : > { %v1807_v59 = vsel %vm1325_vm1, %v1804_v51, %v1806_v55  ;;  %v2163_v51 = vshrl.u32 %v13628_v52, 16 }
 0x17d   : > { %11121 = vmatpush3.bf16.msra.mxu0 %v12659_v56  ;;  %v12683_v56 = vld [vmem:[#allocation6 + $0x130] sm:$0xff]  }
 0x17e   : > { %11122 = vmatprep.subr.bf16.mxu0 %v12660_v62 }
 0x180   : > { %11087 = vmatmul.mubr.bf16.gmra.mrb[12].mxu0 %v1342_v63  ;;  %v1808_v63 = vrot.slane %v13658_v58, 1 }
 0x181   : > { %11090 = vmatprep.mubr.bf16.mxu0 %v1344_v1  ;;  %11123 = vmatpush3.bf16.msra.mxu0 %v12660_v62  ;;  %v12687_v62 = vld [vmem:[#allocation6 + $0x138] sm:$0xff]   ;;  %v1810_v1 = vrot.slane %v13662_v60, 1 }
 0x182   : > { %11124 = vmatprep.subr.bf16.mxu0 %v12661_v2  ;;  %v1809_v4 = vsel %vm1325_vm1, %v1806_v55, %v1808_v63  ;;  %v2166_v55 = vshll.u32 %v13628_v52, 16 }
 0x183   : > { %v1811_v8 = vsel %vm1325_vm1, %v1808_v63, %v1810_v1  ;;  %v2165_v63 = vrot.slane %v2163_v51, 1  ;;  %v12695_v51 = vld [vmem:[#allocation6 + $0x170] sm:$0xff]  }
 0x185   : > { %11125 = vmatpush3.bf16.msra.mxu0 %v12661_v2  ;;  %v13666_v2 = vld [vmem:[#allocation6 + $0x140] sm:$0xff]  }
 0x186   : > { %11162 = vmatprep.subr.bf16.mxu0 %v12665_v10 }
 0x188   : > { %11091 = vmatmul.mubr.bf16.gmra.mrb[16].mxu0 %v1346_v11  ;;  %v1814_v11 = vrot.slane %v13674_v9, 1 }
 0x189   : > { %11094 = vmatprep.mubr.bf16.mxu0 %v1348_v13 }
 0x190   : > { %11095 = vmatmul.mubr.bf16.gmra.mrb[20].mxu0 %v1350_v16  ;;  %v13685_v16 = vld [vmem:[%s13422_s25 + $0x80] sm:$0xff]  }
 0x191   : > { %11098 = vmatprep.mubr.bf16.mxu0 %v1352_v18  ;;  %v1816_v18 = vrot.slane %v13681_v14, 1  ;;  %v1818_v20 = vrot.slane %v13685_v16, 1 }
 0x193   : > { %v1817_v21 = vsel %vm1325_vm1, %v1814_v11, %v1816_v18  ;;  %v1819_v3 = vsel %vm1325_vm1, %v1816_v18, %v1818_v20  ;;  %v2184_v18 = vshll.u32 %v13638_v35, 16 }
 0x198   : > { %11099 = vmatmul.mubr.bf16.gmra.mrb[24].mxu0 %v1354_v22  ;;  %v13691_v22 = vld [vmem:[%s13422_s25 + $0x88] sm:$0xff]  }
 0x199   : > { %11102 = vmatprep.mubr.bf16.mxu0 %v1356_v23  ;;  %v13694_v23 = vld [vmem:[%s13422_s25 + $0x90] sm:$0xff]   ;;  %v1820_v12 = vrot.slane %v13691_v22, 1 }
 0x19a   : > { %v1822_v24 = vrot.slane %v13694_v23, 1 }
 0x19b   : > { %v1821_v19 = vsel %vm1325_vm1, %v1818_v20, %v1820_v12 }
 0x1a0   : > { %11103 = vmatmul.mubr.bf16.gmra.mrb[28].mxu0 %v1358_v7  ;;  %v2128_v7 = vshrl.u32 %v13608_v42, 16 }
 0x1a1   : > { %11106 = vmatprep.mubr.bf16.mxu0 %v1360_v28  ;;  %v2131_v28 = vshll.u32 %v13608_v42, 16  ;;  %v2148_v42 = vshll.u32 %v13618_v31, 16 }
 0x1a2   : > { %v2130_v41 = vrot.slane %v2128_v7, 1 }
 0x1a3   : > { %v2133_v46 = vrot.slane %v2131_v28, 2  ;;  %v2150_v43 = vrot.slane %v2148_v42, 2  ;;  %v2186_v28 = vrot.slane %v2184_v18, 2  ;;  %v13741_v18 = vld [vmem:[#allocation6 + $0x180] sm:$0xff]  }
 0x1a5   : > { %v2134_v30 = vor.u32 %v2133_v46, %v2130_v41  ;;  %v2202_v41 = vshll.u32 %v13648_v47, 16 }
 0x1a8   : > { %11107 = vmatmul.mubr.bf16.gmra.mrb[32].mxu0 %v1362_v26  ;;  %v1823_v26 = vsel %vm1325_vm1, %v1820_v12, %v1822_v24  ;;  %v2193_v12 = vshll.u32 %v13642_v38, 16 }
 0x1a9   : > { %11126 = vmatprep.mubr.bf16.mxu0 %v1791_v34  ;;  %v12688_v34 = vld [vmem:[%s13422_s25 + $0x98] ss:$0 sps:$4 sm:$0x11]  }
 0x1b0   : > { %11127 = vmatmul.mubr.bf16.vlgmr.msra.gmra.mrb[0].mxu0 %v1793_v0  ;;  %v2138_v0 = vrot.slane %v2136_v53, 1 }
 0x1b1   : > { %11163 = vmatpush3.bf16.msra.mxu0 %v12665_v10  ;;  %11130 = vmatprep.mubr.bf16.mxu0 %v1795_v61  ;;  %v1812_v10 = vrot.slane %v13670_v5, 1  ;;  %v2141_v61 = vrot.slane %v2139_v54, 2  ;;  %v2195_v54 = vrot.slane %v2193_v12, 2 }
 0x1b2   : > { %11164 = vmatprep.subr.bf16.mxu0 %v12668_v25 }
 0x1b3   : > { %v1813_v13 = vsel %vm1325_vm1, %v1810_v1, %v1812_v10  ;;  %v1815_v15 = vsel %vm1325_vm1, %v1812_v10, %v1814_v11  ;;  %v2168_v1 = vrot.slane %v2166_v55, 2 }
 0x1b5   : > { %11165 = vmatpush3.bf16.msra.mxu0 %v12668_v25  ;;  %v1824_v25 = vrot.slane %v12688_v34, 1  ;;  %v2199_v34 = vshrl.u32 %v13648_v47, 16 }
 0x1b6   : > { %11166 = vmatprep.subr.bf16.mxu0 %v12671_v32 }
 0x1b7   : > { %v2201_v42 = vrot.slane %v2199_v34, 1 }
 0x1b8   : > { %11131 = vmatmul.mubr.bf16.gmra.mrb[4].mxu0 %v1797_v33  ;;  %v2154_v33 = vshrl.u32 %v13622_v36, 16 }
 0x1b9   : > { %11134 = vmatprep.mubr.bf16.mxu0 %v1799_v37  ;;  %11167 = vmatpush3.bf16.msra.mxu0 %v12671_v32  ;;  %v2142_v32 = vor.u32 %v2141_v61, %v2138_v0  ;;  %v2157_v37 = vshll.u32 %v13622_v36, 16  ;;  %v2208_v0 = vshrl.u32 %v13652_v49, 16  ;;  %v2211_v61 = vshll.u32 %v13652_v49, 16 }
 0x1ba   : > { %11168 = vmatprep.subr.bf16.mxu0 %v12674_v39 }
 0x1bd   : > { %11169 = vmatpush3.bf16.msra.mxu0 %v12674_v39  ;;  %v1825_v39 = vsel %vm1325_vm1, %v1822_v24, %v1824_v25  ;;  %v12693_v25 = vld [vmem:[#allocation6 + $0x160] sm:$0xff]  }
 0x1be   : > { %11170 = vmatprep.subr.bf16.mxu0 %v12677_v44 }
 0x1c0   : > { %11135 = vmatmul.mubr.bf16.gmra.mrb[8].mxu0 %v1801_v45  ;;  %v2156_v45 = vrot.slane %v2154_v33, 1  ;;  %v2210_v33 = vrot.slane %v2208_v0, 1 }
 0x1c1   : > { %11138 = vmatprep.mubr.bf16.mxu0 %v1803_v48  ;;  %11171 = vmatpush3.bf16.msra.mxu0 %v12677_v44  ;;  %v2143_v44 = vsel %vm2126_vm2, %v2134_v30, %v2142_v32  ;;  %v2159_v48 = vrot.slane %v2157_v37, 2  ;;  %v2204_v30 = vrot.slane %v2202_v41, 2  ;;  %v2213_v37 = vrot.slane %v2211_v61, 2 }
 0x1c2   : > { %11172 = vmatprep.subr.bf16.mxu0 %v12680_v50 }
 0x1c5   : > { %11173 = vmatpush3.bf16.msra.mxu0 %v12680_v50  ;;  %v2151_v50 = vor.u32 %v2150_v43, %v2147_v40  ;;  %v2205_v40 = vor.u32 %v2204_v30, %v2201_v42  ;;  %v2217_v43 = vshrl.u32 %v13658_v58, 16  ;;  %v2271_v42 = vshrl.u32 %v13691_v22, 16 }
 0x1c6   : > { %11174 = vmatprep.subr.bf16.mxu0 %v12683_v56  ;;  %v2274_v30 = vshll.u32 %v13691_v22, 16 }
 0x1c8   : > { %11139 = vmatmul.mubr.bf16.gmra.mrb[12].mxu0 %v1805_v57  ;;  %v2172_v57 = vshrl.u32 %v13632_v27, 16 }
 0x1c9   : > { %11142 = vmatprep.mubr.bf16.mxu0 %v1807_v59  ;;  %11175 = vmatpush3.bf16.msra.mxu0 %v12683_v56  ;;  %v2160_v56 = vor.u32 %v2159_v48, %v2156_v45  ;;  %v2175_v59 = vshll.u32 %v13632_v27, 16  ;;  %v2214_v45 = vor.u32 %v2213_v37, %v2210_v33  ;;  %v2226_v48 = vshrl.u32 %v13662_v60, 16 }
 0x1ca   : > { %11176 = vmatprep.subr.bf16.mxu0 %v12687_v62  ;;  %v2174_v10 = vrot.slane %v2172_v57, 1  ;;  %v2280_v33 = vshrl.u32 %v13694_v23, 16  ;;  %v2283_v37 = vshll.u32 %v13694_v23, 16 }
 0x1cb   : > { %v2177_v11 = vrot.slane %v2175_v59, 2  ;;  %v2215_v59 = vsel %vm2126_vm2, %v2205_v40, %v2214_v45 }
 0x1cd   : > { %11177 = vmatpush3.bf16.msra.mxu0 %v12687_v62  ;;  %v2152_v62 = vsel %vm2126_vm2, %v2142_v32, %v2151_v50  ;;  %v2178_v20 = vor.u32 %v2177_v11, %v2174_v10  ;;  %v2238_v10 = vshll.u32 %v13670_v5, 16 }
 0x1ce   : > { %11214 = vmatprep.subr.bf16.mxu0 %v13666_v2 }
 0x1d0   : > { %11143 = vmatmul.mubr.bf16.gmra.mrb[16].mxu0 %v1809_v4  ;;  %v2161_v4 = vsel %vm2126_vm2, %v2151_v50, %v2160_v56  ;;  %v2229_v50 = vshll.u32 %v13662_v60, 16 }
 0x1d1   : > { %11146 = vmatprep.mubr.bf16.mxu0 %v1811_v8  ;;  %v12690_v8 = vld [vmem:[#allocation6 + $0x148] sm:$0xff]  }
 0x1d8   : > { %11147 = vmatmul.mubr.bf16.gmra.mrb[20].mxu0 %v1813_v13  ;;  %v2169_v13 = vor.u32 %v2168_v1, %v2165_v63  ;;  %v2231_v63 = vrot.slane %v2229_v50, 2  ;;  %v12696_v1 = vld [vmem:[#allocation6 + $0x178] sm:$0xff]   ;;  %v2285_v50 = vrot.slane %v2283_v37, 2 }
 0x1d9   : > { %11150 = vmatprep.mubr.bf16.mxu0 %v1815_v15  ;;  %v2181_v15 = vshrl.u32 %v13638_v35, 16 }
 0x1da   : > { %v2170_v24 = vsel %vm2126_vm2, %v2160_v56, %v2169_v13  ;;  %v2219_v56 = vrot.slane %v2217_v43, 1  ;;  %v2276_v43 = vrot.slane %v2274_v30, 2  ;;  %v2625_v30 = vrot.slane %v13681_v14, 2 }
 0x1db   : > { %v2183_v7 = vrot.slane %v2181_v15, 1  ;;  %v2247_v15 = vshll.u32 %v13674_v9, 16 }
 0x1e0   : > { %11151 = vmatmul.mubr.bf16.gmra.mrb[24].mxu0 %v1817_v21  ;;  %v12691_v21 = vld [vmem:[#allocation6 + $0x150] sm:$0xff]  }
 0x1e1   : > { %11154 = vmatprep.mubr.bf16.mxu0 %v1819_v3  ;;  %v2190_v3 = vshrl.u32 %v13642_v38, 16 }
 0x1e3   : > { %v2192_v53 = vrot.slane %v2190_v3, 1  ;;  %v2240_v3 = vrot.slane %v2238_v10, 2 }
 0x1e5   : > { %v2196_v46 = vor.u32 %v2195_v54, %v2192_v53  ;;  %v2256_v53 = vshll.u32 %v13681_v14, 16 }
 0x1e7   : > { %v2206_v55 = vsel %vm2126_vm2, %v2196_v46, %v2205_v40  ;;  %v2273_v40 = vrot.slane %v2271_v42, 1  ;;  %v2623_v42 = vrot.slane %v13674_v9, 2 }
 0x1e8   : > { %11155 = vmatmul.mubr.bf16.gmra.mrb[28].mxu0 %v1821_v19  ;;  %v12692_v19 = vld [vmem:[#allocation6 + $0x158] sm:$0xff]  }
 0x1e9   : > { %11158 = vmatprep.mubr.bf16.mxu0 %v1823_v26  ;;  %v2187_v26 = vor.u32 %v2186_v28, %v2183_v7  ;;  %v2249_v7 = vrot.slane %v2247_v15, 2 }
 0x1eb   : > { %v2188_v29 = vsel %vm2126_vm2, %v2178_v20, %v2187_v26  ;;  %v2197_v32 = vsel %vm2126_vm2, %v2187_v26, %v2196_v46  ;;  %v2265_v26 = vshll.u32 %v13685_v16, 16  ;;  %v2258_v46 = vrot.slane %v2256_v53, 2 }
 0x1ec   : > { %v2609_v53 = vrot.slane %v13638_v35, 2  ;;  %v12705_v35 = vld [vmem:[#allocation6 + $0x1b0] sm:$0xff]  }
 0x1f0   : > { %11159 = vmatmul.mubr.bf16.gmra.mrb[32].mxu0 %v1825_v39  ;;  %v12694_v39 = vld [vmem:[#allocation6 + $0x168] sm:$0xff]  }
 0x1f1   : > { %11178 = vmatprep.mubr.bf16.mxu0 %v2143_v44  ;;  %v2220_v44 = vshll.u32 %v13658_v58, 16 }
 0x1f3   : > { %v2222_v57 = vrot.slane %v2220_v44, 2  ;;  %v13758_v44 = vld [vmem:[%s13422_s25 + $0x98] ss:$0 sps:$4 sm:$0x33]  }
 0x1f8   : > { %11179 = vmatmul.mubr.bf16.vlgmr.msra.gmra.mrb[0].mxu0 %v2152_v62  ;;  %v2228_v62 = vrot.slane %v2226_v48, 1  ;;  %v2282_v48 = vrot.slane %v2280_v33, 1  ;;  %v2626_v33 = vsel %vm2597_vm3, %v2623_v42, %v2625_v30 }
 0x1f9   : > { %11215 = vmatpush3.bf16.msra.mxu0 %v13666_v2  ;;  %11182 = vmatprep.mubr.bf16.mxu0 %v2161_v4  ;;  %v2179_v2 = vsel %vm2126_vm2, %v2169_v13, %v2178_v20  ;;  %v2223_v4 = vor.u32 %v2222_v57, %v2219_v56  ;;  %v2244_v13 = vshrl.u32 %v13674_v9, 16  ;;  %v2292_v56 = vshll.u32 %v13758_v44, 16 }
 0x1fa   : > { %11216 = vmatprep.subr.bf16.mxu0 %v12690_v8  ;;  %v2232_v11 = vor.u32 %v2231_v63, %v2228_v62  ;;  %v2286_v57 = vor.u32 %v2285_v50, %v2282_v48  ;;  %v2631_v9 = vrot.slane %v13694_v23, 2 }
 0x1fb   : > { %v2224_v20 = vsel %vm2126_vm2, %v2214_v45, %v2223_v4 }
 0x1fc   : > { %v2233_v12 = vsel %vm2126_vm2, %v2223_v4, %v2232_v11 }
 0x1fd   : > { %11217 = vmatpush3.bf16.msra.mxu0 %v12690_v8  ;;  %v2235_v8 = vshrl.u32 %v13670_v5, 16 }
 0x1fe   : > { %11218 = vmatprep.subr.bf16.mxu0 %v12691_v21 }
 0x200   : > { %11183 = vmatmul.mubr.bf16.gmra.mrb[4].mxu0 %v2170_v24  ;;  %v2246_v24 = vrot.slane %v2244_v13, 1  ;;  %v2599_v13 = vrot.slane %v13611_v17, 2  ;;  %v2605_v17 = vrot.slane %v13628_v52, 2  ;;  %v12703_v52 = vld [vmem:[#allocation6 + $0x1a0] sm:$0xff]  }
 0x201   : > { %11186 = vmatprep.mubr.bf16.mxu0 %v2179_v2  ;;  %11219 = vmatpush3.bf16.msra.mxu0 %v12691_v21  ;;  %v2237_v21 = vrot.slane %v2235_v8, 1  ;;  %v2253_v2 = vshrl.u32 %v13681_v14, 16 }
 0x202   : > { %11220 = vmatprep.subr.bf16.mxu0 %v12692_v19  ;;  %v2250_v54 = vor.u32 %v2249_v7, %v2246_v24  ;;  %v12700_v24 = vld [vmem:[#allocation6 + $0x188] sm:$0xff]   ;;  %v2607_v7 = vrot.slane %v13632_v27, 2 }
 0x203   : > { %v2241_v28 = vor.u32 %v2240_v3, %v2237_v21  ;;  %v2255_v41 = vrot.slane %v2253_v2, 1  ;;  %v2601_v21 = vrot.slane %v13618_v31, 2  ;;  %v2603_v3 = vrot.slane %v13622_v36, 2  ;;  %v12702_v36 = vld [vmem:[#allocation6 + $0x198] sm:$0xff]  }
 0x204   : > { %v2608_v31 = vsel %vm2597_vm3, %v2605_v17, %v2607_v7 }
 0x205   : > { %11221 = vmatpush3.bf16.msra.mxu0 %v12692_v19  ;;  %v2262_v19 = vshrl.u32 %v13685_v16, 16  ;;  %v2242_v34 = vsel %vm2126_vm2, %v2232_v11, %v2241_v28  ;;  %v2251_v0 = vsel %vm2126_vm2, %v2241_v28, %v2250_v54  ;;  %v12701_v28 = vld [vmem:[#allocation6 + $0x190] sm:$0xff]   ;;  %v2606_v2 = vsel %vm2597_vm3, %v2603_v3, %v2605_v17 }
 0x206   : > { %11222 = vmatprep.subr.bf16.mxu0 %v12693_v25 }
 0x207   : > { %v2264_v61 = vrot.slane %v2262_v19, 1  ;;  %v12704_v19 = vld [vmem:[#allocation6 + $0x1a8] sm:$0xff]  }
 0x208   : > { %11187 = vmatmul.mubr.bf16.gmra.mrb[8].mxu0 %v2188_v29  ;;  %v2259_v29 = vor.u32 %v2258_v46, %v2255_v41  ;;  %v12706_v46 = vld [vmem:[#allocation6 + $0x1b8] sm:$0xff]  }
 0x209   : > { %11190 = vmatprep.mubr.bf16.mxu0 %v2197_v32  ;;  %11223 = vmatpush3.bf16.msra.mxu0 %v12693_v25  ;;  %v2267_v25 = vrot.slane %v2265_v26, 2  ;;  %v2613_v26 = vrot.slane %v13648_v47, 2  ;;  %v12710_v47 = vld [vmem:[#allocation6 + $0x1c0] sm:$0xff]  }
 0x20a   : > { %11224 = vmatprep.subr.bf16.mxu0 %v12694_v39 }
 0x20b   : > { %v2268_v32 = vor.u32 %v2267_v25, %v2264_v61  ;;  %v2619_v61 = vrot.slane %v13662_v60, 2 }
 0x20d   : > { %11225 = vmatpush3.bf16.msra.mxu0 %v12694_v39  ;;  %v2260_v39 = vsel %vm2126_vm2, %v2250_v54, %v2259_v29  ;;  %v2269_v45 = vsel %vm2126_vm2, %v2259_v29, %v2268_v32  ;;  %v2610_v54 = vsel %vm2597_vm3, %v2607_v7, %v2609_v53  ;;  %v2621_v29 = vrot.slane %v13670_v5, 2  ;;  %v13848_v7 = vld [vmem:[%s13422_s25 + $0x50] sm:$0xff]  }
 0x20e   : > { %11226 = vmatprep.subr.bf16.mxu0 %v12695_v51  ;;  %v2629_v5 = vrot.slane %v13691_v22, 2  ;;  %v2633_v22 = vrot.slane %v13758_v44, 2 }
 0x20f   : > { %v2624_v60 = vsel %vm2597_vm3, %v2621_v29, %v2623_v42 }
 0x210   : > { %11191 = vmatmul.mubr.bf16.gmra.mrb[12].mxu0 %v2206_v55  ;;  %v2289_v55 = vshrl.u32 %v13758_v44, 16  ;;  %v2632_v14 = vsel %vm2597_vm3, %v2629_v5, %v2631_v9  ;;  %v2634_v50 = vsel %vm2597_vm3, %v2631_v9, %v2633_v22  ;;  %v13909_v22 = vld [vmem:[%s13422_s25 + $0x90] sm:$0xff]  }
 0x211   : > { %11194 = vmatprep.mubr.bf16.mxu0 %v2215_v59  ;;  %11227 = vmatpush3.bf16.msra.mxu0 %v12695_v51  ;;  %v2277_v51 = vor.u32 %v2276_v43, %v2273_v40  ;;  %v2576_v59 = vld [vmem:[%s13422_s25 + $0x8] sm:$0xc]  ;;  %v13803_v40 = vld [vmem:[%s13422_s25 + $0x14] sm:$0xf] }
 0x212   : > { %11228 = vmatprep.subr.bf16.mxu0 %v12696_v1  ;;  %v2291_v63 = vrot.slane %v2289_v55, 1  ;;  %v9968_v8 = vcombine.low %v2576_v59, %v13603_v6  ;;  %v2604_v6 = vsel %vm2597_vm3, %v2601_v21, %v2603_v3  ;;  %v12719_v3 = vld [vmem:[#allocation6 + $0x1d8] sm:$0xff]  }
 0x213   : > { %v2278_v62 = vsel %vm2126_vm2, %v2268_v32, %v2277_v51  ;;  %v2287_v4 = vsel %vm2126_vm2, %v2277_v51, %v2286_v57  ;;  %v2627_v32 = vrot.slane %v13685_v16, 2  ;;  %v13818_v51 = vld [vmem:[%s13422_s25 + $0x20] sm:$0xff]  }
 0x214   : > { %v2598_v11 = vrot.slane %v9968_v8, 2 }
 0x215   : > { %11229 = vmatpush3.bf16.msra.mxu0 %v12696_v1  ;;  %v2294_v1 = vrot.slane %v2292_v56, 2  ;;  %v2628_v37 = vsel %vm2597_vm3, %v2625_v30, %v2627_v32  ;;  %v2630_v43 = vsel %vm2597_vm3, %v2627_v32, %v2629_v5  ;;  %v13822_v56 = vld [vmem:[%s13422_s25 + $0x28] sm:$0xff]   ;;  %v433_v5 = vld [vmem:[%s15470_s5 + $0x20] sm:$0xff] }
 0x216   : > { %11266 = vmatprep.subr.bf16.mxu0 %v13741_v18  ;;  %v3066_v59 = vrot.slane %v13822_v56, 2  ;;  %v13891_v32 = vld [vmem:[%s13422_s25 + $0x88] sm:$0xff]  }
 0x217   : > { %v2295_v10 = vor.u32 %v2294_v1, %v2291_v63  ;;  %v12713_v1 = vld [vmem:[#allocation6 + $0x1c8] sm:$0xff]  }
 0x218   : > { %11195 = vmatmul.mubr.bf16.gmra.mrb[16].mxu0 %v2224_v20  ;;  %v2600_v20 = vsel %vm2597_vm3, %v2598_v11, %v2599_v13  ;;  %v12716_v11 = vld [vmem:[#allocation6 + $0x1d0] sm:$0xff]  }
 0x219   : > { %11198 = vmatprep.mubr.bf16.mxu0 %v2233_v12  ;;  %v2296_v15 = vsel %vm2126_vm2, %v2286_v57, %v2295_v10  ;;  %v2602_v12 = vsel %vm2597_vm3, %v2599_v13, %v2601_v21  ;;  %v3064_v57 = vrot.slane %v13818_v51, 2  ;;  %v13842_v21 = vld [vmem:[%s13422_s25 + $0x48] sm:$0xff]  }
 0x21b   : > { %v3067_v63 = vsel %vm2597_vm3, %v3064_v57, %v3066_v59 }
 0x220   : > { %11199 = vmatmul.mubr.bf16.gmra.mrb[20].mxu0 %v2242_v34  ;;  %v2615_v34 = vrot.slane %v13652_v49, 2 }
 0x221   : > { %11202 = vmatprep.mubr.bf16.mxu0 %v2251_v0  ;;  %v2617_v0 = vrot.slane %v13658_v58, 2  ;;  %v2622_v58 = vsel %vm2597_vm3, %v2619_v61, %v2621_v29  ;;  %v13136_v29 = vmov 0  }
 0x222   : > { %v2616_v41 = vsel %vm2597_vm3, %v2613_v26, %v2615_v34  ;;  %12608 = vset.pattern.permute.xlu0 %v13136_v29  ;;  %465 = vst [vmem:[#allocation2] sm:$0xf] %v13136_v29  ;;  %466 = vst [vmem:[#allocation2 + $0x4] sm:$0xf] %v13136_v29  ;;  %12609 = vset.pattern.permute.xlu1 %v13136_v29 }
 0x223   : > { %v2618_v49 = vsel %vm2597_vm3, %v2615_v34, %v2617_v0  ;;  %v2620_v25 = vsel %vm2597_vm3, %v2617_v0, %v2619_v61  ;;  %v13874_v61 = vld [vmem:[%s13422_s25 + $0x78] sm:$0xff]   ;;  %467 = vst [vmem:[#allocation2 + $0x8] sm:$0xf] %v13136_v29  ;;  %468 = vst [vmem:[#allocation2 + $0xc] sm:$0xf] %v13136_v29 }
 0x224   : > { %469 = vst [vmem:[#allocation2 + $0x10] sm:$0xf] %v13136_v29  ;;  %470 = vst [vmem:[#allocation2 + $0x14] sm:$0xf] %v13136_v29  ;;  %v3086_v42 = vrot.slane %v13874_v61, 2 }
 0x225   : > { %471 = vst [vmem:[#allocation2 + $0x18] sm:$0xf] %v13136_v29  ;;  %472 = vst [vmem:[#allocation2 + $0x1c] sm:$0xf] %v13136_v29 }
 0x226   : > { %473 = vst [vmem:[#allocation2 + $0x20] sm:$0xf] %v13136_v29  ;;  %474 = vst [vmem:[#allocation2 + $0x24] sm:$0xf] %v13136_v29 }
 0x227   : > { %475 = vst [vmem:[#allocation2 + $0x28] sm:$0xf] %v13136_v29  ;;  %476 = vst [vmem:[#allocation2 + $0x2c] sm:$0xf] %v13136_v29 }
 0x228   : > { %11203 = vmatmul.mubr.bf16.gmra.mrb[24].mxu0 %v2260_v39  ;;  %v2914_v39 = vld [vmem:[%s13422_s25 + $0x10] sm:$0xc]  ;;  %477 = vst [vmem:[#allocation2 + $0x30] sm:$0xf] %v13136_v29  ;;  %478 = vst [vmem:[#allocation2 + $0x34] sm:$0xf] %v13136_v29 }
 0x229   : > { %11206 = vmatprep.mubr.bf16.mxu0 %v2269_v45  ;;  %v13808_v16 = vcombine.low %v2914_v39, %v13803_v40  ;;  %v13811_v45 = vld [vmem:[%s13422_s25 + $0x18] sm:$0xff]   ;;  %479 = vst [vmem:[#allocation2 + $0x38] sm:$0xf] %v13136_v29  ;;  %480 = vst [vmem:[#allocation2 + $0x3c] sm:$0xf] %v13136_v29  ;;  %v3090_v39 = vrot.slane %v13891_v32, 2 }
 0x22a   : > { %v3062_v48 = vrot.slane %v13811_v45, 2  ;;  %481 = vst [vmem:[#allocation2 + $0x40] sm:$0xf] %v13136_v29  ;;  %482 = vst [vmem:[#allocation2 + $0x44] sm:$0xf] %v13136_v29 }
 0x22b   : > { %v3061_v23 = vrot.slane %v13808_v16, 2  ;;  %483 = vst [vmem:[#allocation2 + $0x48] sm:$0xf] %v13136_v29  ;;  %484 = vst [vmem:[#allocation2 + $0x4c] sm:$0xf] %v13136_v29 }
 0x22c   : > { %v3065_v44 = vsel %vm2597_vm3, %v3062_v48, %v3064_v57  ;;  %485 = vst [vmem:[#allocation2 + $0x50] sm:$0xf] %v13136_v29  ;;  %486 = vst [vmem:[#allocation2 + $0x54] sm:$0xf] %v13136_v29  ;;  %v437_v57 = vld [vmem:[%s15470_s5 + $0x40] sm:$0xff] }
 0x22d   : > { %v3063_v55 = vsel %vm2597_vm3, %v3061_v23, %v3062_v48  ;;  %487 = vst [vmem:[#allocation2 + $0x58] sm:$0xf] %v13136_v29  ;;  %488 = vst [vmem:[#allocation2 + $0x5c] sm:$0xf] %v13136_v29  ;;  %v13912_v23 = vld [vmem:[%s13422_s25 + $0x98] sm:$0xff]  }
 0x22e   : > { %489 = vst [vmem:[#allocation2 + $0x60] sm:$0xf] %v13136_v29  ;;  %490 = vst [vmem:[#allocation2 + $0x64] sm:$0xf] %v13136_v29 }
 0x22f   : > { %491 = vst [vmem:[#allocation2 + $0x68] sm:$0xf] %v13136_v29  ;;  %492 = vst [vmem:[#allocation2 + $0x6c] sm:$0xf] %v13136_v29 }
 0x230   : > { %11207 = vmatmul.mubr.bf16.gmra.mrb[28].mxu0 %v2278_v62  ;;  %v13828_v62 = vld [vmem:[%s13422_s25 + $0x30] sm:$0xff]   ;;  %493 = vst [vmem:[#allocation2 + $0x70] sm:$0xf] %v13136_v29  ;;  %494 = vst [vmem:[#allocation2 + $0x74] sm:$0xf] %v13136_v29 }
 0x231   : > { %11210 = vmatprep.mubr.bf16.mxu0 %v2287_v4  ;;  %v13832_v4 = vld [vmem:[%s13422_s25 + $0x38] sm:$0xff]   ;;  %v3068_v8 = vrot.slane %v13828_v62, 2  ;;  %495 = vst [vmem:[#allocation2 + $0x78] sm:$0xf] %v13136_v29  ;;  %496 = vst [vmem:[#allocation2 + $0x7c] sm:$0xf] %v13136_v29 }
 0x232   : > { %v3070_v10 = vrot.slane %v13832_v4, 2  ;;  %497 = vst [vmem:[#allocation2 + $0x80] sm:$0xf] %v13136_v29  ;;  %498 = vst [vmem:[#allocation2 + $0x84] sm:$0xf] %v13136_v29 }
 0x233   : > { %v3069_v13 = vsel %vm2597_vm3, %v3066_v59, %v3068_v8  ;;  %499 = vst [vmem:[#allocation2 + $0x88] sm:$0xf] %v13136_v29  ;;  %500 = vst [vmem:[#allocation2 + $0x8c] sm:$0xf] %v13136_v29  ;;  %v3092_v59 = vrot.slane %v13909_v22, 2 }
 0x234   : > { %501 = vst [vmem:[#allocation2 + $0x90] sm:$0xf] %v13136_v29  ;;  %502 = vst [vmem:[#allocation2 + $0x94] sm:$0xf] %v13136_v29 }
 0x235   : > { %503 = vst [vmem:[#allocation2 + $0x98] sm:$0xf] %v13136_v29  ;;  %504 = vst [vmem:[#allocation2 + $0x9c] sm:$0xf] %v13136_v29 }
 0x236   : > { %505 = vst [vmem:[#allocation2 + $0xa0] sm:$0xf] %v13136_v29 }
 0x238   : > { %11211 = vmatmul.mubr.bf16.gmra.mrb[32].mxu0 %v2296_v15  ;;  %v13838_v15 = vld [vmem:[%s13422_s25 + $0x40] sm:$0xff]  }
 0x239   : > { %11230 = vmatprep.mubr.bf16.mxu0 %v2600_v20  ;;  %v3071_v20 = vsel %vm2597_vm3, %v3068_v8, %v3070_v10  ;;  %v3408_v8 = vshrl.u32 %v13811_v45, 16 }
 0x240   : > { %11231 = vmatmul.mubr.bf16.vlgmr.msra.gmra.mrb[0].mxu0 %v2602_v12  ;;  %v3072_v12 = vrot.slane %v13838_v15, 2 }
 0x241   : > { %11267 = vmatpush3.bf16.msra.mxu0 %v13741_v18  ;;  %11234 = vmatprep.mubr.bf16.mxu0 %v2604_v6  ;;  %v2611_v18 = vrot.slane %v13642_v38, 2  ;;  %v3074_v6 = vrot.slane %v13842_v21, 2 }
 0x242   : > { %11268 = vmatprep.subr.bf16.mxu0 %v12700_v24  ;;  %v3073_v17 = vsel %vm2597_vm3, %v3070_v10, %v3072_v12  ;;  %v3411_v10 = vshll.u32 %v13811_v45, 16 }
 0x243   : > { %v2612_v27 = vsel %vm2597_vm3, %v2609_v53, %v2611_v18  ;;  %v2614_v38 = vsel %vm2597_vm3, %v2611_v18, %v2613_v26  ;;  %v12728_v18 = vld [vmem:[#allocation6 + $0x1f0] sm:$0xff]   ;;  %v12732_v26 = vld [vmem:[#allocation6 + $0x1f8] sm:$0xff]  }
 0x245   : > { %11269 = vmatpush3.bf16.msra.mxu0 %v12700_v24  ;;  %v12722_v24 = vld [vmem:[#allocation6 + $0x1e0] sm:$0xff]  }
 0x246   : > { %11270 = vmatprep.subr.bf16.mxu0 %v12701_v28 }
 0x248   : > { %11235 = vmatmul.mubr.bf16.gmra.mrb[4].mxu0 %v2606_v2  ;;  %v13852_v2 = vld [vmem:[%s13422_s25 + $0x58] sm:$0xff]  }
 0x249   : > { %11238 = vmatprep.mubr.bf16.mxu0 %v2608_v31  ;;  %11271 = vmatpush3.bf16.msra.mxu0 %v12701_v28  ;;  %v3075_v28 = vsel %vm2597_vm3, %v3072_v12, %v3074_v6  ;;  %v12725_v31 = vld [vmem:[#allocation6 + $0x1e8] sm:$0xff]   ;;  %v3078_v53 = vrot.slane %v13852_v2, 2 }
 0x24a   : > { %11272 = vmatprep.subr.bf16.mxu0 %v12702_v36 }
 0x24d   : > { %11273 = vmatpush3.bf16.msra.mxu0 %v12702_v36  ;;  %v3076_v36 = vrot.slane %v13848_v7, 2 }
 0x24e   : > { %11274 = vmatprep.subr.bf16.mxu0 %v12703_v52 }
 0x250   : > { %11239 = vmatmul.mubr.bf16.gmra.mrb[8].mxu0 %v2610_v54  ;;  %v13858_v54 = vld [vmem:[%s13422_s25 + $0x60] sm:$0xff]  }
 0x251   : > { %11242 = vmatprep.mubr.bf16.mxu0 %v2612_v27  ;;  %11275 = vmatpush3.bf16.msra.mxu0 %v12703_v52  ;;  %v3077_v52 = vsel %vm2597_vm3, %v3074_v6, %v3076_v36  ;;  %v3079_v27 = vsel %vm2597_vm3, %v3076_v36, %v3078_v53  ;;  %v3080_v34 = vrot.slane %v13858_v54, 2 }
 0x252   : > { %11276 = vmatprep.subr.bf16.mxu0 %v12704_v19 }
 0x255   : > { %11277 = vmatpush3.bf16.msra.mxu0 %v12704_v19  ;;  %v13862_v19 = vld [vmem:[%s13422_s25 + $0x68] sm:$0xff]  }
 0x256   : > { %11278 = vmatprep.subr.bf16.mxu0 %v12705_v35 }
 0x258   : > { %11243 = vmatmul.mubr.bf16.gmra.mrb[12].mxu0 %v2614_v38  ;;  %v13866_v38 = vld [vmem:[#allocation6 + $0x200] sm:$0xff]  }
 0x259   : > { %11246 = vmatprep.mubr.bf16.mxu0 %v2616_v41  ;;  %11279 = vmatpush3.bf16.msra.mxu0 %v12705_v35  ;;  %v3082_v35 = vrot.slane %v13862_v19, 2  ;;  %v3081_v41 = vsel %vm2597_vm3, %v3078_v53, %v3080_v34  ;;  %v3417_v53 = vshrl.u32 %v13818_v51, 16 }
 0x25a   : > { %11280 = vmatprep.subr.bf16.mxu0 %v12706_v46 }
 0x25b   : > { %v3083_v0 = vsel %vm2597_vm3, %v3080_v34, %v3082_v35  ;;  %v3429_v34 = vshll.u32 %v13822_v56, 16 }
 0x25d   : > { %11281 = vmatpush3.bf16.msra.mxu0 %v12706_v46  ;;  %v13870_v46 = vld [vmem:[%s13422_s25 + $0x70] sm:$0xff]   ;;  %v3431_v29 = vrot.slane %v3429_v34, 3 }
 0x25e   : > { %11318 = vmatprep.subr.bf16.mxu0 %v12710_v47 }
 0x260   : > { %11247 = vmatmul.mubr.bf16.gmra.mrb[16].mxu0 %v2618_v49  ;;  %v431_v49 = vld [vmem:[%s15470_s5 + $0x10] sm:$0xff] }
 0x261   : > { %11250 = vmatprep.mubr.bf16.mxu0 %v2620_v25  ;;  %v3084_v25 = vrot.slane %v13870_v46, 2  ;;  %4277 = vperm.xlu1 %12609, %v431_v49  }
 0x263   : > { %v3087_v30 = vsel %vm2597_vm3, %v3084_v25, %v3086_v42 }
 0x268   : > { %11251 = vmatmul.mubr.bf16.gmra.mrb[20].mxu0 %v2622_v58  ;;  %v3085_v58 = vsel %vm2597_vm3, %v3082_v35, %v3084_v25  ;;  %v442_v35 = vld [vmem:[%s15470_s5 + $0x68] sm:$0xff] }
 0x269   : > { %11254 = vmatprep.mubr.bf16.mxu0 %v2624_v60  ;;  %v13887_v60 = vld [vmem:[%s13422_s25 + $0x80] sm:$0xff]  }
 0x26a   : > { %v3088_v9 = vrot.slane %v13887_v60, 2 }
 0x26c   : > { %v3091_v48 = vsel %vm2597_vm3, %v3088_v9, %v3090_v39 }
 0x270   : > { %11255 = vmatmul.mubr.bf16.gmra.mrb[24].mxu0 %v2626_v33  ;;  %v430_v33 = vld [vmem:[%s15470_s5 + $0x8] sm:$0xff] }
 0x271   : > { %11258 = vmatprep.mubr.bf16.mxu0 %v2628_v37  ;;  %v432_v37 = vld [vmem:[%s15470_s5 + $0x18] sm:$0xff] }
 0x272   : > { %4282 = vperm.xlu1 %12609, %v432_v37   ;;  %v3435_v37 = vshrl.u32 %v13828_v62, 16 }
 0x278   : > { %11259 = vmatmul.mubr.bf16.gmra.mrb[28].mxu0 %v2630_v43  ;;  %v434_v43 = vld [vmem:[%s15470_s5 + $0x28] sm:$0xff] }
 0x279   : > { %11262 = vmatprep.mubr.bf16.mxu0 %v2632_v14  ;;  %v3089_v14 = vsel %vm2597_vm3, %v3086_v42, %v3088_v9  ;;  %4292 = vperm.xlu1 %12609, %v434_v43   ;;  %v443_v42 = vld [vmem:[%s15470_s5 + $0x70] sm:$0xff]  ;;  %v3447_v43 = vshll.u32 %v13832_v4, 16 }
 0x280   : > { %11263 = vmatmul.mubr.bf16.gmra.mrb[32].mxu0 %v2634_v50  ;;  %v435_v50 = vld [vmem:[%s15470_s5 + $0x30] sm:$0xff] }
 0x281   : > { %11282 = vmatprep.mubr.bf16.mxu0 %v3063_v55  ;;  %v436_v55 = vld [vmem:[%s15470_s5 + $0x38] sm:$0xff] }
 0x282   : > { %4302 = vperm.xlu1 %12609, %v436_v55  }
 0x288   : > { %11283 = vmatmul.mubr.bf16.vlgmr.msra.gmra.mrb[0].mxu0 %v3065_v44  ;;  %v3094_v44 = vrot.slane %v13912_v23, 2 }
 0x289   : > { %11319 = vmatpush3.bf16.msra.mxu0 %v12710_v47  ;;  %11286 = vmatprep.mubr.bf16.mxu0 %v3067_v63  ;;  %v429_v47 = vld [vmem:[%s15470_s5] sm:$0xff]  ;;  %v3400_v63 = vshrl.u32 %v13808_v16, 16 }
 0x28a   : > { %11320 = vmatprep.subr.bf16.mxu0 %v12713_v1  ;;  %4267 = vperm.xlu0 %12608, %v429_v47  }
 0x28b   : > { %v3402_v12 = vrot.slane %v3400_v63, 2  ;;  %v3449_v63 = vrot.slane %v3447_v43, 3  ;;  %v456_v43 = vld [vmem:[%s15470_s5 + $0xd8] sm:$0xff] }
 0x28d   : > { %11321 = vmatpush3.bf16.msra.mxu0 %v12713_v1  ;;  %v3403_v1 = vshll.u32 %v13808_v16, 16  ;;  %v439_v16 = vld [vmem:[%s15470_s5 + $0x50] sm:$0xff] }
 0x28e   : > { %11322 = vmatprep.subr.bf16.mxu0 %v12716_v11  ;;  %4272 = vperm.xlu0 %12608, %v430_v33  }
 0x28f   : > { %v3405_v6 = vrot.slane %v3403_v1, 3  ;;  %v447_v1 = vld [vmem:[%s15470_s5 + $0x90] sm:$0xff] }
 0x290   : > { %11287 = vmatmul.mubr.bf16.gmra.mrb[4].mxu0 %v3069_v13  ;;  %v3093_v13 = vsel %vm2597_vm3, %v3090_v39, %v3092_v59  ;;  %v3444_v39 = vshrl.u32 %v13832_v4, 16 }
 0x291   : > { %11290 = vmatprep.mubr.bf16.mxu0 %v3071_v20  ;;  %11323 = vmatpush3.bf16.msra.mxu0 %v12716_v11  ;;  %v438_v11 = vld [vmem:[%s15470_s5 + $0x48] sm:$0xff]  ;;  %v3095_v20 = vsel %vm2597_vm3, %v3092_v59, %v3094_v44  ;;  %v12735_v59 = vld [vmem:[#allocation6 + $0x208] sm:$0xff]  }
 0x292   : > { %11324 = vmatprep.subr.bf16.mxu0 %v12719_v3  ;;  %4287 = vperm.xlu0 %12608, %v433_v5   ;;  %v3438_v5 = vshll.u32 %v13828_v62, 16 }
 0x293   : > { %4312 = vperm.xlu1 %12609, %v438_v11  }
 0x294   : > { %v3440_v55 = vrot.slane %v3438_v5, 3 }
 0x295   : > { %11325 = vmatpush3.bf16.msra.mxu0 %v12719_v3  ;;  %v12733_v3 = vld [vmem:[%s13422_s25 + $0xa0] ss:$0 sps:$4 sm:$0x33]  }
 0x296   : > { %11326 = vmatprep.subr.bf16.mxu0 %v12722_v24  ;;  %4297 = vperm.xlu0 %12608, %v435_v50   ;;  %v3096_v36 = vrot.slane %v12733_v3, 2  ;;  %v3437_v50 = vrot.slane %v3435_v37, 2 }
 0x298   : > { %11291 = vmatmul.mubr.bf16.gmra.mrb[8].mxu0 %v3073_v17  ;;  %v3413_v17 = vrot.slane %v3411_v10, 3  ;;  %v449_v10 = vld [vmem:[%s15470_s5 + $0xa0] sm:$0xff]  ;;  %v3441_v11 = vor.u32 %v3440_v55, %v3437_v50  ;;  %v3489_v50 = vshrl.u32 %v13858_v54, 16  ;;  %v3492_v55 = vshll.u32 %v13858_v54, 16 }
 0x299   : > { %11294 = vmatprep.mubr.bf16.mxu0 %v3075_v28  ;;  %11327 = vmatpush3.bf16.msra.mxu0 %v12722_v24  ;;  %v3410_v24 = vrot.slane %v3408_v8, 2  ;;  %v440_v28 = vld [vmem:[%s15470_s5 + $0x58] sm:$0xff] }
 0x29a   : > { %11328 = vmatprep.subr.bf16.mxu0 %v12725_v31  ;;  %4307 = vperm.xlu0 %12608, %v437_v57   ;;  %v448_v8 = vld [vmem:[%s15470_s5 + $0x98] sm:$0xff] }
 0x29b   : > { %4322 = vperm.xlu1 %12609, %v440_v28  }
 0x29d   : > { %11329 = vmatpush3.bf16.msra.mxu0 %v12725_v31  ;;  %v441_v31 = vld [vmem:[%s15470_s5 + $0x60] sm:$0xff] }
 0x29e   : > { %11330 = vmatprep.subr.bf16.mxu0 %v12728_v18  ;;  %4317 = vperm.xlu0 %12608, %v439_v16  }
 0x29f   : > { %4332 = vperm.xlu1 %12609, %v442_v35   ;;  %v3471_v35 = vshrl.u32 %v13848_v7, 16 }
 0x2a0   : > { %11295 = vmatmul.mubr.bf16.gmra.mrb[12].mxu0 %v3077_v52  ;;  %v3406_v52 = vor.u32 %v3405_v6, %v3402_v12  ;;  %v12736_v12 = vld [vmem:[#allocation6 + $0x210] sm:$0xff]   ;;  %v3462_v6 = vshrl.u32 %v13842_v21, 16 }
 0x2a1   : > { %11298 = vmatprep.mubr.bf16.mxu0 %v3079_v27  ;;  %11331 = vmatpush3.bf16.msra.mxu0 %v12728_v18  ;;  %v3420_v18 = vshll.u32 %v13818_v51, 16  ;;  %v3414_v27 = vor.u32 %v3413_v17, %v3410_v24  ;;  %v3465_v24 = vshll.u32 %v13842_v21, 16  ;;  %v450_v17 = vld [vmem:[%s15470_s5 + $0xa8] sm:$0xff] }
 0x2a2   : > { %11332 = vmatprep.subr.bf16.mxu0 %v12732_v26  ;;  %4327 = vperm.xlu0 %12608, %v441_v31  }
 0x2a3   : > { %v3422_v47 = vrot.slane %v3420_v18, 3  ;;  %v3415_v49 = vsel %vm3398_vm4, %v3406_v52, %v3414_v27  ;;  %v12737_v18 = vld [vmem:[#allocation6 + $0x218] sm:$0xff]   ;;  %v451_v52 = vld [vmem:[%s15470_s5 + $0xb0] sm:$0xff] }
 0x2a5   : > { %11333 = vmatpush3.bf16.msra.mxu0 %v12732_v26  ;;  %v3426_v26 = vshrl.u32 %v13822_v56, 16 }
 0x2a6   : > { %11370 = vmatprep.subr.bf16.mxu0 %v13866_v38  ;;  %4337 = vperm.xlu0 %12608, %v443_v42   ;;  %v455_v42 = vld [vmem:[%s15470_s5 + $0xd0] sm:$0xff] }
 0x2a7   : > { %v3428_v25 = vrot.slane %v3426_v26, 2  ;;  %v453_v26 = vld [vmem:[%s15470_s5 + $0xc0] sm:$0xff] }
 0x2a8   : > { %11299 = vmatmul.mubr.bf16.gmra.mrb[16].mxu0 %v3081_v41  ;;  %v3097_v41 = vsel %vm2597_vm3, %v3094_v44, %v3096_v36  ;;  %v3446_v44 = vrot.slane %v3444_v39, 2  ;;  %v3464_v36 = vrot.slane %v3462_v6, 2  ;;  %v12739_v39 = vld [vmem:[#allocation6 + $0x228] sm:$0xff]   ;;  %v12741_v6 = vld [vmem:[#allocation6 + $0x238] sm:$0xff]  }
 0x2a9   : > { %11302 = vmatprep.mubr.bf16.mxu0 %v3083_v0  ;;  %v3419_v0 = vrot.slane %v3417_v53, 2  ;;  %v3432_v9 = vor.u32 %v3431_v29, %v3428_v25  ;;  %v3467_v53 = vrot.slane %v3465_v24, 3  ;;  %v12738_v25 = vld [vmem:[#allocation6 + $0x220] sm:$0xff]   ;;  %v460_v24 = vld [vmem:[%s15470_s5 + $0xf8] sm:$0xff] }
 0x2aa   : > { %v3450_v3 = vor.u32 %v3449_v63, %v3446_v44  ;;  %v454_v29 = vld [vmem:[%s15470_s5 + $0xc8] sm:$0xff]  ;;  %v3501_v44 = vshll.u32 %v13862_v19, 16  ;;  %v12740_v63 = vld [vmem:[#allocation6 + $0x230] sm:$0xff]  }
 0x2ab   : > { %v3423_v33 = vor.u32 %v3422_v47, %v3419_v0  ;;  %v3468_v0 = vor.u32 %v3467_v53, %v3464_v36  ;;  %v3480_v47 = vshrl.u32 %v13852_v2, 16  ;;  %v3516_v36 = vshrl.u32 %v13874_v61, 16 }
 0x2ac   : > { %v3451_v31 = vsel %vm3398_vm4, %v3441_v11, %v3450_v3  ;;  %v3519_v53 = vshll.u32 %v13874_v61, 16 }
 0x2ad   : > { %v3433_v57 = vsel %vm3398_vm4, %v3423_v33, %v3432_v9  ;;  %v3482_v5 = vrot.slane %v3480_v47, 2  ;;  %v464_v47 = vld [vmem:[%s15470_s5 + $0x118] sm:$0xff] }
 0x2b0   : > { %11303 = vmatmul.mubr.bf16.gmra.mrb[20].mxu0 %v3085_v58  ;;  %v444_v58 = vld [vmem:[%s15470_s5 + $0x78] sm:$0xff] }
 0x2b1   : > { %11306 = vmatprep.mubr.bf16.mxu0 %v3087_v30  ;;  %v445_v30 = vld [vmem:[%s15470_s5 + $0x80] sm:$0xff]  ;;  %4342 = vperm.xlu1 %12609, %v444_v58  }
 0x2b2   : > { %4347 = vperm.xlu0 %12608, %v445_v30   ;;  %v3473_v30 = vrot.slane %v3471_v35, 2 }
 0x2b6   : > { %4357 = vperm.xlu0 %12608, %v447_v1   ;;  %v458_v1 = vld [vmem:[%s15470_s5 + $0xe8] sm:$0xff] }
 0x2b8   : > { %11307 = vmatmul.mubr.bf16.gmra.mrb[24].mxu0 %v3089_v14  ;;  %v446_v14 = vld [vmem:[%s15470_s5 + $0x88] sm:$0xff] }
 0x2b9   : > { %11310 = vmatprep.mubr.bf16.mxu0 %v3091_v48  ;;  %v3424_v48 = vsel %vm3398_vm4, %v3414_v27, %v3423_v33  ;;  %4352 = vperm.xlu1 %12609, %v446_v14   ;;  %v452_v27 = vld [vmem:[%s15470_s5 + $0xb8] sm:$0xff]  ;;  %v457_v14 = vld [vmem:[%s15470_s5 + $0xe0] sm:$0xff] }
 0x2ba   : > { %4367 = vperm.xlu0 %12608, %v449_v10  }
 0x2bd   : > { %4362 = vperm.xlu1 %12609, %v448_v8   ;;  %v459_v8 = vld [vmem:[%s15470_s5 + $0xf0] sm:$0xff] }
 0x2be   : > { %4377 = vperm.xlu0 %12608, %v451_v52   ;;  %v463_v52 = vld [vmem:[%s15470_s5 + $0x110] sm:$0xff] }
 0x2c0   : > { %11311 = vmatmul.mubr.bf16.gmra.mrb[28].mxu0 %v3093_v13  ;;  %v3453_v13 = vshrl.u32 %v13838_v15, 16 }
 0x2c1   : > { %11314 = vmatprep.mubr.bf16.mxu0 %v3095_v20  ;;  %v3456_v20 = vshll.u32 %v13838_v15, 16  ;;  %4372 = vperm.xlu1 %12609, %v450_v17   ;;  %v461_v17 = vld [vmem:[%s15470_s5 + $0x100] sm:$0xff] }
 0x2c2   : > { %v3455_v16 = vrot.slane %v3453_v13, 2  ;;  %4387 = vperm.xlu0 %12608, %v453_v26   ;;  %v3494_v13 = vrot.slane %v3492_v55, 3 }
 0x2c3   : > { %v3458_v28 = vrot.slane %v3456_v20, 3 }
 0x2c5   : > { %v3459_v34 = vor.u32 %v3458_v28, %v3455_v16  ;;  %4382 = vperm.xlu1 %12609, %v452_v27   ;;  %v3507_v16 = vshrl.u32 %v13870_v46, 16  ;;  %v3510_v28 = vshll.u32 %v13870_v46, 16 }
 0x2c6   : > { %4397 = vperm.xlu0 %12608, %v455_v42  }
 0x2c7   : > { %v3460_v58 = vsel %vm3398_vm4, %v3450_v3, %v3459_v34  ;;  %v3469_v37 = vsel %vm3398_vm4, %v3459_v34, %v3468_v0  ;;  %v3509_v26 = vrot.slane %v3507_v16, 2  ;;  %v3512_v34 = vrot.slane %v3510_v28, 3 }
 0x2c8   : > { %11315 = vmatmul.mubr.bf16.gmra.mrb[32].mxu0 %v3097_v41  ;;  %v3474_v41 = vshll.u32 %v13848_v7, 16 }
 0x2c9   : > { %11334 = vmatprep.mubr.bf16.mxu0 %v3415_v49  ;;  %v3483_v49 = vshll.u32 %v13852_v2, 16  ;;  %4392 = vperm.xlu1 %12609, %v454_v29   ;;  %v3528_v29 = vshll.u32 %v13887_v60, 16 }
 0x2ca   : > { %v3476_v33 = vrot.slane %v3474_v41, 3  ;;  %4407 = vperm.xlu0 %12608, %v457_v14   ;;  %v3518_v41 = vrot.slane %v3516_v36, 2 }
 0x2cd   : > { %4402 = vperm.xlu1 %12609, %v456_v43  }
 0x2ce   : > { %4417 = vperm.xlu0 %12608, %v459_v8   ;;  %v14063_v8 = vld [vmem:[%s13422_s25 + $0xa0] ss:$0 sps:$4 sm:$0x77]  }
 0x2d0   : > { %11335 = vmatmul.mubr.bf16.vlgmr.msra.gmra.mrb[0].mxu0 %v3424_v48  ;;  %v3477_v48 = vor.u32 %v3476_v33, %v3473_v30  ;;  %v3537_v30 = vshll.u32 %v13891_v32, 16 }
 0x2d1   : > { %11371 = vmatpush3.bf16.msra.mxu0 %v13866_v38  ;;  %11338 = vmatprep.mubr.bf16.mxu0 %v3433_v57  ;;  %v3442_v38 = vsel %vm3398_vm4, %v3432_v9, %v3441_v11  ;;  %v3485_v9 = vrot.slane %v3483_v49, 3  ;;  %v3491_v11 = vrot.slane %v3489_v50, 2  ;;  %v3513_v49 = vor.u32 %v3512_v34, %v3509_v26 }
 0x2d2   : > { %11372 = vmatprep.subr.bf16.mxu0 %v12735_v59  ;;  %v3478_v10 = vsel %vm3398_vm4, %v3468_v0, %v3477_v48  ;;  %4412 = vperm.xlu1 %12609, %v458_v1   ;;  %v3521_v0 = vrot.slane %v3519_v53, 3  ;;  %v3539_v43 = vrot.slane %v3537_v30, 3  ;;  %v3546_v50 = vshll.u32 %v13909_v22, 16 }
 0x2d3   : > { %v3486_v57 = vor.u32 %v3485_v9, %v3482_v5  ;;  %4427 = vperm.xlu0 %12608, %v461_v17   ;;  %v3530_v5 = vrot.slane %v3528_v29, 3  ;;  %v3873_v26 = vrot.slane %v13818_v51, 3  ;;  %v3875_v34 = vrot.slane %v13822_v56, 3 }
 0x2d4   : > { %v3522_v42 = vor.u32 %v3521_v0, %v3518_v41  ;;  %v3548_v1 = vrot.slane %v3546_v50, 3  ;;  %v3877_v41 = vrot.slane %v13828_v62, 3  ;;  %v3881_v51 = vrot.slane %v13838_v15, 3  ;;  %v12748_v50 = vld [vmem:[#allocation8 + $0x60] sm:$0xff]  }
 0x2d5   : > { %11373 = vmatpush3.bf16.msra.mxu0 %v12735_v59  ;;  %v3498_v59 = vshrl.u32 %v13862_v19, 16  ;;  %v3487_v20 = vsel %vm3398_vm4, %v3477_v48, %v3486_v57  ;;  %v3543_v48 = vshrl.u32 %v13909_v22, 16  ;;  %v3883_v56 = vrot.slane %v13842_v21, 3 }
 0x2d6   : > { %11374 = vmatprep.subr.bf16.mxu0 %v12736_v12  ;;  %4422 = vperm.xlu1 %12609, %v460_v24   ;;  %v3523_v9 = vsel %vm3398_vm4, %v3513_v49, %v3522_v42  ;;  %v3848_v24 = vld [vmem:[%s13422_s25 + $0x10] sm:$0x8]  ;;  %v3878_v0 = vsel %vm3869_vm5, %v3875_v34, %v3877_v41  ;;  %v3885_v62 = vrot.slane %v13848_v7, 3  ;;  %v3889_v15 = vrot.slane %v13858_v54, 3 }
 0x2d7   : > { %v3500_v3 = vrot.slane %v3498_v59, 2  ;;  %4437 = vperm.xlu0 %12608, %v463_v52   ;;  %v3555_v59 = vshll.u32 %v13912_v23, 16  ;;  %v3891_v21 = vrot.slane %v13862_v19, 3  ;;  %v3893_v7 = vrot.slane %v13870_v46, 3 }
 0x2d8   : > { %11339 = vmatmul.mubr.bf16.gmra.mrb[4].mxu0 %v3442_v38  ;;  %v3495_v38 = vor.u32 %v3494_v13, %v3491_v11  ;;  %v3886_v29 = vsel %vm3869_vm5, %v3883_v56, %v3885_v62  ;;  %v3897_v54 = vrot.slane %v13887_v60, 3  ;;  %v3899_v19 = vrot.slane %v13891_v32, 3 }
 0x2d9   : > { %11342 = vmatprep.mubr.bf16.mxu0 %v3451_v31  ;;  %11375 = vmatpush3.bf16.msra.mxu0 %v12736_v12  ;;  %v3503_v12 = vrot.slane %v3501_v44, 3  ;;  %v3557_v13 = vrot.slane %v3555_v59, 3  ;;  %v3892_v30 = vsel %vm3869_vm5, %v3889_v15, %v3891_v21  ;;  %v3901_v46 = vrot.slane %v13909_v22, 3  ;;  %v12746_v22 = vld [vmem:[#allocation8 + $0x50] sm:$0xff]   ;;  %v12751_v59 = vld [vmem:[#allocation8 + $0x78] sm:$0xff]  }
 0x2da   : > { %11376 = vmatprep.subr.bf16.mxu0 %v12737_v18  ;;  %v3496_v27 = vsel %vm3398_vm4, %v3486_v57, %v3495_v38  ;;  %v3552_v57 = vshrl.u32 %v13912_v23, 16 }
 0x2db   : > { %v3504_v31 = vor.u32 %v3503_v12, %v3500_v3  ;;  %v3561_v3 = vshrl.u32 %v14063_v8, 16  ;;  %v3564_v12 = vshll.u32 %v14063_v8, 16 }
 0x2dc   : > { %v3554_v11 = vrot.slane %v3552_v57, 2  ;;  %v12750_v57 = vld [vmem:[#allocation8 + $0x70] sm:$0xff]  }
 0x2dd   : > { %11377 = vmatpush3.bf16.msra.mxu0 %v12737_v18  ;;  %v462_v18 = vld [vmem:[%s15470_s5 + $0x108] sm:$0xff]  ;;  %v3505_v35 = vsel %vm3398_vm4, %v3495_v38, %v3504_v31  ;;  %v3514_v33 = vsel %vm3398_vm4, %v3504_v31, %v3513_v49  ;;  %v3563_v38 = vrot.slane %v3561_v3, 2  ;;  %v3566_v16 = vrot.slane %v3564_v12, 3 }
 0x2de   : > { %11378 = vmatprep.subr.bf16.mxu0 %v12738_v25  ;;  %4432 = vperm.xlu1 %12609, %v462_v18   ;;  %v10013_v31 = vcombine.low %v3848_v24, %v13803_v40  ;;  %v3871_v18 = vrot.slane %v13811_v45, 3  ;;  %v3876_v40 = vsel %vm3869_vm5, %v3873_v26, %v3875_v34  ;;  %v3879_v45 = vrot.slane %v13832_v4, 3 }
 0x2df   : > { %v3567_v36 = vor.u32 %v3566_v16, %v3563_v38  ;;  %v3887_v4 = vrot.slane %v13852_v2, 3  ;;  %v3895_v2 = vrot.slane %v13874_v61, 3  ;;  %v3903_v61 = vrot.slane %v13912_v23, 3  ;;  %v12747_v23 = vld [vmem:[#allocation8 + $0x58] sm:$0xff]  }
 0x2e0   : > { %11343 = vmatmul.mubr.bf16.gmra.mrb[8].mxu0 %v3460_v58  ;;  %v3534_v58 = vshrl.u32 %v13891_v32, 16  ;;  %v3870_v53 = vrot.slane %v10013_v31, 3  ;;  %v3882_v49 = vsel %vm3869_vm5, %v3879_v45, %v3881_v51 }
 0x2e1   : > { %11346 = vmatprep.mubr.bf16.mxu0 %v3469_v37  ;;  %11379 = vmatpush3.bf16.msra.mxu0 %v12738_v25  ;;  %v3525_v25 = vshrl.u32 %v13887_v60, 16  ;;  %v3905_v60 = vrot.slane %v14063_v8, 3  ;;  %v5035_v8 = vld [vmem:[#allocation2 + $0x4] sm:$0xf] }
 0x2e2   : > { %11380 = vmatprep.subr.bf16.mxu0 %v12739_v39  ;;  %4442 = vperm.xlu1 %12609, %v464_v47   ;;  %v3880_v47 = vsel %vm3869_vm5, %v3877_v41, %v3879_v45 }
 0x2e3   : > { %v3527_v37 = vrot.slane %v3525_v25, 2  ;;  %v3884_v25 = vsel %vm3869_vm5, %v3881_v51, %v3883_v56  ;;  %v3906_v32 = vsel %vm3869_vm5, %v3903_v61, %v3905_v60 }
 0x2e5   : > { %11381 = vmatpush3.bf16.msra.mxu0 %v12739_v39  ;;  %v3536_v39 = vrot.slane %v3534_v58, 2  ;;  %v3531_v14 = vor.u32 %v3530_v5, %v3527_v37  ;;  %v3890_v58 = vsel %vm3869_vm5, %v3887_v4, %v3889_v15  ;;  %v3896_v37 = vsel %vm3869_vm5, %v3893_v7, %v3895_v2 }
 0x2e6   : > { %11382 = vmatprep.subr.bf16.mxu0 %v12740_v63  ;;  %v3898_v5 = vsel %vm3869_vm5, %v3895_v2, %v3897_v54 }
 0x2e7   : > { %v3540_v55 = vor.u32 %v3539_v43, %v3536_v39  ;;  %v3532_v44 = vsel %vm3398_vm4, %v3522_v42, %v3531_v14  ;;  %v3888_v42 = vsel %vm3869_vm5, %v3885_v62, %v3887_v4  ;;  %v3902_v39 = vsel %vm3869_vm5, %v3899_v19, %v3901_v46 }
 0x2e8   : > { %11347 = vmatmul.mubr.bf16.gmra.mrb[12].mxu0 %v3478_v10  ;;  %v3904_v43 = vsel %vm3869_vm5, %v3901_v46, %v3903_v61 }
 0x2e9   : > { %11350 = vmatprep.mubr.bf16.mxu0 %v3487_v20  ;;  %11383 = vmatpush3.bf16.msra.mxu0 %v12740_v63  ;;  %v3545_v63 = vrot.slane %v3543_v48, 2  ;;  %v3541_v10 = vsel %vm3398_vm4, %v3531_v14, %v3540_v55  ;;  %v12744_v14 = vld [vmem:[#allocation8 + $0x40] sm:$0xff]   ;;  %v12745_v48 = vld [vmem:[#allocation8 + $0x48] sm:$0xff]  }
 0x2ea   : > { %11384 = vmatprep.subr.bf16.mxu0 %v12741_v6  ;;  %11422 = vmatprep.subr.bf16.mxu1 %v12744_v14 }
 0x2eb   : > { %v3549_v20 = vor.u32 %v3548_v1, %v3545_v63  ;;  %11423 = vmatpush3.bf16.msra.mxu1 %v12744_v14  ;;  %v5034_v1 = vld [vmem:[#allocation2] sm:$0xf]  ;;  %v4991_v14 = vld [vmem:[#allocation2 + $0x8] sm:$0xe] }
 0x2ec   : > { %11424 = vmatprep.subr.bf16.mxu1 %v12745_v48 }
 0x2ed   : > { %11385 = vmatpush3.bf16.msra.mxu0 %v12741_v6  ;;  %v3558_v6 = vor.u32 %v3557_v13, %v3554_v11  ;;  %v3550_v17 = vsel %vm3398_vm4, %v3540_v55, %v3549_v20  ;;  %v12749_v55 = vld [vmem:[#allocation8 + $0x68] sm:$0xff]   ;;  %v14116_v11 = vcombine.low %v5034_v1, %v5035_v8 }
 0x2ef   : > { %v3559_v28 = vsel %vm3398_vm4, %v3549_v20, %v3558_v6  ;;  %v3568_v52 = vsel %vm3398_vm4, %v3558_v6, %v3567_v36  ;;  %11425 = vmatpush3.bf16.msra.mxu1 %v12745_v48  ;;  %v14123_v20 = vld [vmem:[%s15467_s2] ss:$0 sm:$0xff]  ;;  %v5200_v12 = vshll.u32 %v14116_v11, 16 }
 0x2f0   : > { %11351 = vmatmul.mubr.bf16.gmra.mrb[16].mxu0 %v3496_v27  ;;  %v3872_v27 = vsel %vm3869_vm5, %v3870_v53, %v3871_v18  ;;  %11426 = vmatprep.subr.bf16.mxu1 %v12746_v22 }
 0x2f1   : > { %11354 = vmatprep.mubr.bf16.mxu0 %v3505_v35  ;;  %v3874_v35 = vsel %vm3869_vm5, %v3871_v18, %v3873_v26  ;;  %v5202_v26 = vrot.slane %v5200_v12, 1 }
 0x2f3   : > { %11427 = vmatpush3.bf16.msra.mxu1 %v12746_v22 }
 0x2f4   : > { %11428 = vmatprep.subr.bf16.mxu1 %v12747_v23 }
 0x2f7   : > { %11429 = vmatpush3.bf16.msra.mxu1 %v12747_v23 }
 0x2f8   : > { %11355 = vmatmul.mubr.bf16.gmra.mrb[20].mxu0 %v3514_v33  ;;  %v3894_v33 = vsel %vm3869_vm5, %v3891_v21, %v3893_v7  ;;  %11430 = vmatprep.subr.bf16.mxu1 %v12748_v50 }
 0x2f9   : > { %11358 = vmatprep.mubr.bf16.mxu0 %v3523_v9  ;;  %v3900_v9 = vsel %vm3869_vm5, %v3897_v54, %v3899_v19 }
 0x2fb   : > { %11431 = vmatpush3.bf16.msra.mxu1 %v12748_v50 }
 0x2fc   : > { %11432 = vmatprep.subr.bf16.mxu1 %v12749_v55 }
 0x2ff   : > { %11433 = vmatpush3.bf16.msra.mxu1 %v12749_v55 }
 0x300   : > { %11359 = vmatmul.mubr.bf16.gmra.mrb[24].mxu0 %v3532_v44  ;;  %11434 = vmatprep.subr.bf16.mxu1 %v12750_v57  ;;  %v14109_v44 = vld [vmem:[#allocation8] sm:$0xff]  }
 0x301   : > { %11362 = vmatprep.mubr.bf16.mxu0 %v3541_v10  ;;  %v14114_v10 = vpop.permute.xlu1 %4277 }
 0x302   : > { %15572 = vst [vmem:[#allocation20_spill] sm:$0xff] %v14114_v10 }
 0x303   : > { %11435 = vmatpush3.bf16.msra.mxu1 %v12750_v57 }
 0x304   : > { %11436 = vmatprep.subr.bf16.mxu1 %v12751_v59 }
 0x307   : > { %11437 = vmatpush3.bf16.msra.mxu1 %v12751_v59 }
 0x308   : > { %11363 = vmatmul.mubr.bf16.gmra.mrb[28].mxu0 %v3550_v17  ;;  %11474 = vmatprep.subr.bf16.mxu1 %v14109_v44  ;;  %v14127_v17 = vpop.permute.xlu1 %4282 }
 0x309   : > { %11366 = vmatprep.mubr.bf16.mxu0 %v3559_v28  ;;  %v14112_v63 = vpop.permute.xlu0 %4267  ;;  %15574 = vst [vmem:[#allocation22_spill] sm:$0xff] %v14127_v17 }
 0x30a   : > { %15571 = vst [vmem:[#allocation19_spill] sm:$0xff] %v14112_v63 }
 0x30d   : > { %v14118_v13 = vpop.permute.xlu0 %4272 }
 0x30e   : > { %15573 = vst [vmem:[#allocation21_spill] sm:$0xff] %v14118_v13 }
 0x310   : > { %11367 = vmatmul.mubr.bf16.gmra.mrb[32].mxu0 %v3568_v52 }
 0x311   : > { %11386 = vmatprep.mubr.bf16.mxu0 %v3872_v27  ;;  %v14131_v53 = vpop.permute.xlu0 %4287  ;;  %v5198_v27 = vshrl.u32 %v14116_v11, 16 }
 0x312   : > { %15575 = vst [vmem:[#allocation23_spill] sm:$0xff] %v14131_v53 }
 0x315   : > { %v14144_v21 = vpop.permute.xlu0 %4297 }
 0x316   : > { %15577 = vst [vmem:[#allocation25_spill] sm:$0xff] %v14144_v21 }
 0x318   : > { %11387 = vmatmul.mubr.bf16.vlgmr.msra.gmra.mrb[0].mxu0 %v3874_v35 }
 0x319   : > { %11390 = vmatprep.mubr.bf16.mxu0 %v3876_v40 }
 0x320   : > { %11391 = vmatmul.mubr.bf16.gmra.mrb[4].mxu0 %v3878_v0 }
 0x321   : > { %11394 = vmatprep.mubr.bf16.mxu0 %v3880_v47  ;;  %v14138_v47 = vpop.permute.xlu1 %4292 }
 0x322   : > { %15576 = vst [vmem:[#allocation24_spill] sm:$0xff] %v14138_v47 }
 0x325   : > { %v14153_v50 = vpop.permute.xlu1 %4302 }
 0x326   : > { %15580 = vst [vmem:[#allocation26_spill] sm:$0xff] %v14153_v50 }
 0x328   : > { %11395 = vmatmul.mubr.bf16.gmra.mrb[8].mxu0 %v3882_v49 }
 0x329   : > { %11398 = vmatprep.mubr.bf16.mxu0 %v3884_v25  ;;  %v14141_v25 = vor.u32 %v5202_v26, %v5198_v27 }
 0x330   : > { %11399 = vmatmul.mubr.bf16.gmra.mrb[12].mxu0 %v3886_v29 }
 0x331   : > { %11402 = vmatprep.mubr.bf16.mxu0 %v3888_v42 }
 0x338   : > { %11403 = vmatmul.mubr.bf16.gmra.mrb[16].mxu0 %v3890_v58 }
 0x339   : > { %11406 = vmatprep.mubr.bf16.mxu0 %v3892_v30 }
 0x340   : > { %11407 = vmatmul.mubr.bf16.gmra.mrb[20].mxu0 %v3894_v33 }
 0x341   : > { %11410 = vmatprep.mubr.bf16.mxu0 %v3896_v37 }
 0x348   : > { %11411 = vmatmul.mubr.bf16.gmra.mrb[24].mxu0 %v3898_v5 }
 0x349   : > { %11414 = vmatprep.mubr.bf16.mxu0 %v3900_v9 }
 0x350   : > { %11415 = vmatmul.mubr.bf16.gmra.mrb[28].mxu0 %v3902_v39 }
 0x351   : > { %11418 = vmatprep.mubr.bf16.mxu0 %v3904_v43 }
 0x358   : > { %11419 = vmatmul.mubr.bf16.gmra.mrb[32].mxu0 %v3906_v32 }
 0x3eb   : > { %v11388_v3 = vpop.f32.mrb[0].mxu0 }
 0x3ec   : > { %v4195_v6 = vadd.f32 %v11388_v3, %v14123_v20  ;;  %v4007_v24 = vpop.f32.mrb[1].mxu0 }
 0x3ed   : > { %v4193_v38 = vadd.f32 %v14123_v20, %v4007_v24  ;;  %v11389_v16 = vpop.f32.mrb[2].mxu0 }
 0x3ee   : > { %v4231_v28 = vmax.f32 %v4195_v6, 0.0  ;;  %v4196_v31 = vadd.f32 %v11389_v16, %v14123_v20  ;;  %v4010_v36 = vpop.f32.mrb[3].mxu0 }
 0x3ef   : > { %v4229_v18 = vmax.f32 %v4193_v38, 0.0  ;;  %v4194_v52 = vadd.f32 %v14123_v20, %v4010_v36  ;;  %v14163_v38 = vpop.permute.xlu0 %4307 }
 0x3f0   : > { %v4447_v34 = vmul.f32 %v14114_v10, %v4231_v28  ;;  %v4232_v35 = vmax.f32 %v4196_v31, 0.0  ;;  %15583 = vst [vmem:[#allocation27_spill] sm:$0xff] %v14163_v38 }
 0x3f1   : > { %v4445_v40 = vmul.f32 %v14112_v63, %v4229_v18  ;;  %v4230_v41 = vmax.f32 %v4194_v52, 0.0 }
 0x3f2   : > { %v10215_v45 = vpack.c.bf16 %v4447_v34, %v4447_v34  ;;  %v4448_v0 = vmul.f32 %v14127_v17, %v4232_v35 }
 0x3f3   : > { %v10213_v51 = vpack.c.bf16 %v4445_v40, %v4445_v40  ;;  %v4446_v56 = vmul.f32 %v14118_v13, %v4230_v41  ;;  %v11392_v49 = vpop.f32.mrb[4].mxu0 }
 0x3f4   : > { %v4612_v62 = vshrl.u32 %v10215_v45, 16  ;;  %v4615_v4 = vshll.u32 %v10215_v45, 16  ;;  %v10216_v29 = vpack.c.bf16 %v4448_v0, %v4448_v0  ;;  %v4199_v42 = vadd.f32 %v11392_v49, %v14123_v20  ;;  %v4023_v15 = vpop.f32.mrb[5].mxu0 }
 0x3f5   : > { %v4593_v58 = vshrl.u32 %v10213_v51, 16  ;;  %v4596_v30 = vshll.u32 %v10213_v51, 16  ;;  %v10214_v7 = vpack.c.bf16 %v4446_v56, %v4446_v56  ;;  %v4197_v2 = vadd.f32 %v14123_v20, %v4023_v15  ;;  %v11393_v33 = vpop.f32.mrb[6].mxu0 }
 0x3f6   : > { %v4614_v37 = vrot.slane %v4612_v62, 6  ;;  %v4617_v54 = vrot.slane %v4615_v4, 7  ;;  %v4622_v19 = vshrl.u32 %v10216_v29, 16  ;;  %v4625_v5 = vshll.u32 %v10216_v29, 16  ;;  %v4026_v9 = vpop.f32.mrb[7].mxu0 }
 0x3f7   : > { %v4595_v46 = vrot.slane %v4593_v58, 6  ;;  %v4598_v61 = vrot.slane %v4596_v30, 7  ;;  %v4602_v39 = vshrl.u32 %v10214_v7, 16  ;;  %v4605_v43 = vshll.u32 %v10214_v7, 16 }
 0x3f8   : > { %v4618_v60 = vor.u32 %v4617_v54, %v4614_v37  ;;  %v4624_v48 = vrot.slane %v4622_v19, 6  ;;  %v4627_v22 = vrot.slane %v4625_v5, 7  ;;  %v4235_v23 = vmax.f32 %v4199_v42, 0.0  ;;  %v14175_v42 = vpop.permute.xlu1 %4312  ;;  %v14179_v19 = vpop.permute.xlu0 %4317 }
 0x3f9   : > { %v4599_v55 = vor.u32 %v4598_v61, %v4595_v46  ;;  %v4604_v59 = vrot.slane %v4602_v39, 6  ;;  %v4607_v1 = vrot.slane %v4605_v43, 7  ;;  %v4233_v8 = vmax.f32 %v4197_v2, 0.0  ;;  %15584 = vst [vmem:[#allocation28_spill] sm:$0xff] %v14175_v42  ;;  %15585 = vst [vmem:[#allocation29_spill] sm:$0xff] %v14179_v19 }
 0x3fa   : > { %v4620_v3 = vrot.slane %v4618_v60, 4  ;;  %v4628_v12 = vor.u32 %v4627_v22, %v4624_v48  ;;  %v4451_v6 = vmul.f32 %v14144_v21, %v4235_v23  ;;  %v4200_v24 = vadd.f32 %v11393_v33, %v14123_v20 }
 0x3fb   : > { %v4600_v16 = vrot.slane %v4599_v55, 4  ;;  %v4992_v28 = vsel %vm14149_vm10, %v4599_v55, %v4991_v14  ;;  %v4608_v31 = vor.u32 %v4607_v1, %v4604_v59  ;;  %v4449_v36 = vmul.f32 %v14131_v53, %v4233_v8  ;;  %v11396_v18 = vpop.f32.mrb[8].mxu0 }
 0x3fc   : > { %4993 = vst [vmem:[#allocation2 + $0x8] sm:$0xe] %v4992_v28  ;;  %v4629_v52 = vsel %vm14157_vm11, %v4620_v3, %v4628_v12  ;;  %v4630_v27 = vrot.slane %v4628_v12, 4  ;;  %v10219_v26 = vpack.c.bf16 %v4451_v6, %v4451_v6  ;;  %v4236_v34 = vmax.f32 %v4200_v24, 0.0  ;;  %v4039_v35 = vpop.f32.mrb[9].mxu0  ;;  %v14185_v6 = vpop.permute.xlu1 %4322 }
 0x3fd   : > { %4996 = vst [vmem:[#allocation2 + $0x14] sm:$0xf] %v4629_v52  ;;  %v4609_v40 = vsel %vm14157_vm11, %v4600_v16, %v4608_v31  ;;  %v4610_v41 = vrot.slane %v4608_v31, 4  ;;  %v10217_v45 = vpack.c.bf16 %v4449_v36, %v4449_v36  ;;  %v4198_v0 = vadd.f32 %v14123_v20, %v4026_v9  ;;  %v11397_v51 = vpop.f32.mrb[10].mxu0  ;;  %15586 = vst [vmem:[#allocation30_spill] sm:$0xff] %v14185_v6 }
 0x3fe   : > { %4994 = vst [vmem:[#allocation2 + $0xc] sm:$0xf] %v4609_v40  ;;  %v4652_v56 = vshrl.u32 %v10219_v26, 16  ;;  %v4655_v49 = vshll.u32 %v10219_v26, 16  ;;  %v4452_v62 = vmul.f32 %v14153_v50, %v4236_v34  ;;  %v4203_v4 = vadd.f32 %v11396_v18, %v14123_v20  ;;  %v4042_v29 = vpop.f32.mrb[11].mxu0  ;;  %v14190_v40 = vpop.permute.xlu0 %4327 }
 0x3ff   : > { %v4619_v15 = vsel %vm14157_vm11, %v4610_v41, %v4618_v60  ;;  %v4632_v58 = vshrl.u32 %v10217_v45, 16  ;;  %v4635_v30 = vshll.u32 %v10217_v45, 16  ;;  %v4234_v7 = vmax.f32 %v4198_v0, 0.0  ;;  %15587 = vst [vmem:[#allocation31_spill] sm:$0xff] %v14190_v40 }
 0x400   : > { %4995 = vst [vmem:[#allocation2 + $0x10] sm:$0xf] %v4619_v15  ;;  %v4654_v2 = vrot.slane %v4652_v56, 6  ;;  %v4657_v33 = vrot.slane %v4655_v49, 7  ;;  %v10220_v37 = vpack.c.bf16 %v4452_v62, %v4452_v62  ;;  %v4239_v54 = vmax.f32 %v4203_v4, 0.0 }
 0x401   : > { %v4634_v5 = vrot.slane %v4632_v58, 6  ;;  %v4637_v9 = vrot.slane %v4635_v30, 7  ;;  %v4450_v46 = vmul.f32 %v14138_v47, %v4234_v7  ;;  %v4201_v61 = vadd.f32 %v14123_v20, %v4039_v35 }
 0x402   : > { %v4658_v39 = vor.u32 %v4657_v33, %v4654_v2  ;;  %v4662_v43 = vshrl.u32 %v10220_v37, 16  ;;  %v4665_v32 = vshll.u32 %v10220_v37, 16  ;;  %v4455_v60 = vmul.f32 %v14179_v19, %v4239_v54  ;;  %v14201_v37 = vpop.permute.xlu1 %4332 }
 0x403   : > { %v4638_v14 = vor.u32 %v4637_v9, %v4634_v5  ;;  %v10218_v48 = vpack.c.bf16 %v4450_v46, %v4450_v46  ;;  %v4237_v22 = vmax.f32 %v4201_v61, 0.0  ;;  %v4204_v23 = vadd.f32 %v11397_v51, %v14123_v20  ;;  %v11400_v55 = vpop.f32.mrb[12].mxu0  ;;  %15588 = vst [vmem:[#allocation32_spill] sm:$0xff] %v14201_v37 }
 0x404   : > { %v4660_v59 = vrot.slane %v4658_v39, 4  ;;  %v4664_v1 = vrot.slane %v4662_v43, 6  ;;  %v4667_v8 = vrot.slane %v4665_v32, 7  ;;  %v10223_v3 = vpack.c.bf16 %v4455_v60, %v4455_v60  ;;  %v4055_v12 = vpop.f32.mrb[13].mxu0 }
 0x405   : > { %v4639_v24 = vsel %vm14157_vm11, %v4630_v27, %v4638_v14  ;;  %v4640_v16 = vrot.slane %v4638_v14, 4  ;;  %v4642_v28 = vshrl.u32 %v10218_v48, 16  ;;  %v4645_v31 = vshll.u32 %v10218_v48, 16  ;;  %v11401_v36 = vpop.f32.mrb[14].mxu0 }
 0x406   : > { %4997 = vst [vmem:[#allocation2 + $0x18] sm:$0xf] %v4639_v24  ;;  %v4668_v18 = vor.u32 %v4667_v8, %v4664_v1  ;;  %v4692_v52 = vshrl.u32 %v10223_v3, 16  ;;  %v4695_v26 = vshll.u32 %v10223_v3, 16  ;;  %v4453_v34 = vmul.f32 %v14163_v38, %v4237_v22  ;;  %v4058_v35 = vpop.f32.mrb[15].mxu0  ;;  %v14211_v22 = vpop.permute.xlu0 %4337 }
 0x407   : > { %v4644_v41 = vrot.slane %v4642_v28, 6  ;;  %v4647_v45 = vrot.slane %v4645_v31, 7  ;;  %v4240_v0 = vmax.f32 %v4204_v23, 0.0  ;;  %v4202_v51 = vadd.f32 %v14123_v20, %v4042_v29  ;;  %15589 = vst [vmem:[#allocation33_spill] sm:$0xff] %v14211_v22  ;;  %v14741_v17 = vld [vmem:[#allocation2 + $0x10] sm:$0xff]  }
 0x408   : > { %v4669_v27 = vsel %vm14157_vm11, %v4660_v59, %v4668_v18  ;;  %v4670_v56 = vrot.slane %v4668_v18, 4  ;;  %v4694_v49 = vrot.slane %v4692_v52, 6  ;;  %v4697_v62 = vrot.slane %v4695_v26, 7 }
 0x409   : > { %5000 = vst [vmem:[#allocation2 + $0x24] sm:$0xf] %v4669_v27  ;;  %v4648_v4 = vor.u32 %v4647_v45, %v4644_v41  ;;  %v10221_v15 = vpack.c.bf16 %v4453_v34, %v4453_v34  ;;  %v4456_v58 = vmul.f32 %v14185_v6, %v4240_v0  ;;  %v4238_v30 = vmax.f32 %v4202_v51, 0.0  ;;  %v14222_v45 = vpop.permute.xlu1 %4342 }
 0x40a   : > { %v14196_v7 = vor.u32 %v4697_v62, %v4694_v49  ;;  %v4207_v2 = vadd.f32 %v11400_v55, %v14123_v20  ;;  %v4205_v33 = vadd.f32 %v14123_v20, %v4055_v12  ;;  %v4208_v29 = vadd.f32 %v11401_v36, %v14123_v20  ;;  %15590 = vst [vmem:[#allocation34_spill] sm:$0xff] %v14222_v45 }
 0x40b   : > { %v4649_v54 = vsel %vm14157_vm11, %v4640_v16, %v4648_v4  ;;  %v4650_v5 = vrot.slane %v4648_v4, 4  ;;  %v4672_v9 = vshrl.u32 %v10221_v15, 16  ;;  %v4675_v46 = vshll.u32 %v10221_v15, 16  ;;  %v14205_v61 = vpop.f32.mrb[16].mxu0 }
 0x40c   : > { %4998 = vst [vmem:[#allocation2 + $0x1c] sm:$0xf] %v4649_v54  ;;  %v4700_v43 = vrot.slane %v14196_v7, 4  ;;  %v10224_v32 = vpack.c.bf16 %v4456_v58, %v4456_v58  ;;  %v4454_v60 = vmul.f32 %v14175_v42, %v4238_v30  ;;  %v4243_v14 = vmax.f32 %v4207_v2, 0.0  ;;  %v14209_v48 = vpop.f32.mrb[17].mxu0 }
 0x40d   : > { %v4659_v23 = vsel %vm14157_vm11, %v4650_v5, %v4658_v39  ;;  %v4674_v55 = vrot.slane %v4672_v9, 6  ;;  %v4677_v59 = vrot.slane %v4675_v46, 7  ;;  %v4241_v1 = vmax.f32 %v4205_v33, 0.0  ;;  %v14215_v8 = vpop.f32.mrb[18].mxu0 }
 0x40e   : > { %4999 = vst [vmem:[#allocation2 + $0x20] sm:$0xf] %v4659_v23  ;;  %v4702_v3 = vshrl.u32 %v10224_v32, 16  ;;  %v4705_v12 = vshll.u32 %v10224_v32, 16  ;;  %v10222_v24 = vpack.c.bf16 %v4454_v60, %v4454_v60  ;;  %v4459_v16 = vmul.f32 %v14211_v22, %v4243_v14  ;;  %v14218_v28 = vpop.f32.mrb[19].mxu0  ;;  %v14233_v32 = vpop.permute.xlu0 %4347 }
 0x40f   : > { %v4678_v31 = vor.u32 %v4677_v59, %v4674_v55  ;;  %v4457_v36 = vmul.f32 %v14190_v40, %v4241_v1  ;;  %v4244_v18 = vmax.f32 %v4208_v29, 0.0  ;;  %v4206_v52 = vadd.f32 %v14123_v20, %v4058_v35  ;;  %15591 = vst [vmem:[#allocation35_spill] sm:$0xff] %v14233_v32 }
 0x410   : > { %v4704_v39 = vrot.slane %v4702_v3, 6  ;;  %v4707_v26 = vrot.slane %v4705_v12, 7  ;;  %v4682_v34 = vshrl.u32 %v10222_v24, 16  ;;  %v4685_v41 = vshll.u32 %v10222_v24, 16 }
 0x411   : > { %v4679_v0 = vsel %vm14157_vm11, %v4670_v56, %v4678_v31  ;;  %v4680_v51 = vrot.slane %v4678_v31, 4  ;;  %v10227_v27 = vpack.c.bf16 %v4459_v16, %v4459_v16  ;;  %v10225_v49 = vpack.c.bf16 %v4457_v36, %v4457_v36 }
 0x412   : > { %5001 = vst [vmem:[#allocation2 + $0x28] sm:$0xf] %v4679_v0  ;;  %v4708_v62 = vor.u32 %v4707_v26, %v4704_v39  ;;  %v4684_v4 = vrot.slane %v4682_v34, 6  ;;  %v4687_v15 = vrot.slane %v4685_v41, 7  ;;  %v4460_v58 = vmul.f32 %v14222_v45, %v4244_v18  ;;  %v12753_v39 = vld [vmem:[#allocation2 + $0x8] sm:$0xff]   ;;  %v14247_v26 = vpop.permute.xlu1 %4352 }
 0x413   : > { %v4732_v30 = vshrl.u32 %v10227_v27, 16  ;;  %v4735_v35 = vshll.u32 %v10227_v27, 16  ;;  %v4712_v2 = vshrl.u32 %v10225_v49, 16  ;;  %v4715_v33 = vshll.u32 %v10225_v49, 16  ;;  %v14227_v29 = vpop.f32.mrb[20].mxu0  ;;  %15592 = vst [vmem:[#allocation36_spill] sm:$0xff] %v14247_v26 }
 0x414   : > { %v4709_v54 = vsel %vm14157_vm11, %v4700_v43, %v4708_v62  ;;  %v4710_v5 = vrot.slane %v4708_v62, 4  ;;  %v4688_v56 = vor.u32 %v4687_v15, %v4684_v4  ;;  %v10228_v9 = vpack.c.bf16 %v4460_v58, %v4460_v58  ;;  %v14231_v46 = vpop.f32.mrb[21].mxu0  ;;  %v14266_v58 = vpop.permute.xlu0 %4357 }
 0x415   : > { %5004 = vst [vmem:[#allocation2 + $0x34] sm:$0xf] %v4709_v54  ;;  %v4734_v60 = vrot.slane %v4732_v30, 6  ;;  %v4737_v14 = vrot.slane %v4735_v35, 7  ;;  %v4714_v23 = vrot.slane %v4712_v2, 6  ;;  %v4717_v55 = vrot.slane %v4715_v33, 7 }
 0x416   : > { %v14235_v59 = vpop.f32.mrb[22].mxu0  ;;  %v4689_v1 = vsel %vm14157_vm11, %v4680_v51, %v4688_v56  ;;  %v4690_v3 = vrot.slane %v4688_v56, 4  ;;  %v4742_v12 = vshrl.u32 %v10228_v9, 16  ;;  %v4745_v43 = vshll.u32 %v10228_v9, 16  ;;  %15593 = vst [vmem:[#allocation37_spill] sm:$0xff] %v14266_v58 }
 0x417   : > { %v14239_v24 = vpop.f32.mrb[23].mxu0  ;;  %5002 = vst [vmem:[#allocation2 + $0x2c] sm:$0xf] %v4689_v1  ;;  %v14241_v16 = vor.u32 %v4737_v14, %v4734_v60  ;;  %v14243_v31 = vor.u32 %v4717_v55, %v4714_v23  ;;  %v4242_v36 = vmax.f32 %v4206_v52, 0.0  ;;  %v4211_v18 = vadd.f32 %v14205_v61, %v14123_v20 }
 0x418   : > { %v4699_v34 = vsel %vm14157_vm11, %v4690_v3, %v14196_v7  ;;  %v4744_v41 = vrot.slane %v4742_v12, 6  ;;  %v4747_v0 = vrot.slane %v4745_v43, 7  ;;  %v4209_v51 = vadd.f32 %v14123_v20, %v14209_v48  ;;  %v14264_v48 = vld [vmem:[#allocation2 + $0x10] sm:$0xff]   ;;  %v14282_v3 = vpop.permute.xlu1 %4362 }
 0x419   : > { %5003 = vst [vmem:[#allocation2 + $0x30] sm:$0xf] %v4699_v34  ;;  %v4740_v27 = vrot.slane %v14241_v16, 4  ;;  %v4719_v52 = vsel %vm14157_vm11, %v4710_v5, %v14243_v31  ;;  %v4720_v61 = vrot.slane %v14243_v31, 4  ;;  %v4458_v49 = vmul.f32 %v14201_v37, %v4242_v36  ;;  %15594 = vst [vmem:[#allocation38_spill] sm:$0xff] %v14282_v3 }
 0x41a   : > { %5005 = vst [vmem:[#allocation2 + $0x38] sm:$0xf] %v4719_v52  ;;  %v14260_v62 = vor.u32 %v4747_v0, %v4744_v41  ;;  %v4247_v7 = vmax.f32 %v4211_v18, 0.0  ;;  %v4245_v4 = vmax.f32 %v4209_v51, 0.0  ;;  %v4212_v15 = vadd.f32 %v14215_v8, %v14123_v20 }
 0x41b   : > { %v10226_v30 = vpack.c.bf16 %v4458_v49, %v4458_v49  ;;  %v5205_v35 = vshll.u32 %v12753_v39, 16  ;;  %v4210_v2 = vadd.f32 %v14123_v20, %v14218_v28  ;;  %v5209_v33 = vshrl.u32 %v12753_v39, 16  ;;  %v14270_v54 = vpop.f32.mrb[24].mxu0 }
 0x41c   : > { %v4749_v5 = vsel %vm14157_vm11, %v4740_v27, %v14260_v62  ;;  %v4750_v56 = vrot.slane %v14260_v62, 4  ;;  %v4463_v8 = vmul.f32 %v14266_v58, %v4247_v7  ;;  %v4461_v9 = vmul.f32 %v14233_v32, %v4245_v4  ;;  %v14278_v60 = vpop.f32.mrb[25].mxu0 }
 0x41d   : > { %5008 = vst [vmem:[#allocation2 + $0x44] sm:$0xf] %v4749_v5  ;;  %v4722_v14 = vshrl.u32 %v10226_v30, 16  ;;  %v4725_v23 = vshll.u32 %v10226_v30, 16  ;;  %v4248_v55 = vmax.f32 %v4212_v15, 0.0  ;;  %v5207_v28 = vrot.slane %v5205_v35, 1 }
 0x41e   : > { %v14280_v1 = vpop.f32.mrb[26].mxu0  ;;  %v10231_v12 = vpack.c.bf16 %v4463_v8, %v4463_v8  ;;  %v10229_v43 = vpack.c.bf16 %v4461_v9, %v4461_v9  ;;  %v4246_v31 = vmax.f32 %v4210_v2, 0.0  ;;  %v5213_v36 = vshll.u32 %v14264_v48, 16  ;;  %v6169_v30 = vld [vmem:[#allocation2 + $0xc] sm:$0xf] }
 0x41f   : > { %v14285_v18 = vpop.f32.mrb[27].mxu0  ;;  %v4724_v39 = vrot.slane %v4722_v14, 6  ;;  %v4727_v34 = vrot.slane %v4725_v23, 7  ;;  %v4464_v41 = vmul.f32 %v14282_v3, %v4248_v55  ;;  %v5208_v0 = vsel %vm669_vm0, %v14141_v25, %v5207_v28  ;;  %v6168_v9 = vld [vmem:[#allocation2 + $0x8] sm:$0xe]  ;;  %v12757_v14 = vld [vmem:[#allocation2 + $0x10] sm:$0xff]  }
 0x420   : > { %v4772_v51 = vshrl.u32 %v10231_v12, 16  ;;  %v4775_v27 = vshll.u32 %v10231_v12, 16  ;;  %v4752_v52 = vshrl.u32 %v10229_v43, 16  ;;  %v4755_v49 = vshll.u32 %v10229_v43, 16  ;;  %11438 = vmatprep.mubr.bf16.mxu1 %v5208_v0 }
 0x421   : > { %v4728_v62 = vor.u32 %v4727_v34, %v4724_v39  ;;  %v10232_v7 = vpack.c.bf16 %v4464_v41, %v4464_v41  ;;  %v4462_v4 = vmul.f32 %v14247_v26, %v4246_v31  ;;  %v5211_v15 = vor.u32 %v5209_v33, %v5207_v28 }
 0x422   : > { %v4774_v35 = vrot.slane %v4772_v51, 6  ;;  %v4777_v2 = vrot.slane %v4775_v27, 7  ;;  %v4754_v5 = vrot.slane %v4752_v52, 6  ;;  %v4757_v8 = vrot.slane %v4755_v49, 7 }
 0x423   : > { %v4729_v25 = vsel %vm14157_vm11, %v4720_v61, %v4728_v62  ;;  %v4730_v23 = vrot.slane %v4728_v62, 4  ;;  %v4782_v55 = vshrl.u32 %v10232_v7, 16  ;;  %v4785_v12 = vshll.u32 %v10232_v7, 16  ;;  %v14293_v43 = vpop.f32.mrb[28].mxu0  ;;  %v12761_v7 = vld [vmem:[#allocation8 + $0x8] sm:$0xff]  }
 0x424   : > { %5006 = vst [vmem:[#allocation2 + $0x3c] sm:$0xf] %v4729_v25  ;;  %v14295_v39 = vor.u32 %v4777_v2, %v4774_v35  ;;  %v4758_v31 = vor.u32 %v4757_v8, %v4754_v5  ;;  %v10230_v33 = vpack.c.bf16 %v4462_v4, %v4462_v4  ;;  %v5215_v28 = vrot.slane %v5213_v36, 1  ;;  %v14297_v34 = vpop.f32.mrb[29].mxu0  ;;  %v14311_v35 = vpop.permute.xlu0 %4367 }
 0x425   : > { %v4739_v41 = vsel %vm14157_vm11, %v4730_v23, %v14241_v16  ;;  %v4784_v0 = vrot.slane %v4782_v55, 6  ;;  %v4787_v51 = vrot.slane %v4785_v12, 7  ;;  %v14302_v61 = vcombine.low %v6168_v9, %v6169_v30  ;;  %v14304_v27 = vpop.f32.mrb[30].mxu0  ;;  %15595 = vst [vmem:[#allocation39_spill] sm:$0xff] %v14311_v35  ;;  %v14317_v8 = vpop.permute.xlu1 %4372  ;;  %v14320_v55 = vld [vmem:[#allocation2 + $0x18] sm:$0xff]  }
 0x426   : > { %5007 = vst [vmem:[#allocation2 + $0x40] sm:$0xf] %v4739_v41  ;;  %v4780_v52 = vrot.slane %v14295_v39, 4  ;;  %v4759_v49 = vsel %vm14157_vm11, %v4750_v56, %v4758_v31  ;;  %v4760_v62 = vrot.slane %v4758_v31, 4  ;;  %v4762_v36 = vshrl.u32 %v10230_v33, 16  ;;  %v14309_v4 = vpop.f32.mrb[31].mxu0 }
 0x427   : > { %5009 = vst [vmem:[#allocation2 + $0x48] sm:$0xf] %v4759_v49  ;;  %v14313_v16 = vor.u32 %v4787_v51, %v4784_v0  ;;  %v4765_v30 = vshll.u32 %v10230_v33, 16  ;;  %v5216_v2 = vsel %vm669_vm0, %v5211_v15, %v5215_v28  ;;  %v6653_v5 = vshrl.u32 %v14302_v61, 16  ;;  %15596 = vst [vmem:[#allocation40_spill] sm:$0xff] %v14317_v8 }
 0x428   : > { %v4764_v9 = vrot.slane %v4762_v36, 6  ;;  %11439 = vmatmul.mubr.bf16.vlgmr.msra.gmra.mrb[0].mxu1 %v5216_v2  ;;  %v6656_v56 = vshll.u32 %v14302_v61, 16  ;;  %v6661_v25 = vshrl.u32 %v12757_v14, 16  ;;  %v6664_v23 = vshll.u32 %v12757_v14, 16  ;;  %v12766_v14 = vld [vmem:[#allocation8 + $0x10] sm:$0xff]  }
 0x429   : > { %v4789_v12 = vsel %vm14157_vm11, %v4780_v52, %v14313_v16  ;;  %v4767_v33 = vrot.slane %v4765_v30, 7  ;;  %11475 = vmatpush3.bf16.msra.mxu1 %v14109_v44  ;;  %v6655_v15 = vrot.slane %v6653_v5, 1  ;;  %v4215_v49 = vadd.f32 %v14227_v29, %v14123_v20  ;;  %v14339_v29 = vpop.permute.xlu0 %4377 }
 0x42a   : > { %5012 = vst [vmem:[#allocation2 + $0x54] sm:$0xf] %v4789_v12  ;;  %v6658_v41 = vrot.slane %v6656_v56, 2  ;;  %v6663_v0 = vrot.slane %v6661_v25, 1  ;;  %v6666_v51 = vrot.slane %v6664_v23, 2  ;;  %11476 = vmatprep.subr.bf16.mxu1 %v12761_v7  ;;  %v4213_v2 = vadd.f32 %v14123_v20, %v14231_v46  ;;  %v12759_v23 = vld [vmem:[#allocation2 + $0x18] sm:$0xff]  }
 0x42b   : > { %v4768_v36 = vor.u32 %v4767_v33, %v4764_v9  ;;  %v4216_v52 = vadd.f32 %v14235_v59, %v14123_v20  ;;  %v5217_v30 = vshrl.u32 %v14264_v48, 16  ;;  %v4251_v56 = vmax.f32 %v4215_v49, 0.0  ;;  %v14337_v12 = vpop.f32.mrb[32].mxu0  ;;  %15597 = vst [vmem:[#allocation41_spill] sm:$0xff] %v14339_v29  ;;  %v14343_v59 = vpop.permute.xlu1 %4382 }
 0x42c   : > { %v6659_v44 = vor.u32 %v6658_v41, %v6655_v15  ;;  %v14334_v5 = vor.u32 %v6666_v51, %v6663_v0  ;;  %v5221_v25 = vshll.u32 %v14320_v55, 16  ;;  %v4249_v33 = vmax.f32 %v4213_v2, 0.0  ;;  %15598 = vst [vmem:[#allocation42_spill] sm:$0xff] %v14343_v59  ;;  %v12771_v51 = vld [vmem:[#allocation8 + $0x18] sm:$0xff]   ;;  %v14350_v49 = vpop.f32.mrb[33].mxu0 }
 0x42d   : > { %v4769_v9 = vsel %vm14157_vm11, %v4760_v62, %v4768_v36  ;;  %v4770_v46 = vrot.slane %v4768_v36, 4  ;;  %v4252_v31 = vmax.f32 %v4216_v52, 0.0  ;;  %11477 = vmatpush3.bf16.msra.mxu1 %v12761_v7  ;;  %v4467_v15 = vmul.f32 %v14339_v29, %v4251_v56  ;;  %v14360_v52 = vpop.f32.mrb[34].mxu0  ;;  %v14365_v29 = vld [vmem:[#allocation2 + $0x20] sm:$0xff]  }
 0x42e   : > { %5010 = vst [vmem:[#allocation2 + $0x4c] sm:$0xf] %v4769_v9  ;;  %v14347_v48 = vsel %vm2126_vm2, %v6659_v44, %v14334_v5  ;;  %v5219_v41 = vor.u32 %v5217_v30, %v5215_v28  ;;  %v5223_v0 = vrot.slane %v5221_v25, 1  ;;  %11478 = vmatprep.subr.bf16.mxu1 %v12766_v14  ;;  %v4465_v7 = vmul.f32 %v14311_v35, %v4249_v33  ;;  %v14363_v25 = vpop.f32.mrb[35].mxu0  ;;  %v12762_v35 = vld [vmem:[#allocation2 + $0x20] sm:$0xff]  }
 0x42f   : > { %15599 = vst [vmem:[#allocation43_spill] sm:$0xff] %v14347_v48  ;;  %v4779_v62 = vsel %vm14157_vm11, %v4770_v46, %v14295_v39  ;;  %8823 = vxpose.xlu1.c.b16.start [1/8] %v14347_v48, 128  ;;  %v4468_v36 = vmul.f32 %v14343_v59, %v4252_v31  ;;  %v4214_v2 = vadd.f32 %v14123_v20, %v14239_v24  ;;  %v6670_v44 = vshrl.u32 %v12759_v23, 16  ;;  %v12777_v39 = vld [vmem:[#allocation8 + $0x20] sm:$0xff]  }
 0x430   : > { %5011 = vst [vmem:[#allocation2 + $0x50] sm:$0xf] %v4779_v62  ;;  %v10235_v28 = vpack.c.bf16 %v4467_v15, %v4467_v15  ;;  %v5224_v30 = vsel %vm669_vm0, %v5219_v41, %v5223_v0  ;;  %v6673_v56 = vshll.u32 %v12759_v23, 16  ;;  %v10233_v9 = vpack.c.bf16 %v4465_v7, %v4465_v7 }
 0x431   : > { %v10236_v46 = vpack.c.bf16 %v4468_v36, %v4468_v36  ;;  %11442 = vmatprep.mubr.bf16.mxu1 %v5224_v30  ;;  %v4250_v33 = vmax.f32 %v4214_v2, 0.0  ;;  %v5225_v31 = vshrl.u32 %v14320_v55, 16  ;;  %11479 = vmatpush3.bf16.msra.mxu1 %v12766_v14  ;;  %v6672_v62 = vrot.slane %v6670_v44, 1  ;;  %v14371_v30 = vpop.permute.xlu0 %4387 }
 0x432   : > { %v4812_v24 = vshrl.u32 %v10235_v28, 16  ;;  %v4815_v59 = vshll.u32 %v10235_v28, 16  ;;  %v6675_v15 = vrot.slane %v6673_v56, 2  ;;  %11480 = vmatprep.subr.bf16.mxu1 %v12771_v51  ;;  %v4792_v41 = vshrl.u32 %v10233_v9, 16  ;;  %15600 = vst [vmem:[#allocation44_spill] sm:$0xff] %v14371_v30 }
 0x433   : > { %v4795_v23 = vshll.u32 %v10233_v9, 16  ;;  %v4822_v3 = vshrl.u32 %v10236_v46, 16  ;;  %v4825_v26 = vshll.u32 %v10236_v46, 16  ;;  %v4466_v36 = vmul.f32 %v14317_v8, %v4250_v33 }
 0x434   : > { %v4814_v32 = vrot.slane %v4812_v24, 6  ;;  %v4817_v7 = vrot.slane %v4815_v59, 7  ;;  %v14369_v2 = vor.u32 %v6675_v15, %v6672_v62  ;;  %v4794_v55 = vrot.slane %v4792_v41, 6  ;;  %v12782_v59 = vld [vmem:[#allocation8 + $0x28] sm:$0xff]   ;;  %v14384_v41 = vpop.permute.xlu1 %4392 }
 0x435   : > { %v4797_v14 = vrot.slane %v4795_v23, 7  ;;  %v4824_v58 = vrot.slane %v4822_v3, 6  ;;  %v4827_v28 = vrot.slane %v4825_v26, 7  ;;  %11481 = vmatpush3.bf16.msra.mxu1 %v12771_v51  ;;  %v10234_v56 = vpack.c.bf16 %v4466_v36, %v4466_v36  ;;  %15602 = vst [vmem:[#allocation46_spill] sm:$0xff] %v14384_v41 }
 0x436   : > { %v4818_v44 = vor.u32 %v4817_v7, %v4814_v32  ;;  %v14376_v9 = vsel %vm2126_vm2, %v14334_v5, %v14369_v2  ;;  %v5227_v46 = vor.u32 %v5225_v31, %v5223_v0  ;;  %11482 = vmatprep.subr.bf16.mxu1 %v12777_v39  ;;  %v5229_v62 = vshll.u32 %v14365_v29, 16  ;;  %v14391_v7 = vld [vmem:[#allocation2 + $0x28] sm:$0xff]  }
 0x437   : > { %15601 = vst [vmem:[#allocation45_spill] sm:$0xff] %v14376_v9  ;;  %v4798_v33 = vor.u32 %v4797_v14, %v4794_v55  ;;  %v14378_v24 = vor.u32 %v4827_v28, %v4824_v58  ;;  %8824 = vxpose.xlu1.c.b16.cont [2/8] %v14376_v9, 128  ;;  %v4219_v26 = vadd.f32 %v14270_v54, %v14123_v20  ;;  %v4802_v3 = vshrl.u32 %v10234_v56, 16  ;;  %v14396_v28 = vpop.permute.xlu0 %4397 }
 0x438   : > { %v4820_v32 = vrot.slane %v4818_v44, 4  ;;  %v4805_v51 = vshll.u32 %v10234_v56, 16  ;;  %v6679_v15 = vshrl.u32 %v12762_v35, 16  ;;  %v15603_v5 = vrot.slane %v14313_v16, 4  ;;  %v12788_v16 = vld [vmem:[#allocation8 + $0x30] sm:$0xff]   ;;  %15604 = vst [vmem:[#allocation47_spill] sm:$0xff] %v14396_v28 }
 0x439   : > { %v4800_v58 = vrot.slane %v4798_v33, 4  ;;  %v5231_v23 = vrot.slane %v5229_v62, 1  ;;  %11483 = vmatpush3.bf16.msra.mxu1 %v12777_v39  ;;  %v4804_v36 = vrot.slane %v4802_v3, 6  ;;  %v4255_v14 = vmax.f32 %v4219_v26, 0.0 }
 0x43a   : > { %v4799_v0 = vsel %vm14157_vm11, %v15603_v5, %v4798_v33  ;;  %v4829_v54 = vsel %vm14157_vm11, %v4820_v32, %v14378_v24  ;;  %v4807_v55 = vrot.slane %v4805_v51, 7  ;;  %11484 = vmatprep.subr.bf16.mxu1 %v12782_v59  ;;  %v6681_v33 = vrot.slane %v6679_v15, 1 }
 0x43b   : > { %5013 = vst [vmem:[#allocation2 + $0x58] sm:$0xf] %v4799_v0  ;;  %5016 = vst [vmem:[#allocation2 + $0x64] sm:$0xf] %v4829_v54  ;;  %v5232_v56 = vsel %vm669_vm0, %v5227_v46, %v5231_v23  ;;  %v6682_v62 = vshll.u32 %v12762_v35, 16  ;;  %v4217_v39 = vadd.f32 %v14123_v20, %v14278_v60  ;;  %v4471_v0 = vmul.f32 %v14396_v28, %v4255_v14  ;;  %v14410_v14 = vpop.permute.xlu1 %4402 }
 0x43c   : > { %v4808_v5 = vor.u32 %v4807_v55, %v4804_v36  ;;  %11443 = vmatmul.mubr.bf16.gmra.mrb[4].mxu1 %v5232_v56  ;;  %v4220_v32 = vadd.f32 %v14280_v1, %v14123_v20  ;;  %v5233_v26 = vshrl.u32 %v14365_v29, 16  ;;  %v5237_v54 = vshll.u32 %v14391_v7, 16  ;;  %v12764_v55 = vld [vmem:[#allocation2 + $0x28] sm:$0xff]   ;;  %15605 = vst [vmem:[#allocation48_spill] sm:$0xff] %v14410_v14 }
 0x43d   : > { %v6684_v3 = vrot.slane %v6682_v62, 2  ;;  %v4253_v51 = vmax.f32 %v4217_v39, 0.0  ;;  %v4218_v46 = vadd.f32 %v14123_v20, %v14285_v18  ;;  %11485 = vmatpush3.bf16.msra.mxu1 %v12782_v59  ;;  %v10239_v15 = vpack.c.bf16 %v4471_v0, %v4471_v0  ;;  %v12793_v39 = vld [vmem:[#allocation8 + $0x38] sm:$0xff]  }
 0x43e   : > { %v4809_v60 = vsel %vm14157_vm11, %v4800_v58, %v4808_v5  ;;  %v4810_v35 = vrot.slane %v4808_v5, 4  ;;  %v4256_v36 = vmax.f32 %v4220_v32, 0.0  ;;  %11486 = vmatprep.subr.bf16.mxu1 %v12788_v16  ;;  %v5235_v56 = vor.u32 %v5233_v26, %v5231_v23 }
 0x43f   : > { %5014 = vst [vmem:[#allocation2 + $0x5c] sm:$0xf] %v4809_v60  ;;  %v6685_v1 = vor.u32 %v6684_v3, %v6681_v33  ;;  %v4469_v29 = vmul.f32 %v14371_v30, %v4253_v51  ;;  %v5239_v62 = vrot.slane %v5237_v54, 1  ;;  %v4852_v18 = vshrl.u32 %v10239_v15, 16  ;;  %v14422_v51 = vld [vmem:[#allocation8 + $0x80] sm:$0xff]  }
 0x440   : > { %v4819_v20 = vsel %vm14157_vm11, %v4810_v35, %v4818_v44  ;;  %v4855_v59 = vshll.u32 %v10239_v15, 16  ;;  %v4472_v58 = vmul.f32 %v14410_v14, %v4256_v36  ;;  %v4254_v32 = vmax.f32 %v4218_v46, 0.0 }
 0x441   : > { %5015 = vst [vmem:[#allocation2 + $0x60] sm:$0xf] %v4819_v20  ;;  %v14418_v5 = vsel %vm2126_vm2, %v14369_v2, %v6685_v1  ;;  %v10237_v0 = vpack.c.bf16 %v4469_v29, %v4469_v29  ;;  %v5240_v33 = vsel %vm669_vm0, %v5235_v56, %v5239_v62  ;;  %11487 = vmatpush3.bf16.msra.mxu1 %v12788_v16  ;;  %v4854_v23 = vrot.slane %v4852_v18, 6  ;;  %v14425_v16 = vld [vmem:[#allocation2 + $0x30] sm:$0xff]  }
 0x442   : > { %15606 = vst [vmem:[#allocation49_spill] sm:$0xff] %v14418_v5  ;;  %v4857_v26 = vrot.slane %v4855_v59, 7  ;;  %8825 = vxpose.xlu1.c.b16.cont [3/8] %v14418_v5, 128  ;;  %v10240_v3 = vpack.c.bf16 %v4472_v58, %v4472_v58  ;;  %11446 = vmatprep.mubr.bf16.mxu1 %v5240_v33  ;;  %v6688_v44 = vshrl.u32 %v12764_v55, 16  ;;  %v4470_v35 = vmul.f32 %v14384_v41, %v4254_v32  ;;  %v14427_v58 = vpop.permute.xlu0 %4407 }
 0x443   : > { %v4832_v54 = vshrl.u32 %v10237_v0, 16  ;;  %v4835_v60 = vshll.u32 %v10237_v0, 16  ;;  %v6691_v2 = vshll.u32 %v12764_v55, 16  ;;  %11488 = vmatprep.subr.bf16.mxu1 %v12793_v39  ;;  %15607 = vst [vmem:[#allocation50_spill] sm:$0xff] %v14427_v58  ;;  %v5241_v32 = vshrl.u32 %v14391_v7, 16 }
 0x444   : > { %v4858_v15 = vor.u32 %v4857_v26, %v4854_v23  ;;  %v4862_v36 = vshrl.u32 %v10240_v3, 16  ;;  %v4865_v29 = vshll.u32 %v10240_v3, 16  ;;  %v6690_v46 = vrot.slane %v6688_v44, 1  ;;  %v12767_v44 = vld [vmem:[#allocation2 + $0x30] sm:$0xff]  }
 0x445   : > { %v4834_v56 = vrot.slane %v4832_v54, 6  ;;  %v4837_v20 = vrot.slane %v4835_v60, 7  ;;  %v10238_v18 = vpack.c.bf16 %v4470_v35, %v4470_v35  ;;  %v6693_v59 = vrot.slane %v6691_v2, 2  ;;  %11489 = vmatpush3.bf16.msra.mxu1 %v12793_v39  ;;  %v14437_v39 = vld [vmem:[%s15467_s2] ss:$0 sm:$0xff]  ;;  %v14441_v35 = vpop.permute.xlu1 %4412 }
 0x446   : > { %v4860_v33 = vrot.slane %v4858_v15, 4  ;;  %v4864_v31 = vrot.slane %v4862_v36, 6  ;;  %v4867_v0 = vrot.slane %v4865_v29, 7  ;;  %11526 = vmatprep.subr.bf16.mxu1 %v14422_v51  ;;  %v5243_v54 = vor.u32 %v5241_v32, %v5239_v62  ;;  %15608 = vst [vmem:[#allocation51_spill] sm:$0xff] %v14441_v35  ;;  %v14455_v32 = vld [vmem:[#allocation2 + $0x38] sm:$0xff]  }
 0x447   : > { %v4838_v55 = vor.u32 %v4837_v20, %v4834_v56  ;;  %v4842_v23 = vshrl.u32 %v10238_v18, 16  ;;  %v4845_v26 = vshll.u32 %v10238_v18, 16  ;;  %v6694_v3 = vor.u32 %v6693_v59, %v6690_v46 }
 0x448   : > { %v14431_v41 = vor.u32 %v4867_v0, %v4864_v31  ;;  %v5245_v60 = vshll.u32 %v14425_v16, 16  ;;  %v4223_v7 = vadd.f32 %v14437_v39, %v14293_v43  ;;  %v15609_v2 = vrot.slane %v14378_v24, 4 }
 0x449   : > { %v4840_v31 = vrot.slane %v4838_v55, 4  ;;  %v4844_v29 = vrot.slane %v4842_v23, 6  ;;  %v4847_v62 = vrot.slane %v4845_v26, 7  ;;  %v14452_v20 = vsel %vm2126_vm2, %v6685_v1, %v6694_v3 }
 0x44a   : > { %v4839_v36 = vsel %vm14157_vm11, %v15609_v2, %v4838_v55  ;;  %v4869_v46 = vsel %vm14157_vm11, %v4860_v33, %v14431_v41  ;;  %15610 = vst [vmem:[#allocation52_spill] sm:$0xff] %v14452_v20  ;;  %v5247_v43 = vrot.slane %v5245_v60, 1  ;;  %8826 = vxpose.xlu1.c.b16.cont [4/8] %v14452_v20, 128  ;;  %v4259_v24 = vmax.f32 %v4223_v7, 0.0  ;;  %v14457_v55 = vpop.permute.xlu0 %4417  ;;  %v12769_v60 = vld [vmem:[#allocation2 + $0x38] sm:$0xff]  }
 0x44b   : > { %5017 = vst [vmem:[#allocation2 + $0x68] sm:$0xf] %v4839_v36  ;;  %5020 = vst [vmem:[#allocation2 + $0x74] sm:$0xf] %v4869_v46  ;;  %v4848_v18 = vor.u32 %v4847_v62, %v4844_v29  ;;  %v6697_v59 = vshrl.u32 %v12767_v44, 16  ;;  %v6700_v0 = vshll.u32 %v12767_v44, 16  ;;  %v4221_v33 = vadd.f32 %v14437_v39, %v14297_v34  ;;  %v14468_v34 = vpop.permute.xlu1 %4422 }
 0x44c   : > { %15611 = vst [vmem:[#allocation53_spill] sm:$0xff] %v14457_v55  ;;  %v5248_v23 = vsel %vm669_vm0, %v5243_v54, %v5247_v43  ;;  %v4224_v1 = vadd.f32 %v14437_v39, %v14304_v27  ;;  %v5249_v26 = vshrl.u32 %v14425_v16, 16  ;;  %v4475_v44 = vmul.f32 %v14457_v55, %v4259_v24  ;;  %15612 = vst [vmem:[#allocation54_spill] sm:$0xff] %v14468_v34 }
 0x44d   : > { %v4849_v7 = vsel %vm14157_vm11, %v4840_v31, %v4848_v18  ;;  %v4850_v2 = vrot.slane %v4848_v18, 4  ;;  %11447 = vmatmul.mubr.bf16.gmra.mrb[8].mxu1 %v5248_v23  ;;  %v6699_v36 = vrot.slane %v6697_v59, 1  ;;  %v6702_v29 = vrot.slane %v6700_v0, 2 }
 0x44e   : > { %5018 = vst [vmem:[#allocation2 + $0x6c] sm:$0xf] %v4849_v7  ;;  %v4257_v54 = vmax.f32 %v4221_v33, 0.0  ;;  %v4260_v62 = vmax.f32 %v4224_v1, 0.0  ;;  %v5251_v46 = vor.u32 %v5249_v26, %v5247_v43  ;;  %v10243_v56 = vpack.c.bf16 %v4475_v44, %v4475_v44  ;;  %v14480_v44 = vld [vmem:[#allocation2 + $0x40] sm:$0xff]  }
 0x44f   : > { %v4859_v27 = vsel %vm14157_vm11, %v4850_v2, %v4858_v15  ;;  %v5253_v14 = vshll.u32 %v14455_v32, 16  ;;  %v4222_v31 = vadd.f32 %v14437_v39, %v14309_v4  ;;  %v6703_v18 = vor.u32 %v6702_v29, %v6699_v36 }
 0x450   : > { %5019 = vst [vmem:[#allocation2 + $0x70] sm:$0xf] %v4859_v27  ;;  %v4473_v24 = vmul.f32 %v14427_v58, %v4257_v54  ;;  %v4476_v59 = vmul.f32 %v14468_v34, %v4260_v62  ;;  %v6706_v0 = vshrl.u32 %v12769_v60, 16  ;;  %v4892_v23 = vshrl.u32 %v10243_v56, 16 }
 0x451   : > { %v4895_v43 = vshll.u32 %v10243_v56, 16  ;;  %v5255_v33 = vrot.slane %v5253_v14, 1  ;;  %v4258_v1 = vmax.f32 %v4222_v31, 0.0  ;;  %v14478_v26 = vsel %vm2126_vm2, %v6694_v3, %v6703_v18 }
 0x452   : > { %15613 = vst [vmem:[#allocation55_spill] sm:$0xff] %v14478_v26  ;;  %v10241_v15 = vpack.c.bf16 %v4473_v24, %v4473_v24  ;;  %v10244_v7 = vpack.c.bf16 %v4476_v59, %v4476_v59  ;;  %v6708_v2 = vrot.slane %v6706_v0, 1  ;;  %v4894_v4 = vrot.slane %v4892_v23, 6  ;;  %8827 = vxpose.xlu1.c.b16.cont [5/8] %v14478_v26, 128  ;;  %v14486_v0 = vpop.permute.xlu0 %4427 }
 0x453   : > { %v4897_v27 = vrot.slane %v4895_v43, 7  ;;  %v5256_v36 = vsel %vm669_vm0, %v5251_v46, %v5255_v33  ;;  %v4474_v29 = vmul.f32 %v14441_v35, %v4258_v1  ;;  %v6709_v24 = vshll.u32 %v12769_v60, 16  ;;  %15614 = vst [vmem:[#allocation56_spill] sm:$0xff] %v14486_v0  ;;  %v14493_v60 = vpop.permute.xlu1 %4432 }
 0x454   : > { %v4872_v54 = vshrl.u32 %v10241_v15, 16  ;;  %v4875_v56 = vshll.u32 %v10241_v15, 16  ;;  %v4902_v14 = vshrl.u32 %v10244_v7, 16  ;;  %v4905_v62 = vshll.u32 %v10244_v7, 16  ;;  %11450 = vmatprep.mubr.bf16.mxu1 %v5256_v36  ;;  %15615 = vst [vmem:[#allocation57_spill] sm:$0xff] %v14493_v60 }
 0x455   : > { %v4898_v3 = vor.u32 %v4897_v27, %v4894_v4  ;;  %v10242_v31 = vpack.c.bf16 %v4474_v29, %v4474_v29  ;;  %v5257_v59 = vshrl.u32 %v14455_v32, 16  ;;  %v6711_v1 = vrot.slane %v6709_v24, 2  ;;  %v14491_v27 = vld [vmem:[#allocation2 + $0x40] sm:$0xff]   ;;  %v14508_v24 = vld [vmem:[#allocation2 + $0x48] sm:$0xff]  }
 0x456   : > { %v4874_v23 = vrot.slane %v4872_v54, 6  ;;  %v4877_v43 = vrot.slane %v4875_v56, 7  ;;  %v4904_v34 = vrot.slane %v4902_v14, 6  ;;  %v4907_v55 = vrot.slane %v4905_v62, 7 }
 0x457   : > { %v4900_v58 = vrot.slane %v4898_v3, 4  ;;  %v4882_v46 = vshrl.u32 %v10242_v31, 16  ;;  %v4885_v28 = vshll.u32 %v10242_v31, 16  ;;  %v5259_v7 = vor.u32 %v5257_v59, %v5255_v33  ;;  %v14538_v33 = vld [vmem:[#allocation2 + $0x50] sm:$0xff]  }
 0x458   : > { %v4878_v35 = vor.u32 %v4877_v43, %v4874_v23  ;;  %v14488_v15 = vor.u32 %v4907_v55, %v4904_v34  ;;  %v5261_v4 = vshll.u32 %v14480_v44, 16  ;;  %v6712_v54 = vor.u32 %v6711_v1, %v6708_v2 }
 0x459   : > { %v4884_v36 = vrot.slane %v4882_v46, 6  ;;  %v4887_v29 = vrot.slane %v4885_v28, 7  ;;  %v4227_v56 = vadd.f32 %v14437_v39, %v14337_v12  ;;  %v15616_v14 = vrot.slane %v14431_v41, 4  ;;  %v14510_v41 = vpop.permute.xlu0 %4437 }
 0x45a   : > { %v4880_v55 = vrot.slane %v4878_v35, 4  ;;  %v4909_v34 = vsel %vm14157_vm11, %v4900_v58, %v14488_v15  ;;  %v14506_v28 = vsel %vm2126_vm2, %v6703_v18, %v6712_v54  ;;  %v5263_v2 = vrot.slane %v5261_v4, 1  ;;  %15618 = vst [vmem:[#allocation59_spill] sm:$0xff] %v14510_v41 }
 0x45b   : > { %v4879_v62 = vsel %vm14157_vm11, %v15616_v14, %v4878_v35  ;;  %5024 = vst [vmem:[#allocation2 + $0x84] sm:$0xf] %v4909_v34  ;;  %v4888_v31 = vor.u32 %v4887_v29, %v4884_v36  ;;  %15617 = vst [vmem:[#allocation58_spill] sm:$0xff] %v14506_v28  ;;  %v4263_v12 = vmax.f32 %v4227_v56, 0.0  ;;  %8828 = vxpose.xlu1.c.b16.cont [6/8] %v14506_v28, 128  ;;  %v6715_v35 = vshrl.u32 %v14491_v27, 16  ;;  %v14523_v14 = vpop.permute.xlu1 %4442 }
 0x45c   : > { %5021 = vst [vmem:[#allocation2 + $0x78] sm:$0xf] %v4879_v62  ;;  %v6718_v58 = vshll.u32 %v14491_v27, 16  ;;  %v4225_v59 = vadd.f32 %v14437_v39, %v14350_v49  ;;  %v4228_v23 = vadd.f32 %v14437_v39, %v14360_v52  ;;  %v5264_v46 = vsel %vm669_vm0, %v5259_v7, %v5263_v2  ;;  %15619 = vst [vmem:[#allocation60_spill] sm:$0xff] %v14523_v14  ;;  %v14529_v7 = vld [vmem:[#allocation2 + $0x48] sm:$0xff]  }
 0x45d   : > { %v4889_v18 = vsel %vm14157_vm11, %v4880_v55, %v4888_v31  ;;  %v4890_v43 = vrot.slane %v4888_v31, 4  ;;  %v4479_v1 = vmul.f32 %v14510_v41, %v4263_v12  ;;  %11451 = vmatmul.mubr.bf16.gmra.mrb[12].mxu1 %v5264_v46  ;;  %v6717_v4 = vrot.slane %v6715_v35, 1 }
 0x45e   : > { %5022 = vst [vmem:[#allocation2 + $0x7c] sm:$0xf] %v4889_v18  ;;  %v6720_v36 = vrot.slane %v6718_v58, 2  ;;  %v4261_v29 = vmax.f32 %v4225_v59, 0.0  ;;  %v4264_v56 = vmax.f32 %v4228_v23, 0.0  ;;  %v5265_v62 = vshrl.u32 %v14480_v44, 16 }
 0x45f   : > { %v4899_v49 = vsel %vm14157_vm11, %v4890_v43, %v4898_v3  ;;  %v10247_v52 = vpack.c.bf16 %v4479_v1, %v4479_v1  ;;  %v5269_v55 = vshll.u32 %v14508_v24, 16  ;;  %v4226_v35 = vadd.f32 %v14437_v39, %v14363_v25  ;;  %v14543_v39 = vld [vmem:[#allocation2 + $0x50] sm:$0xff]  }
 0x460   : > { %5023 = vst [vmem:[#allocation2 + $0x80] sm:$0xf] %v4899_v49  ;;  %v6721_v34 = vor.u32 %v6720_v36, %v6717_v4  ;;  %v4477_v31 = vmul.f32 %v14486_v0, %v4261_v29  ;;  %v4480_v12 = vmul.f32 %v14523_v14, %v4264_v56  ;;  %v5267_v23 = vor.u32 %v5265_v62, %v5263_v2  ;;  %v5031_v14 = vld [vmem:[#allocation2 + $0x98] sm:$0x3] }
 0x461   : > { %v4932_v58 = vshrl.u32 %v10247_v52, 16  ;;  %v4935_v59 = vshll.u32 %v10247_v52, 16  ;;  %v5271_v3 = vrot.slane %v5269_v55, 1  ;;  %v4262_v1 = vmax.f32 %v4226_v35, 0.0 }
 0x462   : > { %v14536_v18 = vsel %vm2126_vm2, %v6712_v54, %v6721_v34  ;;  %v10245_v43 = vpack.c.bf16 %v4477_v31, %v4477_v31  ;;  %v10248_v46 = vpack.c.bf16 %v4480_v12, %v4480_v12  ;;  %v6724_v25 = vshrl.u32 %v14529_v7, 16 }
 0x463   : > { %15620 = vst [vmem:[#allocation61_spill] sm:$0xff] %v14536_v18  ;;  %v4934_v4 = vrot.slane %v4932_v58, 6  ;;  %v4937_v36 = vrot.slane %v4935_v59, 7  ;;  %8829 = vxpose.xlu1.c.b16.cont [7/8] %v14536_v18, 128  ;;  %v5272_v29 = vsel %vm669_vm0, %v5267_v23, %v5271_v3  ;;  %v4478_v62 = vmul.f32 %v14493_v60, %v4262_v1 }
 0x464   : > { %v4912_v2 = vshrl.u32 %v10245_v43, 16  ;;  %v4915_v56 = vshll.u32 %v10245_v43, 16  ;;  %v4942_v49 = vshrl.u32 %v10248_v46, 16  ;;  %v4945_v54 = vshll.u32 %v10248_v46, 16  ;;  %11454 = vmatprep.mubr.bf16.mxu1 %v5272_v29 }
 0x465   : > { %v14545_v52 = vor.u32 %v4937_v36, %v4934_v4  ;;  %v6726_v55 = vrot.slane %v6724_v25, 1  ;;  %v6727_v31 = vshll.u32 %v14529_v7, 16  ;;  %v10246_v41 = vpack.c.bf16 %v4478_v62, %v4478_v62  ;;  %v14553_v36 = vld [vmem:[#allocation2 + $0x58] sm:$0xff]  }
 0x466   : > { %v4914_v12 = vrot.slane %v4912_v2, 6  ;;  %v4917_v35 = vrot.slane %v4915_v56, 7  ;;  %v4944_v58 = vrot.slane %v4942_v49, 6  ;;  %v4947_v59 = vrot.slane %v4945_v54, 7  ;;  %v14555_v25 = vld [vmem:[#allocation2 + $0x58] sm:$0xff]  }
 0x467   : > { %v4940_v23 = vrot.slane %v14545_v52, 4  ;;  %v6729_v0 = vrot.slane %v6727_v31, 2  ;;  %v5273_v43 = vshrl.u32 %v14508_v24, 16  ;;  %v5277_v4 = vshll.u32 %v14538_v33, 16  ;;  %v14629_v40 = vld [vmem:[#allocation2 + $0x80] sm:$0xff]  }
 0x468   : > { %v4918_v46 = vor.u32 %v4917_v35, %v4914_v12  ;;  %v4948_v29 = vor.u32 %v4947_v59, %v4944_v58  ;;  %v6733_v1 = vshrl.u32 %v14543_v39, 16  ;;  %v4922_v2 = vshrl.u32 %v10246_v41, 16 }
 0x469   : > { %v4925_v56 = vshll.u32 %v10246_v41, 16  ;;  %v6730_v49 = vor.u32 %v6729_v0, %v6726_v55  ;;  %v5275_v54 = vor.u32 %v5273_v43, %v5271_v3  ;;  %v15621_v62 = vrot.slane %v14488_v15, 4  ;;  %v14571_v43 = vld [vmem:[#allocation2 + $0x60] sm:$0xff]  }
 0x46a   : > { %v4920_v12 = vrot.slane %v4918_v46, 4  ;;  %v4949_v35 = vsel %vm14157_vm11, %v4940_v23, %v4948_v29  ;;  %v4950_v58 = vrot.slane %v4948_v29, 4  ;;  %v4924_v59 = vrot.slane %v4922_v2, 6  ;;  %v14573_v23 = vld [vmem:[#allocation2 + $0x60] sm:$0xff]  }
 0x46b   : > { %v4919_v31 = vsel %vm14157_vm11, %v15621_v62, %v4918_v46  ;;  %5028 = vst [vmem:[#allocation2 + $0x94] sm:$0xf] %v4949_v35  ;;  %v4927_v60 = vrot.slane %v4925_v56, 7  ;;  %v14566_v30 = vsel %vm2126_vm2, %v6721_v34, %v6730_v49  ;;  %v5279_v41 = vrot.slane %v5277_v4, 1 }
 0x46c   : > { %5025 = vst [vmem:[#allocation2 + $0x88] sm:$0xf] %v4919_v31  ;;  %15622 = vst [vmem:[#allocation62_spill] sm:$0xff] %v14566_v30  ;;  %v5032_v0 = vsel %vm5030_vm13, %v4950_v58, %v5031_v14  ;;  %8830 = vxpose.xlu1.c.b16.end [8/8] %v14566_v30, 128  ;;  %v6735_v15 = vrot.slane %v6733_v1, 1  ;;  %v6736_v3 = vshll.u32 %v14543_v39, 16  ;;  %v5281_v55 = vshrl.u32 %v14538_v33, 16 }
 0x46d   : > { %5033 = vst [vmem:[#allocation2 + $0x98] sm:$0x3] %v5032_v0  ;;  %v4928_v46 = vor.u32 %v4927_v60, %v4924_v59  ;;  %v5280_v29 = vsel %vm669_vm0, %v5275_v54, %v5279_v41  ;;  %v5285_v34 = vshll.u32 %v14553_v36, 16  ;;  %v6742_v4 = vshrl.u32 %v14555_v25, 16  ;;  %v14582_v60 = vld [vmem:[#allocation2 + $0x68] sm:$0xff]  }
 0x46e   : > { %11455 = vmatmul.mubr.bf16.gmra.mrb[16].mxu1 %v5280_v29  ;;  %v6738_v14 = vrot.slane %v6736_v3, 2  ;;  %v5283_v2 = vor.u32 %v5281_v55, %v5279_v41  ;;  %v6745_v1 = vshll.u32 %v14555_v25, 16  ;;  %v5289_v56 = vshrl.u32 %v14553_v36, 16  ;;  %v14584_v54 = vld [vmem:[#allocation2 + $0x68] sm:$0xff]  }
 0x46f   : > { %v4929_v62 = vsel %vm14157_vm11, %v4920_v12, %v4928_v46  ;;  %v4930_v31 = vrot.slane %v4928_v46, 4  ;;  %v5287_v35 = vrot.slane %v5285_v34, 1  ;;  %v6744_v58 = vrot.slane %v6742_v4, 1  ;;  %v14593_v34 = vld [vmem:[#allocation2 + $0x70] sm:$0xff]  }
 0x470   : > { %5026 = vst [vmem:[#allocation2 + $0x8c] sm:$0xf] %v4929_v62  ;;  %v6739_v59 = vor.u32 %v6738_v14, %v6735_v15  ;;  %v6747_v0 = vrot.slane %v6745_v1, 2  ;;  %v5293_v3 = vshll.u32 %v14571_v43, 16  ;;  %v6751_v41 = vshrl.u32 %v14573_v23, 16  ;;  %v14595_v4 = vld [vmem:[#allocation2 + $0x70] sm:$0xff]  }
 0x471   : > { %v4939_v55 = vsel %vm14157_vm11, %v4930_v31, %v14545_v52  ;;  %v5288_v12 = vsel %vm669_vm0, %v5283_v2, %v5287_v35  ;;  %v5291_v46 = vor.u32 %v5289_v56, %v5287_v35  ;;  %v6754_v29 = vshll.u32 %v14573_v23, 16 }
 0x472   : > { %5027 = vst [vmem:[#allocation2 + $0x90] sm:$0xf] %v4939_v55  ;;  %v14598_v15 = vsel %vm2126_vm2, %v6730_v49, %v6739_v59  ;;  %11458 = vmatprep.mubr.bf16.mxu1 %v5288_v12  ;;  %v6748_v14 = vor.u32 %v6747_v0, %v6744_v58  ;;  %v5295_v1 = vrot.slane %v5293_v3, 1  ;;  %v6753_v62 = vrot.slane %v6751_v41, 1  ;;  %v14613_v12 = vld [vmem:[#allocation2 + $0x78] sm:$0xff]  }
 0x473   : > { %15623 = vst [vmem:[#allocation63_spill] sm:$0xff] %v14598_v15  ;;  %8839 = vxpose.xlu0.c.b16.start [1/8] %v14598_v15, 128  ;;  %10806 = vmatprep.subr.bf16.mxu0 %v14598_v15  ;;  %v6756_v57 = vrot.slane %v6754_v29, 2  ;;  %v5297_v52 = vshrl.u32 %v14571_v43, 16  ;;  %v5301_v2 = vshll.u32 %v14582_v60, 16  ;;  %v6760_v56 = vshrl.u32 %v14584_v54, 16  ;;  %v14615_v29 = vld [vmem:[#allocation2 + $0x78] sm:$0xff]  }
 0x474   : > { %10807 = vmatpush3.bf16.msra.mxu0 %v14347_v48  ;;  %v14607_v49 = vsel %vm2126_vm2, %v6739_v59, %v6748_v14  ;;  %v5296_v31 = vsel %vm669_vm0, %v5291_v46, %v5295_v1  ;;  %v6763_v35 = vshll.u32 %v14584_v54, 16  ;;  %v5305_v58 = vshrl.u32 %v14582_v60, 16 }
 0x475   : > { %15624 = vst [vmem:[#allocation64_spill] sm:$0xff] %v14607_v49  ;;  %10808 = vmatprep.subr.bf16.mxu0 %v14607_v49  ;;  %v6757_v0 = vor.u32 %v6756_v57, %v6753_v62  ;;  %v5299_v3 = vor.u32 %v5297_v52, %v5295_v1  ;;  %v5303_v41 = vrot.slane %v5301_v2, 1  ;;  %v6762_v55 = vrot.slane %v6760_v56, 1  ;;  %v14626_v52 = vld [vmem:[#allocation2 + $0x80] sm:$0xff]  }
 0x476   : > { %11459 = vmatmul.mubr.bf16.gmra.mrb[20].mxu1 %v5296_v31  ;;  %v6765_v8 = vrot.slane %v6763_v35, 2  ;;  %v5309_v59 = vshll.u32 %v14593_v34, 16  ;;  %v6769_v46 = vshrl.u32 %v14595_v4, 16  ;;  %v6772_v37 = vshll.u32 %v14595_v4, 16 }
 0x477   : > { %8840 = vxpose.xlu0.c.b16.cont [2/8] %v14607_v49, 128  ;;  %v14622_v45 = vsel %vm2126_vm2, %v6748_v14, %v6757_v0  ;;  %v5304_v1 = vsel %vm669_vm0, %v5299_v3, %v5303_v41  ;;  %v5307_v62 = vor.u32 %v5305_v58, %v5303_v41  ;;  %v5313_v57 = vshrl.u32 %v14593_v34, 16 }
 0x478   : > { %15625 = vst [vmem:[#allocation65_spill] sm:$0xff] %v14622_v45  ;;  %10809 = vmatpush3.bf16.msra.mxu0 %v14376_v9  ;;  %11462 = vmatprep.mubr.bf16.mxu1 %v5304_v1  ;;  %v6766_v2 = vor.u32 %v6765_v8, %v6762_v55  ;;  %v5311_v56 = vrot.slane %v5309_v59, 1  ;;  %v6771_v31 = vrot.slane %v6769_v46, 1  ;;  %v6774_v35 = vrot.slane %v6772_v37, 2  ;;  %v14639_v55 = vld [vmem:[#allocation2 + $0x88] sm:$0xff]  }
 0x479   : > { %10810 = vmatprep.subr.bf16.mxu0 %v14622_v45  ;;  %v5317_v14 = vshll.u32 %v14613_v12, 16  ;;  %v6778_v3 = vshrl.u32 %v14615_v29, 16  ;;  %v6781_v58 = vshll.u32 %v14615_v29, 16  ;;  %v14641_v37 = vld [vmem:[#allocation2 + $0x88] sm:$0xff]   ;;  %v5325_v6 = vshll.u32 %v14626_v52, 16 }
 0x47a   : > { %v14636_v41 = vsel %vm2126_vm2, %v6757_v0, %v6766_v2  ;;  %v5312_v22 = vsel %vm669_vm0, %v5307_v62, %v5311_v56  ;;  %v6775_v1 = vor.u32 %v6774_v35, %v6771_v31  ;;  %v5315_v8 = vor.u32 %v5313_v57, %v5311_v56  ;;  %v14658_v53 = vld [vmem:[#allocation2 + $0x90] ss:$0 sps:$4 sm:$0x11]  }
 0x47b   : > { %15626 = vst [vmem:[#allocation66_spill] sm:$0xff] %v14636_v41  ;;  %8841 = vxpose.xlu0.c.b16.cont [3/8] %v14622_v45, 128  ;;  %v5319_v59 = vrot.slane %v5317_v14, 1  ;;  %v6780_v46 = vrot.slane %v6778_v3, 1  ;;  %v6783_v42 = vrot.slane %v6781_v58, 2  ;;  %v5321_v0 = vshrl.u32 %v14613_v12, 16  ;;  %v14841_v45 = vld [vmem:[#allocation2 + $0x48] sm:$0xff]  }
 0x47c   : > { %10811 = vmatpush3.bf16.msra.mxu0 %v14418_v5  ;;  %v6787_v38 = vshrl.u32 %v14629_v40, 16  ;;  %v6790_v62 = vshll.u32 %v14629_v40, 16  ;;  %v14651_v57 = vsel %vm2126_vm2, %v6766_v2, %v6775_v1  ;;  %v5327_v35 = vrot.slane %v5325_v6, 1 }
 0x47d   : > { %10812 = vmatprep.subr.bf16.mxu0 %v14636_v41  ;;  %15627 = vst [vmem:[#allocation67_spill] sm:$0xff] %v14651_v57  ;;  %v5320_v56 = vsel %vm669_vm0, %v5315_v8, %v5319_v59  ;;  %v6784_v31 = vor.u32 %v6783_v42, %v6780_v46  ;;  %v5333_v58 = vshll.u32 %v14639_v55, 16  ;;  %v6796_v19 = vshrl.u32 %v14641_v37, 16 }
 0x47e   : > { %11463 = vmatmul.mubr.bf16.gmra.mrb[24].mxu1 %v5312_v22  ;;  %v6789_v14 = vrot.slane %v6787_v38, 1  ;;  %v6792_v3 = vrot.slane %v6790_v62, 2  ;;  %v5323_v47 = vor.u32 %v5321_v0, %v5319_v59  ;;  %v6799_v50 = vshll.u32 %v14641_v37, 16  ;;  %v14666_v62 = vld [vmem:[#allocation2 + $0x90] sm:$0xff]  }
 0x47f   : > { %8842 = vxpose.xlu0.c.b16.cont [4/8] %v14636_v41, 128  ;;  %11466 = vmatprep.mubr.bf16.mxu1 %v5320_v56  ;;  %v5329_v42 = vshrl.u32 %v14626_v52, 16  ;;  %v5335_v6 = vrot.slane %v5333_v58, 1  ;;  %v14664_v38 = vsel %vm2126_vm2, %v6775_v1, %v6784_v31  ;;  %v6798_v8 = vrot.slane %v6796_v19, 1  ;;  %15629 = vst [vmem:[#allocation69_spill] sm:$0xff] %v14666_v62 }
 0x480   : > { %10813 = vmatpush3.bf16.msra.mxu0 %v14452_v20  ;;  %15628 = vst [vmem:[#allocation68_spill] sm:$0xff] %v14664_v38  ;;  %v6793_v22 = vor.u32 %v6792_v3, %v6789_v14  ;;  %v6801_v46 = vrot.slane %v6799_v50, 2  ;;  %v5328_v59 = vsel %vm669_vm0, %v5323_v47, %v5327_v35  ;;  %v5341_v0 = vshll.u32 %v14658_v53, 16  ;;  %v14671_v56 = vld [vmem:[#allocation2 + $0x98] ss:$0 sps:$4 sm:$0x33]  }
 0x481   : > { %10814 = vmatprep.subr.bf16.mxu0 %v14651_v57  ;;  %v5331_v2 = vor.u32 %v5329_v42, %v5327_v35  ;;  %v5337_v1 = vshrl.u32 %v14639_v55, 16  ;;  %v6805_v14 = vshrl.u32 %v14666_v62, 16  ;;  %v6808_v47 = vshll.u32 %v14666_v62, 16 }
 0x482   : > { %v14678_v50 = vsel %vm2126_vm2, %v6784_v31, %v6793_v22  ;;  %v6802_v19 = vor.u32 %v6801_v46, %v6798_v8  ;;  %v5343_v3 = vrot.slane %v5341_v0, 1  ;;  %v6814_v42 = vshrl.u32 %v14671_v56, 16 }
 0x483   : > { %8843 = vxpose.xlu0.c.b16.cont [5/8] %v14651_v57, 128  ;;  %v5336_v58 = vsel %vm669_vm0, %v5331_v2, %v5335_v6  ;;  %15630 = vst [vmem:[#allocation70_spill] sm:$0xff] %v14678_v50  ;;  %v5339_v35 = vor.u32 %v5337_v1, %v5335_v6  ;;  %v6817_v2 = vshll.u32 %v14671_v56, 16  ;;  %v6807_v8 = vrot.slane %v6805_v14, 1 }
 0x484   : > { %10815 = vmatpush3.bf16.msra.mxu0 %v14478_v26  ;;  %v14688_v31 = vsel %vm2126_vm2, %v6793_v22, %v6802_v19  ;;  %v6810_v46 = vrot.slane %v6808_v47, 2  ;;  %v15516_v1 = vrot.slane %v14491_v27, 1  ;;  %v6330_v14 = vrot.slane %v14529_v7, 1 }
 0x485   : > { %10816 = vmatprep.subr.bf16.mxu0 %v14664_v38  ;;  %15631 = vst [vmem:[#allocation71_spill] sm:$0xff] %v14688_v31  ;;  %v6819_v6 = vrot.slane %v6817_v2, 2  ;;  %v6336_v2 = vrot.slane %v14573_v23, 1  ;;  %v15528_v10 = vrot.slane %v14491_v27, 2 }
 0x486   : > { %11467 = vmatmul.mubr.bf16.gmra.mrb[28].mxu1 %v5328_v59  ;;  %v5344_v59 = vsel %vm669_vm0, %v5339_v35, %v5343_v3  ;;  %v6811_v0 = vor.u32 %v6810_v46, %v6807_v8  ;;  %v14709_v3 = vsel %vm1325_vm1, %v15516_v1, %v6330_v14  ;;  %v6338_v8 = vrot.slane %v14584_v54, 1  ;;  %v14725_v1 = vld [vmem:[#allocation2 + $0x8] sm:$0xff]  }
 0x487   : > { %8844 = vxpose.xlu0.c.b16.cont [6/8] %v14664_v38, 128  ;;  %11470 = vmatprep.mubr.bf16.mxu1 %v5336_v58  ;;  %v6816_v58 = vrot.slane %v6814_v42, 1  ;;  %v6334_v42 = vrot.slane %v14555_v25, 1  ;;  %v6342_v46 = vrot.slane %v14615_v29, 1 }
 0x488   : > { %10817 = vmatpush3.bf16.msra.mxu0 %v14506_v28  ;;  %v14700_v47 = vsel %vm2126_vm2, %v6802_v19, %v6811_v0  ;;  %v6340_v19 = vrot.slane %v14595_v4, 1  ;;  %v14732_v13 = vsel %vm1325_vm1, %v6336_v2, %v6338_v8 }
 0x489   : > { %10818 = vmatprep.subr.bf16.mxu0 %v14678_v50  ;;  %v6820_v22 = vor.u32 %v6819_v6, %v6816_v58  ;;  %15632 = vst [vmem:[#allocation72_spill] sm:$0xff] %v14700_v47  ;;  %v14729_v21 = vsel %vm1325_vm1, %v6334_v42, %v6336_v2  ;;  %v15527_v2 = vrot.slane %v14666_v62, 1 }
 0x48b   : > { %8845 = vxpose.xlu0.c.b16.cont [7/8] %v14678_v50, 128  ;;  %v14704_v35 = vsel %vm2126_vm2, %v6811_v0, %v6820_v22  ;;  %v6344_v0 = vrot.slane %v14629_v40, 1  ;;  %v6346_v22 = vrot.slane %v14641_v37, 1 }
 0x48c   : > { %10819 = vmatpush3.bf16.msra.mxu0 %v14536_v18  ;;  %15633 = vst [vmem:[#allocation73_spill] sm:$0xff] %v14704_v35 }
 0x48d   : > { %10820 = vmatprep.subr.bf16.mxu0 %v14688_v31  ;;  %v14745_v63 = vsel %vm1325_vm1, %v6342_v46, %v6344_v0 }
 0x48e   : > { %11471 = vmatmul.mubr.bf16.gmra.mrb[32].mxu1 %v5344_v59  ;;  %v12799_v59 = vld [vmem:[#allocation8 + $0x88] sm:$0xff]   ;;  %15634 = vst [vmem:[#allocation74_spill] sm:$0xff] %v14745_v63 }
 0x48f   : > { %8846 = vxpose.xlu0.c.b16.end [8/8] %v14688_v31, 128  ;;  %11490 = vmatprep.mubr.bf16.mxu1 %v14116_v11  ;;  %v6332_v11 = vrot.slane %v14543_v39, 1  ;;  %v7143_v31 = vrot.slane %v14573_v23, 2 }
 0x490   : > { %10821 = vmatpush3.bf16.msra.mxu0 %v14566_v30  ;;  %v14848_v30 = vld [vmem:[#allocation8 + $0xc0] sm:$0xff]  }
 0x491   : > { %v14718_v58 = vsel %vm1325_vm1, %v6330_v14, %v6332_v11  ;;  %v14721_v6 = vsel %vm1325_vm1, %v6332_v11, %v6334_v42  ;;  %v14735_v14 = vsel %vm1325_vm1, %v6338_v8, %v6340_v19  ;;  %v14738_v11 = vsel %vm1325_vm1, %v6340_v19, %v6342_v46  ;;  %v12800_v8 = vld [vmem:[#allocation8 + $0x90] sm:$0xff]  }
 0x492   : > { %v14748_v42 = vsel %vm1325_vm1, %v6344_v0, %v6346_v22  ;;  %v14755_v19 = vsel %vm1325_vm1, %v6346_v22, %v15527_v2  ;;  %v7139_v46 = vrot.slane %v14543_v39, 2  ;;  %v7141_v0 = vrot.slane %v14555_v25, 2  ;;  %v14768_v2 = vld [vmem:[#allocation2 + $0x18] sm:$0xff]  }
 0x493   : > { %8855 = vxpose.xlu0.c.b16.start [1/2] (short) %v14700_v47, 128  ;;  %15635 = vst [vmem:[#allocation75_spill] sm:$0xff] %v14748_v42  ;;  %15636 = vst [vmem:[#allocation76_spill] sm:$0xff] %v14755_v19  ;;  %v12801_v47 = vld [vmem:[#allocation8 + $0x98] sm:$0xff]   ;;  %v7145_v22 = vrot.slane %v14584_v54, 2  ;;  %v7147_v25 = vrot.slane %v14595_v4, 2 }
 0x494   : > { %v14775_v39 = vsel %vm2597_vm3, %v7139_v46, %v7141_v0  ;;  %v14783_v23 = vsel %vm2597_vm3, %v7141_v0, %v7143_v31  ;;  %v12802_v0 = vld [vmem:[#allocation8 + $0xa0] sm:$0xff]  }
 0x495   : > { %15639 = vst [vmem:[#allocation79_spill] sm:$0xff] %v14775_v39  ;;  %15640 = vst [vmem:[#allocation80_spill] sm:$0xff] %v14783_v23  ;;  %v14786_v54 = vsel %vm2597_vm3, %v7143_v31, %v7145_v22  ;;  %v7157_v39 = vrot.slane %v14671_v56, 2  ;;  %v14813_v56 = vld [vmem:[#allocation2 + $0x14] sm:$0xf] }
 0x496   : > { %11491 = vmatmul.mubr.bf16.vlgmr.msra.gmra.mrb[0].mxu1 %v14725_v1  ;;  %15641 = vst [vmem:[#allocation81_spill] sm:$0xff] %v14786_v54  ;;  %v8371_v19 = vld [vmem:[#allocation2 + $0x10] sm:$0x8] }
 0x497   : > { %8856 = vxpose.xlu0.c.b16.end [2/2] (short) %v14704_v35, 128  ;;  %11494 = vmatprep.mubr.bf16.mxu1 %v14741_v17  ;;  %v7137_v35 = vrot.slane %v14529_v7, 2 }
 0x498   : > { %11527 = vmatpush3.bf16.msra.mxu1 %v14422_v51 }
 0x499   : > { %11528 = vmatprep.subr.bf16.mxu1 %v12799_v59  ;;  %v14764_v51 = vsel %vm2597_vm3, %v15528_v10, %v7137_v35  ;;  %v14772_v7 = vsel %vm2597_vm3, %v7137_v35, %v7139_v46  ;;  %v14779_v10 = vld [vmem:[#allocation2 + $0x20] sm:$0xff]   ;;  %v7151_v35 = vrot.slane %v14629_v40, 2  ;;  %v14791_v46 = vsel %vm2597_vm3, %v7145_v22, %v7147_v25  ;;  %v7438_v22 = vld [vmem:[#allocation2 + $0x10] sm:$0xc] }
 0x49a   : > { %15637 = vst [vmem:[#allocation77_spill] sm:$0xff] %v14764_v51  ;;  %15638 = vst [vmem:[#allocation78_spill] sm:$0xff] %v14772_v7  ;;  %v7153_v7 = vrot.slane %v14641_v37, 2 }
 0x49b   : > { %15642 = vst [vmem:[#allocation82_spill] sm:$0xff] %v14791_v46  ;;  %v12805_v46 = vld [vmem:[#allocation8 + $0xb8] sm:$0xff]  }
 0x49c   : > { %11529 = vmatpush3.bf16.msra.mxu1 %v12799_v59  ;;  %v7149_v59 = vrot.slane %v14615_v29, 2  ;;  %v7155_v29 = vrot.slane %v14666_v62, 2  ;;  %v14802_v40 = vsel %vm2597_vm3, %v7151_v35, %v7153_v7 }
 0x49d   : > { %11530 = vmatprep.subr.bf16.mxu1 %v12800_v8  ;;  %15645 = vst [vmem:[#allocation85_spill] sm:$0xff] %v14802_v40  ;;  %v14831_v40 = vld [vmem:[#allocation2 + $0x38] sm:$0xff]  }
 0x49e   : > { %11495 = vmatmul.mubr.bf16.gmra.mrb[4].mxu1 %v14768_v2  ;;  %v14794_v4 = vsel %vm2597_vm3, %v7147_v25, %v7149_v59  ;;  %v14799_v31 = vsel %vm2597_vm3, %v7149_v59, %v7151_v35  ;;  %v14805_v37 = vsel %vm2597_vm3, %v7153_v7, %v7155_v29  ;;  %v12803_v25 = vld [vmem:[#allocation8 + $0xa8] sm:$0xff]   ;;  %v14817_v59 = vcombine.low %v7438_v22, %v14813_v56  ;;  %v14823_v35 = vld [vmem:[#allocation2 + $0x28] sm:$0xff]  }
 0x49f   : > { %11498 = vmatprep.mubr.bf16.mxu1 %v14779_v10  ;;  %15643 = vst [vmem:[#allocation83_spill] sm:$0xff] %v14794_v4  ;;  %15644 = vst [vmem:[#allocation84_spill] sm:$0xff] %v14799_v31  ;;  %v14810_v4 = vld [vmem:[#allocation2 + $0x28] sm:$0xff]   ;;  %v14819_v7 = vld [vmem:[#allocation2 + $0x18] sm:$0xff]   ;;  %v7952_v41 = vshll.u32 %v14823_v35, 16 }
 0x4a0   : > { %11531 = vmatpush3.bf16.msra.mxu1 %v12800_v8  ;;  %15646 = vst [vmem:[#allocation86_spill] sm:$0xff] %v14805_v37  ;;  %v14808_v8 = vsel %vm2597_vm3, %v7155_v29, %v7157_v39  ;;  %15648 = vst [vmem:[#allocation88_spill] sm:$0xff] %v14817_v59  ;;  %v14821_v39 = vld [vmem:[#allocation2 + $0x20] sm:$0xff]   ;;  %v14825_v29 = vld [vmem:[#allocation2 + $0x30] sm:$0xff]   ;;  %v7926_v37 = vshll.u32 %v14817_v59, 16  ;;  %v7934_v22 = vshll.u32 %v14819_v7, 16 }
 0x4a1   : > { %11532 = vmatprep.subr.bf16.mxu1 %v12801_v47  ;;  %15647 = vst [vmem:[#allocation87_spill] sm:$0xff] %v14808_v8  ;;  %v7923_v8 = vshrl.u32 %v14817_v59, 16  ;;  %v7943_v31 = vshll.u32 %v14821_v39, 16  ;;  %v14836_v59 = vld [vmem:[#allocation2 + $0x40] sm:$0xff]  }
 0x4a2   : > { %v7928_v23 = vrot.slane %v7926_v37, 3  ;;  %v7936_v50 = vrot.slane %v7934_v22, 3  ;;  %v7958_v37 = vshrl.u32 %v14825_v29, 16 }
 0x4a3   : > { %v7925_v54 = vrot.slane %v7923_v8, 2  ;;  %v7945_v57 = vrot.slane %v7943_v31, 3  ;;  %v7961_v8 = vshll.u32 %v14825_v29, 16  ;;  %v7954_v31 = vrot.slane %v7952_v41, 3 }
 0x4a4   : > { %11533 = vmatpush3.bf16.msra.mxu1 %v12801_v47  ;;  %v12804_v47 = vld [vmem:[#allocation8 + $0xb0] sm:$0xff]   ;;  %v7976_v41 = vshrl.u32 %v14836_v59, 16 }
 0x4a5   : > { %11534 = vmatprep.subr.bf16.mxu1 %v12802_v0  ;;  %v7929_v49 = vor.u32 %v7928_v23, %v7925_v54  ;;  %v7960_v23 = vrot.slane %v7958_v37, 2  ;;  %v14854_v54 = vld [vmem:[#allocation2 + $0x58] sm:$0xff]   ;;  %v7985_v37 = vshrl.u32 %v14841_v45, 16 }
 0x4a6   : > { %11499 = vmatmul.mubr.bf16.gmra.mrb[8].mxu1 %v14810_v4 }
 0x4a7   : > { %11502 = vmatprep.mubr.bf16.mxu1 %v14425_v16  ;;  %v7931_v16 = vshrl.u32 %v14819_v7, 16 }
 0x4a8   : > { %11535 = vmatpush3.bf16.msra.mxu1 %v12802_v0  ;;  %v7940_v0 = vshrl.u32 %v14821_v39, 16 }
 0x4a9   : > { %11536 = vmatprep.subr.bf16.mxu1 %v12803_v25  ;;  %v7933_v51 = vrot.slane %v7931_v16, 2 }
 0x4aa   : > { %v7942_v38 = vrot.slane %v7940_v0, 2  ;;  %v7967_v0 = vshrl.u32 %v14831_v40, 16 }
 0x4ab   : > { %v7937_v15 = vor.u32 %v7936_v50, %v7933_v51  ;;  %v7963_v50 = vrot.slane %v7961_v8, 3  ;;  %v7970_v51 = vshll.u32 %v14831_v40, 16 }
 0x4ac   : > { %11537 = vmatpush3.bf16.msra.mxu1 %v12803_v25  ;;  %v7949_v25 = vshrl.u32 %v14823_v35, 16  ;;  %v7946_v16 = vor.u32 %v7945_v57, %v7942_v38  ;;  %v7969_v38 = vrot.slane %v7967_v0, 2 }
 0x4ad   : > { %11538 = vmatprep.subr.bf16.mxu1 %v12804_v47  ;;  %v7964_v18 = vor.u32 %v7963_v50, %v7960_v23  ;;  %v7972_v28 = vrot.slane %v7970_v51, 3  ;;  %v7987_v51 = vrot.slane %v7985_v37, 2 }
 0x4ae   : > { %11503 = vmatmul.mubr.bf16.gmra.mrb[12].mxu1 %v14455_v32  ;;  %v14845_v32 = vld [vmem:[#allocation2 + $0x50] sm:$0xff]   ;;  %v7951_v22 = vrot.slane %v7949_v25, 2  ;;  %v14860_v25 = vld [vmem:[#allocation2 + $0x60] sm:$0xff]  }
 0x4af   : > { %11506 = vmatprep.mubr.bf16.mxu1 %v14480_v44  ;;  %v14851_v44 = vsel %vm3398_vm4, %v7929_v49, %v7937_v15  ;;  %v7979_v49 = vshll.u32 %v14836_v59, 16  ;;  %v7973_v23 = vor.u32 %v7972_v28, %v7969_v38  ;;  %v8006_v28 = vshll.u32 %v14854_v54, 16 }
 0x4b0   : > { %11539 = vmatpush3.bf16.msra.mxu1 %v12804_v47  ;;  %15649 = vst [vmem:[#allocation89_spill] sm:$0xff] %v14851_v44  ;;  %v14857_v47 = vsel %vm3398_vm4, %v7937_v15, %v7946_v16  ;;  %v7955_v57 = vor.u32 %v7954_v31, %v7951_v22  ;;  %v7978_v44 = vrot.slane %v7976_v41, 2  ;;  %v7988_v15 = vshll.u32 %v14841_v45, 16  ;;  %v14870_v31 = vld [vmem:[#allocation2 + $0x68] sm:$0xff]  }
 0x4b1   : > { %11540 = vmatprep.subr.bf16.mxu1 %v12805_v46  ;;  %15650 = vst [vmem:[#allocation90_spill] sm:$0xff] %v14857_v47  ;;  %v7994_v22 = vshrl.u32 %v14845_v32, 16  ;;  %v7981_v50 = vrot.slane %v7979_v49, 3  ;;  %v7997_v41 = vshll.u32 %v14845_v32, 16  ;;  %v14879_v47 = vld [vmem:[#allocation2 + $0x70] sm:$0xff]   ;;  %v14882_v26 = vsel %vm3398_vm4, %v7964_v18, %v7973_v23  ;;  %v14886_v49 = vld [vmem:[#allocation2 + $0x78] sm:$0xff]  }
 0x4b2   : > { %v14865_v8 = vsel %vm3398_vm4, %v7946_v16, %v7955_v57  ;;  %v14873_v0 = vsel %vm3398_vm4, %v7955_v57, %v7964_v18  ;;  %15653 = vst [vmem:[#allocation93_spill] sm:$0xff] %v14882_v26  ;;  %v8012_v38 = vshrl.u32 %v14860_v25, 16  ;;  %v8021_v18 = vshrl.u32 %v14870_v31, 16  ;;  %v14893_v26 = vld [vmem:[#allocation2 + $0x80] sm:$0xff]  }
 0x4b3   : > { %15651 = vst [vmem:[#allocation91_spill] sm:$0xff] %v14865_v8  ;;  %15652 = vst [vmem:[#allocation92_spill] sm:$0xff] %v14873_v0  ;;  %v7996_v16 = vrot.slane %v7994_v22, 2  ;;  %v8003_v8 = vshrl.u32 %v14854_v54, 16  ;;  %v7982_v57 = vor.u32 %v7981_v50, %v7978_v44  ;;  %v7999_v37 = vrot.slane %v7997_v41, 3 }
 0x4b4   : > { %11541 = vmatpush3.bf16.msra.mxu1 %v12805_v46  ;;  %v7990_v46 = vrot.slane %v7988_v15, 3  ;;  %v8015_v22 = vshll.u32 %v14860_v25, 16  ;;  %v8014_v20 = vrot.slane %v8012_v38, 2  ;;  %v8023_v41 = vrot.slane %v8021_v18, 2  ;;  %v14903_v38 = vld [vmem:[#allocation2 + $0x90] sm:$0xff]  }
 0x4b5   : > { %11578 = vmatprep.subr.bf16.mxu1 %v14848_v30  ;;  %v8005_v15 = vrot.slane %v8003_v8, 2  ;;  %v14890_v0 = vsel %vm3398_vm4, %v7973_v23, %v7982_v57  ;;  %v8000_v50 = vor.u32 %v7999_v37, %v7996_v16  ;;  %v8030_v23 = vshrl.u32 %v14879_v47, 16 }
 0x4b6   : > { %11507 = vmatmul.mubr.bf16.gmra.mrb[16].mxu1 %v14508_v24  ;;  %v7991_v24 = vor.u32 %v7990_v46, %v7987_v51  ;;  %15654 = vst [vmem:[#allocation94_spill] sm:$0xff] %v14890_v0  ;;  %v8017_v5 = vrot.slane %v8015_v22, 3  ;;  %v8024_v51 = vshll.u32 %v14870_v31, 16  ;;  %v14899_v46 = vld [vmem:[#allocation2 + $0x88] sm:$0xff]   ;;  %v8039_v16 = vshrl.u32 %v14886_v49, 16 }
 0x4b7   : > { %11510 = vmatprep.mubr.bf16.mxu1 %v14538_v33  ;;  %v8008_v33 = vrot.slane %v8006_v28, 3  ;;  %v8033_v28 = vshll.u32 %v14879_v47, 16  ;;  %v8032_v22 = vrot.slane %v8030_v23, 2  ;;  %v8057_v23 = vshrl.u32 %v14899_v46, 16 }
 0x4b8   : > { %v14896_v44 = vsel %vm3398_vm4, %v7982_v57, %v7991_v24  ;;  %v14906_v0 = vsel %vm3398_vm4, %v7991_v24, %v8000_v50  ;;  %v8018_v9 = vor.u32 %v8017_v5, %v8014_v20  ;;  %v8026_v57 = vrot.slane %v8024_v51, 3 }
 0x4b9   : > { %15655 = vst [vmem:[#allocation95_spill] sm:$0xff] %v14896_v44  ;;  %v8009_v8 = vor.u32 %v8008_v33, %v8005_v15  ;;  %15656 = vst [vmem:[#allocation96_spill] sm:$0xff] %v14906_v0  ;;  %v8035_v44 = vrot.slane %v8033_v28, 3  ;;  %v8042_v15 = vshll.u32 %v14886_v49, 16  ;;  %v14914_v33 = vld [vmem:[#allocation2 + $0x98] sm:$0xff]   ;;  %v8041_v0 = vrot.slane %v8039_v16, 2 }
 0x4ba   : > { %v8027_v24 = vor.u32 %v8026_v57, %v8023_v41  ;;  %v8048_v5 = vshrl.u32 %v14893_v26, 16  ;;  %v8051_v51 = vshll.u32 %v14893_v26, 16  ;;  %v8060_v48 = vshll.u32 %v14899_v46, 16 }
 0x4bb   : > { %v14910_v37 = vsel %vm3398_vm4, %v8000_v50, %v8009_v8  ;;  %v14917_v18 = vsel %vm3398_vm4, %v8009_v8, %v8018_v9  ;;  %v8036_v20 = vor.u32 %v8035_v44, %v8032_v22  ;;  %v8044_v50 = vrot.slane %v8042_v15, 3 }
 0x4bc   : > { %15657 = vst [vmem:[#allocation97_spill] sm:$0xff] %v14910_v37  ;;  %15658 = vst [vmem:[#allocation98_spill] sm:$0xff] %v14917_v18  ;;  %v14924_v28 = vsel %vm3398_vm4, %v8018_v9, %v8027_v24  ;;  %v8050_v37 = vrot.slane %v8048_v5, 2  ;;  %v8066_v8 = vshrl.u32 %v14903_v38, 16  ;;  %v8053_v16 = vrot.slane %v8051_v51, 3 }
 0x4bd   : > { %15659 = vst [vmem:[#allocation99_spill] sm:$0xff] %v14924_v28  ;;  %v14929_v41 = vsel %vm3398_vm4, %v8027_v24, %v8036_v20  ;;  %v8045_v57 = vor.u32 %v8044_v50, %v8041_v0  ;;  %v8059_v18 = vrot.slane %v8057_v23, 2  ;;  %v8062_v44 = vrot.slane %v8060_v48, 3 }
 0x4be   : > { %11511 = vmatmul.mubr.bf16.gmra.mrb[20].mxu1 %v14553_v36  ;;  %v8068_v22 = vrot.slane %v8066_v8, 2  ;;  %v8069_v15 = vshll.u32 %v14903_v38, 16  ;;  %v8075_v62 = vshrl.u32 %v14914_v33, 16  ;;  %v8054_v5 = vor.u32 %v8053_v16, %v8050_v37  ;;  %v5831_v37 = vld [vmem:[#allocation2] sm:$0xe] }
 0x4bf   : > { %11514 = vmatprep.mubr.bf16.mxu1 %v14571_v43  ;;  %v14934_v9 = vsel %vm3398_vm4, %v8036_v20, %v8045_v57  ;;  %v8078_v28 = vshll.u32 %v14914_v33, 16  ;;  %v8063_v42 = vor.u32 %v8062_v44, %v8059_v18  ;;  %v10184_v48 = vcombine.low %v8371_v19, %v14813_v56 }
 0x4c0   : > { %v8071_v63 = vrot.slane %v8069_v15, 3  ;;  %v8077_v24 = vrot.slane %v8075_v62, 2  ;;  %v14938_v0 = vsel %vm3398_vm4, %v8045_v57, %v8054_v5  ;;  %v8393_v20 = vrot.slane %v14819_v7, 3  ;;  %v12896_v15 = vld [vmem:[#allocation2 + $0x4] sm:$0xf] }
 0x4c1   : > { %v8080_v50 = vrot.slane %v8078_v28, 3  ;;  %v14943_v51 = vsel %vm3398_vm4, %v8054_v5, %v8063_v42  ;;  %v8392_v62 = vrot.slane %v10184_v48, 3  ;;  %v8395_v8 = vrot.slane %v14821_v39, 3  ;;  %v14969_v5 = vld [vmem:[#allocation2 + $0xa0] ss:$0 sps:$4 sm:$0x77]  }
 0x4c2   : > { %v8072_v23 = vor.u32 %v8071_v63, %v8068_v22  ;;  %v8397_v28 = vrot.slane %v14823_v35, 3  ;;  %v8399_v56 = vrot.slane %v14825_v29, 3  ;;  %v8401_v57 = vrot.slane %v14831_v40, 3 }
 0x4c3   : > { %v14947_v18 = vor.u32 %v8080_v50, %v8077_v24  ;;  %v14961_v16 = vsel %vm3869_vm5, %v8392_v62, %v8393_v20  ;;  %v14964_v44 = vsel %vm3869_vm5, %v8393_v20, %v8395_v8  ;;  %v8403_v48 = vrot.slane %v14836_v59, 3 }
 0x4c4   : > { %v14952_v19 = vsel %vm3398_vm4, %v8063_v42, %v8072_v23  ;;  %15660 = vst [vmem:[#allocation100_spill] sm:$0xff] %v14964_v44  ;;  %v14967_v22 = vsel %vm3869_vm5, %v8395_v8, %v8397_v28  ;;  %v10094_v42 = vcombine.low %v5831_v37, %v12896_v15  ;;  %v14972_v24 = vsel %vm3869_vm5, %v8397_v28, %v8399_v56 }
 0x4c5   : > { %v14958_v63 = vsel %vm3398_vm4, %v8072_v23, %v14947_v18  ;;  %15661 = vst [vmem:[#allocation101_spill] sm:$0xff] %v14967_v22  ;;  %15662 = vst [vmem:[#allocation102_spill] sm:$0xff] %v14972_v24  ;;  %v14975_v50 = vsel %vm3869_vm5, %v8399_v56, %v8401_v57  ;;  %v8405_v23 = vrot.slane %v14841_v45, 3  ;;  %v8407_v20 = vrot.slane %v14845_v32, 3 }
 0x4c6   : > { %11515 = vmatmul.mubr.bf16.gmra.mrb[24].mxu1 %v14582_v60  ;;  %15663 = vst [vmem:[#allocation103_spill] sm:$0xff] %v14975_v50  ;;  %v8409_v62 = vrot.slane %v14854_v54, 3  ;;  %v8411_v8 = vrot.slane %v14860_v25, 3  ;;  %v14983_v37 = vsel %vm3869_vm5, %v8401_v57, %v8403_v48  ;;  %v8413_v15 = vrot.slane %v14870_v31, 3 }
 0x4c7   : > { %11518 = vmatprep.mubr.bf16.mxu1 %v14593_v34  ;;  %15664 = vst [vmem:[#allocation104_spill] sm:$0xff] %v14983_v37  ;;  %v8415_v28 = vrot.slane %v14879_v47, 3  ;;  %v8417_v56 = vrot.slane %v14886_v49, 3  ;;  %v14989_v50 = vsel %vm3869_vm5, %v8403_v48, %v8405_v23  ;;  %v14992_v24 = vsel %vm3869_vm5, %v8405_v23, %v8407_v20 }
 0x4c8   : > { %15665 = vst [vmem:[#allocation105_spill] sm:$0xff] %v14992_v24  ;;  %v14995_v22 = vsel %vm3869_vm5, %v8407_v20, %v8409_v62  ;;  %v14998_v44 = vsel %vm3869_vm5, %v8409_v62, %v8411_v8  ;;  %v15002_v57 = vsel %vm3869_vm5, %v8411_v8, %v8413_v15  ;;  %v8419_v23 = vrot.slane %v14893_v26, 3 }
 0x4c9   : > { %15666 = vst [vmem:[#allocation106_spill] sm:$0xff] %v14995_v22  ;;  %15667 = vst [vmem:[#allocation107_spill] sm:$0xff] %v14998_v44  ;;  %v15005_v37 = vsel %vm3869_vm5, %v8413_v15, %v8415_v28  ;;  %v15008_v48 = vsel %vm3869_vm5, %v8415_v28, %v8417_v56  ;;  %v8421_v20 = vrot.slane %v14899_v46, 3  ;;  %v8423_v62 = vrot.slane %v14903_v38, 3 }
 0x4ca   : > { %15668 = vst [vmem:[#allocation108_spill] sm:$0xff] %v15002_v57  ;;  %15669 = vst [vmem:[#allocation109_spill] sm:$0xff] %v15005_v37  ;;  %v8425_v44 = vrot.slane %v14914_v33, 3  ;;  %v8427_v22 = vrot.slane %v14969_v5, 3  ;;  %v15017_v8 = vsel %vm3869_vm5, %v8417_v56, %v8419_v23  ;;  %v5852_v57 = vrot.slane %v10094_v42, 1 }
 0x4cb   : > { %15670 = vst [vmem:[#allocation110_spill] sm:$0xff] %v15008_v48  ;;  %v15020_v15 = vsel %vm3869_vm5, %v8419_v23, %v8421_v20  ;;  %v15023_v28 = vsel %vm3869_vm5, %v8421_v20, %v8423_v62  ;;  %v5853_v24 = vrot.slane %v14725_v1, 1  ;;  %v5855_v23 = vrot.slane %v14741_v17, 1  ;;  %v12808_v20 = vld [vmem:[#allocation8 + $0xc8] sm:$0xff]   ;;  %v12809_v1 = vld [vmem:[#allocation8 + $0xd0] sm:$0xff]   ;;  %v12810_v17 = vld [vmem:[#allocation8 + $0xd8] sm:$0xff]  }
 0x4cc   : > { %15671 = vst [vmem:[#allocation111_spill] sm:$0xff] %v15020_v15  ;;  %15672 = vst [vmem:[#allocation112_spill] sm:$0xff] %v15023_v28  ;;  %v15026_v48 = vsel %vm3869_vm5, %v8423_v62, %v8425_v44  ;;  %v15029_v37 = vsel %vm3869_vm5, %v8425_v44, %v8427_v22  ;;  %v5857_v15 = vrot.slane %v14768_v2, 1  ;;  %v5859_v44 = vrot.slane %v14779_v10, 1  ;;  %v12812_v10 = vld [vmem:[#allocation8 + $0xe8] sm:$0xff]  }
 0x4cd   : > { %v5854_v56 = vsel %vm1325_vm1, %v5852_v57, %v5853_v24  ;;  %v5856_v28 = vsel %vm1325_vm1, %v5853_v24, %v5855_v23  ;;  %v5861_v22 = vrot.slane %v14810_v4, 1  ;;  %v12811_v24 = vld [vmem:[#allocation8 + $0xe0] sm:$0xff]  }
 0x4ce   : > { %11519 = vmatmul.mubr.bf16.gmra.mrb[28].mxu1 %v14613_v12  ;;  %v5858_v62 = vsel %vm1325_vm1, %v5855_v23, %v5857_v15  ;;  %v5860_v2 = vsel %vm1325_vm1, %v5857_v15, %v5859_v44  ;;  %v12897_v57 = vld [vmem:[#allocation2 + $0x30] sm:$0xff]   ;;  %v12813_v15 = vld [vmem:[#allocation8 + $0xf0] sm:$0xff]  }
 0x4cf   : > { %11522 = vmatprep.mubr.bf16.mxu1 %v14626_v52  ;;  %v5862_v42 = vsel %vm1325_vm1, %v5859_v44, %v5861_v22 }
 0x4d6   : > { %11523 = vmatmul.mubr.bf16.gmra.mrb[32].mxu1 %v14639_v55 }
 0x4d7   : > { %11542 = vmatprep.mubr.bf16.mxu1 %v5854_v56 }
 0x4de   : > { %11543 = vmatmul.mubr.bf16.vlgmr.msra.gmra.mrb[0].mxu1 %v5856_v28  ;;  %v12898_v28 = vld [vmem:[#allocation2 + $0x38] sm:$0xff]  }
 0x4df   : > { %11546 = vmatprep.mubr.bf16.mxu1 %v5858_v62  ;;  %11579 = vmatpush3.bf16.msra.mxu1 %v14848_v30  ;;  %v5863_v30 = vrot.slane %v12897_v57, 1  ;;  %v5865_v56 = vrot.slane %v12898_v28, 1  ;;  %v12901_v57 = vld [vmem:[#allocation2 + $0x50] sm:$0xff]  }
 0x4e0   : > { %11580 = vmatprep.subr.bf16.mxu1 %v12808_v20 }
 0x4e1   : > { %v5864_v4 = vsel %vm1325_vm1, %v5861_v22, %v5863_v30  ;;  %v5866_v23 = vsel %vm1325_vm1, %v5863_v30, %v5865_v56  ;;  %v12815_v22 = vld [vmem:[#allocation8 + $0x100] sm:$0xff]   ;;  %v5873_v30 = vrot.slane %v14553_v36, 1  ;;  %v5879_v36 = vrot.slane %v14593_v34, 1 }
 0x4e2   : > { %v5887_v34 = vrot.slane %v14658_v53, 1 }
 0x4e3   : > { %11581 = vmatpush3.bf16.msra.mxu1 %v12808_v20  ;;  %v12899_v20 = vld [vmem:[#allocation2 + $0x40] sm:$0xff]  }
 0x4e4   : > { %11582 = vmatprep.subr.bf16.mxu1 %v12809_v1  ;;  %v5867_v62 = vrot.slane %v12899_v20, 1  ;;  %v5881_v20 = vrot.slane %v14613_v12, 1  ;;  %v6315_v12 = vrot.slane %v14302_v61, 1 }
 0x4e6   : > { %11547 = vmatmul.mubr.bf16.gmra.mrb[4].mxu1 %v5860_v2  ;;  %v12814_v2 = vld [vmem:[#allocation8 + $0xf8] sm:$0xff]  }
 0x4e7   : > { %11550 = vmatprep.mubr.bf16.mxu1 %v5862_v42  ;;  %11583 = vmatpush3.bf16.msra.mxu1 %v12809_v1  ;;  %v12900_v1 = vld [vmem:[#allocation2 + $0x48] sm:$0xff]  }
 0x4e8   : > { %11584 = vmatprep.subr.bf16.mxu1 %v12810_v17  ;;  %v5869_v44 = vrot.slane %v12900_v1, 1  ;;  %v5882_v1 = vsel %vm1325_vm1, %v5879_v36, %v5881_v20 }
 0x4ea   : > { %v5870_v42 = vsel %vm1325_vm1, %v5867_v62, %v5869_v44 }
 0x4eb   : > { %11585 = vmatpush3.bf16.msra.mxu1 %v12810_v17  ;;  %v5868_v17 = vsel %vm1325_vm1, %v5865_v56, %v5867_v62  ;;  %v5875_v56 = vrot.slane %v14571_v43, 1  ;;  %v5883_v43 = vrot.slane %v14626_v52, 1 }
 0x4ec   : > { %11586 = vmatprep.subr.bf16.mxu1 %v12811_v24 }
 0x4ee   : > { %11551 = vmatmul.mubr.bf16.gmra.mrb[8].mxu1 %v5864_v4  ;;  %v5877_v4 = vrot.slane %v14582_v60, 1  ;;  %v5885_v60 = vrot.slane %v14639_v55, 1  ;;  %v15069_v55 = vld [vmem:[#allocation2 + $0x18] sm:$0xff]  }
 0x4ef   : > { %11554 = vmatprep.mubr.bf16.mxu1 %v5866_v23  ;;  %11587 = vmatpush3.bf16.msra.mxu1 %v12811_v24  ;;  %v5871_v24 = vrot.slane %v12901_v57, 1  ;;  %v5876_v23 = vsel %vm1325_vm1, %v5873_v30, %v5875_v56 }
 0x4f0   : > { %11588 = vmatprep.subr.bf16.mxu1 %v12812_v10  ;;  %v5880_v62 = vsel %vm1325_vm1, %v5877_v4, %v5879_v36  ;;  %v5888_v57 = vsel %vm1325_vm1, %v5885_v60, %v5887_v34  ;;  %v15673_v34 = vrot.slane %v14491_v27, 1 }
 0x4f1   : > { %v5872_v28 = vsel %vm1325_vm1, %v5869_v44, %v5871_v24  ;;  %v5884_v44 = vsel %vm1325_vm1, %v5881_v20, %v5883_v43  ;;  %v12818_v20 = vld [vmem:[#allocation8 + $0x118] sm:$0xff]  }
 0x4f3   : > { %11589 = vmatpush3.bf16.msra.mxu1 %v12812_v10  ;;  %v5874_v10 = vsel %vm1325_vm1, %v5871_v24, %v5873_v30  ;;  %v6318_v24 = vrot.slane %v15069_v55, 1  ;;  %v15072_v30 = vld [vmem:[#allocation2 + $0x20] sm:$0xff]  }
 0x4f4   : > { %11590 = vmatprep.subr.bf16.mxu1 %v12813_v15  ;;  %v6320_v53 = vrot.slane %v15072_v30, 1 }
 0x4f6   : > { %11555 = vmatmul.mubr.bf16.gmra.mrb[12].mxu1 %v5868_v17  ;;  %v15064_v17 = vld [vmem:[#allocation2 + $0x10] sm:$0xff]  }
 0x4f7   : > { %11558 = vmatprep.mubr.bf16.mxu1 %v5870_v42  ;;  %11591 = vmatpush3.bf16.msra.mxu1 %v12813_v15  ;;  %v5878_v15 = vsel %vm1325_vm1, %v5875_v56, %v5877_v4  ;;  %v6316_v42 = vrot.slane %v15064_v17, 1  ;;  %v12817_v56 = vld [vmem:[#allocation8 + $0x110] sm:$0xff]   ;;  %v15077_v4 = vld [vmem:[#allocation2 + $0x28] sm:$0xff]  }
 0x4f8   : > { %11592 = vmatprep.subr.bf16.mxu1 %v12814_v2 }
 0x4f9   : > { %v6317_v52 = vsel %vm1325_vm1, %v6315_v12, %v6316_v42  ;;  %v6319_v61 = vsel %vm1325_vm1, %v6316_v42, %v6318_v24  ;;  %v12821_v42 = vld [vmem:[#allocation8 + $0x130] sm:$0xff]  }
 0x4fb   : > { %11593 = vmatpush3.bf16.msra.mxu1 %v12814_v2  ;;  %v5886_v2 = vsel %vm1325_vm1, %v5883_v43, %v5885_v60  ;;  %v15085_v43 = vld [vmem:[#allocation2 + $0x38] sm:$0xff]  }
 0x4fc   : > { %11630 = vmatprep.subr.bf16.mxu1 %v12815_v22  ;;  %v6326_v60 = vrot.slane %v15085_v43, 1 }
 0x4fe   : > { %11559 = vmatmul.mubr.bf16.gmra.mrb[16].mxu1 %v5872_v28  ;;  %v12816_v28 = vld [vmem:[#allocation8 + $0x108] sm:$0xff]   ;;  %v6329_v12 = vsel %vm1325_vm1, %v6326_v60, %v15673_v34  ;;  %v15686_v34 = vld [vmem:[#allocation62_spill] sm:$0xff] }
 0x4ff   : > { %11562 = vmatprep.mubr.bf16.mxu1 %v5874_v10  ;;  %v6321_v10 = vsel %vm1325_vm1, %v6318_v24, %v6320_v53  ;;  %v15674_v24 = vld [vmem:[#allocation74_spill] sm:$0xff] }
 0x506   : > { %11563 = vmatmul.mubr.bf16.gmra.mrb[20].mxu1 %v5876_v23  ;;  %v6322_v23 = vrot.slane %v15077_v4, 1 }
 0x507   : > { %11566 = vmatprep.mubr.bf16.mxu1 %v5878_v15  ;;  %v15080_v15 = vld [vmem:[#allocation2 + $0x30] sm:$0xff]  }
 0x508   : > { %v6324_v36 = vrot.slane %v15080_v15, 1 }
 0x50e   : > { %11567 = vmatmul.mubr.bf16.gmra.mrb[24].mxu1 %v5880_v62  ;;  %v6323_v62 = vsel %vm1325_vm1, %v6320_v53, %v6322_v23  ;;  %v15675_v53 = vld [vmem:[#allocation75_spill] sm:$0xff] }
 0x50f   : > { %11570 = vmatprep.mubr.bf16.mxu1 %v5882_v1  ;;  %v6325_v1 = vsel %vm1325_vm1, %v6322_v23, %v6324_v36  ;;  %v12827_v23 = vld [vmem:[#allocation8 + $0x158] sm:$0xff]  }
 0x516   : > { %11571 = vmatmul.mubr.bf16.gmra.mrb[28].mxu1 %v5884_v44  ;;  %v12820_v44 = vld [vmem:[#allocation8 + $0x128] sm:$0xff]  }
 0x517   : > { %11574 = vmatprep.mubr.bf16.mxu1 %v5886_v2  ;;  %v6327_v2 = vsel %vm1325_vm1, %v6324_v36, %v6326_v60  ;;  %v15682_v36 = vld [vmem:[#allocation52_spill] sm:$0xff]  ;;  %v15685_v60 = vld [vmem:[#allocation61_spill] sm:$0xff] }
 0x51e   : > { %11575 = vmatmul.mubr.bf16.gmra.mrb[32].mxu1 %v5888_v57  ;;  %v12822_v57 = vld [vmem:[#allocation8 + $0x138] sm:$0xff]  }
 0x51f   : > { %11594 = vmatprep.mubr.bf16.mxu1 %v6317_v52  ;;  %v12824_v52 = vld [vmem:[#allocation8 + $0x140] sm:$0xff]  }
 0x526   : > { %11595 = vmatmul.mubr.bf16.vlgmr.msra.gmra.mrb[0].mxu1 %v6319_v61  ;;  %v15677_v61 = vld [vmem:[#allocation69_spill] sm:$0xff] }
 0x527   : > { %11598 = vmatprep.mubr.bf16.mxu1 %v6321_v10  ;;  %11631 = vmatpush3.bf16.msra.mxu1 %v12815_v22  ;;  %v12819_v22 = vld [vmem:[#allocation8 + $0x120] sm:$0xff]   ;;  %v15678_v10 = vrot.slane %v15677_v61, 1 }
 0x528   : > { %11632 = vmatprep.subr.bf16.mxu1 %v12816_v28  ;;  %v15694_v61 = vld [vmem:[#allocation71_spill] sm:$0xff] }
 0x52b   : > { %11633 = vmatpush3.bf16.msra.mxu1 %v12816_v28 }
 0x52c   : > { %11634 = vmatprep.subr.bf16.mxu1 %v12817_v56 }
 0x52e   : > { %11599 = vmatmul.mubr.bf16.gmra.mrb[4].mxu1 %v6323_v62  ;;  %v12828_v62 = vld [vmem:[#allocation8 + $0x160] sm:$0xff]  }
 0x52f   : > { %11602 = vmatprep.mubr.bf16.mxu1 %v6325_v1  ;;  %11635 = vmatpush3.bf16.msra.mxu1 %v12817_v56  ;;  %v15680_v56 = vld [vmem:[#allocation45_spill] sm:$0xff]  ;;  %v12829_v1 = vld [vmem:[#allocation8 + $0x168] sm:$0xff]  }
 0x530   : > { %11636 = vmatprep.subr.bf16.mxu1 %v12818_v20 }
 0x533   : > { %11637 = vmatpush3.bf16.msra.mxu1 %v12818_v20  ;;  %v15683_v20 = vld [vmem:[#allocation55_spill] sm:$0xff] }
 0x534   : > { %11638 = vmatprep.subr.bf16.mxu1 %v12819_v22 }
 0x536   : > { %11603 = vmatmul.mubr.bf16.gmra.mrb[8].mxu1 %v6327_v2  ;;  %v12831_v2 = vld [vmem:[#allocation8 + $0x178] sm:$0xff]  }
 0x537   : > { %11606 = vmatprep.mubr.bf16.mxu1 %v6329_v12  ;;  %11639 = vmatpush3.bf16.msra.mxu1 %v12819_v22  ;;  %v15684_v22 = vld [vmem:[#allocation58_spill] sm:$0xff]  ;;  %v15687_v12 = vld [vmem:[#allocation63_spill] sm:$0xff] }
 0x538   : > { %11640 = vmatprep.subr.bf16.mxu1 %v12820_v44 }
 0x53b   : > { %11641 = vmatpush3.bf16.msra.mxu1 %v12820_v44  ;;  %v12830_v44 = vld [vmem:[#allocation8 + $0x170] sm:$0xff]  }
 0x53c   : > { %11642 = vmatprep.subr.bf16.mxu1 %v12821_v42 }
 0x53e   : > { %11607 = vmatmul.mubr.bf16.gmra.mrb[12].mxu1 %v14709_v3  ;;  %v12823_v3 = vld [vmem:[#allocation2 + $0x98] ss:$0 sps:$4 sm:$0x11]  }
 0x53f   : > { %11610 = vmatprep.mubr.bf16.mxu1 %v14718_v58  ;;  %11643 = vmatpush3.bf16.msra.mxu1 %v12821_v42  ;;  %v15676_v58 = vld [vmem:[#allocation76_spill] sm:$0xff]  ;;  %v6350_v28 = vrot.slane %v12823_v3, 1  ;;  %v12833_v42 = vld [vmem:[#allocation8 + $0x180] sm:$0xff]  }
 0x540   : > { %11644 = vmatprep.subr.bf16.mxu1 %v12822_v57  ;;  %v15691_v3 = vld [vmem:[#allocation67_spill] sm:$0xff] }
 0x543   : > { %11645 = vmatpush3.bf16.msra.mxu1 %v12822_v57  ;;  %v15688_v57 = vld [vmem:[#allocation64_spill] sm:$0xff] }
 0x544   : > { %11682 = vmatprep.subr.bf16.mxu1 %v12824_v52 }
 0x546   : > { %11611 = vmatmul.mubr.bf16.gmra.mrb[16].mxu1 %v14721_v6  ;;  %v6351_v6 = vsel %vm1325_vm1, %v15678_v10, %v6350_v28  ;;  %v7101_v28 = vld [vmem:[#allocation2 + $0x8] sm:$0xc]  ;;  %v12908_v10 = vld [vmem:[#allocation2 + $0xc] sm:$0xf] }
 0x547   : > { %11614 = vmatprep.mubr.bf16.mxu1 %v14729_v21  ;;  %v15679_v21 = vld [vmem:[#allocation43_spill] sm:$0xff] }
 0x54e   : > { %11615 = vmatmul.mubr.bf16.gmra.mrb[20].mxu1 %v14732_v13  ;;  %v12825_v13 = vld [vmem:[#allocation8 + $0x148] sm:$0xff]  }
 0x54f   : > { %11618 = vmatprep.mubr.bf16.mxu1 %v14735_v14  ;;  %v15681_v14 = vld [vmem:[#allocation49_spill] sm:$0xff] }
 0x556   : > { %11619 = vmatmul.mubr.bf16.gmra.mrb[24].mxu1 %v14738_v11  ;;  %v12826_v11 = vld [vmem:[#allocation8 + $0x150] sm:$0xff]  }
 0x557   : > { %11622 = vmatprep.mubr.bf16.mxu1 %v15674_v24  ;;  %v15690_v24 = vld [vmem:[#allocation66_spill] sm:$0xff] }
 0x55e   : > { %11623 = vmatmul.mubr.bf16.gmra.mrb[28].mxu1 %v15675_v53  ;;  %v15692_v53 = vld [vmem:[#allocation68_spill] sm:$0xff] }
 0x55f   : > { %11626 = vmatprep.mubr.bf16.mxu1 %v15676_v58  ;;  %v15693_v58 = vld [vmem:[#allocation70_spill] sm:$0xff] }
 0x566   : > { %11627 = vmatmul.mubr.bf16.gmra.mrb[32].mxu1 %v6351_v6  ;;  %v10139_v6 = vcombine.low %v7101_v28, %v12908_v10  ;;  %v15703_v28 = vld [vmem:[#allocation82_spill] sm:$0xff]  ;;  %v15705_v10 = vld [vmem:[#allocation84_spill] sm:$0xff] }
 0x567   : > { %11646 = vmatprep.mubr.bf16.mxu1 %v15679_v21  ;;  %v15695_v21 = vld [vmem:[#allocation72_spill] sm:$0xff] }
 0x56e   : > { %11647 = vmatmul.mubr.bf16.vlgmr.msra.gmra.mrb[0].mxu1 %v15680_v56  ;;  %v7123_v56 = vrot.slane %v15064_v17, 2  ;;  %v7129_v17 = vrot.slane %v15077_v4, 2 }
 0x56f   : > { %11650 = vmatprep.mubr.bf16.mxu1 %v15681_v14  ;;  %11683 = vmatpush3.bf16.msra.mxu1 %v12824_v52  ;;  %v15689_v52 = vld [vmem:[#allocation65_spill] sm:$0xff] }
 0x570   : > { %11684 = vmatprep.subr.bf16.mxu1 %v12825_v13  ;;  %v15696_v14 = vld [vmem:[#allocation73_spill] sm:$0xff] }
 0x573   : > { %11685 = vmatpush3.bf16.msra.mxu1 %v12825_v13  ;;  %v7122_v13 = vrot.slane %v10139_v6, 2  ;;  %v15706_v6 = vld [vmem:[#allocation85_spill] sm:$0xff] }
 0x574   : > { %11686 = vmatprep.subr.bf16.mxu1 %v12826_v11 }
 0x576   : > { %11651 = vmatmul.mubr.bf16.gmra.mrb[4].mxu1 %v15682_v36  ;;  %v7127_v36 = vrot.slane %v15072_v30, 2 }
 0x577   : > { %11654 = vmatprep.mubr.bf16.mxu1 %v15683_v20  ;;  %11687 = vmatpush3.bf16.msra.mxu1 %v12826_v11  ;;  %v7124_v11 = vsel %vm2597_vm3, %v7122_v13, %v7123_v56  ;;  %v12834_v20 = vld [vmem:[#allocation8 + $0x188] sm:$0xff]   ;;  %v15707_v13 = vld [vmem:[#allocation86_spill] sm:$0xff] }
 0x578   : > { %11688 = vmatprep.subr.bf16.mxu1 %v12827_v23 }
 0x57b   : > { %11689 = vmatpush3.bf16.msra.mxu1 %v12827_v23  ;;  %v7125_v23 = vrot.slane %v15069_v55, 2  ;;  %v7130_v55 = vsel %vm2597_vm3, %v7127_v36, %v7129_v17 }
 0x57c   : > { %11690 = vmatprep.subr.bf16.mxu1 %v12828_v62 }
 0x57e   : > { %11655 = vmatmul.mubr.bf16.gmra.mrb[8].mxu1 %v15684_v22  ;;  %v12835_v22 = vld [vmem:[#allocation8 + $0x190] sm:$0xff]  }
 0x57f   : > { %11658 = vmatprep.mubr.bf16.mxu1 %v15685_v60  ;;  %11691 = vmatpush3.bf16.msra.mxu1 %v12828_v62  ;;  %v7126_v62 = vsel %vm2597_vm3, %v7123_v56, %v7125_v23  ;;  %v7131_v60 = vrot.slane %v15080_v15, 2  ;;  %v15697_v15 = vrot.slane %v14491_v27, 2  ;;  %v15701_v27 = vld [vmem:[#allocation80_spill] sm:$0xff]  ;;  %v7586_v56 = vrot.slane %v14819_v7, 2 }
 0x580   : > { %11692 = vmatprep.subr.bf16.mxu1 %v12829_v1  ;;  %v12851_v7 = vld [vmem:[#allocation8 + $0x1d0] sm:$0xff]  }
 0x581   : > { %v7132_v30 = vsel %vm2597_vm3, %v7129_v17, %v7131_v60 }
 0x583   : > { %11693 = vmatpush3.bf16.msra.mxu1 %v12829_v1  ;;  %v7128_v1 = vsel %vm2597_vm3, %v7125_v23, %v7127_v36  ;;  %v15709_v36 = vld [vmem:[#allocation87_spill] sm:$0xff] }
 0x584   : > { %11694 = vmatprep.subr.bf16.mxu1 %v12830_v44 }
 0x586   : > { %11659 = vmatmul.mubr.bf16.gmra.mrb[12].mxu1 %v15686_v34  ;;  %v7133_v34 = vrot.slane %v15085_v43, 2  ;;  %v15699_v43 = vld [vmem:[#allocation78_spill] sm:$0xff] }
 0x587   : > { %11662 = vmatprep.mubr.bf16.mxu1 %v15687_v12  ;;  %11695 = vmatpush3.bf16.msra.mxu1 %v12830_v44  ;;  %v12836_v44 = vld [vmem:[#allocation8 + $0x198] sm:$0xff]   ;;  %v12838_v12 = vld [vmem:[#allocation8 + $0x1a8] sm:$0xff]  }
 0x588   : > { %11696 = vmatprep.subr.bf16.mxu1 %v12831_v2  ;;  %v7134_v4 = vsel %vm2597_vm3, %v7131_v60, %v7133_v34 }
 0x58b   : > { %11697 = vmatpush3.bf16.msra.mxu1 %v12831_v2  ;;  %v12837_v2 = vld [vmem:[#allocation8 + $0x1a0] sm:$0xff]  }
 0x58c   : > { %11734 = vmatprep.subr.bf16.mxu1 %v12833_v42 }
 0x58e   : > { %11663 = vmatmul.mubr.bf16.gmra.mrb[16].mxu1 %v15688_v57  ;;  %v12839_v57 = vld [vmem:[#allocation8 + $0x1b0] sm:$0xff]  }
 0x58f   : > { %11666 = vmatprep.mubr.bf16.mxu1 %v15689_v52  ;;  %v12840_v52 = vld [vmem:[#allocation8 + $0x1b8] sm:$0xff]  }
 0x596   : > { %11667 = vmatmul.mubr.bf16.gmra.mrb[20].mxu1 %v15690_v24  ;;  %v15698_v24 = vld [vmem:[#allocation77_spill] sm:$0xff] }
 0x597   : > { %11670 = vmatprep.mubr.bf16.mxu1 %v15691_v3  ;;  %v12844_v3 = vld [vmem:[#allocation8 + $0x1c0] sm:$0xff]  }
 0x59e   : > { %11671 = vmatmul.mubr.bf16.gmra.mrb[24].mxu1 %v15692_v53  ;;  %v15700_v53 = vld [vmem:[#allocation79_spill] sm:$0xff] }
 0x59f   : > { %11674 = vmatprep.mubr.bf16.mxu1 %v15693_v58  ;;  %v15702_v58 = vld [vmem:[#allocation81_spill] sm:$0xff] }
 0x5a6   : > { %11675 = vmatmul.mubr.bf16.gmra.mrb[28].mxu1 %v15694_v61  ;;  %v15704_v61 = vld [vmem:[#allocation83_spill] sm:$0xff] }
 0x5a7   : > { %11678 = vmatprep.mubr.bf16.mxu1 %v15695_v21 }
 0x5ae   : > { %11679 = vmatmul.mubr.bf16.gmra.mrb[32].mxu1 %v15696_v14 }
 0x5af   : > { %11698 = vmatprep.mubr.bf16.mxu1 %v7124_v11  ;;  %v15708_v11 = vld [vmem:[#allocation88_spill] sm:$0xff] }
 0x5b0   : > { %v7585_v23 = vrot.slane %v15708_v11, 2  ;;  %v15710_v11 = vld [vmem:[#allocation89_spill] sm:$0xff] }
 0x5b6   : > { %11699 = vmatmul.mubr.bf16.vlgmr.msra.gmra.mrb[0].mxu1 %v7126_v62  ;;  %v7588_v62 = vrot.slane %v14821_v39, 2 }
 0x5b7   : > { %11702 = vmatprep.mubr.bf16.mxu1 %v7128_v1  ;;  %11735 = vmatpush3.bf16.msra.mxu1 %v12833_v42  ;;  %v7136_v42 = vsel %vm2597_vm3, %v7133_v34, %v15697_v15  ;;  %v7590_v1 = vrot.slane %v14823_v35, 2  ;;  %v7596_v34 = vrot.slane %v14836_v59, 2  ;;  %v12863_v15 = vld [vmem:[#allocation8 + $0x1f0] sm:$0xff]   ;;  %v12866_v59 = vld [vmem:[#allocation8 + $0x1f8] sm:$0xff]  }
 0x5b8   : > { %11736 = vmatprep.subr.bf16.mxu1 %v12834_v20  ;;  %v7589_v17 = vsel %vm2597_vm3, %v7586_v56, %v7588_v62 }
 0x5b9   : > { %v7591_v60 = vsel %vm2597_vm3, %v7588_v62, %v7590_v1  ;;  %v15713_v62 = vld [vmem:[#allocation92_spill] sm:$0xff] }
 0x5bb   : > { %11737 = vmatpush3.bf16.msra.mxu1 %v12834_v20  ;;  %v7587_v20 = vsel %vm2597_vm3, %v7585_v23, %v7586_v56  ;;  %v12869_v23 = vld [vmem:[#allocation8 + $0x208] sm:$0xff]  }
 0x5bc   : > { %11738 = vmatprep.subr.bf16.mxu1 %v12835_v22 }
 0x5be   : > { %11703 = vmatmul.mubr.bf16.gmra.mrb[4].mxu1 %v7130_v55  ;;  %v7594_v55 = vrot.slane %v14831_v40, 2 }
 0x5bf   : > { %11706 = vmatprep.mubr.bf16.mxu1 %v7132_v30  ;;  %11739 = vmatpush3.bf16.msra.mxu1 %v12835_v22  ;;  %v12848_v22 = vld [vmem:[#allocation8 + $0x1c8] sm:$0xff]   ;;  %v12854_v30 = vld [vmem:[#allocation8 + $0x1d8] sm:$0xff]  }
 0x5c0   : > { %11740 = vmatprep.subr.bf16.mxu1 %v12836_v44  ;;  %v7597_v40 = vsel %vm2597_vm3, %v7594_v55, %v7596_v34 }
 0x5c3   : > { %11741 = vmatpush3.bf16.msra.mxu1 %v12836_v44  ;;  %v7592_v44 = vrot.slane %v14825_v29, 2  ;;  %v12860_v29 = vld [vmem:[#allocation8 + $0x1e8] sm:$0xff]  }
 0x5c4   : > { %11742 = vmatprep.subr.bf16.mxu1 %v12837_v2 }
 0x5c5   : > { %v7593_v39 = vsel %vm2597_vm3, %v7590_v1, %v7592_v44  ;;  %v7595_v35 = vsel %vm2597_vm3, %v7592_v44, %v7594_v55  ;;  %v15714_v1 = vld [vmem:[#allocation93_spill] sm:$0xff] }
 0x5c6   : > { %11707 = vmatmul.mubr.bf16.gmra.mrb[8].mxu1 %v7134_v4  ;;  %v12874_v44 = vld [vmem:[#allocation8 + $0x230] sm:$0xff]   ;;  %v12875_v55 = vld [vmem:[#allocation8 + $0x238] sm:$0xff]  }
 0x5c7   : > { %11710 = vmatprep.mubr.bf16.mxu1 %v7136_v42  ;;  %11743 = vmatpush3.bf16.msra.mxu1 %v12837_v2  ;;  %v12857_v2 = vld [vmem:[#allocation8 + $0x1e0] sm:$0xff]   ;;  %v7600_v42 = vrot.slane %v14845_v32, 2 }
 0x5c8   : > { %11744 = vmatprep.subr.bf16.mxu1 %v12838_v12 }
 0x5cb   : > { %11745 = vmatpush3.bf16.msra.mxu1 %v12838_v12  ;;  %v7598_v12 = vrot.slane %v14841_v45, 2 }
 0x5cc   : > { %11746 = vmatprep.subr.bf16.mxu1 %v12839_v57 }
 0x5cd   : > { %v7599_v4 = vsel %vm2597_vm3, %v7596_v34, %v7598_v12  ;;  %v7601_v45 = vsel %vm2597_vm3, %v7598_v12, %v7600_v42  ;;  %v8084_v34 = vshrl.u32 %v14969_v5, 16  ;;  %v8087_v12 = vshll.u32 %v14969_v5, 16  ;;  %v15728_v5 = vld [vmem:[#allocation107_spill] sm:$0xff] }
 0x5ce   : > { %11711 = vmatmul.mubr.bf16.gmra.mrb[12].mxu1 %v15698_v24  ;;  %v12868_v24 = vld [vmem:[#allocation8 + $0x200] sm:$0xff]  }
 0x5cf   : > { %11714 = vmatprep.mubr.bf16.mxu1 %v15699_v43  ;;  %11747 = vmatpush3.bf16.msra.mxu1 %v12839_v57  ;;  %v7602_v57 = vrot.slane %v14854_v54, 2  ;;  %v7604_v43 = vrot.slane %v14860_v25, 2  ;;  %v7612_v25 = vrot.slane %v14893_v26, 2 }
 0x5d0   : > { %11748 = vmatprep.subr.bf16.mxu1 %v12840_v52 }
 0x5d1   : > { %v7605_v32 = vsel %vm2597_vm3, %v7602_v57, %v7604_v43 }
 0x5d3   : > { %11749 = vmatpush3.bf16.msra.mxu1 %v12840_v52  ;;  %v7603_v52 = vsel %vm2597_vm3, %v7600_v42, %v7602_v57  ;;  %v15731_v42 = vld [vmem:[#allocation110_spill] sm:$0xff]  ;;  %v15733_v57 = vld [vmem:[#allocation112_spill] sm:$0xff] }
 0x5d4   : > { %11786 = vmatprep.subr.bf16.mxu1 %v12844_v3 }
 0x5d6   : > { %11715 = vmatmul.mubr.bf16.gmra.mrb[16].mxu1 %v15700_v53  ;;  %v7608_v53 = vrot.slane %v14879_v47, 2  ;;  %v7616_v47 = vrot.slane %v14903_v38, 2  ;;  %v15712_v38 = vld [vmem:[#allocation91_spill] sm:$0xff] }
 0x5d7   : > { %11718 = vmatprep.mubr.bf16.mxu1 %v15701_v27  ;;  %v7610_v27 = vrot.slane %v14886_v49, 2  ;;  %v7618_v49 = vrot.slane %v14914_v33, 2  ;;  %v12870_v33 = vld [vmem:[#allocation8 + $0x210] sm:$0xff]  }
 0x5d9   : > { %v7619_v56 = vsel %vm2597_vm3, %v7616_v47, %v7618_v49 }
 0x5de   : > { %11719 = vmatmul.mubr.bf16.gmra.mrb[20].mxu1 %v15702_v58 }
 0x5df   : > { %11722 = vmatprep.mubr.bf16.mxu1 %v15703_v28  ;;  %v7611_v28 = vsel %vm2597_vm3, %v7608_v53, %v7610_v27 }
 0x5e6   : > { %11723 = vmatmul.mubr.bf16.gmra.mrb[24].mxu1 %v15704_v61  ;;  %v7613_v61 = vsel %vm2597_vm3, %v7610_v27, %v7612_v25 }
 0x5e7   : > { %11726 = vmatprep.mubr.bf16.mxu1 %v15705_v10 }
 0x5ee   : > { %11727 = vmatmul.mubr.bf16.gmra.mrb[28].mxu1 %v15706_v6 }
 0x5ef   : > { %11730 = vmatprep.mubr.bf16.mxu1 %v15707_v13  ;;  %v12867_v13 = vld [vmem:[#allocation2 + $0xa0] ss:$0 sps:$4 sm:$0x33]  }
 0x5f0   : > { %v7620_v26 = vrot.slane %v12867_v13, 2  ;;  %v15246_v13 = vld [vmem:[%s15469_s4] ss:$0 sm:$0xff] }
 0x5f6   : > { %11731 = vmatmul.mubr.bf16.gmra.mrb[32].mxu1 %v15709_v36  ;;  %v15711_v36 = vld [vmem:[#allocation90_spill] sm:$0xff] }
 0x5f7   : > { %11750 = vmatprep.mubr.bf16.mxu1 %v7587_v20  ;;  %v12871_v20 = vld [vmem:[#allocation8 + $0x218] sm:$0xff]  }
 0x5fe   : > { %11751 = vmatmul.mubr.bf16.vlgmr.msra.gmra.mrb[0].mxu1 %v7589_v17  ;;  %v12873_v17 = vld [vmem:[#allocation8 + $0x228] sm:$0xff]  }
 0x5ff   : > { %11754 = vmatprep.mubr.bf16.mxu1 %v7591_v60  ;;  %11787 = vmatpush3.bf16.msra.mxu1 %v12844_v3  ;;  %v7606_v3 = vrot.slane %v14870_v31, 2  ;;  %v7614_v31 = vrot.slane %v14899_v46, 2  ;;  %v7621_v46 = vsel %vm2597_vm3, %v7618_v49, %v7620_v26  ;;  %v15715_v60 = vld [vmem:[#allocation94_spill] sm:$0xff] }
 0x600   : > { %11788 = vmatprep.subr.bf16.mxu1 %v12848_v22 }
 0x601   : > { %v7607_v54 = vsel %vm2597_vm3, %v7604_v43, %v7606_v3  ;;  %v7609_v58 = vsel %vm2597_vm3, %v7606_v3, %v7608_v53  ;;  %v7615_v10 = vsel %vm2597_vm3, %v7612_v25, %v7614_v31  ;;  %v7617_v6 = vsel %vm2597_vm3, %v7614_v31, %v7616_v47  ;;  %v8831_v53 = vpop.trf.xlu1 }
 0x603   : > { %11789 = vmatpush3.bf16.msra.mxu1 %v12848_v22  ;;  %v12872_v22 = vld [vmem:[#allocation8 + $0x220] sm:$0xff]  }
 0x604   : > { %11790 = vmatprep.subr.bf16.mxu1 %v12851_v7 }
 0x606   : > { %11755 = vmatmul.mubr.bf16.gmra.mrb[4].mxu1 %v7593_v39  ;;  %v15718_v39 = vld [vmem:[#allocation97_spill] sm:$0xff] }
 0x607   : > { %11758 = vmatprep.mubr.bf16.mxu1 %v7595_v35  ;;  %11791 = vmatpush3.bf16.msra.mxu1 %v12851_v7  ;;  %v15716_v7 = vld [vmem:[#allocation95_spill] sm:$0xff]  ;;  %v15719_v35 = vld [vmem:[#allocation98_spill] sm:$0xff] }
 0x608   : > { %11792 = vmatprep.subr.bf16.mxu1 %v12854_v30 }
 0x60b   : > { %11793 = vmatpush3.bf16.msra.mxu1 %v12854_v30  ;;  %v15717_v30 = vld [vmem:[#allocation96_spill] sm:$0xff] }
 0x60c   : > { %11794 = vmatprep.subr.bf16.mxu1 %v12857_v2 }
 0x60e   : > { %11759 = vmatmul.mubr.bf16.gmra.mrb[8].mxu1 %v7597_v40  ;;  %v8089_v40 = vrot.slane %v8087_v12, 3  ;;  %v15736_v12 = vld [vmem:[#allocation22_spill] sm:$0xff] }
 0x60f   : > { %11762 = vmatprep.mubr.bf16.mxu1 %v7599_v4  ;;  %11795 = vmatpush3.bf16.msra.mxu1 %v12857_v2  ;;  %v15720_v2 = vld [vmem:[#allocation99_spill] sm:$0xff] }
 0x610   : > { %11796 = vmatprep.subr.bf16.mxu1 %v12860_v29 }
 0x613   : > { %11797 = vmatpush3.bf16.msra.mxu1 %v12860_v29  ;;  %v8086_v29 = vrot.slane %v8084_v34, 2 }
 0x614   : > { %11798 = vmatprep.subr.bf16.mxu1 %v12863_v15 }
 0x615   : > { %v8090_v4 = vor.u32 %v8089_v40, %v8086_v29 }
 0x616   : > { %11763 = vmatmul.mubr.bf16.gmra.mrb[12].mxu1 %v7601_v45 }
 0x617   : > { %11766 = vmatprep.mubr.bf16.mxu1 %v7603_v52  ;;  %11799 = vmatpush3.bf16.msra.mxu1 %v12863_v15  ;;  %v15730_v15 = vld [vmem:[#allocation109_spill] sm:$0xff] }
 0x618   : > { %11800 = vmatprep.subr.bf16.mxu1 %v12866_v59 }
 0x61b   : > { %11801 = vmatpush3.bf16.msra.mxu1 %v12866_v59 }
 0x61c   : > { %11838 = vmatprep.subr.bf16.mxu1 %v12868_v24 }
 0x61e   : > { %11767 = vmatmul.mubr.bf16.gmra.mrb[16].mxu1 %v7605_v32 }
 0x61f   : > { %11770 = vmatprep.mubr.bf16.mxu1 %v7607_v54 }
 0x626   : > { %11771 = vmatmul.mubr.bf16.gmra.mrb[20].mxu1 %v7609_v58 }
 0x627   : > { %11774 = vmatprep.mubr.bf16.mxu1 %v7611_v28 }
 0x62e   : > { %11775 = vmatmul.mubr.bf16.gmra.mrb[24].mxu1 %v7613_v61 }
 0x62f   : > { %11778 = vmatprep.mubr.bf16.mxu1 %v7615_v10 }
 0x636   : > { %11779 = vmatmul.mubr.bf16.gmra.mrb[28].mxu1 %v7617_v6 }
 0x637   : > { %11782 = vmatprep.mubr.bf16.mxu1 %v7619_v56 }
 0x63e   : > { %11783 = vmatmul.mubr.bf16.gmra.mrb[32].mxu1 %v7621_v46 }
 0x63f   : > { %11802 = vmatprep.mubr.bf16.mxu1 %v15710_v11 }
 0x646   : > { %11803 = vmatmul.mubr.bf16.vlgmr.msra.gmra.mrb[0].mxu1 %v15711_v36  ;;  %v10321_v36 = vld [vmem:[%s15241_s14 + $0x8] sm:$0xff]  }
 0x647   : > { %11839 = vmatpush3.bf16.msra.mxu1 %v12868_v24  ;;  %11806 = vmatprep.mubr.bf16.mxu1 %v15712_v38  ;;  %v10256_v40 = vunpack.c.h.bf16 %v10321_v36 }
 0x648   : > { %11840 = vmatprep.subr.bf16.mxu1 %v12869_v23 }
 0x64b   : > { %11841 = vmatpush3.bf16.msra.mxu1 %v12869_v23  ;;  %v10250_v23 = vld [vmem:[%s15241_s14] sm:$0xff]  }
 0x64c   : > { %11842 = vmatprep.subr.bf16.mxu1 %v12870_v33  ;;  %v10252_v34 = vunpack.c.h.bf16 %v10250_v23 }
 0x64e   : > { %11807 = vmatmul.mubr.bf16.gmra.mrb[4].mxu1 %v15713_v62 }
 0x64f   : > { %11843 = vmatpush3.bf16.msra.mxu1 %v12870_v33  ;;  %11810 = vmatprep.mubr.bf16.mxu1 %v15714_v1 }
 0x650   : > { %11844 = vmatprep.subr.bf16.mxu1 %v12871_v20 }
 0x653   : > { %11845 = vmatpush3.bf16.msra.mxu1 %v12871_v20 }
 0x654   : > { %11846 = vmatprep.subr.bf16.mxu1 %v12872_v22 }
 0x656   : > { %11811 = vmatmul.mubr.bf16.gmra.mrb[8].mxu1 %v15715_v60 }
 0x657   : > { %11847 = vmatpush3.bf16.msra.mxu1 %v12872_v22  ;;  %11814 = vmatprep.mubr.bf16.mxu1 %v15716_v7  ;;  %v10255_v7 = vunpack.c.l.bf16 %v10321_v36 }
 0x658   : > { %11848 = vmatprep.subr.bf16.mxu1 %v12873_v17 }
 0x65b   : > { %11849 = vmatpush3.bf16.msra.mxu1 %v12873_v17  ;;  %v10251_v17 = vunpack.c.l.bf16 %v10250_v23 }
 0x65c   : > { %11850 = vmatprep.subr.bf16.mxu1 %v12874_v44 }
 0x65e   : > { %11815 = vmatmul.mubr.bf16.gmra.mrb[12].mxu1 %v15717_v30 }
 0x65f   : > { %11851 = vmatpush3.bf16.msra.mxu1 %v12874_v44  ;;  %11818 = vmatprep.mubr.bf16.mxu1 %v15718_v39  ;;  %v15735_v39 = vld [vmem:[#allocation19_spill] sm:$0xff] }
 0x660   : > { %11852 = vmatprep.subr.bf16.mxu1 %v12875_v55 }
 0x663   : > { %11853 = vmatpush3.bf16.msra.mxu1 %v12875_v55  ;;  %v15734_v55 = vld [vmem:[#allocation20_spill] sm:$0xff] }
 0x664   : > { %11890 = vmatprep.subr.bf16.mxu1 %v15695_v21 }
 0x666   : > { %11819 = vmatmul.mubr.bf16.gmra.mrb[16].mxu1 %v15719_v35 }
 0x667   : > { %11822 = vmatprep.mubr.bf16.mxu1 %v15720_v2 }
 0x66e   : > { %11823 = vmatmul.mubr.bf16.gmra.mrb[20].mxu1 %v14929_v41  ;;  %v8091_v41 = vsel %vm3398_vm4, %v14947_v18, %v8090_v4  ;;  %v15726_v18 = vld [vmem:[#allocation105_spill] sm:$0xff] }
 0x66f   : > { %11826 = vmatprep.mubr.bf16.mxu1 %v14934_v9  ;;  %v15721_v9 = vld [vmem:[#allocation100_spill] sm:$0xff] }
 0x676   : > { %11827 = vmatmul.mubr.bf16.gmra.mrb[24].mxu1 %v14938_v0  ;;  %v15722_v0 = vld [vmem:[#allocation101_spill] sm:$0xff] }
 0x677   : > { %11830 = vmatprep.mubr.bf16.mxu1 %v14943_v51  ;;  %v15723_v51 = vld [vmem:[#allocation102_spill] sm:$0xff] }
 0x67e   : > { %11831 = vmatmul.mubr.bf16.gmra.mrb[28].mxu1 %v14952_v19  ;;  %v15724_v19 = vld [vmem:[#allocation103_spill] sm:$0xff] }
 0x67f   : > { %11834 = vmatprep.mubr.bf16.mxu1 %v14958_v63  ;;  %v15725_v63 = vld [vmem:[#allocation104_spill] sm:$0xff] }
 0x686   : > { %11835 = vmatmul.mubr.bf16.gmra.mrb[32].mxu1 %v8091_v41  ;;  %v15737_v41 = vld [vmem:[#allocation21_spill] sm:$0xff] }
 0x687   : > { %11854 = vmatprep.mubr.bf16.mxu1 %v14961_v16  ;;  %v15727_v16 = vld [vmem:[#allocation106_spill] sm:$0xff] }
 0x68e   : > { %11855 = vmatmul.mubr.bf16.vlgmr.msra.gmra.mrb[0].mxu1 %v15721_v9 }
 0x68f   : > { %11891 = vmatpush3.bf16.msra.mxu1 %v15695_v21  ;;  %11858 = vmatprep.mubr.bf16.mxu1 %v15722_v0  ;;  %v15729_v21 = vld [vmem:[#allocation108_spill] sm:$0xff] }
 0x690   : > { %11892 = vmatprep.subr.bf16.mxu1 %v15696_v14 }
 0x693   : > { %11893 = vmatpush3.bf16.msra.mxu1 %v15696_v14  ;;  %v15732_v14 = vld [vmem:[#allocation111_spill] sm:$0xff] }
 0x696   : > { %11859 = vmatmul.mubr.bf16.gmra.mrb[4].mxu1 %v15723_v51  ;;  %v10322_v51 = vld [vmem:[%s15241_s14 + $0x10] sm:$0xff]  }
 0x697   : > { %11862 = vmatprep.mubr.bf16.mxu1 %v15724_v19 }
 0x69e   : > { %11863 = vmatmul.mubr.bf16.gmra.mrb[8].mxu1 %v15725_v63 }
 0x69f   : > { %11866 = vmatprep.mubr.bf16.mxu1 %v14989_v50  ;;  %v8847_v50 = vpop.trf.xlu0 }
 0x6a0   : > { %8928 = vmatprep.mubr.bf16.mxu0 %v8847_v50 }
 0x6a1   : > { %8929 = vmatmul.mubr.bf16.vlgmr.msra.gmra.mrb[36].mxu0 %v8831_v53 }
 0x6a3   : > { %v8848_v59 = vpop.trf.xlu0 }
 0x6a4   : > { %8936 = vmatprep.mubr.bf16.mxu0 %v8848_v59  ;;  %v10259_v59 = vunpack.c.l.bf16 %v10322_v51 }
 0x6a6   : > { %11867 = vmatmul.mubr.bf16.gmra.mrb[12].mxu1 %v15726_v18 }
 0x6a7   : > { %11870 = vmatprep.mubr.bf16.mxu1 %v15727_v16  ;;  %v8849_v45 = vpop.trf.xlu0 }
 0x6ab   : > { %v8850_v52 = vpop.trf.xlu0 }
 0x6ae   : > { %11871 = vmatmul.mubr.bf16.gmra.mrb[16].mxu1 %v15728_v5 }
 0x6af   : > { %11874 = vmatprep.mubr.bf16.mxu1 %v15729_v21  ;;  %v8851_v24 = vpop.trf.xlu0  ;;  %v10323_v21 = vld [vmem:[%s15241_s14 + $0x18] sm:$0xff]  }
 0x6b0   : > { %v10263_v53 = vunpack.c.l.bf16 %v10323_v21 }
 0x6b3   : > { %v8852_v43 = vpop.trf.xlu0 }
 0x6b6   : > { %11875 = vmatmul.mubr.bf16.gmra.mrb[20].mxu1 %v15730_v15 }
 0x6b7   : > { %11878 = vmatprep.mubr.bf16.mxu1 %v15731_v42  ;;  %v8853_v3 = vpop.trf.xlu0 }
 0x6bb   : > { %v8854_v32 = vpop.trf.xlu0 }
 0x6be   : > { %11879 = vmatmul.mubr.bf16.gmra.mrb[24].mxu1 %v15017_v8 }
 0x6bf   : > { %11882 = vmatprep.mubr.bf16.mxu1 %v15732_v14  ;;  %v8863_v54 = vpop.trf.xlu0 }
 0x6c3   : > { %v8864_v8 = vpop.trf.xlu0 }
 0x6c6   : > { %11883 = vmatmul.mubr.bf16.gmra.mrb[28].mxu1 %v15733_v57 }
 0x6c7   : > { %11886 = vmatprep.mubr.bf16.mxu1 %v15026_v48  ;;  %v8865_v48 = vpop.trf.xlu0 }
 0x6cb   : > { %v8866_v58 = vpop.trf.xlu0 }
 0x6ce   : > { %11887 = vmatmul.mubr.bf16.gmra.mrb[32].mxu1 %v15029_v37  ;;  %v8832_v37 = vpop.trf.xlu1 }
 0x6cf   : > { %11894 = vmatprep.mubr.msk.bf16.mxu1 %vm8871_vm14, %v8863_v54  ;;  %8937 = vmatmul.mubr.bf16.gmra.mrb[40].mxu0 %v8832_v37  ;;  %v8867_v28 = vpop.trf.xlu0  ;;  %v15738_v54 = vld [vmem:[#allocation25_spill] sm:$0xff] }
 0x6d0   : > { %8944 = vmatprep.mubr.bf16.mxu0 %v8849_v45 }
 0x6d2   : > { %v8833_v27 = vpop.trf.xlu1 }
 0x6d3   : > { %v8868_v31 = vpop.trf.xlu0 }
 0x6d6   : > { %11895 = vmatmul.mubr.msk.bf16.vlgmr.msra.gmra.mrb[36].mxu1 %vm8871_vm14, %v8864_v8  ;;  %v8834_v25 = vpop.trf.xlu1 }
 0x6d7   : > { %11898 = vmatprep.mubr.msk.bf16.mxu1 %vm8871_vm14, %v8865_v48  ;;  %8945 = vmatmul.mubr.bf16.gmra.mrb[44].mxu0 %v8833_v27  ;;  %v8869_v61 = vpop.trf.xlu0  ;;  %v10260_v48 = vunpack.c.h.bf16 %v10322_v51 }
 0x6d8   : > { %8952 = vmatprep.mubr.bf16.mxu0 %v8850_v52 }
 0x6da   : > { %v8835_v10 = vpop.trf.xlu1 }
 0x6db   : > { %v8870_v47 = vpop.trf.xlu0 }
 0x6de   : > { %11899 = vmatmul.mubr.msk.bf16.gmra.mrb[40].mxu1 %vm8871_vm14, %v8866_v58  ;;  %v8836_v49 = vpop.trf.xlu1 }
 0x6df   : > { %11902 = vmatprep.mubr.msk.bf16.mxu1 %vm8871_vm14, %v8867_v28  ;;  %8953 = vmatmul.mubr.bf16.gmra.mrb[48].mxu0 %v8834_v25  ;;  %v15739_v28 = vld [vmem:[#allocation23_spill] sm:$0xff] }
 0x6e0   : > { %8960 = vmatprep.mubr.bf16.mxu0 %v8851_v24 }
 0x6e2   : > { %v8837_v6 = vpop.trf.xlu1 }
 0x6e6   : > { %11903 = vmatmul.mubr.msk.bf16.gmra.mrb[44].mxu1 %vm8871_vm14, %v8868_v31  ;;  %v8838_v56 = vpop.trf.xlu1 }
 0x6e7   : > { %11906 = vmatprep.mubr.msk.bf16.mxu1 %vm8871_vm14, %v8869_v61  ;;  %8961 = vmatmul.mubr.bf16.gmra.mrb[52].mxu0 %v8835_v10  ;;  %v15740_v61 = vld [vmem:[#allocation26_spill] sm:$0xff] }
 0x6e8   : > { %8968 = vmatprep.mubr.bf16.mxu0 %v8852_v43 }
 0x6ee   : > { %11907 = vmatmul.mubr.msk.bf16.gmra.mrb[48].mxu1 %vm8871_vm14, %v8870_v47  ;;  %v10264_v47 = vunpack.c.h.bf16 %v10323_v21  ;;  %v15743_v21 = vld [vmem:[#allocation27_spill] sm:$0xff] }
 0x6ef   : > { %8969 = vmatmul.mubr.bf16.gmra.mrb[56].mxu0 %v8836_v49 }
 0x6f0   : > { %8976 = vmatprep.mubr.bf16.mxu0 %v8853_v3 }
 0x6f7   : > { %8977 = vmatmul.mubr.bf16.gmra.mrb[60].mxu0 %v8837_v6 }
 0x6f8   : > { %8984 = vmatprep.mubr.bf16.mxu0 %v8854_v32 }
 0x6ff   : > { %8985 = vmatmul.mubr.bf16.gmra.mrb[64].mxu0 %v8838_v56 }
 0x761   : > { %v11856_v26 = vpop.f32.mrb[0].mxu1 }
 0x762   : > { %v8717_v46 = vadd.f32 %v11856_v26, %v15246_v13  ;;  %v8529_v11 = vpop.f32.mrb[1].mxu1  ;;  %v15741_v26 = vld [vmem:[#allocation24_spill] sm:$0xff] }
 0x763   : > { %v8715_v38 = vadd.f32 %v15246_v13, %v8529_v11  ;;  %v11857_v33 = vpop.f32.mrb[2].mxu1 }
 0x764   : > { %v8753_v20 = vmax.f32 %v8717_v46, 0.0  ;;  %v8718_v62 = vadd.f32 %v11857_v33, %v15246_v13  ;;  %v8532_v1 = vpop.f32.mrb[3].mxu1 }
 0x765   : > { %v8751_v22 = vmax.f32 %v8715_v38, 0.0  ;;  %v8716_v60 = vadd.f32 %v15246_v13, %v8532_v1 }
 0x766   : > { %v8754_v44 = vmax.f32 %v8718_v62, 0.0  ;;  %v8789_v30 = vmul.f32 %v8753_v20, %v15734_v55 }
 0x767   : > { %v8787_v35 = vmul.f32 %v8751_v22, %v15735_v39  ;;  %v8752_v2 = vmax.f32 %v8716_v60, 0.0 }
 0x768   : > { %v8790_v29 = vmul.f32 %v8754_v44, %v15736_v12  ;;  %v9626_v16 = vsub.f32 %v8789_v30, %v10255_v7 }
 0x769   : > { %v9624_v4 = vsub.f32 %v8787_v35, %v10251_v17  ;;  %v8788_v9 = vmul.f32 %v8752_v2, %v15737_v41  ;;  %v11860_v0 = vpop.f32.mrb[4].mxu1  ;;  %v10324_v17 = vld [vmem:[%s15241_s14 + $0x20] sm:$0xff]  }
 0x76a   : > { %v15259_v19 = vpack.c.bf16 %v8790_v29, %v8789_v30  ;;  %v8721_v63 = vadd.f32 %v11860_v0, %v15246_v13  ;;  %v8545_v18 = vpop.f32.mrb[5].mxu1  ;;  %v9627_v57 = vsub.f32 %v8790_v29, %v10256_v40  ;;  %v9662_v27 = vmul.f32 %v9626_v16, %v9626_v16 }
 0x76b   : > { %v9625_v5 = vsub.f32 %v8788_v9, %v10252_v34  ;;  %v8719_v15 = vadd.f32 %v15246_v13, %v8545_v18  ;;  %v11861_v42 = vpop.f32.mrb[6].mxu1  ;;  %v15264_v14 = vpack.c.bf16 %v8788_v9, %v8787_v35  ;;  %v9660_v24 = vmul.f32 %v9624_v4, %v9624_v4  ;;  %v10325_v34 = vld [vmem:[%s15241_s14 + $0x28] sm:$0xff]   ;;  %v15742_v18 = vld [vmem:[#allocation29_spill] sm:$0xff] }
 0x76c   : > { %v8757_v50 = vmax.f32 %v8721_v63, 0.0  ;;  %v8722_v45 = vadd.f32 %v11861_v42, %v15246_v13  ;;  %v8548_v52 = vpop.f32.mrb[7].mxu1  ;;  %v9663_v49 = vmul.f32 %v9627_v57, %v9627_v57  ;;  %v10267_v40 = vunpack.c.l.bf16 %v10324_v17  ;;  %v10327_v63 = vld [vmem:[%s15241_s14 + $0x38] sm:$0xff]   ;;  %v15744_v42 = vld [vmem:[#allocation30_spill] sm:$0xff] }
 0x76d   : > { %v9661_v43 = vmul.f32 %v9625_v5, %v9625_v5  ;;  %v8755_v3 = vmax.f32 %v8719_v15, 0.0  ;;  %v8720_v32 = vadd.f32 %v15246_v13, %v8548_v52  ;;  %9124 = vxpose.xlu0.c.b16.start [1/8] %v15264_v14, 128  ;;  %v10268_v51 = vunpack.c.h.bf16 %v10324_v17 }
 0x76e   : > { %v8793_v8 = vmul.f32 %v8757_v50, %v15738_v54  ;;  %v8758_v37 = vmax.f32 %v8722_v45, 0.0  ;;  %v10271_v5 = vunpack.c.l.bf16 %v10325_v34  ;;  %v15745_v45 = vld [vmem:[#allocation28_spill] sm:$0xff]  ;;  %v10279_v54 = vunpack.c.l.bf16 %v10327_v63 }
 0x76f   : > { %v9696_v58 = vadd.f32 %v9661_v43, %v9660_v24  ;;  %v8791_v25 = vmul.f32 %v8755_v3, %v15739_v28  ;;  %v8756_v31 = vmax.f32 %v8720_v32, 0.0  ;;  %v10272_v32 = vunpack.c.h.bf16 %v10325_v34 }
 0x770   : > { %v8794_v10 = vmul.f32 %v8758_v37, %v15740_v61  ;;  %v9630_v23 = vsub.f32 %v8793_v8, %v10263_v53  ;;  %v10326_v53 = vld [vmem:[%s15241_s14 + $0x30] sm:$0xff]  }
 0x771   : > { %v9697_v6 = vadd.f32 %v9696_v58, %v9662_v27  ;;  %v9628_v56 = vsub.f32 %v8791_v25, %v10259_v59  ;;  %v8792_v46 = vmul.f32 %v8756_v31, %v15741_v26  ;;  %9125 = vxpose.xlu0.c.b16.cont [2/8] %v15259_v19, 128  ;;  %v11864_v11 = vpop.f32.mrb[8].mxu1  ;;  %v10276_v17 = vunpack.c.h.bf16 %v10326_v53 }
 0x772   : > { %v15274_v36 = vpack.c.bf16 %v8794_v10, %v8793_v8  ;;  %v8725_v38 = vadd.f32 %v11864_v11, %v15246_v13  ;;  %v8561_v33 = vpop.f32.mrb[9].mxu1  ;;  %v9631_v35 = vsub.f32 %v8794_v10, %v10264_v47  ;;  %v9666_v41 = vmul.f32 %v9630_v23, %v9630_v23 }
 0x773   : > { %v9664_v20 = vmul.f32 %v9628_v56, %v9628_v56  ;;  %v9698_v62 = vadd.f32 %v9697_v6, %v9663_v49  ;;  %v15277_v1 = vpack.c.bf16 %v8792_v46, %v8791_v25  ;;  %v9629_v22 = vsub.f32 %v8792_v46, %v10260_v48  ;;  %v11865_v60 = vpop.f32.mrb[10].mxu1 }
 0x774   : > { %v8761_v7 = vmax.f32 %v8725_v38, 0.0  ;;  %v8723_v44 = vadd.f32 %v15246_v13, %v8561_v33  ;;  %v8726_v55 = vadd.f32 %v11865_v60, %v15246_v13  ;;  %v8564_v30 = vpop.f32.mrb[11].mxu1  ;;  %v9667_v50 = vmul.f32 %v9631_v35, %v9631_v35  ;;  %v15746_v33 = vld [vmem:[#allocation33_spill] sm:$0xff]  ;;  %v15749_v35 = vld [vmem:[#allocation32_spill] sm:$0xff] }
 0x775   : > { %v9699_v39 = vadd.f32 %v9698_v62, %v9664_v20  ;;  %v9665_v2 = vmul.f32 %v9629_v22, %v9629_v22  ;;  %v8724_v12 = vadd.f32 %v15246_v13, %v8564_v30  ;;  %9126 = vxpose.xlu0.c.b16.cont [3/8] %v15277_v1, 128  ;;  %v10275_v56 = vunpack.c.l.bf16 %v10326_v53  ;;  %v15748_v30 = vld [vmem:[#allocation34_spill] sm:$0xff]  ;;  %v15750_v53 = vld [vmem:[#allocation37_spill] sm:$0xff] }
 0x776   : > { %v8759_v29 = vmax.f32 %v8723_v44, 0.0  ;;  %v8762_v4 = vmax.f32 %v8726_v55, 0.0  ;;  %v8797_v16 = vmul.f32 %v8761_v7, %v15742_v18  ;;  %v10280_v62 = vunpack.c.h.bf16 %v10327_v63  ;;  %v15747_v44 = vld [vmem:[#allocation31_spill] sm:$0xff] }
 0x777   : > { %v9700_v9 = vadd.f32 %v9699_v39, %v9665_v2  ;;  %v8760_v0 = vmax.f32 %v8724_v12, 0.0  ;;  %v10329_v18 = vld [vmem:[%s15241_s14 + $0x48] sm:$0xff]  }
 0x778   : > { %v8795_v15 = vmul.f32 %v8759_v29, %v15743_v21  ;;  %v8798_v57 = vmul.f32 %v8762_v4, %v15744_v42  ;;  %v9634_v25 = vsub.f32 %v8797_v16, %v10271_v5 }
 0x779   : > { %v9701_v59 = vadd.f32 %v9700_v9, %v9666_v41  ;;  %v8796_v52 = vmul.f32 %v8760_v0, %v15745_v45  ;;  %9127 = vxpose.xlu0.c.b16.cont [4/8] %v15274_v36, 128  ;;  %v11868_v24 = vpop.f32.mrb[12].mxu1 }
 0x77a   : > { %v9632_v43 = vsub.f32 %v8795_v15, %v10267_v40  ;;  %v15291_v3 = vpack.c.bf16 %v8798_v57, %v8797_v16  ;;  %v8577_v8 = vpop.f32.mrb[13].mxu1  ;;  %v8729_v58 = vadd.f32 %v11868_v24, %v15246_v13  ;;  %v9635_v11 = vsub.f32 %v8798_v57, %v10272_v32  ;;  %v10328_v16 = vld [vmem:[%s15241_s14 + $0x40] sm:$0xff]  }
 0x77b   : > { %v9702_v37 = vadd.f32 %v9701_v59, %v9667_v50  ;;  %v15294_v48 = vpack.c.bf16 %v8796_v52, %v8795_v15  ;;  %v9633_v27 = vsub.f32 %v8796_v52, %v10268_v51  ;;  %v11869_v28 = vpop.f32.mrb[14].mxu1  ;;  %v8727_v61 = vadd.f32 %v15246_v13, %v8577_v8 }
 0x77c   : > { %v9668_v31 = vmul.f32 %v9632_v43, %v9632_v43  ;;  %v8730_v10 = vadd.f32 %v11869_v28, %v15246_v13  ;;  %v8580_v47 = vpop.f32.mrb[15].mxu1  ;;  %v8765_v6 = vmax.f32 %v8729_v58, 0.0  ;;  %v9670_v60 = vmul.f32 %v9634_v25, %v9634_v25 }
 0x77d   : > { %v9669_v49 = vmul.f32 %v9633_v27, %v9633_v27  ;;  %v8728_v26 = vadd.f32 %v15246_v13, %v8580_v47  ;;  %9128 = vxpose.xlu0.c.b16.cont [5/8] %v15294_v48, 128  ;;  %v8763_v23 = vmax.f32 %v8727_v61, 0.0  ;;  %v9671_v12 = vmul.f32 %v9635_v11, %v9635_v11  ;;  %v15751_v61 = vld [vmem:[#allocation35_spill] sm:$0xff] }
 0x77e   : > { %v9703_v46 = vadd.f32 %v9702_v37, %v9668_v31  ;;  %v8766_v38 = vmax.f32 %v8730_v10, 0.0  ;;  %v8801_v20 = vmul.f32 %v8765_v6, %v15746_v33  ;;  %v10287_v32 = vunpack.c.l.bf16 %v10329_v18  ;;  %v15752_v6 = vld [vmem:[#allocation36_spill] sm:$0xff] }
 0x77f   : > { %v8764_v22 = vmax.f32 %v8728_v26, 0.0  ;;  %v8799_v55 = vmul.f32 %v8763_v23, %v15747_v44  ;;  %v10283_v8 = vunpack.c.l.bf16 %v10328_v16  ;;  %v10284_v28 = vunpack.c.h.bf16 %v10328_v16  ;;  %v15753_v23 = vld [vmem:[#allocation38_spill] sm:$0xff] }
 0x780   : > { %v9704_v7 = vadd.f32 %v9703_v46, %v9669_v49  ;;  %v8802_v39 = vmul.f32 %v8766_v38, %v15748_v30  ;;  %v9638_v9 = vsub.f32 %v8801_v20, %v10279_v54  ;;  %v10288_v49 = vunpack.c.h.bf16 %v10329_v18  ;;  %v15754_v18 = vld [vmem:[#allocation39_spill] sm:$0xff] }
 0x781   : > { %v8800_v2 = vmul.f32 %v8764_v22, %v15749_v35  ;;  %9129 = vxpose.xlu0.c.b16.cont [6/8] %v15291_v3, 128  ;;  %v11872_v34 = vpop.f32.mrb[16].mxu1  ;;  %v9636_v40 = vsub.f32 %v8799_v55, %v10275_v56 }
 0x782   : > { %v9705_v29 = vadd.f32 %v9704_v7, %v9670_v60  ;;  %v15306_v4 = vpack.c.bf16 %v8802_v39, %v8801_v20  ;;  %v8593_v41 = vpop.f32.mrb[17].mxu1  ;;  %v8733_v63 = vadd.f32 %v11872_v34, %v15246_v13  ;;  %v9639_v42 = vsub.f32 %v8802_v39, %v10280_v62  ;;  %v10330_v62 = vld [vmem:[%s15241_s14 + $0x50] sm:$0xff]   ;;  %v10331_v34 = vld [vmem:[%s15241_s14 + $0x58] sm:$0xff]  }
 0x783   : > { %v15308_v0 = vpack.c.bf16 %v8800_v2, %v8799_v55  ;;  %v9637_v51 = vsub.f32 %v8800_v2, %v10276_v17  ;;  %v11873_v5 = vpop.f32.mrb[18].mxu1  ;;  %v9672_v21 = vmul.f32 %v9636_v40, %v9636_v40  ;;  %v8731_v57 = vadd.f32 %v15246_v13, %v8593_v41 }
 0x784   : > { %v9706_v15 = vadd.f32 %v9705_v29, %v9671_v12  ;;  %v8596_v50 = vpop.f32.mrb[19].mxu1  ;;  %v8769_v45 = vmax.f32 %v8733_v63, 0.0  ;;  %v8734_v52 = vadd.f32 %v11873_v5, %v15246_v13  ;;  %v9674_v25 = vmul.f32 %v9638_v9, %v9638_v9 }
 0x785   : > { %v9673_v59 = vmul.f32 %v9637_v51, %v9637_v51  ;;  %v8732_v24 = vadd.f32 %v15246_v13, %v8596_v50  ;;  %9130 = vxpose.xlu0.c.b16.cont [7/8] %v15308_v0, 128  ;;  %v8767_v54 = vmax.f32 %v8731_v57, 0.0  ;;  %v9675_v47 = vmul.f32 %v9639_v42, %v9639_v42  ;;  %v15330_v42 = vld [vmem:[%s15241_s14 + $0x60] sm:$0xff]  }
 0x786   : > { %v9707_v43 = vadd.f32 %v9706_v15, %v9672_v21  ;;  %v8805_v37 = vmul.f32 %v8769_v45, %v15750_v53  ;;  %v8770_v27 = vmax.f32 %v8734_v52, 0.0  ;;  %v10291_v29 = vunpack.c.l.bf16 %v10330_v62 }
 0x787   : > { %v8768_v58 = vmax.f32 %v8732_v24, 0.0  ;;  %v8803_v10 = vmul.f32 %v8767_v54, %v15751_v61  ;;  %v10292_v21 = vunpack.c.h.bf16 %v10330_v62  ;;  %v10295_v52 = vunpack.c.l.bf16 %v10331_v34 }
 0x788   : > { %v9708_v31 = vadd.f32 %v9707_v43, %v9673_v59  ;;  %v8806_v38 = vmul.f32 %v8770_v27, %v15753_v23  ;;  %v9642_v22 = vsub.f32 %v8805_v37, %v10287_v32  ;;  %v15755_v59 = vld [vmem:[#allocation41_spill] sm:$0xff]  ;;  %v15756_v43 = vld [vmem:[#allocation42_spill] sm:$0xff]  ;;  %v10296_v54 = vunpack.c.h.bf16 %v10331_v34  ;;  %v15759_v34 = vld [vmem:[#allocation47_spill] sm:$0xff] }
 0x789   : > { %v8804_v56 = vmul.f32 %v8768_v58, %v15752_v6  ;;  %9131 = vxpose.xlu0.c.b16.end [8/8] %v15306_v4, 128  ;;  %v11876_v26 = vpop.f32.mrb[20].mxu1  ;;  %v9640_v11 = vsub.f32 %v8803_v10, %v10283_v8  ;;  %v15757_v8 = vld [vmem:[#allocation40_spill] sm:$0xff] }
 0x78a   : > { %v9709_v46 = vadd.f32 %v9708_v31, %v9674_v25  ;;  %v8737_v33 = vadd.f32 %v11876_v26, %v15246_v13  ;;  %v8609_v20 = vpop.f32.mrb[21].mxu1  ;;  %v9643_v9 = vsub.f32 %v8806_v38, %v10288_v49  ;;  %v9115_v15 = vpack.c.bf16 %v8806_v38, %v8805_v37  ;;  %v10333_v38 = vld [vmem:[%s15241_s14 + $0x68] sm:$0xff]  }
 0x78b   : > { %v9641_v17 = vsub.f32 %v8804_v56, %v10284_v28  ;;  %v8735_v60 = vadd.f32 %v15246_v13, %v8609_v20  ;;  %v11877_v7 = vpop.f32.mrb[22].mxu1  ;;  %v9676_v44 = vmul.f32 %v9640_v11, %v9640_v11  ;;  %v9114_v63 = vpack.c.bf16 %v8804_v56, %v8803_v10 }
 0x78c   : > { %v9710_v55 = vadd.f32 %v9709_v46, %v9675_v47  ;;  %v8773_v30 = vmax.f32 %v8737_v33, 0.0  ;;  %v8738_v39 = vadd.f32 %v11877_v7, %v15246_v13  ;;  %v8612_v35 = vpop.f32.mrb[23].mxu1  ;;  %v9678_v57 = vmul.f32 %v9642_v22, %v9642_v22  ;;  %v15758_v7 = vld [vmem:[#allocation44_spill] sm:$0xff] }
 0x78d   : > { %v9677_v2 = vmul.f32 %v9641_v17, %v9641_v17  ;;  %v8771_v12 = vmax.f32 %v8735_v60, 0.0  ;;  %v8736_v40 = vadd.f32 %v15246_v13, %v8612_v35  ;;  %9140 = vxpose.xlu1.c.b16.start [1/8] %v9114_v63, 128  ;;  %10880 = vmatprep.subr.bf16.mxu1 %v9114_v63  ;;  %v9679_v58 = vmul.f32 %v9643_v9, %v9643_v9 }
 0x78e   : > { %v9711_v41 = vadd.f32 %v9710_v55, %v9676_v44  ;;  %v8774_v51 = vmax.f32 %v8738_v39, 0.0  ;;  %v8809_v45 = vmul.f32 %v8773_v30, %v15755_v59  ;;  %10881 = vmatpush3.bf16.msra.mxu1 %v15264_v14  ;;  %v10299_v31 = vunpack.c.l.bf16 %v15330_v42  ;;  %v15346_v39 = vld [vmem:[%s15241_s14 + $0x70] sm:$0xff]  }
 0x78f   : > { %v8807_v16 = vmul.f32 %v8771_v12, %v15754_v18  ;;  %v8772_v5 = vmax.f32 %v8736_v40, 0.0  ;;  %10882 = vmatprep.subr.bf16.mxu1 %v9115_v15  ;;  %v10300_v30 = vunpack.c.h.bf16 %v15330_v42  ;;  %v15760_v40 = vld [vmem:[#allocation48_spill] sm:$0xff]  ;;  %v10304_v9 = vunpack.c.h.bf16 %v10333_v38 }
 0x790   : > { %v9712_v50 = vadd.f32 %v9711_v41, %v9677_v2  ;;  %v8810_v32 = vmul.f32 %v8774_v51, %v15756_v43  ;;  %v9646_v56 = vsub.f32 %v8809_v45, %v10295_v52  ;;  %v15761_v51 = vld [vmem:[#allocation46_spill] sm:$0xff]  ;;  %v10307_v42 = vunpack.c.l.bf16 %v15346_v39 }
 0x791   : > { %v9644_v24 = vsub.f32 %v8807_v16, %v10291_v29  ;;  %v8808_v53 = vmul.f32 %v8772_v5, %v15757_v8  ;;  %v11880_v27 = vpop.f32.mrb[24].mxu1  ;;  %9141 = vxpose.xlu1.c.b16.cont [2/8] %v9115_v15, 128  ;;  %v10303_v29 = vunpack.c.l.bf16 %v10333_v38 }
 0x792   : > { %v9713_v37 = vadd.f32 %v9712_v50, %v9678_v57  ;;  %v8741_v28 = vadd.f32 %v11880_v27, %v15246_v13  ;;  %v8625_v25 = vpop.f32.mrb[25].mxu1  ;;  %10883 = vmatpush3.bf16.msra.mxu1 %v15259_v19  ;;  %v9117_v62 = vpack.c.bf16 %v8810_v32, %v8809_v45  ;;  %v9647_v17 = vsub.f32 %v8810_v32, %v10296_v54 }
 0x793   : > { %v9680_v61 = vmul.f32 %v9644_v24, %v9644_v24  ;;  %v9116_v10 = vpack.c.bf16 %v8808_v53, %v8807_v16  ;;  %v9645_v47 = vsub.f32 %v8808_v53, %v10292_v21  ;;  %v8739_v49 = vadd.f32 %v15246_v13, %v8625_v25  ;;  %v11881_v6 = vpop.f32.mrb[26].mxu1  ;;  %v10335_v53 = vld [vmem:[%s15241_s14 + $0x78] sm:$0xff]  }
 0x794   : > { %v9714_v26 = vadd.f32 %v9713_v37, %v9679_v58  ;;  %v8777_v14 = vmax.f32 %v8741_v28, 0.0  ;;  %v8742_v46 = vadd.f32 %v11881_v6, %v15246_v13  ;;  %v8628_v11 = vpop.f32.mrb[27].mxu1  ;;  %v9682_v35 = vmul.f32 %v9646_v56, %v9646_v56  ;;  %v10336_v6 = vld [vmem:[%s15241_s14 + $0x80] sm:$0xff]  }
 0x795   : > { %v9681_v23 = vmul.f32 %v9645_v47, %v9645_v47  ;;  %v8775_v33 = vmax.f32 %v8739_v49, 0.0  ;;  %v8740_v20 = vadd.f32 %v15246_v13, %v8628_v11  ;;  %10884 = vmatprep.subr.bf16.mxu1 %v9116_v10  ;;  %9142 = vxpose.xlu1.c.b16.cont [3/8] %v9116_v10, 128  ;;  %v9683_v16 = vmul.f32 %v9647_v17, %v9647_v17 }
 0x796   : > { %v9715_v22 = vadd.f32 %v9714_v26, %v9680_v61  ;;  %v8778_v60 = vmax.f32 %v8742_v46, 0.0  ;;  %v8813_v12 = vmul.f32 %v8777_v14, %v15759_v34  ;;  %10885 = vmatpush3.bf16.msra.mxu1 %v15277_v1  ;;  %v15762_v61 = vld [vmem:[#allocation50_spill] sm:$0xff]  ;;  %v10308_v49 = vunpack.c.h.bf16 %v15346_v39  ;;  %v15763_v14 = vld [vmem:[#allocation53_spill] sm:$0xff] }
 0x797   : > { %v8811_v44 = vmul.f32 %v8775_v33, %v15758_v7  ;;  %v8776_v55 = vmax.f32 %v8740_v20, 0.0  ;;  %10886 = vmatprep.subr.bf16.mxu1 %v9117_v62  ;;  %v10311_v11 = vunpack.c.l.bf16 %v10335_v53  ;;  %v10312_v33 = vunpack.c.h.bf16 %v10335_v53  ;;  %v15765_v20 = vld [vmem:[#allocation51_spill] sm:$0xff] }
 0x798   : > { %v9716_v2 = vadd.f32 %v9715_v22, %v9681_v23  ;;  %v8814_v41 = vmul.f32 %v8778_v60, %v15760_v40  ;;  %v9650_v24 = vsub.f32 %v8813_v12, %v10303_v29  ;;  %v15764_v23 = vld [vmem:[#allocation54_spill] sm:$0xff] }
 0x799   : > { %v9648_v19 = vsub.f32 %v8811_v44, %v10299_v31  ;;  %v8812_v63 = vmul.f32 %v8776_v55, %v15761_v51  ;;  %v11884_v18 = vpop.f32.mrb[28].mxu1  ;;  %9143 = vxpose.xlu1.c.b16.cont [4/8] %v9117_v62, 128  ;;  %v10315_v55 = vunpack.c.l.bf16 %v10336_v6 }
 0x79a   : > { %v9717_v5 = vadd.f32 %v9716_v2, %v9682_v35  ;;  %v8745_v21 = vadd.f32 %v11884_v18, %v15246_v13  ;;  %v8641_v15 = vpop.f32.mrb[29].mxu1  ;;  %10887 = vmatpush3.bf16.msra.mxu1 %v15274_v36  ;;  %v9119_v37 = vpack.c.bf16 %v8814_v41, %v8813_v12  ;;  %v9651_v25 = vsub.f32 %v8814_v41, %v10304_v9 }
 0x79b   : > { %v9684_v57 = vmul.f32 %v9648_v19, %v9648_v19  ;;  %v9118_v50 = vpack.c.bf16 %v8812_v63, %v8811_v44  ;;  %v9649_v59 = vsub.f32 %v8812_v63, %v10300_v30  ;;  %v8743_v45 = vadd.f32 %v15246_v13, %v8641_v15  ;;  %v11885_v52 = vpop.f32.mrb[30].mxu1 }
 0x79c   : > { %v9718_v43 = vadd.f32 %v9717_v5, %v9683_v16  ;;  %v8781_v1 = vmax.f32 %v8745_v21, 0.0  ;;  %v8746_v32 = vadd.f32 %v11885_v52, %v15246_v13  ;;  %v8644_v54 = vpop.f32.mrb[31].mxu1  ;;  %v9686_v56 = vmul.f32 %v9650_v24, %v9650_v24  ;;  %v15767_v24 = vld [vmem:[#allocation59_spill] sm:$0xff] }
 0x79d   : > { %v9685_v8 = vmul.f32 %v9649_v59, %v9649_v59  ;;  %v8779_v27 = vmax.f32 %v8743_v45, 0.0  ;;  %v8744_v58 = vadd.f32 %v15246_v13, %v8644_v54  ;;  %10888 = vmatprep.subr.bf16.mxu1 %v9118_v50  ;;  %9144 = vxpose.xlu1.c.b16.cont [5/8] %v9118_v50, 128  ;;  %v9687_v17 = vmul.f32 %v9651_v25, %v9651_v25  ;;  %v15769_v54 = vld [vmem:[#allocation57_spill] sm:$0xff] }
 0x79e   : > { %v9719_v28 = vadd.f32 %v9718_v43, %v9684_v57  ;;  %v8782_v31 = vmax.f32 %v8746_v32, 0.0  ;;  %v8817_v46 = vmul.f32 %v8781_v1, %v15763_v14  ;;  %10889 = vmatpush3.bf16.msra.mxu1 %v15294_v48  ;;  %v10337_v48 = vld [vmem:[%s15241_s14 + $0x88] sm:$0xff]   ;;  %v10316_v59 = vunpack.c.h.bf16 %v10336_v6  ;;  %v15768_v1 = vld [vmem:[#allocation60_spill] sm:$0xff]  ;;  %s15421_s14 = scalar_lea.hbm %s15474_s9, %s10210_s3 }
 0x79f   : > { %v8815_v10 = vmul.f32 %v8779_v27, %v15762_v61  ;;  %v8780_v47 = vmax.f32 %v8744_v58, 0.0  ;;  %10890 = vmatprep.subr.bf16.mxu1 %v9119_v37  ;;  %v10319_v15 = vunpack.c.l.bf16 %v10337_v48  ;;  %v10320_v58 = vunpack.c.h.bf16 %v10337_v48 }
 0x7a0   : > { %v9720_v26 = vadd.f32 %v9719_v28, %v9685_v8  ;;  %v8818_v38 = vmul.f32 %v8782_v31, %v15764_v23  ;;  %v9654_v12 = vsub.f32 %v8817_v46, %v10311_v11 }
 0x7a1   : > { %v9652_v36 = vsub.f32 %v8815_v10, %v10307_v42  ;;  %v8816_v62 = vmul.f32 %v8780_v47, %v15765_v20  ;;  %v11888_v22 = vpop.f32.mrb[32].mxu1  ;;  %9145 = vxpose.xlu1.c.b16.cont [6/8] %v9119_v37, 128  ;;  %v15766_v42 = vld [vmem:[#allocation56_spill] sm:$0xff] }
 0x7a2   : > { %v9721_v60 = vadd.f32 %v9720_v26, %v9686_v56  ;;  %v8749_v7 = vadd.f32 %v11888_v22, %v15246_v13  ;;  %v8657_v44 = vpop.f32.mrb[33].mxu1  ;;  %10891 = vmatpush3.bf16.msra.mxu1 %v15291_v3  ;;  %v9121_v18 = vpack.c.bf16 %v8818_v38, %v8817_v46  ;;  %v9655_v5 = vsub.f32 %v8818_v38, %v10312_v33  ;;  %v10822_v22 = vpop.f32.mrb[36].mxu0 }
 0x7a3   : > { %v9688_v30 = vmul.f32 %v9652_v36, %v9652_v36  ;;  %v9120_v39 = vpack.c.bf16 %v8816_v62, %v8815_v10  ;;  %v9653_v35 = vsub.f32 %v8816_v62, %v10308_v49  ;;  %v8747_v2 = vadd.f32 %v15246_v13, %v8657_v44  ;;  %v11889_v34 = vpop.f32.mrb[34].mxu1 }
 0x7a4   : > { %v9722_v29 = vadd.f32 %v9721_v60, %v9687_v17  ;;  %v8785_v19 = vmax.f32 %v8749_v7, 0.0  ;;  %v8750_v40 = vadd.f32 %v11889_v34, %v15246_v13  ;;  %v8660_v41 = vpop.f32.mrb[35].mxu1  ;;  %v9690_v45 = vmul.f32 %v9654_v12, %v9654_v12  ;;  %v10823_v17 = vpop.f32.mrb[37].mxu0 }
 0x7a5   : > { %v9689_v9 = vmul.f32 %v9653_v35, %v9653_v35  ;;  %v8783_v51 = vmax.f32 %v8747_v2, 0.0  ;;  %v8748_v63 = vadd.f32 %v15246_v13, %v8660_v41  ;;  %10892 = vmatprep.subr.bf16.mxu1 %v9120_v39  ;;  %9146 = vxpose.xlu1.c.b16.cont [7/8] %v9120_v39, 128  ;;  %v9691_v8 = vmul.f32 %v9655_v5, %v9655_v5  ;;  %v10825_v7 = vpop.f32.mrb[38].mxu0  ;;  %v9406_v35 = vld [vmem:[#allocation9] sm:$0xff] }
 0x7a6   : > { %v9723_v16 = vadd.f32 %v9722_v29, %v9688_v30  ;;  %v8786_v21 = vmax.f32 %v8750_v40, 0.0  ;;  %v8821_v43 = vmul.f32 %v8785_v19, %v15767_v24  ;;  %10893 = vmatpush3.bf16.msra.mxu1 %v15308_v0  ;;  %v10824_v60 = vadd.f32 %v10823_v17, %v10822_v22  ;;  %v10826_v44 = vpop.f32.mrb[39].mxu0  ;;  %v9407_v29 = vld [vmem:[#allocation9 + $0x8] sm:$0xff] }
 0x7a7   : > { %v8819_v57 = vmul.f32 %v8783_v51, %v15766_v42  ;;  %v8784_v50 = vmax.f32 %v8748_v63, 0.0  ;;  %10894 = vmatprep.subr.bf16.mxu1 %v9121_v18  ;;  %v10827_v30 = vadd.f32 %v10826_v44, %v10825_v7  ;;  %v10828_v40 = vpop.f32.mrb[40].mxu0 }
 0x7a8   : > { %v9724_v52 = vadd.f32 %v9723_v16, %v9689_v9  ;;  %v8822_v32 = vmul.f32 %v8786_v21, %v15768_v1  ;;  %v9658_v31 = vsub.f32 %v8821_v43, %v10319_v15  ;;  %v10829_v9 = vpop.f32.mrb[41].mxu0  ;;  %v9409_v1 = vld [vmem:[#allocation9 + $0x18] sm:$0xff] }
 0x7a9   : > { %v9656_v3 = vsub.f32 %v8819_v57, %v10315_v55  ;;  %v8820_v13 = vmul.f32 %v8784_v50, %v15769_v54  ;;  %9147 = vxpose.xlu1.c.b16.end [8/8] %v9121_v18, 128  ;;  %v11896_v46 = vpop.f32.mrb[36].mxu1  ;;  %v10830_v63 = vadd.f32 %v10829_v9, %v10828_v40  ;;  %v10831_v16 = vpop.f32.mrb[42].mxu0  ;;  %v9408_v50 = vld [vmem:[#allocation9 + $0x10] sm:$0xff] }
 0x7aa   : > { %v9725_v53 = vadd.f32 %v9724_v52, %v9690_v45  ;;  %v9123_v27 = vpack.c.bf16 %v8822_v32, %v8821_v43  ;;  %10895 = vmatpush3.bf16.msra.mxu1 %v15306_v4  ;;  %v9659_v47 = vsub.f32 %v8822_v32, %v10320_v58  ;;  %v9694_v0 = vmul.f32 %v9658_v31, %v9658_v31  ;;  %v9027_v11 = vpop.f32.mrb[37].mxu1  ;;  %v10832_v5 = vpop.f32.mrb[43].mxu0 }
 0x7ab   : > { %v9692_v37 = vmul.f32 %v9656_v3, %v9656_v3  ;;  %v9657_v28 = vsub.f32 %v8820_v13, %v10316_v59  ;;  %v9122_v25 = vpack.c.bf16 %v8820_v13, %v8819_v57  ;;  %v11897_v36 = vpop.f32.mrb[38].mxu1  ;;  %v9028_v39 = vadd.f32 %v10824_v60, %v9027_v11 }
 0x7ac   : > { %v9726_v61 = vadd.f32 %v9725_v53, %v9691_v8  ;;  %v9695_v56 = vmul.f32 %v9659_v47, %v9659_v47  ;;  %v9030_v23 = vpop.f32.mrb[39].mxu1  ;;  %v9036_v15 = vadd.f32 %v11896_v46, %v10830_v63  ;;  %v10833_v57 = vadd.f32 %v10832_v5, %v10831_v16  ;;  %v10834_v8 = vpop.f32.mrb[44].mxu0 }
 0x7ad   : > { %v9693_v10 = vmul.f32 %v9657_v28, %v9657_v28  ;;  %11910 = vmatprep.subr.bf16.mxu0 %v9122_v25  ;;  %9156 = vxpose.xlu1.c.b16.start [1/2] (short) %v9122_v25, 128  ;;  %v9090_v2 = vmul.f32 0.00012207031, %v9028_v39  ;;  %v9031_v34 = vadd.f32 %v10827_v30, %v9030_v23  ;;  %v10835_v53 = vpop.f32.mrb[45].mxu0 }
 0x7ae   : > { %11911 = vmatpush3.bf16.msra.mxu0 %v9122_v25  ;;  %v9727_v49 = vadd.f32 %v9726_v61, %v9692_v37  ;;  %v9092_v59 = vmul.f32 0.00012207031, %v9036_v15  ;;  %v9039_v52 = vadd.f32 %v11897_v36, %v10833_v57  ;;  %v10836_v28 = vadd.f32 %v10835_v53, %v10834_v8  ;;  %v10837_v25 = vpop.f32.mrb[46].mxu0 }
 0x7af   : > { %11912 = vmatprep.subr.bf16.mxu0 %v9123_v27  ;;  %v9422_v48 = vsub.f32 %v9090_v2, %v9406_v35  ;;  %v9091_v41 = vmul.f32 0.00012207031, %v9031_v34  ;;  %v10838_v61 = vpop.f32.mrb[47].mxu0 }
 0x7b0   : > { %v9728_v6 = vadd.f32 %v9727_v49, %v9693_v10  ;;  %v9424_v54 = vsub.f32 %v9092_v59, %v9408_v50  ;;  %v9093_v13 = vmul.f32 0.00012207031, %v9039_v52 }
 0x7b1   : > { %9157 = vxpose.xlu1.c.b16.end [2/2] (short) %v9123_v27, 128  ;;  %v9470_v51 = vmul.f32 %v9422_v48, %v9422_v48  ;;  %v9423_v18 = vsub.f32 %v9091_v41, %v9407_v29  ;;  %v11900_v24 = vpop.f32.mrb[40].mxu1  ;;  %v9412_v48 = vld [vmem:[#allocation9 + $0x30] sm:$0xff] }
 0x7b2   : > { %11913 = vmatpush3.bf16.msra.mxu0 %v9123_v27  ;;  %v9729_v26 = vadd.f32 %v9728_v6, %v9694_v0  ;;  %v9043_v32 = vpop.f32.mrb[41].mxu1  ;;  %v9472_v58 = vmul.f32 %v9424_v54, %v9424_v54  ;;  %v9425_v37 = vsub.f32 %v9093_v13, %v9409_v1  ;;  %v10839_v0 = vadd.f32 %v10838_v61, %v10837_v25 }
 0x7b3   : > { %v9471_v42 = vmul.f32 %v9423_v18, %v9423_v18  ;;  %v11901_v27 = vpop.f32.mrb[42].mxu1  ;;  %v9044_v6 = vadd.f32 %v10836_v28, %v9043_v32  ;;  %v9413_v18 = vld [vmem:[#allocation9 + $0x38] sm:$0xff] }
 0x7b4   : > { %v15378_v14 = vadd.f32 %v9729_v26, %v9695_v56  ;;  %v9046_v31 = vpop.f32.mrb[43].mxu1  ;;  %v9473_v49 = vmul.f32 %v9425_v37, %v9425_v37  ;;  %v9410_v56 = vld [vmem:[#allocation9 + $0x20] sm:$0xff] }
 0x7b5   : > { %v9486_v45 = vadd.f32 %v9471_v42, %v9470_v51  ;;  %v9094_v26 = vmul.f32 0.00012207031, %v9044_v6  ;;  %v9047_v11 = vadd.f32 %v10839_v0, %v9046_v31  ;;  %v9415_v31 = vld [vmem:[#allocation9 + $0x48] sm:$0xff] }
 0x7b7   : > { %v9487_v47 = vadd.f32 %v9486_v45, %v9472_v58  ;;  %v9095_v22 = vmul.f32 0.00012207031, %v9047_v11 }
 0x7b9   : > { %v9488_v46 = vadd.f32 %v9487_v47, %v9473_v49  ;;  %v15384_v36 = vpop.f32.mrb[44].mxu1 }
 0x7d3   : > { %v9132_v38 = vpop.trf.xlu0 }
 0x7d7   : > { %v9133_v20 = vpop.trf.xlu0 }
 0x7db   : > { %v9134_v12 = vpop.trf.xlu0 }
 0x7df   : > { %v9135_v43 = vpop.trf.xlu0 }
 0x7e3   : > { %v9136_v23 = vpop.trf.xlu0 }
 0x7e7   : > { %v9137_v63 = vpop.trf.xlu0 }
 0x7eb   : > { %v9138_v25 = vpop.trf.xlu0 }
 0x7f3   : > { %v9148_v4 = vpop.trf.xlu1 }
 0x7f4   : > { %9228 = vmatprep.mubr.bf16.mxu1 %v9148_v4  ;;  %v9059_v4 = vpop.f32.mrb[45].mxu1 }
 0x7f5   : > { %9229 = vmatmul.mubr.bf16.vlgmr.msra.gmra.mrb[52].mxu1 %v9132_v38  ;;  %v9411_v38 = vld [vmem:[#allocation9 + $0x28] sm:$0xff]  ;;  %v15387_v60 = vpop.f32.mrb[46].mxu1 }
 0x7f6   : > { %v9062_v39 = vpop.f32.mrb[47].mxu1 }
 0x7f7   : > { %v9149_v33 = vpop.trf.xlu1  ;;  %v15390_v51 = vpop.f32.mrb[48].mxu1 }
 0x7f8   : > { %9236 = vmatprep.mubr.bf16.mxu1 %v9149_v33  ;;  %v15392_v16 = vpop.f32.mrb[49].mxu1 }
 0x7f9   : > { %v15395_v50 = vpop.f32.mrb[50].mxu1 }
 0x7fb   : > { %v9150_v62 = vpop.trf.xlu1 }
 0x7fd   : > { %9237 = vmatmul.mubr.bf16.gmra.mrb[56].mxu1 %v9133_v20  ;;  %v9426_v20 = vsub.f32 %v9094_v26, %v9410_v56 }
 0x7fe   : > { %9244 = vmatprep.mubr.bf16.mxu1 %v9150_v62  ;;  %v10840_v62 = vpop.f32.mrb[48].mxu0 }
 0x7ff   : > { %v9151_v55 = vpop.trf.xlu1  ;;  %v10841_v17 = vpop.f32.mrb[49].mxu0  ;;  %v9474_v7 = vmul.f32 %v9426_v20, %v9426_v20 }
 0x800   : > { %v10842_v44 = vadd.f32 %v10841_v17, %v10840_v62  ;;  %v10843_v30 = vpop.f32.mrb[50].mxu0  ;;  %v9416_v62 = vld [vmem:[#allocation9 + $0x50] sm:$0xff] }
 0x801   : > { %v10844_v35 = vpop.f32.mrb[51].mxu0  ;;  %v9489_v34 = vadd.f32 %v9488_v46, %v9474_v7 }
 0x802   : > { %v10846_v42 = vpop.f32.mrb[52].mxu0 }
 0x803   : > { %v9152_v19 = vpop.trf.xlu1  ;;  %v10847_v57 = vpop.f32.mrb[53].mxu0 }
 0x804   : > { %v10848_v52 = vadd.f32 %v10847_v57, %v10846_v42 }
 0x805   : > { %9245 = vmatmul.mubr.bf16.gmra.mrb[60].mxu1 %v9134_v12  ;;  %v9052_v12 = vadd.f32 %v11900_v24, %v10842_v44  ;;  %v10849_v24 = vpop.f32.mrb[54].mxu0  ;;  %v9139_v44 = vpop.trf.xlu0 }
 0x806   : > { %9252 = vmatprep.mubr.bf16.mxu1 %v9151_v55  ;;  %v9427_v55 = vsub.f32 %v9095_v22, %v9411_v38  ;;  %v10850_v1 = vpop.f32.mrb[55].mxu0  ;;  %v9060_v53 = vadd.f32 %v10848_v52, %v9059_v4 }
 0x807   : > { %v9153_v21 = vpop.trf.xlu1  ;;  %v9096_v40 = vmul.f32 0.00012207031, %v9052_v12  ;;  %v10851_v8 = vadd.f32 %v10850_v1, %v10849_v24  ;;  %v10852_v49 = vpop.f32.mrb[56].mxu0 }
 0x808   : > { %v9475_v29 = vmul.f32 %v9427_v55, %v9427_v55  ;;  %v9098_v58 = vmul.f32 0.00012207031, %v9060_v53  ;;  %v9417_v55 = vld [vmem:[#allocation9 + $0x58] sm:$0xff] }
 0x809   : > { %v9063_v28 = vadd.f32 %v10851_v8, %v9062_v39 }
 0x80a   : > { %v9490_v41 = vadd.f32 %v9489_v34, %v9475_v29 }
 0x80b   : > { %v15380_v3 = vpop.trf.xlu1  ;;  %v9099_v0 = vmul.f32 0.00012207031, %v9063_v28  ;;  %v9421_v28 = vld [vmem:[#allocation9 + $0x78] sm:$0xff] }
 0x80d   : > { %9253 = vmatmul.mubr.bf16.gmra.mrb[64].mxu1 %v9135_v43  ;;  %v9078_v43 = vpop.f32.mrb[51].mxu1  ;;  %v9431_v26 = vsub.f32 %v9099_v0, %v9415_v31 }
 0x80e   : > { %9260 = vmatprep.mubr.bf16.mxu1 %v9152_v19  ;;  %v10845_v19 = vadd.f32 %v10844_v35, %v10843_v30 }
 0x80f   : > { %v15382_v10 = vpop.trf.xlu1 }
 0x810   : > { %v9055_v9 = vadd.f32 %v11901_v27, %v10845_v19  ;;  %v9414_v27 = vld [vmem:[#allocation9 + $0x40] sm:$0xff] }
 0x811   : > { %v9430_v47 = vsub.f32 %v9098_v58, %v9414_v27  ;;  %v9420_v27 = vld [vmem:[#allocation9 + $0x70] sm:$0xff] }
 0x812   : > { %v9097_v15 = vmul.f32 0.00012207031, %v9055_v9 }
 0x813   : > { %v9164_v33 = vpop.trf.xlu1  ;;  %v9478_v6 = vmul.f32 %v9430_v47, %v9430_v47 }
 0x814   : > { %11914 = vmatprep.mubr.msk.bf16.mxu0 %vm8871_vm14, %v9164_v33  ;;  %v9429_v45 = vsub.f32 %v9097_v15, %v9413_v18  ;;  %v9479_v33 = vmul.f32 %v9431_v26, %v9431_v26  ;;  %v9419_v15 = vld [vmem:[#allocation9 + $0x68] sm:$0xff] }
 0x815   : > { %9261 = vmatmul.mubr.bf16.gmra.mrb[68].mxu1 %v9136_v23 }
 0x816   : > { %9268 = vmatprep.mubr.bf16.mxu1 %v9153_v21  ;;  %v9428_v21 = vsub.f32 %v9096_v40, %v9412_v48  ;;  %v9477_v13 = vmul.f32 %v9429_v45, %v9429_v45 }
 0x817   : > { %v9165_v2 = vpop.trf.xlu1 }
 0x818   : > { %11915 = vmatmul.mubr.msk.bf16.vlgmr.msra.gmra.mrb[68].mxu0 %vm8871_vm14, %v9165_v2  ;;  %v9476_v59 = vmul.f32 %v9428_v21, %v9428_v21 }
 0x81a   : > { %v9491_v54 = vadd.f32 %v9490_v41, %v9476_v59 }
 0x81b   : > { %v9166_v5 = vpop.trf.xlu1 }
 0x81c   : > { %11918 = vmatprep.mubr.msk.bf16.mxu0 %vm8871_vm14, %v9166_v5  ;;  %v9492_v37 = vadd.f32 %v9491_v54, %v9477_v13 }
 0x81d   : > { %9269 = vmatmul.mubr.bf16.gmra.mrb[72].mxu1 %v9137_v63  ;;  %v9418_v63 = vld [vmem:[#allocation9 + $0x60] sm:$0xff] }
 0x81e   : > { %9276 = vmatprep.mubr.bf16.mxu1 %v15380_v3  ;;  %v10853_v3 = vpop.f32.mrb[57].mxu0  ;;  %v9493_v38 = vadd.f32 %v9492_v37, %v9478_v6 }
 0x81f   : > { %v9167_v32 = vpop.trf.xlu1  ;;  %v10854_v56 = vadd.f32 %v10853_v3, %v10852_v49  ;;  %v10855_v46 = vpop.f32.mrb[58].mxu0 }
 0x820   : > { %11919 = vmatmul.mubr.msk.bf16.gmra.mrb[72].mxu0 %vm8871_vm14, %v9167_v32  ;;  %v10856_v11 = vpop.f32.mrb[59].mxu0  ;;  %v9494_v17 = vadd.f32 %v9493_v38, %v9479_v33 }
 0x821   : > { %v9068_v4 = vadd.f32 %v15384_v36, %v10854_v56  ;;  %v10857_v20 = vadd.f32 %v10856_v11, %v10855_v46 }
 0x823   : > { %v9168_v61 = vpop.trf.xlu1  ;;  %v9100_v22 = vmul.f32 0.00012207031, %v9068_v4  ;;  %v9071_v7 = vadd.f32 %v15387_v60, %v10857_v20 }
 0x824   : > { %11922 = vmatprep.mubr.msk.bf16.mxu0 %vm8871_vm14, %v9168_v61 }
 0x825   : > { %9277 = vmatmul.mubr.bf16.gmra.mrb[76].mxu1 %v9138_v25  ;;  %v9432_v39 = vsub.f32 %v9100_v22, %v9416_v62  ;;  %v9101_v35 = vmul.f32 0.00012207031, %v9071_v7 }
 0x826   : > { %9284 = vmatprep.mubr.bf16.mxu1 %v15382_v10  ;;  %v10858_v10 = vpop.f32.mrb[60].mxu0 }
 0x827   : > { %v9169_v23 = vpop.trf.xlu1  ;;  %v10859_v2 = vpop.f32.mrb[61].mxu0  ;;  %v9480_v36 = vmul.f32 %v9432_v39, %v9432_v39  ;;  %v9433_v34 = vsub.f32 %v9101_v35, %v9417_v55 }
 0x828   : > { %11923 = vmatmul.mubr.msk.bf16.gmra.mrb[76].mxu0 %vm8871_vm14, %v9169_v23  ;;  %v10860_v12 = vadd.f32 %v10859_v2, %v10858_v10  ;;  %v10861_v29 = vpop.f32.mrb[62].mxu0 }
 0x829   : > { %v10862_v19 = vpop.f32.mrb[63].mxu0  ;;  %v9495_v40 = vadd.f32 %v9494_v17, %v9480_v36  ;;  %v9481_v41 = vmul.f32 %v9433_v34, %v9433_v34 }
 0x82a   : > { %v10863_v9 = vadd.f32 %v10862_v19, %v10861_v29  ;;  %v9076_v60 = vadd.f32 %v10860_v12, %v15392_v16  ;;  %v10864_v57 = vpop.f32.mrb[64].mxu0 }
 0x82b   : > { %v9170_v30 = vpop.trf.xlu1  ;;  %v9496_v5 = vadd.f32 %v9495_v40, %v9481_v41  ;;  %v10865_v45 = vpop.f32.mrb[65].mxu0 }
 0x82c   : > { %11926 = vmatprep.mubr.msk.bf16.mxu0 %vm8871_vm14, %v9170_v30  ;;  %v9102_v18 = vmul.f32 0.00012207031, %v9076_v60  ;;  %v9079_v21 = vadd.f32 %v10863_v9, %v9078_v43  ;;  %v10866_v24 = vadd.f32 %v10865_v45, %v10864_v57  ;;  %v10867_v32 = vpop.f32.mrb[66].mxu0 }
 0x82d   : > { %9285 = vmatmul.mubr.bf16.gmra.mrb[80].mxu1 %v9139_v44  ;;  %v10868_v54 = vpop.f32.mrb[67].mxu0 }
 0x82e   : > { %v9434_v42 = vsub.f32 %v9102_v18, %v9418_v63  ;;  %v9103_v59 = vmul.f32 0.00012207031, %v9079_v21  ;;  %v9084_v8 = vadd.f32 %v15390_v51, %v10866_v24  ;;  %v10869_v53 = vadd.f32 %v10868_v54, %v10867_v32  ;;  %v9438_v24 = vld [vmem:[#allocation11] sm:$0xff]  ;;  %v9440_v54 = vld [vmem:[#allocation11 + $0x10] sm:$0xff] }
 0x82f   : > { %v9171_v48 = vpop.trf.xlu1 }
 0x830   : > { %11927 = vmatmul.mubr.msk.bf16.gmra.mrb[80].mxu0 %vm8871_vm14, %v9171_v48  ;;  %v9482_v52 = vmul.f32 %v9434_v42, %v9434_v42  ;;  %v9435_v1 = vsub.f32 %v9103_v59, %v9419_v15  ;;  %v9104_v58 = vmul.f32 0.00012207031, %v9084_v8  ;;  %v9087_v37 = vadd.f32 %v15395_v50, %v10869_v53  ;;  %v9439_v53 = vld [vmem:[#allocation11 + $0x8] sm:$0xff] }
 0x832   : > { %v9497_v13 = vadd.f32 %v9496_v5, %v9482_v52  ;;  %v9483_v16 = vmul.f32 %v9435_v1, %v9435_v1  ;;  %v9436_v25 = vsub.f32 %v9104_v58, %v9420_v27  ;;  %v9105_v31 = vmul.f32 0.00012207031, %v9087_v37  ;;  %v9441_v37 = vld [vmem:[#allocation11 + $0x18] sm:$0xff] }
 0x834   : > { %v9498_v43 = vadd.f32 %v9497_v13, %v9483_v16  ;;  %v9437_v61 = vsub.f32 %v9105_v31, %v9421_v28  ;;  %v9484_v47 = vmul.f32 %v9436_v25, %v9436_v25 }
 0x836   : > { %v9485_v49 = vmul.f32 %v9437_v61, %v9437_v61  ;;  %v9499_v0 = vadd.f32 %v9498_v43, %v9484_v47 }
 0x838   : > { %v9500_v3 = vadd.f32 %v9499_v0, %v9485_v49 }
 0x83a   : > { %9501 = vadd.xlane.f32.xlu1 %v9500_v3 }
 0x8c7   : > { %v9502_v38 = vpop.xlane.xlu1 %9501 }
 0x8c8   : > { %v10896_v6 = vpop.f32.mrb[52].mxu1  ;;  %v9503_v50 = vrot.slane %v9502_v38, 4 }
 0x8c9   : > { %v10897_v56 = vpop.f32.mrb[53].mxu1 }
 0x8ca   : > { %v10898_v26 = vadd.f32 %v10897_v56, %v10896_v6  ;;  %v10899_v51 = vpop.f32.mrb[54].mxu1  ;;  %v9504_v22 = vadd.f32 %v9503_v50, %v9502_v38 }
 0x8cb   : > { %v10900_v46 = vpop.f32.mrb[55].mxu1 }
 0x8cc   : > { %v10901_v11 = vadd.f32 %v10900_v46, %v10899_v51  ;;  %v9505_v7 = vrot.slane %v9504_v22, 2 }
 0x8ce   : > { %v9506_v44 = vadd.f32 %v9505_v7, %v9504_v22 }
 0x8d0   : > { %v10902_v23 = vpop.f32.mrb[56].mxu1  ;;  %v9507_v39 = vrot.slane %v9506_v44, 1 }
 0x8d1   : > { %v10903_v4 = vpop.f32.mrb[57].mxu1 }
 0x8d2   : > { %v10904_v33 = vadd.f32 %v10903_v4, %v10902_v23  ;;  %v10905_v20 = vpop.f32.mrb[58].mxu1  ;;  %v9508_v36 = vadd.f32 %v9507_v39, %v9506_v44  ;;  %v9442_v4 = vld [vmem:[#allocation11 + $0x20] sm:$0xff]  ;;  %v9444_v44 = vld [vmem:[#allocation11 + $0x30] sm:$0xff] }
 0x8d3   : > { %v10906_v62 = vpop.f32.mrb[59].mxu1 }
 0x8d4   : > { %v10907_v17 = vadd.f32 %v10906_v62, %v10905_v20  ;;  %12510 = vpush %v9508_v36 }
 0x8d8   : > { %v10908_v55 = vpop.f32.mrb[60].mxu1 }
 0x8d9   : > { %v10909_v30 = vpop.f32.mrb[61].mxu1 }
 0x8da   : > { %v10910_v35 = vadd.f32 %v10909_v30, %v10908_v55  ;;  %v10911_v10 = vpop.f32.mrb[62].mxu1  ;;  %v9443_v55 = vld [vmem:[#allocation11 + $0x28] sm:$0xff] }
 0x8db   : > { %v10912_v2 = vpop.f32.mrb[63].mxu1 }
 0x8dc   : > { %v10913_v34 = vadd.f32 %v10912_v2, %v10911_v10 }
 0x8e0   : > { %v10914_v12 = vpop.f32.mrb[64].mxu1 }
 0x8e1   : > { %v10915_v29 = vpop.f32.mrb[65].mxu1 }
 0x8e2   : > { %v10916_v19 = vadd.f32 %v10915_v29, %v10914_v12  ;;  %v10917_v48 = vpop.f32.mrb[66].mxu1  ;;  %v9445_v29 = vld [vmem:[#allocation11 + $0x38] sm:$0xff] }
 0x8e3   : > { %v10918_v40 = vpop.f32.mrb[67].mxu1 }
 0x8e4   : > { %v10919_v41 = vadd.f32 %v10918_v40, %v10917_v48 }
 0x8e8   : > { %v10920_v9 = vpop.f32.mrb[68].mxu1 }
 0x8e9   : > { %v10921_v60 = vpop.f32.mrb[69].mxu1 }
 0x8ea   : > { %v15409_v63 = vadd.f32 %v10921_v60, %v10920_v9  ;;  %v10923_v18 = vpop.f32.mrb[70].mxu1 }
 0x8eb   : > { %v11916_v5 = vpop.f32.mrb[68].mxu0  ;;  %v10924_v21 = vpop.f32.mrb[71].mxu1 }
 0x8ec   : > { %v9336_v15 = vadd.f32 %v11916_v5, %v10904_v33  ;;  %v9327_v42 = vpop.f32.mrb[69].mxu0  ;;  %v15411_v57 = vadd.f32 %v10924_v21, %v10923_v18 }
 0x8ed   : > { %v9328_v59 = vadd.f32 %v10898_v26, %v9327_v42  ;;  %v11917_v45 = vpop.f32.mrb[70].mxu0 }
 0x8ee   : > { %v9392_v52 = vmul.f32 0.00012207031, %v9336_v15  ;;  %v9339_v1 = vadd.f32 %v11917_v45, %v10907_v17  ;;  %v9330_v32 = vpop.f32.mrb[71].mxu0 }
 0x8ef   : > { %v9390_v13 = vmul.f32 0.00012207031, %v9328_v59  ;;  %v9331_v8 = vadd.f32 %v10901_v11, %v9330_v32 }
 0x8f0   : > { %v9393_v16 = vmul.f32 0.00012207031, %v9339_v1  ;;  %v10926_v27 = vpop.f32.mrb[72].mxu1  ;;  %v9456_v25 = vsub.f32 %v9392_v52, %v9440_v54  ;;  %v9446_v1 = vld [vmem:[#allocation11 + $0x40] sm:$0xff] }
 0x8f1   : > { %v9454_v58 = vsub.f32 %v9390_v13, %v9438_v24  ;;  %v9391_v43 = vmul.f32 0.00012207031, %v9331_v8  ;;  %v10927_v28 = vpop.f32.mrb[73].mxu1 }
 0x8f2   : > { %v10928_v31 = vadd.f32 %v10927_v28, %v10926_v27  ;;  %v10929_v61 = vpop.f32.mrb[74].mxu1  ;;  %v9457_v3 = vsub.f32 %v9393_v16, %v9441_v37  ;;  %v9512_v38 = vmul.f32 %v9456_v25, %v9456_v25  ;;  %v9448_v16 = vld [vmem:[#allocation11 + $0x50] sm:$0xff]  ;;  %v9447_v37 = vld [vmem:[#allocation11 + $0x48] sm:$0xff] }
 0x8f3   : > { %v9455_v47 = vsub.f32 %v9391_v43, %v9439_v53  ;;  %v11920_v49 = vpop.f32.mrb[72].mxu0  ;;  %v10930_v0 = vpop.f32.mrb[75].mxu1  ;;  %v9510_v51 = vmul.f32 %v9454_v58, %v9454_v58 }
 0x8f4   : > { %v9352_v6 = vadd.f32 %v11920_v49, %v10916_v19  ;;  %v9343_v56 = vpop.f32.mrb[73].mxu0  ;;  %v10931_v26 = vadd.f32 %v10930_v0, %v10929_v61  ;;  %v9513_v7 = vmul.f32 %v9457_v3, %v9457_v3  ;;  %v9449_v61 = vld [vmem:[#allocation11 + $0x58] sm:$0xff] }
 0x8f5   : > { %v9511_v46 = vmul.f32 %v9455_v47, %v9455_v47  ;;  %v9344_v11 = vadd.f32 %v10910_v35, %v9343_v56  ;;  %v11921_v23 = vpop.f32.mrb[74].mxu0 }
 0x8f6   : > { %v9355_v50 = vadd.f32 %v11921_v23, %v10919_v41  ;;  %v9346_v33 = vpop.f32.mrb[75].mxu0  ;;  %v9396_v62 = vmul.f32 0.00012207031, %v9352_v6 }
 0x8f7   : > { %v9526_v20 = vadd.f32 %v9511_v46, %v9510_v51  ;;  %v9394_v22 = vmul.f32 0.00012207031, %v9344_v11  ;;  %v9347_v17 = vadd.f32 %v10913_v34, %v9346_v33 }
 0x8f8   : > { %v10932_v30 = vpop.f32.mrb[76].mxu1  ;;  %v9397_v2 = vmul.f32 0.00012207031, %v9355_v50  ;;  %v9460_v48 = vsub.f32 %v9396_v62, %v9444_v44 }
 0x8f9   : > { %v9527_v39 = vadd.f32 %v9526_v20, %v9512_v38  ;;  %v9458_v10 = vsub.f32 %v9394_v22, %v9442_v4  ;;  %v9395_v36 = vmul.f32 0.00012207031, %v9347_v17  ;;  %v10933_v12 = vpop.f32.mrb[77].mxu1  ;;  %v9450_v22 = vld [vmem:[#allocation11 + $0x60] sm:$0xff] }
 0x8fa   : > { %v10934_v35 = vadd.f32 %v10933_v12, %v10932_v30  ;;  %v10935_v19 = vpop.f32.mrb[78].mxu1  ;;  %v9461_v42 = vsub.f32 %v9397_v2, %v9445_v29  ;;  %v9516_v13 = vmul.f32 %v9460_v48, %v9460_v48  ;;  %v9452_v2 = vld [vmem:[#allocation11 + $0x70] sm:$0xff] }
 0x8fb   : > { %v9514_v40 = vmul.f32 %v9458_v10, %v9458_v10  ;;  %v9528_v41 = vadd.f32 %v9527_v39, %v9513_v7  ;;  %v9459_v9 = vsub.f32 %v9395_v36, %v9443_v55  ;;  %v11924_v60 = vpop.f32.mrb[76].mxu0  ;;  %v10936_v18 = vpop.f32.mrb[79].mxu1  ;;  %v9451_v36 = vld [vmem:[#allocation11 + $0x68] sm:$0xff] }
 0x8fc   : > { %v9368_v5 = vadd.f32 %v11924_v60, %v10928_v31  ;;  %v9359_v34 = vpop.f32.mrb[77].mxu0  ;;  %v10937_v21 = vadd.f32 %v10936_v18, %v10935_v19  ;;  %v9517_v28 = vmul.f32 %v9461_v42, %v9461_v42 }
 0x8fd   : > { %v9529_v15 = vadd.f32 %v9528_v41, %v9514_v40  ;;  %v9515_v59 = vmul.f32 %v9459_v9, %v9459_v9  ;;  %v9360_v45 = vadd.f32 %v15409_v63, %v9359_v34  ;;  %v11925_v52 = vpop.f32.mrb[78].mxu0  ;;  %v9453_v40 = vld [vmem:[#allocation11 + $0x78] sm:$0xff] }
 0x8fe   : > { %v9400_v24 = vmul.f32 0.00012207031, %v9368_v5  ;;  %v9371_v32 = vadd.f32 %v11925_v52, %v10931_v26  ;;  %v9362_v54 = vpop.f32.mrb[79].mxu0 }
 0x8ff   : > { %v9530_v8 = vadd.f32 %v9529_v15, %v9515_v59  ;;  %v9398_v53 = vmul.f32 0.00012207031, %v9360_v45  ;;  %v9363_v27 = vadd.f32 %v15411_v57, %v9362_v54 }
 0x900   : > { %v9401_v58 = vmul.f32 0.00012207031, %v9371_v32  ;;  %v10938_v43 = vpop.f32.mrb[80].mxu1  ;;  %v9464_v49 = vsub.f32 %v9400_v24, %v9448_v16 }
 0x901   : > { %v9531_v25 = vadd.f32 %v9530_v8, %v9516_v13  ;;  %v9462_v31 = vsub.f32 %v9398_v53, %v9446_v1  ;;  %v9399_v47 = vmul.f32 0.00012207031, %v9363_v27  ;;  %v10939_v63 = vpop.f32.mrb[81].mxu1 }
 0x902   : > { %v10940_v0 = vadd.f32 %v10939_v63, %v10938_v43  ;;  %v10941_v3 = vpop.f32.mrb[82].mxu1  ;;  %v9465_v11 = vsub.f32 %v9401_v58, %v9449_v61  ;;  %v9520_v62 = vmul.f32 %v9464_v49, %v9464_v49 }
 0x903   : > { %v9518_v6 = vmul.f32 %v9462_v31, %v9462_v31  ;;  %v9532_v56 = vadd.f32 %v9531_v25, %v9517_v28  ;;  %v9463_v26 = vsub.f32 %v9399_v47, %v9447_v37  ;;  %v10942_v51 = vpop.f32.mrb[83].mxu1  ;;  %v11928_v46 = vpop.f32.mrb[80].mxu0 }
 0x904   : > { %v10943_v23 = vadd.f32 %v10942_v51, %v10941_v3  ;;  %v9384_v57 = vadd.f32 %v11928_v46, %v10940_v0  ;;  %v9375_v38 = vpop.f32.mrb[81].mxu0  ;;  %v9521_v10 = vmul.f32 %v9465_v11, %v9465_v11 }
 0x905   : > { %v9533_v4 = vadd.f32 %v9532_v56, %v9518_v6  ;;  %v9519_v50 = vmul.f32 %v9463_v26, %v9463_v26  ;;  %v9376_v33 = vadd.f32 %v10934_v35, %v9375_v38  ;;  %v11929_v20 = vpop.f32.mrb[82].mxu0  ;;  %s12511_s28 = spop %12510 }
 0x906   : > { %v9387_v17 = vadd.f32 %v11929_v20, %v10943_v23  ;;  %v9378_v7 = vpop.f32.mrb[83].mxu0  ;;  %v9404_v55 = vmul.f32 0.00012207031, %v9384_v57 }
 0x907   : > { %v9534_v44 = vadd.f32 %v9533_v4, %v9519_v50  ;;  %v9402_v30 = vmul.f32 0.00012207031, %v9376_v33  ;;  %v9379_v39 = vadd.f32 %v10937_v21, %v9378_v7 }
 0x908   : > { %v9405_v19 = vmul.f32 0.00012207031, %v9387_v17  ;;  %v9468_v41 = vsub.f32 %v9404_v55, %v9452_v2 }
 0x909   : > { %v9535_v12 = vadd.f32 %v9534_v44, %v9520_v62  ;;  %v9466_v29 = vsub.f32 %v9402_v30, %v9450_v22  ;;  %v9403_v48 = vmul.f32 0.00012207031, %v9379_v39 }
 0x90a   : > { %v9469_v5 = vsub.f32 %v9405_v19, %v9453_v40  ;;  %v9524_v15 = vmul.f32 %v9468_v41, %v9468_v41 }
 0x90b   : > { %v9522_v9 = vmul.f32 %v9466_v29, %v9466_v29  ;;  %v9536_v35 = vadd.f32 %v9535_v12, %v9521_v10  ;;  %v9467_v60 = vsub.f32 %v9403_v48, %v9451_v36 }
 0x90c   : > { %v9525_v59 = vmul.f32 %v9469_v5, %v9469_v5 }
 0x90d   : > { %v9537_v18 = vadd.f32 %v9536_v35, %v9522_v9  ;;  %v9523_v34 = vmul.f32 %v9467_v60, %v9467_v60 }
 0x90f   : > { %v9538_v42 = vadd.f32 %v9537_v18, %v9523_v34 }
 0x911   : > { %v9539_v45 = vadd.f32 %v9538_v42, %v9524_v15 }
 0x913   : > { %v9540_v21 = vadd.f32 %v9539_v45, %v9525_v59 }
 0x915   : > { %9541 = vadd.xlane.f32.xlu0 %v9540_v21 }
 0x919   : > { %9731 = vadd.xlane.f32.xlu0 %v15378_v14 }
 0x9a2   : > { %v9542_v52 = vpop.xlane.xlu0 %9541 }
 0x9a3   : > { %v9543_v24 = vrot.slane %v9542_v52, 4 }
 0x9a5   : > { %v9544_v1 = vadd.f32 %v9543_v24, %v9542_v52 }
 0x9a6   : > { %v9732_v32 = vpop.xlane.xlu0 %9731 }
 0x9a7   : > { %v9545_v54 = vrot.slane %v9544_v1, 2  ;;  %v9733_v13 = vrot.slane %v9732_v32, 4 }
 0x9a9   : > { %v9734_v8 = vadd.f32 %v9733_v13, %v9732_v32  ;;  %v9546_v16 = vadd.f32 %v9545_v54, %v9544_v1 }
 0x9ab   : > { %v9735_v53 = vrot.slane %v9734_v8, 2  ;;  %v9547_v27 = vrot.slane %v9546_v16, 1 }
 0x9ad   : > { %v9736_v58 = vadd.f32 %v9735_v53, %v9734_v8  ;;  %v9548_v37 = vadd.f32 %v9547_v27, %v9546_v16 }
 0x9af   : > { %12512 = vpush %v9548_v37  ;;  %v9737_v43 = vrot.slane %v9736_v58, 1 }
 0x9b1   : > { %v9738_v28 = vadd.f32 %v9737_v43, %v9736_v58 }
 0x9b3   : > { %12514 = vpush %v9738_v28 }
 0x9e0   : > { %s12513_s27 = spop %12512 }
 0x9e1   : > { %s9550_s16 = sadd.f32 %s12513_s27, %s12511_s28  ;;  %s13055_s28 = sshll.u32 %s13137_s13, 4  ;;  %s13056_s28 = int_to_ptr.vmem [resolvable:$false] %s13055_s28 }
 0x9e2   : > { %s13057_s27 = scalar_lea.vmem %s13056_s28, 32  ;;  %p13058_p1 = scmp.lt.s32.totalorder %s15423_s15, %s13056_s28 }
 0x9e3   : > { %s9551_s22 = smul.f32 0.0009765625, %s9550_s16  ;;  %p13059_p2 = scmp.lt.s32.totalorder %s13057_s27, %s13051_s21 }
 0x9e4   : > { %s12515_s26 = spop %12514 }
 0x9e5   : > { %s9741_s25 = smul.f32 10.0, %s9551_s22  ;;  %p13060_p13 = por %p13059_p2, %p13058_p1 }
 0x9e6   : > { %s9740_s29 = smul.f32 0.00012207031, %s12515_s26 }
 0x9e7   : > { %p13061_p9 = pnand %p13060_p13, %p13054_p12 }
 0x9e8   : > { %s9742_s17 = sadd.f32 %s9741_s25, %s9740_s29 }
 0x9ea   : > { %v9743_v14 = vstv %s9742_s17 }
 0x9eb   : > { %9744 = vst [vmem:[%s422_s30] sm:$0x1] %v9743_v14 }
 0x9ec   : > { %13064 = shalt.err (!%p13061_p9)
}
 0x9ed   : > { %s13065_s7 = scalar_lea.hbm %s15421_s14, 16  ;;  %s13069_s26 = scalar_lea.hbm %s15474_s9, 32 }
 0x9ee   : > { %p13066_p0 = scmp.ne.s32.totalorder %s15421_s14, %s13065_s7  ;;  %p13070_p4 = scmp.lt.u32.totalorder %s15421_s14, %s15474_s9 }
 0x9ef   : > { %p13071_p8 = scmp.lt.u32.totalorder %s13069_s26, %s13065_s7  ;;  %p13073_p5 = scmp.lt.u32.totalorder %s13065_s7, %s15421_s14 }
 0x9f0   : > { %p13067_p11 = pnand %p13066_p0, %p13366_p3 }
 0x9f1   : > { %p13072_p10 = por %p13071_p8, %p13070_p4 }
 0x9f2   : > { %p13068_p6 = pneg %p13067_p11 }
 0x9f3   : > { %p13074_p7 = por %p13073_p5, %p13072_p10 }
 0x9f5   : > { %p13075_p12 = pnand %p13074_p7, %p13068_p6 }
 0x9f7   : > { %13078 = shalt.err (!%p13075_p12)
}
 0x9f8   : > { %12534 = dma.vmem_to_hbm [thread:$0]  (%p13366_p3), %s15423_s15, 16, %s15421_s14, %s9746_s24  }
 0x9f9 PF: > { %s15770_s29 = sld [smem:[#allocation17_spill]]  ;;  %s15771_s30 = sld [smem:[#allocation18_spill]] }
 0x9fa   : > { %p15773_p2 = scmp.ge.s32.totalorder %s13125_s12, 2 }
 0x9ff   : > { %s9770_s17 = sand.u32 1, %s15770_s29   ;;  %p15772_p1 = scmp.ne.s32.totalorder %s15771_s30, 0 }
 0xa00   : > { %s9771_s1 = scalar_lea.sflag [#allocation5], %s9770_s17 }
 0xa01   : > { %p12554_p13 = pnand %p15773_p2, %p15772_p1 }
 0xa03   : > { %13108 = dma.done.wait (!%p12554_p13), %s9771_s1, 16  }
 0xa04   : > { %13110 = vsyncadd (!%p12554_p13), %s9771_s1, 4294967280  ;;  %p24_p9 = scmp.ge.s32.totalorder %s13353_s20, 4   ;;  %s15774_s30 = smov %s13117_s10 }
 0xa05   : > { %s15775_s10 = smov %s13121_s11  ;;  %s15776_s11 = smov %s13362_s18 }
 0xa06   : > { %s15777_s12 = smov %s13353_s20  ;;  %26 = sbr.rel (!%p24_p9) target bundleno = 11 (0xb), region = 136 }
 0xa0d   :  { %9775 = vsyncpa [#allocation4], 1 }
 0xa0e   :  { %9777 = vsyncpa [#allocation4 + $0x1], 1 }
 0xa0f   :  { %9778 = vsyncpa [#allocation7], 1 }
 0xa10   :  { %9779 = vsyncpa [#allocation10], 1 }
 0xa11   :  { %9780 = vsyncpa [#allocation5], 1 }
 0xa12   :  { %9782 = vsyncpa [#allocation5 + $0x1], 1 }

</bundles_post_ra>
